<compile_context>
chip_gen: v5e
topology: v5e:2x2
jax: 0.10.0
libtpu: 0.0.40
codegen_flags: <defaults>
</compile_context>

<pallas_src>
import functools

import jax
import jax.numpy as jnp
from jax.experimental import pallas as pl
from jax.experimental.pallas import tpu as pltpu

NEG_SLOPE = 0.01                                    # nn.LeakyReLU default
FC_HIDDEN = 512
_TAPS = tuple((dy, dx) for dy in range(3) for dx in range(3))
_CONV_CH = (1, 32, 64, 128, 256)                    # conv1..conv4 channels


def _leaky(v):
    return jnp.where(v >= 0, v, NEG_SLOPE * v)


# ----------------------------------------------------------------------------
# Kernel 1: fused conv1..conv4 (one grid step per sample)
# ----------------------------------------------------------------------------
def _conv_stack_kernel(xpad_ref, w1_ref, b1_ref, w2_ref, b2_ref,
                       w3_ref, b3_ref, w4_ref, b4_ref, out_ref, act_ref,
                       *, H, W):
    # act_ref: (H+2, W+2, 128) f32 scratch holding the zero-padded activation
    # of the previous layer (only the first Cin lanes of a layer are read).
    # Zero every step: borders must be zero and scratch persists across the
    # (possibly megacore-sharded) grid, so a pid==0 guard would be unsafe.
    act_ref[...] = jnp.zeros_like(act_ref)

    # conv1 (Cin=1): 9 shifted multiply-adds on the VPU (avoids K=1 on MXU).
    acc1 = jnp.zeros((H, W, 32), jnp.float32)
    for t, (dy, dx) in enumerate(_TAPS):
        xt = xpad_ref[0, dy:dy + H, dx:dx + W, :]     # (H, W, 1) f32
        acc1 = acc1 + xt * w1_ref[t:t + 1, :]         # * (1, 32) -> (H, W, 32)
    act_ref[1:H + 1, 1:W + 1, 0:32] = _leaky(acc1 + b1_ref[...])

    # conv2..conv4: 9 shifted-slice bf16 MXU matmuls, f32 accumulation; bias
    # and LeakyReLU applied once per layer (not per tap).
    def conv3x3(cin, w_ref, b_ref, cout):
        acc = jnp.zeros((H * W, cout), jnp.float32)
        for t, (dy, dx) in enumerate(_TAPS):
            a = act_ref[dy:dy + H, dx:dx + W, 0:cin]            # (H, W, cin)
            a = a.reshape(H * W, cin).astype(jnp.bfloat16)      # free: W % 8 == 0
            wt = w_ref[t * cin:(t + 1) * cin, :]                # (cin, cout) bf16
            acc = acc + jnp.dot(a, wt, preferred_element_type=jnp.float32)
        return _leaky(acc + b_ref[...])                         # (H*W, cout) f32

    act_ref[1:H + 1, 1:W + 1, 0:64] = conv3x3(32, w2_ref, b2_ref, 64).reshape(H, W, 64)
    act_ref[1:H + 1, 1:W + 1, 0:128] = conv3x3(64, w3_ref, b3_ref, 128).reshape(H, W, 128)
    out_ref[...] = conv3x3(128, w4_ref, b4_ref, 256).astype(out_ref.dtype)


def conv_stack_pallas(xpad, kp):
    """xpad: (B, H+2, W+2, 1) f32 -> conv4 activation (B*H*W, 256) bf16,
    rows in (b, h, w) raster (NHWC) order."""
    B, Hp, Wp, _ = xpad.shape
    H, W = Hp - 2, Wp - 2
    # TODO(synk): pad spatial dims in the wrapper to support W / H*W not multiples of 8.
    assert W % 8 == 0 and (H * W) % 8 == 0, "kernel assumes W and H*W are multiples of 8"

    flops = 2 * B * H * W * 9 * sum(ci * co for ci, co in zip(_CONV_CH[:-1], _CONV_CH[1:]))
    bytes_accessed = int(xpad.size * 4
                         + sum(kp[k].size * kp[k].dtype.itemsize
                               for k in kp if k.startswith("conv"))
                         + B * H * W * 256 * 2)

    kernel = functools.partial(_conv_stack_kernel, H=H, W=W)
    return pl.pallas_call(
        kernel,
        out_shape=jax.ShapeDtypeStruct((B * H * W, 256), jnp.bfloat16),
        grid=(B,),
        in_specs=[
            pl.BlockSpec((1, Hp, Wp, 1), lambda b: (b, 0, 0, 0)),
            pl.BlockSpec((9, 32), lambda b: (0, 0)),
            pl.BlockSpec((1, 32), lambda b: (0, 0)),
            pl.BlockSpec((9 * 32, 64), lambda b: (0, 0)),
            pl.BlockSpec((1, 64), lambda b: (0, 0)),
            pl.BlockSpec((9 * 64, 128), lambda b: (0, 0)),
            pl.BlockSpec((1, 128), lambda b: (0, 0)),
            pl.BlockSpec((9 * 128, 256), lambda b: (0, 0)),
            pl.BlockSpec((1, 256), lambda b: (0, 0)),
        ],
        out_specs=pl.BlockSpec((H * W, 256), lambda b: (b, 0)),
        scratch_shapes=[pltpu.VMEM((Hp, Wp, 128), jnp.float32)],
        compiler_params=pltpu.CompilerParams(dimension_semantics=("parallel",)),
        cost_estimate=pl.CostEstimate(flops=flops, transcendentals=0,
                                      bytes_accessed=bytes_accessed),
    )(xpad, kp["conv1_w"], kp["conv1_b"], kp["conv2_w"], kp["conv2_b"],
      kp["conv3_w"], kp["conv3_b"], kp["conv4_w"], kp["conv4_b"])


# ----------------------------------------------------------------------------
# Kernel 2: fused fc1 (K-tiled, f32 accumulator) + LeakyReLU + fc2
# ----------------------------------------------------------------------------
def _fc_kernel(x_ref, w1_ref, b1_ref, w2_ref, b2_ref, o_ref, acc_ref):
    k = pl.program_id(0)

    @pl.when(k == 0)
    def _init():
        acc_ref[...] = jnp.zeros_like(acc_ref)

    acc_ref[...] += jnp.dot(x_ref[...], w1_ref[...],
                            preferred_element_type=jnp.float32)

    @pl.when(k == pl.num_programs(0) - 1)
    def _finalize():
        h = _leaky(acc_ref[...] + b1_ref[...]).astype(jnp.bfloat16)   # (B, 512)
        o_ref[...] = (jnp.dot(h, w2_ref[...], preferred_element_type=jnp.float32)
                      + b2_ref[...]).astype(o_ref.dtype)


def fc_pallas(flat, kp):
    """flat: (B, 256*H*W) bf16, rows already in NHWC-flatten order."""
    B, K = flat.shape
    out_dim = kp["fc2_w"].shape[1]
    # tk bounded so the double-buffered fc1_w block stays <= 4 MiB (v5e-safe).
    tk = next(t for t in (2048, 1024, 512, 256) if K % t == 0)   # 256 | K always

    flops = 2 * B * K * FC_HIDDEN + 2 * B * FC_HIDDEN * out_dim
    bytes_accessed = int(B * K * 2 + K * FC_HIDDEN * 2
                         + FC_HIDDEN * out_dim * 2 + B * out_dim * 4)

    return pl.pallas_call(
        _fc_kernel,
        out_shape=jax.ShapeDtypeStruct((B, out_dim), jnp.float32),
        grid=(K // tk,),
        in_specs=[
            pl.BlockSpec((B, tk), lambda k: (0, k)),
            pl.BlockSpec((tk, FC_HIDDEN), lambda k: (k, 0)),
            pl.BlockSpec((1, FC_HIDDEN), lambda k: (0, 0)),
            pl.BlockSpec((FC_HIDDEN, out_dim), lambda k: (0, 0)),
            pl.BlockSpec((1, out_dim), lambda k: (0, 0)),
        ],
        out_specs=pl.BlockSpec((B, out_dim), lambda k: (0, 0)),
        scratch_shapes=[pltpu.VMEM((B, FC_HIDDEN), jnp.float32)],
        compiler_params=pltpu.CompilerParams(dimension_semantics=("arbitrary",)),
        cost_estimate=pl.CostEstimate(flops=flops, transcendentals=0,
                                      bytes_accessed=bytes_accessed),
    )(flat, kp["fc1_w"], kp["fc1_b"], kp["fc2_w"], kp["fc2_b"])


# ----------------------------------------------------------------------------
# Forward pass + one-time parameter re-layout
# ----------------------------------------------------------------------------
def convdqn_forward(kp, x):
    """x: (B, H, W) f32 -> (B, output) f32, matching ConvDQN.forward."""
    B, H, W = x.shape
    xpad = jnp.pad(x, ((0, 0), (1, 1), (1, 1)))[..., None]    # (B, H+2, W+2, 1)
    a4 = conv_stack_pallas(xpad, kp)                           # (B*H*W, 256) bf16
    flat = a4.reshape(B, H * W * 256)   # free row-major reshape (HWC order),
                                        # matched by the fc1_w row permutation
    return fc_pallas(flat, kp)


def prepare_params(params, H, W):
    """One-time re-layout of PyTorch-convention parameters for the kernels."""
    def conv_w2d(w):                       # (Cout, Cin, 3, 3) -> (9*Cin, Cout)
        cout, cin = w.shape[0], w.shape[1]
        return jnp.transpose(w, (2, 3, 1, 0)).reshape(9 * cin, cout)

    hw = H * W
    # Permute fc1_w rows from NCHW-flatten order (c*H*W + h*W + w) to
    # NHWC-flatten order ((h*W + w)*256 + c): kills the runtime transpose.
    fc1_hwc = jnp.transpose(params["fc1_w"].reshape(256, hw, FC_HIDDEN),
                            (1, 0, 2)).reshape(256 * hw, FC_HIDDEN)
    return {
        "conv1_w": jnp.transpose(params["conv1_w"], (2, 3, 1, 0)).reshape(9, 32),
        "conv1_b": params["conv1_b"].reshape(1, 32),
        "conv2_w": conv_w2d(params["conv2_w"]).astype(jnp.bfloat16),
        "conv2_b": params["conv2_b"].reshape(1, 64),
        "conv3_w": conv_w2d(params["conv3_w"]).astype(jnp.bfloat16),
        "conv3_b": params["conv3_b"].reshape(1, 128),
        "conv4_w": conv_w2d(params["conv4_w"]).astype(jnp.bfloat16),
        "conv4_b": params["conv4_b"].reshape(1, 256),
        "fc1_w": fc1_hwc.astype(jnp.bfloat16),
        "fc1_b": params["fc1_b"].reshape(1, FC_HIDDEN),
        "fc2_w": params["fc2_w"].astype(jnp.bfloat16),
        "fc2_b": params["fc2_b"].reshape(1, -1),
    }


# ----------------------------------------------------------------------------
# Plain-JAX f32 reference (PyTorch semantics) for the sanity check
# ----------------------------------------------------------------------------
def convdqn_reference(params, x):
    def conv(h, w, b):
        out = jax.lax.conv_general_dilated(
            h, w, window_strides=(1, 1), padding=((1, 1), (1, 1)),
            dimension_numbers=("NCHW", "OIHW", "NCHW"))
        return _leaky(out + b[None, :, None, None])

    h = x[:, None, :, :]
    h = conv(h, params["conv1_w"], params["conv1_b"])
    h = conv(h, params["conv2_w"], params["conv2_b"])
    h = conv(h, params["conv3_w"], params["conv3_b"])
    h = conv(h, params["conv4_w"], params["conv4_b"])
    flat = h.reshape(h.shape[0], -1)                 # nn.Flatten on NCHW
    h = _leaky(flat @ params["fc1_w"] + params["fc1_b"])
    return h @ params["fc2_w"] + params["fc2_b"]


# ----------------------------------------------------------------------------
# Deterministic parameter init (shapes from ConvDQN.__init__)
# ----------------------------------------------------------------------------
def init_params(key, spatial, output):
    hw = spatial * spatial                           # == `input` arg of ConvDQN
    shapes = {
        "conv1_w": (32, 1, 3, 3), "conv1_b": (32,),
        "conv2_w": (64, 32, 3, 3), "conv2_b": (64,),
        "conv3_w": (128, 64, 3, 3), "conv3_b": (128,),
        "conv4_w": (256, 128, 3, 3), "conv4_b": (256,),
        # Linear weights stored already transposed: (in_features, out_features)
        "fc1_w": (256 * hw, FC_HIDDEN), "fc1_b": (FC_HIDDEN,),
        "fc2_w": (FC_HIDDEN, output), "fc2_b": (output,),
    }
    params = {}
    keys = jax.random.split(key, len(shapes))
    for k, (name, shp) in zip(keys, sorted(shapes.items())):
        if name.endswith("_w"):
            fan_in = shp[1] * 9 if len(shp) == 4 else shp[0]
            params[name] = (jax.random.normal(k, shp, jnp.float32)
                            / jnp.sqrt(jnp.float32(fan_in)))
        else:
            params[name] = 0.01 * jax.random.normal(k, shp, jnp.float32)
    return params


if __name__ == "__main__":
    B, H, W, OUT = 2, 8, 8, 8            # ConvDQN(input=H*W=64, output=8)
    key = jax.random.PRNGKey(0)
    k_params, k_x = jax.random.split(key)
    params = init_params(k_params, H, OUT)
    x = jax.random.normal(k_x, (B, H, W), jnp.float32)

    kp = prepare_params(params, H, W)
    fwd = jax.jit(convdqn_forward)
    out = jax.block_until_ready(fwd(kp, x))
    ref = jax.block_until_ready(convdqn_reference(params, x))

    assert out.shape == (B, OUT), out.shape
    # bf16 MXU inputs widen the error vs the f32 reference; 5e-2 (max-abs
    # normalized) still catches any tap-order / transpose / flatten mistake.
    err = float(jnp.max(jnp.abs(out - ref)) / (jnp.max(jnp.abs(ref)) + 1e-6))
    assert err < 5e-2, f"mismatch vs reference: rel err {err}"
    print("KERNEL_OK")
</pallas_src>

<mosaic_0001>
module attributes {stable_mosaic.version = 11 : i64} {
  func.func @_conv_stack_kernel(%arg0: i32, %arg1: memref<1x10x10x1xf32, #tpu.memory_space<vmem>>, %arg2: memref<9x32xf32, #tpu.memory_space<vmem>>, %arg3: memref<1x32xf32, #tpu.memory_space<vmem>>, %arg4: memref<288x64xbf16, #tpu.memory_space<vmem>>, %arg5: memref<1x64xf32, #tpu.memory_space<vmem>>, %arg6: memref<576x128xbf16, #tpu.memory_space<vmem>>, %arg7: memref<1x128xf32, #tpu.memory_space<vmem>>, %arg8: memref<1152x256xbf16, #tpu.memory_space<vmem>>, %arg9: memref<1x256xf32, #tpu.memory_space<vmem>>, %arg10: memref<64x256xbf16, #tpu.memory_space<vmem>>, %arg11: memref<10x10x128xf32, #tpu.memory_space<vmem>>) attributes {dimension_semantics = [#tpu.dimension_semantics<parallel>], iteration_bounds = array<i64: 2>, scalar_prefetch = 0 : i64, scratch_operands = 1 : i64, tpu.core_type = #tpu.core_type<tc>, window_params = [{transform_indices = @transform_0, window_bounds = array<i64: 1, 10, 10, 1>}, {pipeline_mode = #tpu.pipeline_mode<synchronous>, transform_indices = @transform_1, window_bounds = array<i64: 9, 32>}, {pipeline_mode = #tpu.pipeline_mode<synchronous>, transform_indices = @transform_2, window_bounds = array<i64: 1, 32>}, {pipeline_mode = #tpu.pipeline_mode<synchronous>, transform_indices = @transform_3, window_bounds = array<i64: 288, 64>}, {pipeline_mode = #tpu.pipeline_mode<synchronous>, transform_indices = @transform_4, window_bounds = array<i64: 1, 64>}, {pipeline_mode = #tpu.pipeline_mode<synchronous>, transform_indices = @transform_5, window_bounds = array<i64: 576, 128>}, {pipeline_mode = #tpu.pipeline_mode<synchronous>, transform_indices = @transform_6, window_bounds = array<i64: 1, 128>}, {pipeline_mode = #tpu.pipeline_mode<synchronous>, transform_indices = @transform_7, window_bounds = array<i64: 1152, 256>}, {pipeline_mode = #tpu.pipeline_mode<synchronous>, transform_indices = @transform_8, window_bounds = array<i64: 1, 256>}, {transform_indices = @transform_9, window_bounds = array<i64: 64, 256>}]} {
    %cst = arith.constant 0.000000e+00 : f32
    %0 = vector.broadcast %cst : f32 to vector<10x10x128xf32>
    %c0 = arith.constant 0 : index
    %c0_0 = arith.constant 0 : index
    %c0_1 = arith.constant 0 : index
    %1 = vector.load %arg11[%c0, %c0_0, %c0_1] : memref<10x10x128xf32, #tpu.memory_space<vmem>>, vector<10x10x128xf32>
    tpu.vector_store %arg11[%c0, %c0_0, %c0_1], %0 {strides = array<i32>} : memref<10x10x128xf32, #tpu.memory_space<vmem>>, vector<10x10x128xf32>,
    %cst_2 = arith.constant 0.000000e+00 : f32
    %2 = vector.broadcast %cst_2 : f32 to vector<8x8x32xf32>
    %c0_3 = arith.constant 0 : index
    %c0_4 = arith.constant 0 : index
    %c0_5 = arith.constant 0 : index
    %c0_6 = arith.constant 0 : index
    %3 = vector.load %arg1[%c0_3, %c0_4, %c0_5, %c0_6] : memref<1x10x10x1xf32, #tpu.memory_space<vmem>>, vector<1x8x8x1xf32>
    %4 = vector.shape_cast %3 : vector<1x8x8x1xf32> to vector<8x8x1xf32>
    %c0_7 = arith.constant 0 : index
    %c0_8 = arith.constant 0 : index
    %5 = vector.load %arg2[%c0_7, %c0_8] : memref<9x32xf32, #tpu.memory_space<vmem>>, vector<1x32xf32>
    %6 = vector.shape_cast %5 : vector<1x32xf32> to vector<1x1x32xf32>
    %7 = vector.broadcast %4 : vector<8x8x1xf32> to vector<8x8x32xf32>
    %8 = vector.broadcast %6 : vector<1x1x32xf32> to vector<8x8x32xf32>
    %9 = arith.mulf %7, %8 : vector<8x8x32xf32>
    %10 = arith.addf %2, %9 : vector<8x8x32xf32>
    %c0_9 = arith.constant 0 : index
    %c0_10 = arith.constant 0 : index
    %c1 = arith.constant 1 : index
    %c0_11 = arith.constant 0 : index
    %11 = vector.load %arg1[%c0_9, %c0_10, %c1, %c0_11] : memref<1x10x10x1xf32, #tpu.memory_space<vmem>>, vector<1x8x8x1xf32>
    %12 = vector.shape_cast %11 : vector<1x8x8x1xf32> to vector<8x8x1xf32>
    %c1_12 = arith.constant 1 : index
    %c0_13 = arith.constant 0 : index
    %13 = vector.load %arg2[%c1_12, %c0_13] : memref<9x32xf32, #tpu.memory_space<vmem>>, vector<1x32xf32>
    %14 = vector.shape_cast %13 : vector<1x32xf32> to vector<1x1x32xf32>
    %15 = vector.broadcast %12 : vector<8x8x1xf32> to vector<8x8x32xf32>
    %16 = vector.broadcast %14 : vector<1x1x32xf32> to vector<8x8x32xf32>
    %17 = arith.mulf %15, %16 : vector<8x8x32xf32>
    %18 = arith.addf %10, %17 : vector<8x8x32xf32>
    %c0_14 = arith.constant 0 : index
    %c0_15 = arith.constant 0 : index
    %c2 = arith.constant 2 : index
    %c0_16 = arith.constant 0 : index
    %19 = vector.load %arg1[%c0_14, %c0_15, %c2, %c0_16] : memref<1x10x10x1xf32, #tpu.memory_space<vmem>>, vector<1x8x8x1xf32>
    %20 = vector.shape_cast %19 : vector<1x8x8x1xf32> to vector<8x8x1xf32>
    %c2_17 = arith.constant 2 : index
    %c0_18 = arith.constant 0 : index
    %21 = vector.load %arg2[%c2_17, %c0_18] : memref<9x32xf32, #tpu.memory_space<vmem>>, vector<1x32xf32>
    %22 = vector.shape_cast %21 : vector<1x32xf32> to vector<1x1x32xf32>
    %23 = vector.broadcast %20 : vector<8x8x1xf32> to vector<8x8x32xf32>
    %24 = vector.broadcast %22 : vector<1x1x32xf32> to vector<8x8x32xf32>
    %25 = arith.mulf %23, %24 : vector<8x8x32xf32>
    %26 = arith.addf %18, %25 : vector<8x8x32xf32>
    %c0_19 = arith.constant 0 : index
    %c1_20 = arith.constant 1 : index
    %c0_21 = arith.constant 0 : index
    %c0_22 = arith.constant 0 : index
    %27 = vector.load %arg1[%c0_19, %c1_20, %c0_21, %c0_22] : memref<1x10x10x1xf32, #tpu.memory_space<vmem>>, vector<1x8x8x1xf32>
    %28 = vector.shape_cast %27 : vector<1x8x8x1xf32> to vector<8x8x1xf32>
    %c3 = arith.constant 3 : index
    %c0_23 = arith.constant 0 : index
    %29 = vector.load %arg2[%c3, %c0_23] : memref<9x32xf32, #tpu.memory_space<vmem>>, vector<1x32xf32>
    %30 = vector.shape_cast %29 : vector<1x32xf32> to vector<1x1x32xf32>
    %31 = vector.broadcast %28 : vector<8x8x1xf32> to vector<8x8x32xf32>
    %32 = vector.broadcast %30 : vector<1x1x32xf32> to vector<8x8x32xf32>
    %33 = arith.mulf %31, %32 : vector<8x8x32xf32>
    %34 = arith.addf %26, %33 : vector<8x8x32xf32>
    %c0_24 = arith.constant 0 : index
    %c1_25 = arith.constant 1 : index
    %c1_26 = arith.constant 1 : index
    %c0_27 = arith.constant 0 : index
    %35 = vector.load %arg1[%c0_24, %c1_25, %c1_26, %c0_27] : memref<1x10x10x1xf32, #tpu.memory_space<vmem>>, vector<1x8x8x1xf32>
    %36 = vector.shape_cast %35 : vector<1x8x8x1xf32> to vector<8x8x1xf32>
    %c4 = arith.constant 4 : index
    %c0_28 = arith.constant 0 : index
    %37 = vector.load %arg2[%c4, %c0_28] : memref<9x32xf32, #tpu.memory_space<vmem>>, vector<1x32xf32>
    %38 = vector.shape_cast %37 : vector<1x32xf32> to vector<1x1x32xf32>
    %39 = vector.broadcast %36 : vector<8x8x1xf32> to vector<8x8x32xf32>
    %40 = vector.broadcast %38 : vector<1x1x32xf32> to vector<8x8x32xf32>
    %41 = arith.mulf %39, %40 : vector<8x8x32xf32>
    %42 = arith.addf %34, %41 : vector<8x8x32xf32>
    %c0_29 = arith.constant 0 : index
    %c1_30 = arith.constant 1 : index
    %c2_31 = arith.constant 2 : index
    %c0_32 = arith.constant 0 : index
    %43 = vector.load %arg1[%c0_29, %c1_30, %c2_31, %c0_32] : memref<1x10x10x1xf32, #tpu.memory_space<vmem>>, vector<1x8x8x1xf32>
    %44 = vector.shape_cast %43 : vector<1x8x8x1xf32> to vector<8x8x1xf32>
    %c5 = arith.constant 5 : index
    %c0_33 = arith.constant 0 : index
    %45 = vector.load %arg2[%c5, %c0_33] : memref<9x32xf32, #tpu.memory_space<vmem>>, vector<1x32xf32>
    %46 = vector.shape_cast %45 : vector<1x32xf32> to vector<1x1x32xf32>
    %47 = vector.broadcast %44 : vector<8x8x1xf32> to vector<8x8x32xf32>
    %48 = vector.broadcast %46 : vector<1x1x32xf32> to vector<8x8x32xf32>
    %49 = arith.mulf %47, %48 : vector<8x8x32xf32>
    %50 = arith.addf %42, %49 : vector<8x8x32xf32>
    %c0_34 = arith.constant 0 : index
    %c2_35 = arith.constant 2 : index
    %c0_36 = arith.constant 0 : index
    %c0_37 = arith.constant 0 : index
    %51 = vector.load %arg1[%c0_34, %c2_35, %c0_36, %c0_37] : memref<1x10x10x1xf32, #tpu.memory_space<vmem>>, vector<1x8x8x1xf32>
    %52 = vector.shape_cast %51 : vector<1x8x8x1xf32> to vector<8x8x1xf32>
    %c6 = arith.constant 6 : index
    %c0_38 = arith.constant 0 : index
    %53 = vector.load %arg2[%c6, %c0_38] : memref<9x32xf32, #tpu.memory_space<vmem>>, vector<1x32xf32>
    %54 = vector.shape_cast %53 : vector<1x32xf32> to vector<1x1x32xf32>
    %55 = vector.broadcast %52 : vector<8x8x1xf32> to vector<8x8x32xf32>
    %56 = vector.broadcast %54 : vector<1x1x32xf32> to vector<8x8x32xf32>
    %57 = arith.mulf %55, %56 : vector<8x8x32xf32>
    %58 = arith.addf %50, %57 : vector<8x8x32xf32>
    %c0_39 = arith.constant 0 : index
    %c2_40 = arith.constant 2 : index
    %c1_41 = arith.constant 1 : index
    %c0_42 = arith.constant 0 : index
    %59 = vector.load %arg1[%c0_39, %c2_40, %c1_41, %c0_42] : memref<1x10x10x1xf32, #tpu.memory_space<vmem>>, vector<1x8x8x1xf32>
    %60 = vector.shape_cast %59 : vector<1x8x8x1xf32> to vector<8x8x1xf32>
    %c7 = arith.constant 7 : index
    %c0_43 = arith.constant 0 : index
    %61 = vector.load %arg2[%c7, %c0_43] : memref<9x32xf32, #tpu.memory_space<vmem>>, vector<1x32xf32>
    %62 = vector.shape_cast %61 : vector<1x32xf32> to vector<1x1x32xf32>
    %63 = vector.broadcast %60 : vector<8x8x1xf32> to vector<8x8x32xf32>
    %64 = vector.broadcast %62 : vector<1x1x32xf32> to vector<8x8x32xf32>
    %65 = arith.mulf %63, %64 : vector<8x8x32xf32>
    %66 = arith.addf %58, %65 : vector<8x8x32xf32>
    %c0_44 = arith.constant 0 : index
    %c2_45 = arith.constant 2 : index
    %c2_46 = arith.constant 2 : index
    %c0_47 = arith.constant 0 : index
    %67 = vector.load %arg1[%c0_44, %c2_45, %c2_46, %c0_47] : memref<1x10x10x1xf32, #tpu.memory_space<vmem>>, vector<1x8x8x1xf32>
    %68 = vector.shape_cast %67 : vector<1x8x8x1xf32> to vector<8x8x1xf32>
    %c8 = arith.constant 8 : index
    %c0_48 = arith.constant 0 : index
    %69 = vector.load %arg2[%c8, %c0_48] : memref<9x32xf32, #tpu.memory_space<vmem>>, vector<1x32xf32>
    %70 = vector.shape_cast %69 : vector<1x32xf32> to vector<1x1x32xf32>
    %71 = vector.broadcast %68 : vector<8x8x1xf32> to vector<8x8x32xf32>
    %72 = vector.broadcast %70 : vector<1x1x32xf32> to vector<8x8x32xf32>
    %73 = arith.mulf %71, %72 : vector<8x8x32xf32>
    %74 = arith.addf %66, %73 : vector<8x8x32xf32>
    %c0_49 = arith.constant 0 : index
    %c0_50 = arith.constant 0 : index
    %75 = vector.load %arg3[%c0_49, %c0_50] : memref<1x32xf32, #tpu.memory_space<vmem>>, vector<1x32xf32>
    %76 = vector.shape_cast %75 : vector<1x32xf32> to vector<1x1x32xf32>
    %77 = vector.broadcast %76 : vector<1x1x32xf32> to vector<8x8x32xf32>
    %78 = arith.addf %74, %77 : vector<8x8x32xf32>
    %cst_51 = arith.constant 0.000000e+00 : f32
    %79 = vector.broadcast %cst_51 : f32 to vector<8x8x32xf32>
    %80 = arith.cmpf oge, %78, %79 : vector<8x8x32xf32>
    %cst_52 = arith.constant 0.00999999977 : f32
    %81 = vector.broadcast %cst_52 : f32 to vector<8x8x32xf32>
    %82 = arith.mulf %81, %78 : vector<8x8x32xf32>
    %83 = arith.select %80, %78, %82 : vector<8x8x32xi1>, vector<8x8x32xf32>
    %c1_53 = arith.constant 1 : index
    %c1_54 = arith.constant 1 : index
    %c0_55 = arith.constant 0 : index
    %84 = vector.load %arg11[%c1_53, %c1_54, %c0_55] : memref<10x10x128xf32, #tpu.memory_space<vmem>>, vector<8x8x32xf32>
    tpu.vector_store %arg11[%c1_53, %c1_54, %c0_55], %83 {strides = array<i32>} : memref<10x10x128xf32, #tpu.memory_space<vmem>>, vector<8x8x32xf32>,
    %cst_56 = arith.constant 0.000000e+00 : f32
    %85 = vector.broadcast %cst_56 : f32 to vector<64x64xf32>
    %c0_57 = arith.constant 0 : index
    %c0_58 = arith.constant 0 : index
    %c0_59 = arith.constant 0 : index
    %86 = vector.load %arg11[%c0_57, %c0_58, %c0_59] : memref<10x10x128xf32, #tpu.memory_space<vmem>>, vector<8x8x32xf32>
    %87 = vector.shape_cast %86 : vector<8x8x32xf32> to vector<64x32xf32>
    %88 = arith.truncf %87 : vector<64x32xf32> to vector<64x32xbf16>
    %c0_60 = arith.constant 0 : index
    %c0_61 = arith.constant 0 : index
    %89 = vector.load %arg4[%c0_60, %c0_61] : memref<288x64xbf16, #tpu.memory_space<vmem>>, vector<32x64xbf16>
    %cst_62 = arith.constant dense<0.000000e+00> : vector<64x64xf32>
    %90 = tpu.matmul %88, %89, %cst_62 {dimension_numbers = #tpu.dot_dimension_numbers<[1], [0], [0], [1], [0, 0, 1, 1], [], []>} : vector<64x32xbf16>, vector<32x64xbf16>, vector<64x64xf32> -> vector<64x64xf32>
    %91 = arith.addf %85, %90 : vector<64x64xf32>
    %c0_63 = arith.constant 0 : index
    %c1_64 = arith.constant 1 : index
    %c0_65 = arith.constant 0 : index
    %92 = vector.load %arg11[%c0_63, %c1_64, %c0_65] : memref<10x10x128xf32, #tpu.memory_space<vmem>>, vector<8x8x32xf32>
    %93 = vector.shape_cast %92 : vector<8x8x32xf32> to vector<64x32xf32>
    %94 = arith.truncf %93 : vector<64x32xf32> to vector<64x32xbf16>
    %c32 = arith.constant 32 : index
    %c0_66 = arith.constant 0 : index
    %95 = vector.load %arg4[%c32, %c0_66] : memref<288x64xbf16, #tpu.memory_space<vmem>>, vector<32x64xbf16>
    %cst_67 = arith.constant dense<0.000000e+00> : vector<64x64xf32>
    %96 = tpu.matmul %94, %95, %cst_67 {dimension_numbers = #tpu.dot_dimension_numbers<[1], [0], [0], [1], [0, 0, 1, 1], [], []>} : vector<64x32xbf16>, vector<32x64xbf16>, vector<64x64xf32> -> vector<64x64xf32>
    %97 = arith.addf %91, %96 : vector<64x64xf32>
    %c0_68 = arith.constant 0 : index
    %c2_69 = arith.constant 2 : index
    %c0_70 = arith.constant 0 : index
    %98 = vector.load %arg11[%c0_68, %c2_69, %c0_70] : memref<10x10x128xf32, #tpu.memory_space<vmem>>, vector<8x8x32xf32>
    %99 = vector.shape_cast %98 : vector<8x8x32xf32> to vector<64x32xf32>
    %100 = arith.truncf %99 : vector<64x32xf32> to vector<64x32xbf16>
    %c64 = arith.constant 64 : index
    %c0_71 = arith.constant 0 : index
    %101 = vector.load %arg4[%c64, %c0_71] : memref<288x64xbf16, #tpu.memory_space<vmem>>, vector<32x64xbf16>
    %cst_72 = arith.constant dense<0.000000e+00> : vector<64x64xf32>
    %102 = tpu.matmul %100, %101, %cst_72 {dimension_numbers = #tpu.dot_dimension_numbers<[1], [0], [0], [1], [0, 0, 1, 1], [], []>} : vector<64x32xbf16>, vector<32x64xbf16>, vector<64x64xf32> -> vector<64x64xf32>
    %103 = arith.addf %97, %102 : vector<64x64xf32>
    %c1_73 = arith.constant 1 : index
    %c0_74 = arith.constant 0 : index
    %c0_75 = arith.constant 0 : index
    %104 = vector.load %arg11[%c1_73, %c0_74, %c0_75] : memref<10x10x128xf32, #tpu.memory_space<vmem>>, vector<8x8x32xf32>
    %105 = vector.shape_cast %104 : vector<8x8x32xf32> to vector<64x32xf32>
    %106 = arith.truncf %105 : vector<64x32xf32> to vector<64x32xbf16>
    %c96 = arith.constant 96 : index
    %c0_76 = arith.constant 0 : index
    %107 = vector.load %arg4[%c96, %c0_76] : memref<288x64xbf16, #tpu.memory_space<vmem>>, vector<32x64xbf16>
    %cst_77 = arith.constant dense<0.000000e+00> : vector<64x64xf32>
    %108 = tpu.matmul %106, %107, %cst_77 {dimension_numbers = #tpu.dot_dimension_numbers<[1], [0], [0], [1], [0, 0, 1, 1], [], []>} : vector<64x32xbf16>, vector<32x64xbf16>, vector<64x64xf32> -> vector<64x64xf32>
    %109 = arith.addf %103, %108 : vector<64x64xf32>
    %c1_78 = arith.constant 1 : index
    %c1_79 = arith.constant 1 : index
    %c0_80 = arith.constant 0 : index
    %110 = vector.load %arg11[%c1_78, %c1_79, %c0_80] : memref<10x10x128xf32, #tpu.memory_space<vmem>>, vector<8x8x32xf32>
    %111 = vector.shape_cast %110 : vector<8x8x32xf32> to vector<64x32xf32>
    %112 = arith.truncf %111 : vector<64x32xf32> to vector<64x32xbf16>
    %c128 = arith.constant 128 : index
    %c0_81 = arith.constant 0 : index
    %113 = vector.load %arg4[%c128, %c0_81] : memref<288x64xbf16, #tpu.memory_space<vmem>>, vector<32x64xbf16>
    %cst_82 = arith.constant dense<0.000000e+00> : vector<64x64xf32>
    %114 = tpu.matmul %112, %113, %cst_82 {dimension_numbers = #tpu.dot_dimension_numbers<[1], [0], [0], [1], [0, 0, 1, 1], [], []>} : vector<64x32xbf16>, vector<32x64xbf16>, vector<64x64xf32> -> vector<64x64xf32>
    %115 = arith.addf %109, %114 : vector<64x64xf32>
    %c1_83 = arith.constant 1 : index
    %c2_84 = arith.constant 2 : index
    %c0_85 = arith.constant 0 : index
    %116 = vector.load %arg11[%c1_83, %c2_84, %c0_85] : memref<10x10x128xf32, #tpu.memory_space<vmem>>, vector<8x8x32xf32>
    %117 = vector.shape_cast %116 : vector<8x8x32xf32> to vector<64x32xf32>
    %118 = arith.truncf %117 : vector<64x32xf32> to vector<64x32xbf16>
    %c160 = arith.constant 160 : index
    %c0_86 = arith.constant 0 : index
    %119 = vector.load %arg4[%c160, %c0_86] : memref<288x64xbf16, #tpu.memory_space<vmem>>, vector<32x64xbf16>
    %cst_87 = arith.constant dense<0.000000e+00> : vector<64x64xf32>
    %120 = tpu.matmul %118, %119, %cst_87 {dimension_numbers = #tpu.dot_dimension_numbers<[1], [0], [0], [1], [0, 0, 1, 1], [], []>} : vector<64x32xbf16>, vector<32x64xbf16>, vector<64x64xf32> -> vector<64x64xf32>
    %121 = arith.addf %115, %120 : vector<64x64xf32>
    %c2_88 = arith.constant 2 : index
    %c0_89 = arith.constant 0 : index
    %c0_90 = arith.constant 0 : index
    %122 = vector.load %arg11[%c2_88, %c0_89, %c0_90] : memref<10x10x128xf32, #tpu.memory_space<vmem>>, vector<8x8x32xf32>
    %123 = vector.shape_cast %122 : vector<8x8x32xf32> to vector<64x32xf32>
    %124 = arith.truncf %123 : vector<64x32xf32> to vector<64x32xbf16>
    %c192 = arith.constant 192 : index
    %c0_91 = arith.constant 0 : index
    %125 = vector.load %arg4[%c192, %c0_91] : memref<288x64xbf16, #tpu.memory_space<vmem>>, vector<32x64xbf16>
    %cst_92 = arith.constant dense<0.000000e+00> : vector<64x64xf32>
    %126 = tpu.matmul %124, %125, %cst_92 {dimension_numbers = #tpu.dot_dimension_numbers<[1], [0], [0], [1], [0, 0, 1, 1], [], []>} : vector<64x32xbf16>, vector<32x64xbf16>, vector<64x64xf32> -> vector<64x64xf32>
    %127 = arith.addf %121, %126 : vector<64x64xf32>
    %c2_93 = arith.constant 2 : index
    %c1_94 = arith.constant 1 : index
    %c0_95 = arith.constant 0 : index
    %128 = vector.load %arg11[%c2_93, %c1_94, %c0_95] : memref<10x10x128xf32, #tpu.memory_space<vmem>>, vector<8x8x32xf32>
    %129 = vector.shape_cast %128 : vector<8x8x32xf32> to vector<64x32xf32>
    %130 = arith.truncf %129 : vector<64x32xf32> to vector<64x32xbf16>
    %c224 = arith.constant 224 : index
    %c0_96 = arith.constant 0 : index
    %131 = vector.load %arg4[%c224, %c0_96] : memref<288x64xbf16, #tpu.memory_space<vmem>>, vector<32x64xbf16>
    %cst_97 = arith.constant dense<0.000000e+00> : vector<64x64xf32>
    %132 = tpu.matmul %130, %131, %cst_97 {dimension_numbers = #tpu.dot_dimension_numbers<[1], [0], [0], [1], [0, 0, 1, 1], [], []>} : vector<64x32xbf16>, vector<32x64xbf16>, vector<64x64xf32> -> vector<64x64xf32>
    %133 = arith.addf %127, %132 : vector<64x64xf32>
    %c2_98 = arith.constant 2 : index
    %c2_99 = arith.constant 2 : index
    %c0_100 = arith.constant 0 : index
    %134 = vector.load %arg11[%c2_98, %c2_99, %c0_100] : memref<10x10x128xf32, #tpu.memory_space<vmem>>, vector<8x8x32xf32>
    %135 = vector.shape_cast %134 : vector<8x8x32xf32> to vector<64x32xf32>
    %136 = arith.truncf %135 : vector<64x32xf32> to vector<64x32xbf16>
    %c256 = arith.constant 256 : index
    %c0_101 = arith.constant 0 : index
    %137 = vector.load %arg4[%c256, %c0_101] : memref<288x64xbf16, #tpu.memory_space<vmem>>, vector<32x64xbf16>
    %cst_102 = arith.constant dense<0.000000e+00> : vector<64x64xf32>
    %138 = tpu.matmul %136, %137, %cst_102 {dimension_numbers = #tpu.dot_dimension_numbers<[1], [0], [0], [1], [0, 0, 1, 1], [], []>} : vector<64x32xbf16>, vector<32x64xbf16>, vector<64x64xf32> -> vector<64x64xf32>
    %139 = arith.addf %133, %138 : vector<64x64xf32>
    %c0_103 = arith.constant 0 : index
    %c0_104 = arith.constant 0 : index
    %140 = vector.load %arg5[%c0_103, %c0_104] : memref<1x64xf32, #tpu.memory_space<vmem>>, vector<1x64xf32>
    %141 = vector.broadcast %140 : vector<1x64xf32> to vector<64x64xf32>
    %142 = arith.addf %139, %141 : vector<64x64xf32>
    %cst_105 = arith.constant 0.000000e+00 : f32
    %143 = vector.broadcast %cst_105 : f32 to vector<64x64xf32>
    %144 = arith.cmpf oge, %142, %143 : vector<64x64xf32>
    %cst_106 = arith.constant 0.00999999977 : f32
    %145 = vector.broadcast %cst_106 : f32 to vector<64x64xf32>
    %146 = arith.mulf %145, %142 : vector<64x64xf32>
    %147 = arith.select %144, %142, %146 : vector<64x64xi1>, vector<64x64xf32>
    %148 = vector.shape_cast %147 : vector<64x64xf32> to vector<8x8x64xf32>
    %c1_107 = arith.constant 1 : index
    %c1_108 = arith.constant 1 : index
    %c0_109 = arith.constant 0 : index
    %149 = vector.load %arg11[%c1_107, %c1_108, %c0_109] : memref<10x10x128xf32, #tpu.memory_space<vmem>>, vector<8x8x64xf32>
    tpu.vector_store %arg11[%c1_107, %c1_108, %c0_109], %148 {strides = array<i32>} : memref<10x10x128xf32, #tpu.memory_space<vmem>>, vector<8x8x64xf32>,
    %cst_110 = arith.constant 0.000000e+00 : f32
    %150 = vector.broadcast %cst_110 : f32 to vector<64x128xf32>
    %c0_111 = arith.constant 0 : index
    %c0_112 = arith.constant 0 : index
    %c0_113 = arith.constant 0 : index
    %151 = vector.load %arg11[%c0_111, %c0_112, %c0_113] : memref<10x10x128xf32, #tpu.memory_space<vmem>>, vector<8x8x64xf32>
    %152 = vector.shape_cast %151 : vector<8x8x64xf32> to vector<64x64xf32>
    %153 = arith.truncf %152 : vector<64x64xf32> to vector<64x64xbf16>
    %c0_114 = arith.constant 0 : index
    %c0_115 = arith.constant 0 : index
    %154 = vector.load %arg6[%c0_114, %c0_115] : memref<576x128xbf16, #tpu.memory_space<vmem>>, vector<64x128xbf16>
    %cst_116 = arith.constant dense<0.000000e+00> : vector<64x128xf32>
    %155 = tpu.matmul %153, %154, %cst_116 {dimension_numbers = #tpu.dot_dimension_numbers<[1], [0], [0], [1], [0, 0, 1, 1], [], []>} : vector<64x64xbf16>, vector<64x128xbf16>, vector<64x128xf32> -> vector<64x128xf32>
    %156 = arith.addf %150, %155 : vector<64x128xf32>
    %c0_117 = arith.constant 0 : index
    %c1_118 = arith.constant 1 : index
    %c0_119 = arith.constant 0 : index
    %157 = vector.load %arg11[%c0_117, %c1_118, %c0_119] : memref<10x10x128xf32, #tpu.memory_space<vmem>>, vector<8x8x64xf32>
    %158 = vector.shape_cast %157 : vector<8x8x64xf32> to vector<64x64xf32>
    %159 = arith.truncf %158 : vector<64x64xf32> to vector<64x64xbf16>
    %c64_120 = arith.constant 64 : index
    %c0_121 = arith.constant 0 : index
    %160 = vector.load %arg6[%c64_120, %c0_121] : memref<576x128xbf16, #tpu.memory_space<vmem>>, vector<64x128xbf16>
    %cst_122 = arith.constant dense<0.000000e+00> : vector<64x128xf32>
    %161 = tpu.matmul %159, %160, %cst_122 {dimension_numbers = #tpu.dot_dimension_numbers<[1], [0], [0], [1], [0, 0, 1, 1], [], []>} : vector<64x64xbf16>, vector<64x128xbf16>, vector<64x128xf32> -> vector<64x128xf32>
    %162 = arith.addf %156, %161 : vector<64x128xf32>
    %c0_123 = arith.constant 0 : index
    %c2_124 = arith.constant 2 : index
    %c0_125 = arith.constant 0 : index
    %163 = vector.load %arg11[%c0_123, %c2_124, %c0_125] : memref<10x10x128xf32, #tpu.memory_space<vmem>>, vector<8x8x64xf32>
    %164 = vector.shape_cast %163 : vector<8x8x64xf32> to vector<64x64xf32>
    %165 = arith.truncf %164 : vector<64x64xf32> to vector<64x64xbf16>
    %c128_126 = arith.constant 128 : index
    %c0_127 = arith.constant 0 : index
    %166 = vector.load %arg6[%c128_126, %c0_127] : memref<576x128xbf16, #tpu.memory_space<vmem>>, vector<64x128xbf16>
    %cst_128 = arith.constant dense<0.000000e+00> : vector<64x128xf32>
    %167 = tpu.matmul %165, %166, %cst_128 {dimension_numbers = #tpu.dot_dimension_numbers<[1], [0], [0], [1], [0, 0, 1, 1], [], []>} : vector<64x64xbf16>, vector<64x128xbf16>, vector<64x128xf32> -> vector<64x128xf32>
    %168 = arith.addf %162, %167 : vector<64x128xf32>
    %c1_129 = arith.constant 1 : index
    %c0_130 = arith.constant 0 : index
    %c0_131 = arith.constant 0 : index
    %169 = vector.load %arg11[%c1_129, %c0_130, %c0_131] : memref<10x10x128xf32, #tpu.memory_space<vmem>>, vector<8x8x64xf32>
    %170 = vector.shape_cast %169 : vector<8x8x64xf32> to vector<64x64xf32>
    %171 = arith.truncf %170 : vector<64x64xf32> to vector<64x64xbf16>
    %c192_132 = arith.constant 192 : index
    %c0_133 = arith.constant 0 : index
    %172 = vector.load %arg6[%c192_132, %c0_133] : memref<576x128xbf16, #tpu.memory_space<vmem>>, vector<64x128xbf16>
    %cst_134 = arith.constant dense<0.000000e+00> : vector<64x128xf32>
    %173 = tpu.matmul %171, %172, %cst_134 {dimension_numbers = #tpu.dot_dimension_numbers<[1], [0], [0], [1], [0, 0, 1, 1], [], []>} : vector<64x64xbf16>, vector<64x128xbf16>, vector<64x128xf32> -> vector<64x128xf32>
    %174 = arith.addf %168, %173 : vector<64x128xf32>
    %c1_135 = arith.constant 1 : index
    %c1_136 = arith.constant 1 : index
    %c0_137 = arith.constant 0 : index
    %175 = vector.load %arg11[%c1_135, %c1_136, %c0_137] : memref<10x10x128xf32, #tpu.memory_space<vmem>>, vector<8x8x64xf32>
    %176 = vector.shape_cast %175 : vector<8x8x64xf32> to vector<64x64xf32>
    %177 = arith.truncf %176 : vector<64x64xf32> to vector<64x64xbf16>
    %c256_138 = arith.constant 256 : index
    %c0_139 = arith.constant 0 : index
    %178 = vector.load %arg6[%c256_138, %c0_139] : memref<576x128xbf16, #tpu.memory_space<vmem>>, vector<64x128xbf16>
    %cst_140 = arith.constant dense<0.000000e+00> : vector<64x128xf32>
    %179 = tpu.matmul %177, %178, %cst_140 {dimension_numbers = #tpu.dot_dimension_numbers<[1], [0], [0], [1], [0, 0, 1, 1], [], []>} : vector<64x64xbf16>, vector<64x128xbf16>, vector<64x128xf32> -> vector<64x128xf32>
    %180 = arith.addf %174, %179 : vector<64x128xf32>
    %c1_141 = arith.constant 1 : index
    %c2_142 = arith.constant 2 : index
    %c0_143 = arith.constant 0 : index
    %181 = vector.load %arg11[%c1_141, %c2_142, %c0_143] : memref<10x10x128xf32, #tpu.memory_space<vmem>>, vector<8x8x64xf32>
    %182 = vector.shape_cast %181 : vector<8x8x64xf32> to vector<64x64xf32>
    %183 = arith.truncf %182 : vector<64x64xf32> to vector<64x64xbf16>
    %c320 = arith.constant 320 : index
    %c0_144 = arith.constant 0 : index
    %184 = vector.load %arg6[%c320, %c0_144] : memref<576x128xbf16, #tpu.memory_space<vmem>>, vector<64x128xbf16>
    %cst_145 = arith.constant dense<0.000000e+00> : vector<64x128xf32>
    %185 = tpu.matmul %183, %184, %cst_145 {dimension_numbers = #tpu.dot_dimension_numbers<[1], [0], [0], [1], [0, 0, 1, 1], [], []>} : vector<64x64xbf16>, vector<64x128xbf16>, vector<64x128xf32> -> vector<64x128xf32>
    %186 = arith.addf %180, %185 : vector<64x128xf32>
    %c2_146 = arith.constant 2 : index
    %c0_147 = arith.constant 0 : index
    %c0_148 = arith.constant 0 : index
    %187 = vector.load %arg11[%c2_146, %c0_147, %c0_148] : memref<10x10x128xf32, #tpu.memory_space<vmem>>, vector<8x8x64xf32>
    %188 = vector.shape_cast %187 : vector<8x8x64xf32> to vector<64x64xf32>
    %189 = arith.truncf %188 : vector<64x64xf32> to vector<64x64xbf16>
    %c384 = arith.constant 384 : index
    %c0_149 = arith.constant 0 : index
    %190 = vector.load %arg6[%c384, %c0_149] : memref<576x128xbf16, #tpu.memory_space<vmem>>, vector<64x128xbf16>
    %cst_150 = arith.constant dense<0.000000e+00> : vector<64x128xf32>
    %191 = tpu.matmul %189, %190, %cst_150 {dimension_numbers = #tpu.dot_dimension_numbers<[1], [0], [0], [1], [0, 0, 1, 1], [], []>} : vector<64x64xbf16>, vector<64x128xbf16>, vector<64x128xf32> -> vector<64x128xf32>
    %192 = arith.addf %186, %191 : vector<64x128xf32>
    %c2_151 = arith.constant 2 : index
    %c1_152 = arith.constant 1 : index
    %c0_153 = arith.constant 0 : index
    %193 = vector.load %arg11[%c2_151, %c1_152, %c0_153] : memref<10x10x128xf32, #tpu.memory_space<vmem>>, vector<8x8x64xf32>
    %194 = vector.shape_cast %193 : vector<8x8x64xf32> to vector<64x64xf32>
    %195 = arith.truncf %194 : vector<64x64xf32> to vector<64x64xbf16>
    %c448 = arith.constant 448 : index
    %c0_154 = arith.constant 0 : index
    %196 = vector.load %arg6[%c448, %c0_154] : memref<576x128xbf16, #tpu.memory_space<vmem>>, vector<64x128xbf16>
    %cst_155 = arith.constant dense<0.000000e+00> : vector<64x128xf32>
    %197 = tpu.matmul %195, %196, %cst_155 {dimension_numbers = #tpu.dot_dimension_numbers<[1], [0], [0], [1], [0, 0, 1, 1], [], []>} : vector<64x64xbf16>, vector<64x128xbf16>, vector<64x128xf32> -> vector<64x128xf32>
    %198 = arith.addf %192, %197 : vector<64x128xf32>
    %c2_156 = arith.constant 2 : index
    %c2_157 = arith.constant 2 : index
    %c0_158 = arith.constant 0 : index
    %199 = vector.load %arg11[%c2_156, %c2_157, %c0_158] : memref<10x10x128xf32, #tpu.memory_space<vmem>>, vector<8x8x64xf32>
    %200 = vector.shape_cast %199 : vector<8x8x64xf32> to vector<64x64xf32>
    %201 = arith.truncf %200 : vector<64x64xf32> to vector<64x64xbf16>
    %c512 = arith.constant 512 : index
    %c0_159 = arith.constant 0 : index
    %202 = vector.load %arg6[%c512, %c0_159] : memref<576x128xbf16, #tpu.memory_space<vmem>>, vector<64x128xbf16>
    %cst_160 = arith.constant dense<0.000000e+00> : vector<64x128xf32>
    %203 = tpu.matmul %201, %202, %cst_160 {dimension_numbers = #tpu.dot_dimension_numbers<[1], [0], [0], [1], [0, 0, 1, 1], [], []>} : vector<64x64xbf16>, vector<64x128xbf16>, vector<64x128xf32> -> vector<64x128xf32>
    %204 = arith.addf %198, %203 : vector<64x128xf32>
    %c0_161 = arith.constant 0 : index
    %c0_162 = arith.constant 0 : index
    %205 = vector.load %arg7[%c0_161, %c0_162] : memref<1x128xf32, #tpu.memory_space<vmem>>, vector<1x128xf32>
    %206 = vector.broadcast %205 : vector<1x128xf32> to vector<64x128xf32>
    %207 = arith.addf %204, %206 : vector<64x128xf32>
    %cst_163 = arith.constant 0.000000e+00 : f32
    %208 = vector.broadcast %cst_163 : f32 to vector<64x128xf32>
    %209 = arith.cmpf oge, %207, %208 : vector<64x128xf32>
    %cst_164 = arith.constant 0.00999999977 : f32
    %210 = vector.broadcast %cst_164 : f32 to vector<64x128xf32>
    %211 = arith.mulf %210, %207 : vector<64x128xf32>
    %212 = arith.select %209, %207, %211 : vector<64x128xi1>, vector<64x128xf32>
    %213 = vector.shape_cast %212 : vector<64x128xf32> to vector<8x8x128xf32>
    %c1_165 = arith.constant 1 : index
    %c1_166 = arith.constant 1 : index
    %c0_167 = arith.constant 0 : index
    %214 = vector.load %arg11[%c1_165, %c1_166, %c0_167] : memref<10x10x128xf32, #tpu.memory_space<vmem>>, vector<8x8x128xf32>
    tpu.vector_store %arg11[%c1_165, %c1_166, %c0_167], %213 {strides = array<i32>} : memref<10x10x128xf32, #tpu.memory_space<vmem>>, vector<8x8x128xf32>,
    %cst_168 = arith.constant 0.000000e+00 : f32
    %215 = vector.broadcast %cst_168 : f32 to vector<64x256xf32>
    %c0_169 = arith.constant 0 : index
    %c0_170 = arith.constant 0 : index
    %c0_171 = arith.constant 0 : index
    %216 = vector.load %arg11[%c0_169, %c0_170, %c0_171] : memref<10x10x128xf32, #tpu.memory_space<vmem>>, vector<8x8x128xf32>
    %217 = vector.shape_cast %216 : vector<8x8x128xf32> to vector<64x128xf32>
    %218 = arith.truncf %217 : vector<64x128xf32> to vector<64x128xbf16>
    %c0_172 = arith.constant 0 : index
    %c0_173 = arith.constant 0 : index
    %219 = vector.load %arg8[%c0_172, %c0_173] : memref<1152x256xbf16, #tpu.memory_space<vmem>>, vector<128x256xbf16>
    %cst_174 = arith.constant dense<0.000000e+00> : vector<64x256xf32>
    %220 = tpu.matmul %218, %219, %cst_174 {dimension_numbers = #tpu.dot_dimension_numbers<[1], [0], [0], [1], [0, 0, 1, 1], [], []>} : vector<64x128xbf16>, vector<128x256xbf16>, vector<64x256xf32> -> vector<64x256xf32>
    %221 = arith.addf %215, %220 : vector<64x256xf32>
    %c0_175 = arith.constant 0 : index
    %c1_176 = arith.constant 1 : index
    %c0_177 = arith.constant 0 : index
    %222 = vector.load %arg11[%c0_175, %c1_176, %c0_177] : memref<10x10x128xf32, #tpu.memory_space<vmem>>, vector<8x8x128xf32>
    %223 = vector.shape_cast %222 : vector<8x8x128xf32> to vector<64x128xf32>
    %224 = arith.truncf %223 : vector<64x128xf32> to vector<64x128xbf16>
    %c128_178 = arith.constant 128 : index
    %c0_179 = arith.constant 0 : index
    %225 = vector.load %arg8[%c128_178, %c0_179] : memref<1152x256xbf16, #tpu.memory_space<vmem>>, vector<128x256xbf16>
    %cst_180 = arith.constant dense<0.000000e+00> : vector<64x256xf32>
    %226 = tpu.matmul %224, %225, %cst_180 {dimension_numbers = #tpu.dot_dimension_numbers<[1], [0], [0], [1], [0, 0, 1, 1], [], []>} : vector<64x128xbf16>, vector<128x256xbf16>, vector<64x256xf32> -> vector<64x256xf32>
    %227 = arith.addf %221, %226 : vector<64x256xf32>
    %c0_181 = arith.constant 0 : index
    %c2_182 = arith.constant 2 : index
    %c0_183 = arith.constant 0 : index
    %228 = vector.load %arg11[%c0_181, %c2_182, %c0_183] : memref<10x10x128xf32, #tpu.memory_space<vmem>>, vector<8x8x128xf32>
    %229 = vector.shape_cast %228 : vector<8x8x128xf32> to vector<64x128xf32>
    %230 = arith.truncf %229 : vector<64x128xf32> to vector<64x128xbf16>
    %c256_184 = arith.constant 256 : index
    %c0_185 = arith.constant 0 : index
    %231 = vector.load %arg8[%c256_184, %c0_185] : memref<1152x256xbf16, #tpu.memory_space<vmem>>, vector<128x256xbf16>
    %cst_186 = arith.constant dense<0.000000e+00> : vector<64x256xf32>
    %232 = tpu.matmul %230, %231, %cst_186 {dimension_numbers = #tpu.dot_dimension_numbers<[1], [0], [0], [1], [0, 0, 1, 1], [], []>} : vector<64x128xbf16>, vector<128x256xbf16>, vector<64x256xf32> -> vector<64x256xf32>
    %233 = arith.addf %227, %232 : vector<64x256xf32>
    %c1_187 = arith.constant 1 : index
    %c0_188 = arith.constant 0 : index
    %c0_189 = arith.constant 0 : index
    %234 = vector.load %arg11[%c1_187, %c0_188, %c0_189] : memref<10x10x128xf32, #tpu.memory_space<vmem>>, vector<8x8x128xf32>
    %235 = vector.shape_cast %234 : vector<8x8x128xf32> to vector<64x128xf32>
    %236 = arith.truncf %235 : vector<64x128xf32> to vector<64x128xbf16>
    %c384_190 = arith.constant 384 : index
    %c0_191 = arith.constant 0 : index
    %237 = vector.load %arg8[%c384_190, %c0_191] : memref<1152x256xbf16, #tpu.memory_space<vmem>>, vector<128x256xbf16>
    %cst_192 = arith.constant dense<0.000000e+00> : vector<64x256xf32>
    %238 = tpu.matmul %236, %237, %cst_192 {dimension_numbers = #tpu.dot_dimension_numbers<[1], [0], [0], [1], [0, 0, 1, 1], [], []>} : vector<64x128xbf16>, vector<128x256xbf16>, vector<64x256xf32> -> vector<64x256xf32>
    %239 = arith.addf %233, %238 : vector<64x256xf32>
    %c1_193 = arith.constant 1 : index
    %c1_194 = arith.constant 1 : index
    %c0_195 = arith.constant 0 : index
    %240 = vector.load %arg11[%c1_193, %c1_194, %c0_195] : memref<10x10x128xf32, #tpu.memory_space<vmem>>, vector<8x8x128xf32>
    %241 = vector.shape_cast %240 : vector<8x8x128xf32> to vector<64x128xf32>
    %242 = arith.truncf %241 : vector<64x128xf32> to vector<64x128xbf16>
    %c512_196 = arith.constant 512 : index
    %c0_197 = arith.constant 0 : index
    %243 = vector.load %arg8[%c512_196, %c0_197] : memref<1152x256xbf16, #tpu.memory_space<vmem>>, vector<128x256xbf16>
    %cst_198 = arith.constant dense<0.000000e+00> : vector<64x256xf32>
    %244 = tpu.matmul %242, %243, %cst_198 {dimension_numbers = #tpu.dot_dimension_numbers<[1], [0], [0], [1], [0, 0, 1, 1], [], []>} : vector<64x128xbf16>, vector<128x256xbf16>, vector<64x256xf32> -> vector<64x256xf32>
    %245 = arith.addf %239, %244 : vector<64x256xf32>
    %c1_199 = arith.constant 1 : index
    %c2_200 = arith.constant 2 : index
    %c0_201 = arith.constant 0 : index
    %246 = vector.load %arg11[%c1_199, %c2_200, %c0_201] : memref<10x10x128xf32, #tpu.memory_space<vmem>>, vector<8x8x128xf32>
    %247 = vector.shape_cast %246 : vector<8x8x128xf32> to vector<64x128xf32>
    %248 = arith.truncf %247 : vector<64x128xf32> to vector<64x128xbf16>
    %c640 = arith.constant 640 : index
    %c0_202 = arith.constant 0 : index
    %249 = vector.load %arg8[%c640, %c0_202] : memref<1152x256xbf16, #tpu.memory_space<vmem>>, vector<128x256xbf16>
    %cst_203 = arith.constant dense<0.000000e+00> : vector<64x256xf32>
    %250 = tpu.matmul %248, %249, %cst_203 {dimension_numbers = #tpu.dot_dimension_numbers<[1], [0], [0], [1], [0, 0, 1, 1], [], []>} : vector<64x128xbf16>, vector<128x256xbf16>, vector<64x256xf32> -> vector<64x256xf32>
    %251 = arith.addf %245, %250 : vector<64x256xf32>
    %c2_204 = arith.constant 2 : index
    %c0_205 = arith.constant 0 : index
    %c0_206 = arith.constant 0 : index
    %252 = vector.load %arg11[%c2_204, %c0_205, %c0_206] : memref<10x10x128xf32, #tpu.memory_space<vmem>>, vector<8x8x128xf32>
    %253 = vector.shape_cast %252 : vector<8x8x128xf32> to vector<64x128xf32>
    %254 = arith.truncf %253 : vector<64x128xf32> to vector<64x128xbf16>
    %c768 = arith.constant 768 : index
    %c0_207 = arith.constant 0 : index
    %255 = vector.load %arg8[%c768, %c0_207] : memref<1152x256xbf16, #tpu.memory_space<vmem>>, vector<128x256xbf16>
    %cst_208 = arith.constant dense<0.000000e+00> : vector<64x256xf32>
    %256 = tpu.matmul %254, %255, %cst_208 {dimension_numbers = #tpu.dot_dimension_numbers<[1], [0], [0], [1], [0, 0, 1, 1], [], []>} : vector<64x128xbf16>, vector<128x256xbf16>, vector<64x256xf32> -> vector<64x256xf32>
    %257 = arith.addf %251, %256 : vector<64x256xf32>
    %c2_209 = arith.constant 2 : index
    %c1_210 = arith.constant 1 : index
    %c0_211 = arith.constant 0 : index
    %258 = vector.load %arg11[%c2_209, %c1_210, %c0_211] : memref<10x10x128xf32, #tpu.memory_space<vmem>>, vector<8x8x128xf32>
    %259 = vector.shape_cast %258 : vector<8x8x128xf32> to vector<64x128xf32>
    %260 = arith.truncf %259 : vector<64x128xf32> to vector<64x128xbf16>
    %c896 = arith.constant 896 : index
    %c0_212 = arith.constant 0 : index
    %261 = vector.load %arg8[%c896, %c0_212] : memref<1152x256xbf16, #tpu.memory_space<vmem>>, vector<128x256xbf16>
    %cst_213 = arith.constant dense<0.000000e+00> : vector<64x256xf32>
    %262 = tpu.matmul %260, %261, %cst_213 {dimension_numbers = #tpu.dot_dimension_numbers<[1], [0], [0], [1], [0, 0, 1, 1], [], []>} : vector<64x128xbf16>, vector<128x256xbf16>, vector<64x256xf32> -> vector<64x256xf32>
    %263 = arith.addf %257, %262 : vector<64x256xf32>
    %c2_214 = arith.constant 2 : index
    %c2_215 = arith.constant 2 : index
    %c0_216 = arith.constant 0 : index
    %264 = vector.load %arg11[%c2_214, %c2_215, %c0_216] : memref<10x10x128xf32, #tpu.memory_space<vmem>>, vector<8x8x128xf32>
    %265 = vector.shape_cast %264 : vector<8x8x128xf32> to vector<64x128xf32>
    %266 = arith.truncf %265 : vector<64x128xf32> to vector<64x128xbf16>
    %c1024 = arith.constant 1024 : index
    %c0_217 = arith.constant 0 : index
    %267 = vector.load %arg8[%c1024, %c0_217] : memref<1152x256xbf16, #tpu.memory_space<vmem>>, vector<128x256xbf16>
    %cst_218 = arith.constant dense<0.000000e+00> : vector<64x256xf32>
    %268 = tpu.matmul %266, %267, %cst_218 {dimension_numbers = #tpu.dot_dimension_numbers<[1], [0], [0], [1], [0, 0, 1, 1], [], []>} : vector<64x128xbf16>, vector<128x256xbf16>, vector<64x256xf32> -> vector<64x256xf32>
    %269 = arith.addf %263, %268 : vector<64x256xf32>
    %c0_219 = arith.constant 0 : index
    %c0_220 = arith.constant 0 : index
    %270 = vector.load %arg9[%c0_219, %c0_220] : memref<1x256xf32, #tpu.memory_space<vmem>>, vector<1x256xf32>
    %271 = vector.broadcast %270 : vector<1x256xf32> to vector<64x256xf32>
    %272 = arith.addf %269, %271 : vector<64x256xf32>
    %cst_221 = arith.constant 0.000000e+00 : f32
    %273 = vector.broadcast %cst_221 : f32 to vector<64x256xf32>
    %274 = arith.cmpf oge, %272, %273 : vector<64x256xf32>
    %cst_222 = arith.constant 0.00999999977 : f32
    %275 = vector.broadcast %cst_222 : f32 to vector<64x256xf32>
    %276 = arith.mulf %275, %272 : vector<64x256xf32>
    %277 = arith.select %274, %272, %276 : vector<64x256xi1>, vector<64x256xf32>
    %278 = arith.truncf %277 : vector<64x256xf32> to vector<64x256xbf16>
    %c0_223 = arith.constant 0 : index
    %c0_224 = arith.constant 0 : index
    %279 = vector.load %arg10[%c0_223, %c0_224] : memref<64x256xbf16, #tpu.memory_space<vmem>>, vector<64x256xbf16>
    tpu.vector_store %arg10[%c0_223, %c0_224], %278 {strides = array<i32>} : memref<64x256xbf16, #tpu.memory_space<vmem>>, vector<64x256xbf16>,
    return
  }
  func.func @transform_0(%arg0: i32) -> (i32, i32, i32, i32) {
    %c0_i32 = arith.constant 0 : i32
    %c0_i32_0 = arith.constant 0 : i32
    %c0_i32_1 = arith.constant 0 : i32
    %c0_i32_2 = arith.constant 0 : i32
    return %arg0, %c0_i32, %c0_i32_0, %c0_i32_1 : i32, i32, i32, i32
  }
  func.func @transform_1(%arg0: i32) -> (i32, i32) {
    %c0_i32 = arith.constant 0 : i32
    %c0_i32_0 = arith.constant 0 : i32
    %c0_i32_1 = arith.constant 0 : i32
    return %c0_i32, %c0_i32_0 : i32, i32
  }
  func.func @transform_2(%arg0: i32) -> (i32, i32) {
    %c0_i32 = arith.constant 0 : i32
    %c0_i32_0 = arith.constant 0 : i32
    %c0_i32_1 = arith.constant 0 : i32
    return %c0_i32, %c0_i32_0 : i32, i32
  }
  func.func @transform_3(%arg0: i32) -> (i32, i32) {
    %c0_i32 = arith.constant 0 : i32
    %c0_i32_0 = arith.constant 0 : i32
    %c0_i32_1 = arith.constant 0 : i32
    return %c0_i32, %c0_i32_0 : i32, i32
  }
  func.func @transform_4(%arg0: i32) -> (i32, i32) {
    %c0_i32 = arith.constant 0 : i32
    %c0_i32_0 = arith.constant 0 : i32
    %c0_i32_1 = arith.constant 0 : i32
    return %c0_i32, %c0_i32_0 : i32, i32
  }
  func.func @transform_5(%arg0: i32) -> (i32, i32) {
    %c0_i32 = arith.constant 0 : i32
    %c0_i32_0 = arith.constant 0 : i32
    %c0_i32_1 = arith.constant 0 : i32
    return %c0_i32, %c0_i32_0 : i32, i32
  }
  func.func @transform_6(%arg0: i32) -> (i32, i32) {
    %c0_i32 = arith.constant 0 : i32
    %c0_i32_0 = arith.constant 0 : i32
    %c0_i32_1 = arith.constant 0 : i32
    return %c0_i32, %c0_i32_0 : i32, i32
  }
  func.func @transform_7(%arg0: i32) -> (i32, i32) {
    %c0_i32 = arith.constant 0 : i32
    %c0_i32_0 = arith.constant 0 : i32
    %c0_i32_1 = arith.constant 0 : i32
    return %c0_i32, %c0_i32_0 : i32, i32
  }
  func.func @transform_8(%arg0: i32) -> (i32, i32) {
    %c0_i32 = arith.constant 0 : i32
    %c0_i32_0 = arith.constant 0 : i32
    %c0_i32_1 = arith.constant 0 : i32
    return %c0_i32, %c0_i32_0 : i32, i32
  }
  func.func @transform_9(%arg0: i32) -> (i32, i32) {
    %c0_i32 = arith.constant 0 : i32
    %c0_i32_0 = arith.constant 0 : i32
    return %arg0, %c0_i32 : i32, i32
  }
}

module attributes {stable_mosaic.version = 11 : i64} {
  func.func @_fc_kernel(%arg0: i32, %arg1: memref<2x2048xbf16, #tpu.memory_space<vmem>>, %arg2: memref<2048x512xbf16, #tpu.memory_space<vmem>>, %arg3: memref<1x512xf32, #tpu.memory_space<vmem>>, %arg4: memref<512x8xbf16, #tpu.memory_space<vmem>>, %arg5: memref<1x8xf32, #tpu.memory_space<vmem>>, %arg6: memref<2x8xf32, #tpu.memory_space<vmem>>, %arg7: memref<2x512xf32, #tpu.memory_space<vmem>>) attributes {dimension_semantics = [#tpu.dimension_semantics<arbitrary>], iteration_bounds = array<i64: 8>, scalar_prefetch = 0 : i64, scratch_operands = 1 : i64, tpu.core_type = #tpu.core_type<tc>, window_params = [{transform_indices = @transform_0, window_bounds = array<i64: 2, 2048>}, {transform_indices = @transform_1, window_bounds = array<i64: 2048, 512>}, {pipeline_mode = #tpu.pipeline_mode<synchronous>, transform_indices = @transform_2, window_bounds = array<i64: 1, 512>}, {pipeline_mode = #tpu.pipeline_mode<synchronous>, transform_indices = @transform_3, window_bounds = array<i64: 512, 8>}, {pipeline_mode = #tpu.pipeline_mode<synchronous>, transform_indices = @transform_4, window_bounds = array<i64: 1, 8>}, {pipeline_mode = #tpu.pipeline_mode<synchronous>, transform_indices = @transform_5, window_bounds = array<i64: 2, 8>}]} {
    %c0_i32 = arith.constant 0 : i32
    %0 = arith.cmpi eq, %arg0, %c0_i32 : i32
    %1 = arith.extui %0 : i1 to i32
    %c0_i32_0 = arith.constant 0 : i32
    %2 = arith.cmpi ne, %1, %c0_i32_0 : i32
    scf.if %2 {
      %cst_9 = arith.constant 0.000000e+00 : f32
      %12 = vector.broadcast %cst_9 : f32 to vector<2x512xf32>
      %c0_10 = arith.constant 0 : index
      %c0_11 = arith.constant 0 : index
      %13 = vector.load %arg7[%c0_10, %c0_11] : memref<2x512xf32, #tpu.memory_space<vmem>>, vector<2x512xf32>
      tpu.vector_store %arg7[%c0_10, %c0_11], %12 {strides = array<i32>} : memref<2x512xf32, #tpu.memory_space<vmem>>, vector<2x512xf32>,
    } else {
    }
    %c0 = arith.constant 0 : index
    %c0_1 = arith.constant 0 : index
    %3 = vector.load %arg7[%c0, %c0_1] : memref<2x512xf32, #tpu.memory_space<vmem>>, vector<2x512xf32>
    %c0_2 = arith.constant 0 : index
    %c0_3 = arith.constant 0 : index
    %4 = vector.load %arg1[%c0_2, %c0_3] : memref<2x2048xbf16, #tpu.memory_space<vmem>>, vector<2x2048xbf16>
    %c0_4 = arith.constant 0 : index
    %c0_5 = arith.constant 0 : index
    %5 = vector.load %arg2[%c0_4, %c0_5] : memref<2048x512xbf16, #tpu.memory_space<vmem>>, vector<2048x512xbf16>
    %cst = arith.constant dense<0.000000e+00> : vector<2x512xf32>
    %6 = tpu.matmul %4, %5, %cst {dimension_numbers = #tpu.dot_dimension_numbers<[1], [0], [0], [1], [0, 0, 1, 1], [], []>} : vector<2x2048xbf16>, vector<2048x512xbf16>, vector<2x512xf32> -> vector<2x512xf32>
    %7 = arith.addf %3, %6 : vector<2x512xf32>
    %c0_6 = arith.constant 0 : index
    %c0_7 = arith.constant 0 : index
    %8 = vector.load %arg7[%c0_6, %c0_7] : memref<2x512xf32, #tpu.memory_space<vmem>>, vector<2x512xf32>
    tpu.vector_store %arg7[%c0_6, %c0_7], %7 {strides = array<i32>} : memref<2x512xf32, #tpu.memory_space<vmem>>, vector<2x512xf32>,
    %c7_i32 = arith.constant 7 : i32
    %9 = arith.cmpi eq, %arg0, %c7_i32 : i32
    %10 = arith.extui %9 : i1 to i32
    %c0_i32_8 = arith.constant 0 : i32
    %11 = arith.cmpi ne, %10, %c0_i32_8 : i32
    scf.if %11 {
      %c0_9 = arith.constant 0 : index
      %c0_10 = arith.constant 0 : index
      %12 = vector.load %arg7[%c0_9, %c0_10] : memref<2x512xf32, #tpu.memory_space<vmem>>, vector<2x512xf32>
      %c0_11 = arith.constant 0 : index
      %c0_12 = arith.constant 0 : index
      %13 = vector.load %arg3[%c0_11, %c0_12] : memref<1x512xf32, #tpu.memory_space<vmem>>, vector<1x512xf32>
      %14 = vector.broadcast %13 : vector<1x512xf32> to vector<2x512xf32>
      %15 = arith.addf %12, %14 : vector<2x512xf32>
      %cst_13 = arith.constant 0.000000e+00 : f32
      %16 = vector.broadcast %cst_13 : f32 to vector<2x512xf32>
      %17 = arith.cmpf oge, %15, %16 : vector<2x512xf32>
      %cst_14 = arith.constant 0.00999999977 : f32
      %18 = vector.broadcast %cst_14 : f32 to vector<2x512xf32>
      %19 = arith.mulf %18, %15 : vector<2x512xf32>
      %20 = arith.select %17, %15, %19 : vector<2x512xi1>, vector<2x512xf32>
      %21 = arith.truncf %20 : vector<2x512xf32> to vector<2x512xbf16>
      %c0_15 = arith.constant 0 : index
      %c0_16 = arith.constant 0 : index
      %22 = vector.load %arg4[%c0_15, %c0_16] : memref<512x8xbf16, #tpu.memory_space<vmem>>, vector<512x8xbf16>
      %cst_17 = arith.constant dense<0.000000e+00> : vector<2x8xf32>
      %23 = tpu.matmul %21, %22, %cst_17 {dimension_numbers = #tpu.dot_dimension_numbers<[1], [0], [0], [1], [0, 0, 1, 1], [], []>} : vector<2x512xbf16>, vector<512x8xbf16>, vector<2x8xf32> -> vector<2x8xf32>
      %c0_18 = arith.constant 0 : index
      %c0_19 = arith.constant 0 : index
      %24 = vector.load %arg5[%c0_18, %c0_19] : memref<1x8xf32, #tpu.memory_space<vmem>>, vector<1x8xf32>
      %25 = vector.broadcast %24 : vector<1x8xf32> to vector<2x8xf32>
      %26 = arith.addf %23, %25 : vector<2x8xf32>
      %c0_20 = arith.constant 0 : index
      %c0_21 = arith.constant 0 : index
      %27 = vector.load %arg6[%c0_20, %c0_21] : memref<2x8xf32, #tpu.memory_space<vmem>>, vector<2x8xf32>
      tpu.vector_store %arg6[%c0_20, %c0_21], %26 {strides = array<i32>} : memref<2x8xf32, #tpu.memory_space<vmem>>, vector<2x8xf32>,
    } else {
    }
    return
  }
  func.func @transform_0(%arg0: i32) -> (i32, i32) {
    %c0_i32 = arith.constant 0 : i32
    %c0_i32_0 = arith.constant 0 : i32
    return %c0_i32, %arg0 : i32, i32
  }
  func.func @transform_1(%arg0: i32) -> (i32, i32) {
    %c0_i32 = arith.constant 0 : i32
    %c0_i32_0 = arith.constant 0 : i32
    return %arg0, %c0_i32 : i32, i32
  }
  func.func @transform_2(%arg0: i32) -> (i32, i32) {
    %c0_i32 = arith.constant 0 : i32
    %c0_i32_0 = arith.constant 0 : i32
    %c0_i32_1 = arith.constant 0 : i32
    return %c0_i32, %c0_i32_0 : i32, i32
  }
  func.func @transform_3(%arg0: i32) -> (i32, i32) {
    %c0_i32 = arith.constant 0 : i32
    %c0_i32_0 = arith.constant 0 : i32
    %c0_i32_1 = arith.constant 0 : i32
    return %c0_i32, %c0_i32_0 : i32, i32
  }
  func.func @transform_4(%arg0: i32) -> (i32, i32) {
    %c0_i32 = arith.constant 0 : i32
    %c0_i32_0 = arith.constant 0 : i32
    %c0_i32_1 = arith.constant 0 : i32
    return %c0_i32, %c0_i32_0 : i32, i32
  }
  func.func @transform_5(%arg0: i32) -> (i32, i32) {
    %c0_i32 = arith.constant 0 : i32
    %c0_i32_0 = arith.constant 0 : i32
    %c0_i32_1 = arith.constant 0 : i32
    return %c0_i32, %c0_i32_0 : i32, i32
  }
}

</mosaic_0001>

<bundles_post_ra>
// kernel: convdqn_forward.2
= control target key start
LH: loop header
LB: loop body
LE: loop exit
PB: predicated region body
PF: predicated region fallthrough
CT: control target
= control target key end

     0   :  { %14 = vsyncpa [#allocation4], 0  ;;  %s7237_s0 = inlined_call_operand.vmem [shape: f32[2,10,10,1], index: 0, kind: input, shape index: {}]   ;;  %s7238_s1 = inlined_call_operand.hbm [shape: f32[9,32], index: 1, kind: input, shape index: {}]   ;;  %s7239_s2 = inlined_call_operand.hbm [shape: f32[1,32], index: 2, kind: input, shape index: {}]   ;;  %s7240_s3 = inlined_call_operand.vmem [shape: bf16[288,64], index: 3, kind: input, shape index: {}]   ;;  %s7241_s4 = inlined_call_operand.hbm [shape: f32[1,64], index: 4, kind: input, shape index: {}]   ;;  %s7242_s5 = inlined_call_operand.hbm [shape: bf16[576,128], index: 5, kind: input, shape index: {}]   ;;  %s7243_s6 = inlined_call_operand.hbm [shape: f32[1,128], index: 6, kind: input, shape index: {}]   ;;  %s7244_s7 = inlined_call_operand.hbm [shape: bf16[1152,256], index: 7, kind: input, shape index: {}]   ;;  %s7245_s8 = inlined_call_operand.hbm [shape: f32[1,256], index: 8, kind: input, shape index: {}]   ;;  %s7246_s9 = inlined_call_operand.vmem [shape: bf16[128,256], index: 9, kind: output, shape index: {}]  }
   0x1   :  { %15 = vsyncpa [#allocation6], 0 }
   0x2   :  { %16 = vsyncpa [#allocation9], 0 }
   0x3   :  { %17 = vsyncpa [#allocation12], 0  ;;  %s6050_s30 = smov 0  }
   0x4 LB: > { %s274_s12 = sshll.u32 %s7239_s2, 4  ;;  %s6059_s13 = sadd.s32 4294967295, %s5985_s30   ;;  %s5985_s30 = sphi %s6050_s30, %s23_s30   ;;  %s275_s12 = int_to_ptr.hbm [resolvable:$true] %s274_s12 }
   0x5   : > { %p4516_p0 = scmp.ge.s32.totalorder %s5985_s30, 1  ;;  %p248_p1 = scmp.lt.s32.totalorder %s5985_s30, 3 }
   0x6   : > { %p5701_p2 = scmp.eq.s32.totalorder %s6059_s13, 0  ;;  %s5987_s15 = smov [#allocation5]  }
   0x7   : > { %p6064_p3 = pnand %p4516_p0, %p248_p1  ;;  %s276_s16 = sshll.u32 %s5987_s15, 4  ;;  %s277_s16 = int_to_ptr.vmem [resolvable:$true] %s276_s16 }
   0x8   : > { %s300_s19 = sshll.u32 %s7242_s5, 4  ;;  %s5988_s21 = smov [#allocation8]   ;;  %s301_s19 = int_to_ptr.hbm [resolvable:$true] %s300_s19 }
   0x9   : > { %p5679_p4 = pneg %p6064_p3  ;;  %s302_s22 = sshll.u32 %s5988_s21, 4  ;;  %s303_s22 = int_to_ptr.vmem [resolvable:$true] %s302_s22 }
   0xa   : > { %s5989_s23 = smov 64   ;;  %s5990_s24 = smov 4  }
   0xb   : > { %p6075_p5 = pnand %p5701_p2, %p5679_p4  ;;  %s326_s27 = sshll.u32 %s7244_s7, 4  ;;  %s327_s27 = int_to_ptr.hbm [resolvable:$true] %s326_s27 }
   0xc   : > { %s5991_s28 = smov [#allocation11]   ;;  %s259_s15 = sshll.u32 %s7238_s1, 4  ;;  %s260_s15 = int_to_ptr.hbm [resolvable:$true] %s259_s15 }
   0xd   : > { %5685 = dma.hbm_to_vmem [thread:$0]  (!%p6075_p5), %s275_s12, 16, %s277_s16, [#allocation6]  }
   0xe   : > { %5691 = dma.hbm_to_vmem [thread:$0]  (!%p6075_p5), %s301_s19, 4608, %s303_s22, [#allocation9], %s5989_s23, %s5989_s23, %s5990_s24  }
   0xf   : > { %s328_s29 = sshll.u32 %s5991_s28, 4  ;;  %s5992_s12 = smov 128   ;;  %s329_s29 = int_to_ptr.vmem [resolvable:$true] %s328_s29 }
  0x10   : > { %s5993_s16 = smov 8   ;;  %s289_s19 = sshll.u32 %s7241_s4, 4  ;;  %s290_s19 = int_to_ptr.hbm [resolvable:$true] %s289_s19 }
  0x11   : > { %5697 = dma.hbm_to_vmem [thread:$0]  (!%p6075_p5), %s327_s27, 18432, %s329_s29, [#allocation12], %s5992_s12, %s5992_s12, %s5993_s16  }
  0x12   : > { %s5994_s21 = smov [#allocation3]   ;;  %s5995_s23 = smov [#allocation7]  }
  0x13   : > { %s261_s22 = sshll.u32 %s5994_s21, 4  ;;  %s291_s24 = sshll.u32 %s5995_s23, 4  ;;  %s262_s22 = int_to_ptr.vmem [resolvable:$true] %s261_s22  ;;  %s292_s24 = int_to_ptr.vmem [resolvable:$true] %s291_s24 }
  0x14   : > { %5682 = dma.hbm_to_vmem [thread:$0]  (!%p6075_p5), %s260_s15, 256, %s262_s22, [#allocation4], %s5992_s12, %s5992_s12, %s5993_s16  }
  0x15   : > { %s315_s28 = sshll.u32 %s7243_s6, 4  ;;  %s341_s10 = sshll.u32 %s7245_s8, 4  ;;  %s316_s28 = int_to_ptr.hbm [resolvable:$true] %s315_s28  ;;  %s342_s10 = int_to_ptr.hbm [resolvable:$true] %s341_s10 }
  0x16   : > { %5688 = dma.hbm_to_vmem [thread:$0]  (!%p6075_p5), %s290_s19, 16, %s292_s24, [#allocation6]  }
  0x17   : > { %s5996_s11 = smov [#allocation10]   ;;  %s5997_s15 = smov [#allocation13]  }
  0x18   : > { %s317_s17 = sshll.u32 %s5996_s11, 4  ;;  %s343_s12 = sshll.u32 %s5997_s15, 4  ;;  %s318_s17 = int_to_ptr.vmem [resolvable:$true] %s317_s17  ;;  %s344_s12 = int_to_ptr.vmem [resolvable:$true] %s343_s12 }
  0x19   : > { %5694 = dma.hbm_to_vmem [thread:$0]  (!%p6075_p5), %s316_s28, 16, %s318_s17, [#allocation9]  }
  0x1a   : > { %5700 = dma.hbm_to_vmem [thread:$0]  (!%p6075_p5), %s342_s10, 32, %s344_s12, [#allocation12]  }
  0x1b   : > { %364 = sbr.rel (%p6064_p3) target bundleno = 1284 (0x504), region = 56 }
  0x20   : > { %5968 = dma.done.wait (%p5701_p2), [#allocation4], 256  }
  0x21   : > { %5970 = vsyncadd (%p5701_p2), [#allocation4], 4294967040 }
  0x22   : > { %5972 = dma.done.wait (%p5701_p2), [#allocation6], 32  }
  0x23   : > { %5974 = vsyncadd (%p5701_p2), [#allocation6], 4294967264 }
  0x24   : > { %5976 = dma.done.wait (%p5701_p2), [#allocation9], 4624  }
  0x25   : > { %5978 = vsyncadd (%p5701_p2), [#allocation9], 4294962672 }
  0x26   : > { %5980 = dma.done.wait (%p5701_p2), [#allocation12], 18464  }
  0x27   : > { %5982 = vsyncadd (%p5701_p2), [#allocation12], 4294948832  ;;  %p432_p6 = scmp.lt.s32.totalorder %s6059_s13, 1  ;;  %v5998_v0 = vmov 0   ;;  %v5999_v21 = vmov 0.0   ;;  %v5455_v29 = vld [vmem:[%s7240_s3 + $0x18] sm:$0xff] }
  0x28   : > { %5738 = vset.pattern.permute.xlu2 %v5998_v0  ;;  %5737 = vset.pattern.permute.xlu1 %v5998_v0  ;;  %447 = vst [vmem:[#allocation2 + $0x10] sm:$0xff] %v5999_v21  ;;  %v5453_v30 = vld [vmem:[%s7240_s3 + $0x8] sm:$0xff]  ;;  %v6204_v32 = vld [vmem:[#allocation3] ss:$0 sm:$0xff]  ;;  %v5454_v33 = vld [vmem:[%s7240_s3 + $0x10] sm:$0xff]  ;;  %vm1098_vm0 = vcmask 261120  }
  0x29   : > { %5736 = vset.pattern.permute.xlu0 %v5998_v0  ;;  %s433_s14 = scalar_select %p432_p6, %s6059_s13, 1  ;;  %448 = vst [vmem:[#allocation2 + $0x18] sm:$0x3] %v5999_v21  ;;  %v5457_v31 = vld [vmem:[%s7240_s3 + $0x28] sm:$0xff]  ;;  %1169 = vmatpush.bf16.msra.mxu0 %v5455_v29  ;;  %v5452_v34 = vld [vmem:[%s7240_s3] sm:$0xff]  ;;  %vm1821_vm10 = vcmask 523264  }
  0x2a   : > { %445 = vst [vmem:[#allocation2] sm:$0xff] %v5999_v21  ;;  %1222 = vmatpush.bf16.msra.mxu1 %v5453_v30  ;;  %1291 = vmatpush.bf16.msra.mxu2 %v5457_v31  ;;  %v5456_v35 = vld [vmem:[%s7240_s3 + $0x20] sm:$0xff]  ;;  %v6248_v60 = vld [vmem:[#allocation3 + $0x8] ss:$0 sm:$0xff]  ;;  %s4534_s18 = sshll.u32 %s6059_s13, 3 }
  0x2b   : > { %s5650_s20 = smul.u32 160, %s433_s14  ;;  %446 = vst [vmem:[#allocation2 + $0x8] sm:$0x3] %v5999_v21  ;;  %v6216_v36 = vld [vmem:[#allocation3 + $0x2] ss:$0 sm:$0xff]  ;;  %p438_p7 = scmp.lt.s32.totalorder %s4534_s18, 15 }
  0x2c   : > { %449 = vst [vmem:[#allocation2 + $0x20] sm:$0xff] %v5999_v21  ;;  %v6218_v37 = vld [vmem:[#allocation3 + $0x1] ss:$0 sm:$0xff]  ;;  %v6223_v42 = vld [vmem:[#allocation3 + $0x3] ss:$0 sm:$0xff] }
  0x2d   : > { %s6131_s19 = scalar_lea.vmem %s7237_s0, %s5650_s20  ;;  %450 = vst [vmem:[#allocation2 + $0x28] sm:$0x3] %v5999_v21  ;;  %1170 = vmatpush.bf16.msra.mxu0 %v5454_v33  ;;  %v6226_v44 = vld [vmem:[#allocation3 + $0x4] ss:$0 sm:$0xff]  ;;  %v6229_v47 = vld [vmem:[#allocation3 + $0x5] ss:$0 sm:$0xff] }
  0x2e   : > { %v4545_v1 = vld [vmem:[%s6131_s19 + $0x11] sm:$0xff]  ;;  %v597_v2 = vld [vmem:[%s6131_s19 + $0x2] sm:$0xff]  ;;  %451 = vst [vmem:[#allocation2 + $0x30] sm:$0xff] %v5999_v21  ;;  %1223 = vmatpush.bf16.msra.mxu1 %v5452_v34  ;;  %1292 = vmatpush.bf16.msra.mxu2 %v5456_v35  ;;  %s7250_s18 = smov (!%p438_p7, %s4534_s18), 15 }
  0x2f   : > { %v465_v3 = vld [vmem:[%s6131_s19] sm:$0xff]  ;;  %741 = vperm.xlu2 %5738, %v4545_v1   ;;  %608 = vperm.xlu1 %5737, %v597_v2   ;;  %v4553_v4 = vld [vmem:[%s6131_s19 + $0x12] sm:$0xff]  ;;  %452 = vst [vmem:[#allocation2 + $0x38] sm:$0x3] %v5999_v21  ;;  %v6257_v2 = vld [vmem:[#allocation5] ss:$0 sm:$0xff] }
  0x30   : > { %476 = vperm.xlu0 %5736, %v465_v3   ;;  %v4537_v5 = vld [vmem:[%s6131_s19 + $0x10] sm:$0xff]  ;;  %v531_v6 = vld [vmem:[%s6131_s19 + $0x1] sm:$0xff]  ;;  %453 = vst [vmem:[#allocation2 + $0x40] sm:$0xff] %v5999_v21  ;;  %v5459_v34 = vld [vmem:[%s7240_s3 + $0x38] sm:$0xff]  ;;  %s5451_s13 = sshll.u32 %s7250_s18, 3 }
  0x31   : > { %v4577_v7 = vld [vmem:[%s6131_s19 + $0x22] sm:$0xff]  ;;  %v4539_v10 = vld [vmem:[%s6131_s19 + $0x30] sm:$0xff]  ;;  %454 = vst [vmem:[#allocation2 + $0x48] sm:$0x3] %v5999_v21  ;;  %1368 = vmatpush.bf16.msra.mxu3 %v5459_v34  ;;  %s7176_s22 = scalar_lea.vmem %s7246_s9, %s5451_s13 }
  0x32   : > { %v4569_v8 = vld [vmem:[%s6131_s19 + $0x21] sm:$0xff]  ;;  %v4555_v11 = vld [vmem:[%s6131_s19 + $0x32] sm:$0xff]  ;;  %455 = vst [vmem:[#allocation2 + $0x50] sm:$0xff] %v5999_v21 }
  0x33   : > { %v4561_v9 = vld [vmem:[%s6131_s19 + $0x20] sm:$0xff]  ;;  %v4547_v12 = vld [vmem:[%s6131_s19 + $0x31] sm:$0xff]  ;;  %456 = vst [vmem:[#allocation2 + $0x58] sm:$0x3] %v5999_v21 }
  0x34   : > { %v4563_v13 = vld [vmem:[%s6131_s19 + $0x40] sm:$0xff]  ;;  %v4541_v16 = vld [vmem:[%s6131_s19 + $0x50] sm:$0xff]  ;;  %457 = vst [vmem:[#allocation2 + $0x60] sm:$0xff] %v5999_v21 }
  0x35   : > { %v4579_v14 = vld [vmem:[%s6131_s19 + $0x42] sm:$0xff]  ;;  %v6152_v18 = vld [vmem:[%s6131_s19 + $0x52] sm:$0xff]  ;;  %458 = vst [vmem:[#allocation2 + $0x68] sm:$0x3] %v5999_v21 }
  0x36   : > { %v4571_v15 = vld [vmem:[%s6131_s19 + $0x41] sm:$0xff]  ;;  %v4549_v19 = vld [vmem:[%s6131_s19 + $0x51] sm:$0xff]  ;;  %459 = vst [vmem:[#allocation2 + $0x70] sm:$0xff] %v5999_v21 }
  0x37   : > { %807 = vperm.xlu2 %5738, %v4553_v4   ;;  %675 = vperm.xlu1 %5737, %v4537_v5   ;;  %v6160_v22 = vld [vmem:[%s6131_s19 + $0x60] sm:$0xff]  ;;  %460 = vst [vmem:[#allocation2 + $0x78] sm:$0x3] %v5999_v21  ;;  %v6246_v59 = vld [vmem:[%s6131_s19 + $0x70] sm:$0xff] }
  0x38   : > { %542 = vperm.xlu0 %5736, %v531_v6   ;;  %v6174_v24 = vld [vmem:[%s6131_s19 + $0x62] sm:$0xff]  ;;  %461 = vst [vmem:[#allocation2 + $0x80] sm:$0xff] %v5999_v21 }
  0x39   : > { %v6178_v25 = vld [vmem:[%s6131_s19 + $0x61] sm:$0xff]  ;;  %462 = vst [vmem:[#allocation2 + $0x88] sm:$0x3] %v5999_v21 }
  0x3a   : > { %463 = vst [vmem:[#allocation2 + $0x90] sm:$0xff] %v5999_v21  ;;  %v6239_v54 = vld [vmem:[#allocation3 + $0x6] ss:$0 sm:$0xff]  ;;  %v6243_v57 = vld [vmem:[#allocation3 + $0x7] ss:$0 sm:$0xff] }
  0x3b   : > { %464 = vst [vmem:[#allocation2 + $0x98] sm:$0x3] %v5999_v21  ;;  %v4583_v30 = vld [vmem:[%s6131_s19 + $0x82] sm:$0xff] }
  0x3c   : > { %v4575_v31 = vld [vmem:[%s6131_s19 + $0x81] sm:$0xff] }
  0x3f   : > { %1006 = vperm.xlu2 %5738, %v4577_v7   ;;  %940 = vperm.xlu1 %5737, %v4569_v8  }
  0x40   : > { %874 = vperm.xlu0 %5736, %v4561_v9  }
  0x47   : > { %547 = vperm.xlu2 %5738, %v4545_v1   ;;  %486 = vperm.xlu1 %5737, %v4561_v9  }
  0x48   : > { %481 = vperm.xlu0 %5736, %v4537_v5  }
  0x4f   : > { %618 = vperm.xlu2 %5738, %v4577_v7   ;;  %613 = vperm.xlu1 %5737, %v4553_v4  }
  0x50   : > { %552 = vperm.xlu0 %5736, %v4569_v8  }
  0x57   : > { %746 = vperm.xlu2 %5738, %v4569_v8   ;;  %685 = vperm.xlu1 %5737, %v4539_v10   ;;  %v4559_v8 = vld [vmem:[%s6131_s19 + $0x72] sm:$0xff] }
  0x58   : > { %680 = vperm.xlu0 %5736, %v4561_v9  }
  0x5f   : > { %817 = vperm.xlu2 %5738, %v4555_v11   ;;  %812 = vperm.xlu1 %5737, %v4577_v7  }
  0x60   : > { %751 = vperm.xlu0 %5736, %v4547_v12  }
  0x67   : > { %945 = vperm.xlu2 %5738, %v4547_v12   ;;  %884 = vperm.xlu1 %5737, %v4563_v13  }
  0x68   : > { %879 = vperm.xlu0 %5736, %v4539_v10  }
  0x6f   : > { %1016 = vperm.xlu2 %5738, %v4579_v14   ;;  %1011 = vperm.xlu1 %5737, %v4555_v11  }
  0x70   : > { %950 = vperm.xlu0 %5736, %v4571_v15  }
  0x77   : > { %557 = vperm.xlu2 %5738, %v4547_v12   ;;  %496 = vperm.xlu1 %5737, %v4563_v13  }
  0x78   : > { %491 = vperm.xlu0 %5736, %v4539_v10   ;;  %v4551_v10 = vld [vmem:[%s6131_s19 + $0x71] sm:$0xff] }
  0x7f   : > { %628 = vperm.xlu2 %5738, %v4579_v14   ;;  %623 = vperm.xlu1 %5737, %v4555_v11  }
  0x80   : > { %562 = vperm.xlu0 %5736, %v4571_v15  }
  0x87   : > { %756 = vperm.xlu2 %5738, %v4571_v15   ;;  %695 = vperm.xlu1 %5737, %v4541_v16  }
  0x88   : > { %690 = vperm.xlu0 %5736, %v4563_v13  }
  0x89   : > { %v6149_v17 = vpop.permute.xlu2 %741 }
  0x8a   : > { %v780_v50 = vmul.f32 %v6226_v44, %v6149_v17  ;;  %v1123_v17 = vld [vmem:[#allocation2 + $0x1] sm:$0xff] }
  0x8f   : > { %827 = vperm.xlu2 %5738, %v6152_v18   ;;  %822 = vperm.xlu1 %5737, %v4579_v14  }
  0x90   : > { %761 = vperm.xlu0 %5736, %v4549_v19  }
  0x91   : > { %v6156_v20 = vpop.permute.xlu2 %807 }
  0x92   : > { %v846_v56 = vmul.f32 %v6229_v47, %v6156_v20 }
  0x97   : > { %955 = vperm.xlu2 %5738, %v4549_v19   ;;  %894 = vperm.xlu1 %5737, %v6160_v22  }
  0x98   : > { %889 = vperm.xlu0 %5736, %v4541_v16  }
  0x99   : > { %v6168_v23 = vpop.permute.xlu2 %1006 }
  0x9a   : > { %v1045_v1 = vmul.f32 %v6248_v60, %v6168_v23 }
  0x9f   : > { %1026 = vperm.xlu2 %5738, %v6174_v24   ;;  %1021 = vperm.xlu1 %5737, %v6152_v18  }
  0xa0   : > { %960 = vperm.xlu0 %5736, %v6178_v25  }
  0xa1   : > { %v609_v26 = vpop.permute.xlu1 %608  ;;  %v6187_v27 = vpop.permute.xlu2 %547 }
  0xa2   : > { %v477_v28 = vpop.permute.xlu0 %476  ;;  %v647_v45 = vmul.f32 %v6216_v36, %v609_v26 }
  0xa3   : > { %v515_v41 = vmul.f32 %v6204_v32, %v477_v28 }
  0xa7   : > { %567 = vperm.xlu2 %5738, %v4549_v19   ;;  %506 = vperm.xlu1 %5737, %v6160_v22  }
  0xa8   : > { %501 = vperm.xlu0 %5736, %v4541_v16   ;;  %v6269_v16 = vld [vmem:[%s6131_s19 + $0x80] sm:$0xff] }
  0xa9   : > { %v676_v38 = vpop.permute.xlu1 %675  ;;  %v6220_v39 = vpop.permute.xlu2 %618 }
  0xaa   : > { %v543_v40 = vpop.permute.xlu0 %542  ;;  %v714_v48 = vmul.f32 %v6223_v42, %v676_v38 }
  0xab   : > { %v581_v43 = vmul.f32 %v6218_v37, %v543_v40 }
  0xad   : > { %v589_v46 = vadd.f32 %v581_v43, %v515_v41 }
  0xaf   : > { %v655_v49 = vadd.f32 %v647_v45, %v589_v46  ;;  %638 = vperm.xlu2 %5738, %v6174_v24   ;;  %633 = vperm.xlu1 %5737, %v6152_v18   ;;  %v1245_v18 = vld [vmem:[#allocation2 + $0x2] sm:$0xff] }
  0xb0   : > { %572 = vperm.xlu0 %5736, %v6178_v25  }
  0xb1   : > { %v722_v51 = vadd.f32 %v714_v48, %v655_v49  ;;  %v941_v52 = vpop.permute.xlu1 %940  ;;  %v6237_v53 = vpop.permute.xlu2 %746  ;;  %v5458_v48 = vld [vmem:[%s7240_s3 + $0x30] sm:$0xff] }
  0xb2   : > { %v875_v55 = vpop.permute.xlu0 %874  ;;  %v979_v63 = vmul.f32 %v6243_v57, %v941_v52  ;;  %1369 = vmatpush.bf16.msra.mxu3 %v5458_v48  ;;  %v649_v52 = vmul.f32 %v6216_v36, %v6220_v39 }
  0xb3   : > { %v788_v58 = vadd.f32 %v780_v50, %v722_v51  ;;  %v913_v62 = vmul.f32 %v6239_v54, %v875_v55 }
  0xb5   : > { %v854_v61 = vadd.f32 %v846_v56, %v788_v58  ;;  %v781_v56 = vmul.f32 %v6226_v44, %v6237_v53 }
  0xb7   : > { %v921_v0 = vadd.f32 %v913_v62, %v854_v61  ;;  %766 = vperm.xlu2 %5738, %v6178_v25   ;;  %705 = vperm.xlu1 %5737, %v6246_v59  }
  0xb8   : > { %700 = vperm.xlu0 %5736, %v6160_v22  }
  0xb9   : > { %v987_v3 = vadd.f32 %v979_v63, %v921_v0  ;;  %v6259_v4 = vpop.permute.xlu2 %817  ;;  %v487_v5 = vpop.permute.xlu1 %486 }
  0xba   : > { %v482_v6 = vpop.permute.xlu0 %481  ;;  %v517_v49 = vmul.f32 %v6204_v32, %v487_v5  ;;  %v848_v53 = vmul.f32 %v6229_v47, %v6259_v4 }
  0xbb   : > { %v1053_v7 = vadd.f32 %v1045_v1, %v987_v3  ;;  %v516_v33 = vmul.f32 %v6204_v32, %v482_v6 }
  0xbd   : > { %v1065_v9 = vadd.f32 %v6257_v2, %v1053_v7 }
  0xbf   : > { %vm1073_vm1 = vcmp.ge.f32.partialorder %v1065_v9, 0.0  ;;  %v1081_v11 = vmul.f32 0.01, %v1065_v9  ;;  %837 = vperm.xlu2 %5738, %v4559_v8   ;;  %832 = vperm.xlu1 %5737, %v6174_v24  }
  0xc0   : > { %771 = vperm.xlu0 %5736, %v4551_v10  }
  0xc1   : > { %v1089_v12 = vsel %vm1073_vm1, %v1065_v9, %v1081_v11  ;;  %v6265_v13 = vpop.permute.xlu2 %945  ;;  %v614_v14 = vpop.permute.xlu1 %613 }
  0xc2   : > { %1099 = vst.msk [vmem:[#allocation2 + $0x11] sm:$0xff] %vm1098_vm0, %v1089_v12  ;;  %v553_v15 = vpop.permute.xlu0 %552  ;;  %v648_v35 = vmul.f32 %v6216_v36, %v614_v14  ;;  %v980_v9 = vmul.f32 %v6243_v57, %v6265_v13  ;;  %v4568_v13 = vld [vmem:[%s6131_s19 + $0x90] sm:$0xff] }
  0xc3   : > { %v583_v38 = vmul.f32 %v6218_v37, %v553_v15 }
  0xc5   : > { %v591_v50 = vadd.f32 %v583_v38, %v517_v49 }
  0xc7   : > { %965 = vperm.xlu2 %5738, %v4551_v10   ;;  %904 = vperm.xlu1 %5737, %v6269_v16   ;;  %v657_v61 = vadd.f32 %v649_v52, %v591_v50 }
  0xc8   : > { %899 = vperm.xlu0 %5736, %v6246_v59  }
  0xc9   : > { %v6273_v19 = vpop.permute.xlu2 %1016  ;;  %v686_v20 = vpop.permute.xlu1 %685  ;;  %v6275_v22 = vld [vmem:[#allocation2 + $0x11] sm:$0xff] }
  0xca   : > { %v6277_v23 = vld [vmem:[#allocation2 + $0x10] sm:$0xff]  ;;  %v681_v25 = vpop.permute.xlu0 %680  ;;  %v1131_v26 = vpack.c.bf16 %v6275_v22, %v1123_v17  ;;  %v716_v55 = vmul.f32 %v6223_v42, %v686_v20 }
  0xcb   : > { %v6279_v24 = vld [vmem:[#allocation2 + $0x12] sm:$0xff]  ;;  %v1115_v28 = vpack.c.bf16 %v6277_v23, %v5999_v21  ;;  %v582_v21 = vmul.f32 %v6218_v37, %v6187_v27  ;;  %v715_v45 = vmul.f32 %v6223_v42, %v681_v25 }
  0xcc   : > { %v1253_v29 = vpack.c.bf16 %v6279_v24, %v1245_v18  ;;  %4593 = vmatmul.msk.bf16.vlgmr.msra.gmra.mxu0 %vm1098_vm0, %v1131_v26  ;;  %v724_v39 = vadd.f32 %v716_v55, %v657_v61  ;;  %v4584_v25 = vld [vmem:[%s6131_s19 + $0x92] sm:$0xff] }
  0xcd   : > { %4605 = vmatmul.msk.bf16.vlgmr.msra.gmra.mxu1 %vm1098_vm0, %v1115_v28  ;;  %v590_v43 = vadd.f32 %v582_v21, %v516_v33  ;;  %v4576_v26 = vld [vmem:[%s6131_s19 + $0x91] sm:$0xff]  ;;  %v1047_v28 = vmul.f32 %v6248_v60, %v6273_v19 }
  0xce   : > { %4617 = vmatmul.msk.bf16.vlgmr.msra.gmra.mxu2 %vm1098_vm0, %v1253_v29 }
  0xcf   : > { %1036 = vperm.xlu2 %5738, %v4583_v30   ;;  %1031 = vperm.xlu1 %5737, %v4559_v8   ;;  %v656_v27 = vadd.f32 %v648_v35, %v590_v43 }
  0xd0   : > { %970 = vperm.xlu0 %5736, %v4575_v31  }
  0xd1   : > { %v6298_v40 = vpop.permute.xlu2 %557  ;;  %v813_v41 = vpop.permute.xlu1 %812  ;;  %v723_v51 = vadd.f32 %v715_v45, %v656_v27 }
  0xd2   : > { %v752_v46 = vpop.permute.xlu0 %751  ;;  %v847_v58 = vmul.f32 %v6229_v47, %v813_v41 }
  0xd3   : > { %v782_v62 = vmul.f32 %v6226_v44, %v752_v46  ;;  %v789_v1 = vadd.f32 %v781_v56, %v723_v51 }
  0xd5   : > { %v855_v6 = vadd.f32 %v847_v58, %v789_v1  ;;  %v790_v7 = vadd.f32 %v782_v62, %v724_v39  ;;  %v584_v1 = vmul.f32 %v6218_v37, %v6298_v40 }
  0xd7   : > { %643 = vperm.xlu2 %5738, %v4559_v8   ;;  %577 = vperm.xlu1 %5737, %v4551_v10   ;;  %v856_v10 = vadd.f32 %v848_v53, %v790_v7 }
  0xd8   : > { %511 = vperm.xlu0 %5736, %v6246_v59  }
  0xd9   : > { %v6313_v63 = vpop.permute.xlu2 %628  ;;  %v885_v0 = vpop.permute.xlu1 %884 }
  0xda   : > { %v880_v3 = vpop.permute.xlu0 %879  ;;  %v915_v59 = vmul.f32 %v6239_v54, %v885_v0 }
  0xdb   : > { %v914_v5 = vmul.f32 %v6239_v54, %v880_v3 }
  0xdc   : > { %v923_v17 = vadd.f32 %v915_v59, %v856_v10 }
  0xdd   : > { %v922_v8 = vadd.f32 %v914_v5, %v855_v6 }
  0xdf   : > { %842 = vperm.xlu2 %5738, %v4583_v30   ;;  %776 = vperm.xlu1 %5737, %v4575_v31   ;;  %v988_v12 = vadd.f32 %v980_v9, %v922_v8 }
  0xe0   : > { %710 = vperm.xlu0 %5736, %v6269_v16  }
  0xe1   : > { %v1012_v11 = vpop.permute.xlu1 %1011  ;;  %v757_v18 = vpop.permute.xlu2 %756 }
  0xe2   : > { %v1046_v14 = vmul.f32 %v6248_v60, %v1012_v11  ;;  %v951_v15 = vpop.permute.xlu0 %950 }
  0xe3   : > { %v981_v4 = vmul.f32 %v6243_v57, %v951_v15 }
  0xe4   : > { %v1054_v20 = vadd.f32 %v1046_v14, %v988_v12  ;;  %v651_v12 = vmul.f32 %v6216_v36, %v6313_v63  ;;  %v783_v14 = vmul.f32 %v6226_v44, %v757_v18 }
  0xe5   : > { %v989_v29 = vadd.f32 %v981_v4, %v923_v17 }
  0xe6   : > { %v1066_v16 = vadd.f32 %v6257_v2, %v1054_v20 }
  0xe7   : > { %v1055_v30 = vadd.f32 %v1047_v28, %v989_v29  ;;  %1041 = vperm.xlu2 %5738, %v4584_v25   ;;  %975 = vperm.xlu1 %5737, %v4576_v26   ;;  %v5461_v25 = vld [vmem:[%s7240_s3 + $0x48] sm:$0xff] }
  0xe8   : > { %vm1074_vm2 = vcmp.ge.f32.partialorder %v1066_v16, 0.0  ;;  %v1082_v31 = vmul.f32 0.01, %v1066_v16  ;;  %909 = vperm.xlu0 %5736, %v4568_v13   ;;  %1445 = vmatpush.bf16.msrb.mxu0 %v5461_v25 }
  0xe9   : > { %v1067_v33 = vadd.f32 %v6257_v2, %v1055_v30  ;;  %v497_v34 = vpop.permute.xlu1 %496  ;;  %v828_v41 = vpop.permute.xlu2 %827 }
  0xea   : > { %v1090_v21 = vsel %vm1074_vm2, %v1066_v16, %v1082_v31  ;;  %v492_v35 = vpop.permute.xlu0 %491  ;;  %v519_v59 = vmul.f32 %v6204_v32, %v497_v34  ;;  %v850_v31 = vmul.f32 %v6229_v47, %v828_v41 }
  0xeb   : > { %1100 = vst.msk [vmem:[#allocation2 + $0x21] sm:$0xff] %vm1098_vm0, %v1090_v21  ;;  %vm1075_vm3 = vcmp.ge.f32.partialorder %v1067_v33, 0.0  ;;  %v1083_v38 = vmul.f32 0.01, %v1067_v33  ;;  %v518_v0 = vmul.f32 %v6204_v32, %v492_v35 }
  0xed   : > { %v1091_v19 = vsel %vm1075_vm3, %v1067_v33, %v1083_v38  ;;  %v592_v7 = vadd.f32 %v584_v1, %v518_v0 }
  0xee   : > { %1101 = vst.msk [vmem:[#allocation2 + $0x31] sm:$0xff] %vm1098_vm0, %v1091_v19 }
  0xf1   : > { %v624_v43 = vpop.permute.xlu1 %623  ;;  %v956_v58 = vpop.permute.xlu2 %955 }
  0xf2   : > { %v563_v45 = vpop.permute.xlu0 %562  ;;  %v1323_v46 = vld [vmem:[#allocation2 + $0x20] sm:$0xff]  ;;  %v650_v3 = vmul.f32 %v6216_v36, %v624_v43  ;;  %v982_v34 = vmul.f32 %v6243_v57, %v956_v58 }
  0xf3   : > { %v1330_v48 = vpack.c.bf16 %v1323_v46, %v6277_v23  ;;  %v6334_v49 = vld [vmem:[#allocation2 + $0x21] sm:$0xff]  ;;  %v585_v39 = vmul.f32 %v6218_v37, %v563_v45 }
  0xf4   : > { %v6336_v27 = vld [vmem:[#allocation2 + $0x22] sm:$0xff]  ;;  %v658_v9 = vadd.f32 %v650_v3, %v592_v7 }
  0xf5   : > { %4629 = vmatmul.msk.bf16.vlgmr.msra.gmra.mxu3 %vm1098_vm0, %v1330_v48  ;;  %v6339_v50 = vld [vmem:[#allocation2 + $0x31] sm:$0xff]  ;;  %v593_v10 = vadd.f32 %v585_v39, %v519_v59 }
  0xf6   : > { %v6341_v51 = vld [vmem:[#allocation2 + $0x30] sm:$0xff]  ;;  %v6347_v55 = vpack.c.bf16 %v6339_v50, %v6334_v49 }
  0xf7   : > { %v6343_v52 = vld [vmem:[#allocation2 + $0x32] sm:$0xff]  ;;  %v6350_v56 = vpack.c.bf16 %v6341_v51, %v1323_v46  ;;  %v659_v17 = vadd.f32 %v651_v12, %v593_v10 }
  0xf8   : > { %v6354_v23 = vpack.c.bf16 %v6343_v52, %v6336_v27  ;;  %4594 = vmatmul.msk.bf16.gmra.mxu0 %vm1098_vm0, %v6347_v55 }
  0xf9   : > { %4606 = vmatmul.msk.bf16.gmra.mxu1 %vm1098_vm0, %v6350_v56  ;;  %v696_v61 = vpop.permute.xlu1 %695  ;;  %v1027_v5 = vpop.permute.xlu2 %1026 }
  0xfa   : > { %4618 = vmatmul.msk.bf16.gmra.mxu2 %vm1098_vm0, %v6354_v23  ;;  %v691_v62 = vpop.permute.xlu0 %690  ;;  %v718_v40 = vmul.f32 %v6223_v42, %v696_v61  ;;  %v1049_v61 = vmul.f32 %v6248_v60, %v1027_v5 }
  0xfb   : > { %v717_v8 = vmul.f32 %v6223_v42, %v691_v62 }
  0xfc   : > { %v726_v29 = vadd.f32 %v718_v40, %v659_v17 }
  0xfd   : > { %v725_v11 = vadd.f32 %v717_v8, %v658_v9 }
  0xff   : > { %v791_v26 = vadd.f32 %v783_v14, %v725_v11 }
 0x101   : > { %v823_v6 = vpop.permute.xlu1 %822  ;;  %v568_v13 = vpop.permute.xlu2 %567 }
 0x102   : > { %v762_v53 = vpop.permute.xlu0 %761  ;;  %v849_v15 = vmul.f32 %v6229_v47, %v823_v6 }
 0x103   : > { %v784_v4 = vmul.f32 %v6226_v44, %v762_v53 }
 0x104   : > { %v857_v16 = vadd.f32 %v849_v15, %v791_v26 }
 0x105   : > { %v792_v30 = vadd.f32 %v784_v4, %v726_v29 }
 0x107   : > { %v858_v21 = vadd.f32 %v850_v31, %v792_v30 }
 0x109   : > { %v895_v20 = vpop.permute.xlu1 %894  ;;  %v639_v62 = vpop.permute.xlu2 %638 }
 0x10a   : > { %v890_v28 = vpop.permute.xlu0 %889  ;;  %v917_v33 = vmul.f32 %v6239_v54, %v895_v20 }
 0x10b   : > { %v916_v63 = vmul.f32 %v6239_v54, %v890_v28 }
 0x10c   : > { %v925_v45 = vadd.f32 %v917_v33, %v858_v21 }
 0x10d   : > { %v924_v18 = vadd.f32 %v916_v63, %v857_v16  ;;  %v5460_v63 = vld [vmem:[%s7240_s3 + $0x40] sm:$0xff]  ;;  %v586_v16 = vmul.f32 %v6218_v37, %v568_v13 }
 0x10e   : > { %1446 = vmatpush.bf16.msrb.mxu0 %v5460_v63 }
 0x10f   : > { %v990_v38 = vadd.f32 %v982_v34, %v924_v18 }
 0x111   : > { %v1022_v35 = vpop.permute.xlu1 %1021  ;;  %v767_v5 = vpop.permute.xlu2 %766 }
 0x112   : > { %v1048_v19 = vmul.f32 %v6248_v60, %v1022_v35  ;;  %v961_v43 = vpop.permute.xlu0 %960 }
 0x113   : > { %v983_v46 = vmul.f32 %v6243_v57, %v961_v43 }
 0x114   : > { %v1056_v48 = vadd.f32 %v1048_v19, %v990_v38 }
 0x115   : > { %v991_v0 = vadd.f32 %v983_v46, %v925_v45  ;;  %v653_v46 = vmul.f32 %v6216_v36, %v639_v62 }
 0x116   : > { %v1068_v41 = vadd.f32 %v6257_v2, %v1056_v48  ;;  %v785_v48 = vmul.f32 %v6226_v44, %v767_v5 }
 0x117   : > { %v1057_v1 = vadd.f32 %v1049_v61, %v991_v0 }
 0x118   : > { %vm1076_vm4 = vcmp.ge.f32.partialorder %v1068_v41, 0.0  ;;  %v1084_v3 = vmul.f32 0.01, %v1068_v41 }
 0x119   : > { %v1069_v58 = vadd.f32 %v6257_v2, %v1057_v1  ;;  %v507_v39 = vpop.permute.xlu1 %506  ;;  %v838_v25 = vpop.permute.xlu2 %837 }
 0x11a   : > { %v1092_v6 = vsel %vm1076_vm4, %v1068_v41, %v1084_v3  ;;  %v502_v7 = vpop.permute.xlu0 %501  ;;  %v521_v35 = vmul.f32 %v6204_v32, %v507_v39  ;;  %v852_v62 = vmul.f32 %v6229_v47, %v838_v25 }
 0x11b   : > { %1102 = vst.msk [vmem:[#allocation2 + $0x41] sm:$0xff] %vm1098_vm0, %v1092_v6  ;;  %vm1077_vm5 = vcmp.ge.f32.partialorder %v1069_v58, 0.0  ;;  %v1085_v8 = vmul.f32 0.01, %v1069_v58  ;;  %v520_v29 = vmul.f32 %v6204_v32, %v502_v7 }
 0x11d   : > { %v1093_v53 = vsel %vm1077_vm5, %v1069_v58, %v1085_v8  ;;  %v594_v33 = vadd.f32 %v586_v16, %v520_v29 }
 0x11e   : > { %1103 = vst.msk [vmem:[#allocation2 + $0x51] sm:$0xff] %vm1098_vm0, %v1093_v53 }
 0x121   : > { %v634_v59 = vpop.permute.xlu1 %633  ;;  %v966_v38 = vpop.permute.xlu2 %965 }
 0x122   : > { %v573_v9 = vpop.permute.xlu0 %572  ;;  %v1325_v10 = vld [vmem:[#allocation2 + $0x40] sm:$0xff]  ;;  %v652_v30 = vmul.f32 %v6216_v36, %v634_v59  ;;  %v984_v5 = vmul.f32 %v6243_v57, %v966_v38 }
 0x123   : > { %v1331_v11 = vpack.c.bf16 %v1325_v10, %v6341_v51  ;;  %v6390_v12 = vld [vmem:[#allocation2 + $0x41] sm:$0xff]  ;;  %v587_v18 = vmul.f32 %v6218_v37, %v573_v9 }
 0x124   : > { %v6392_v40 = vld [vmem:[#allocation2 + $0x42] sm:$0xff]  ;;  %v660_v19 = vadd.f32 %v652_v30, %v594_v33 }
 0x125   : > { %4630 = vmatmul.msk.bf16.gmra.mxu3 %vm1098_vm0, %v1331_v11  ;;  %v6395_v14 = vld [vmem:[#allocation2 + $0x51] sm:$0xff]  ;;  %v595_v43 = vadd.f32 %v587_v18, %v521_v35  ;;  %v5464_v33 = vld [vmem:[%s7240_s3 + $0x60] sm:$0xff] }
 0x126   : > { %v6397_v15 = vld [vmem:[#allocation2 + $0x50] sm:$0xff]  ;;  %v6403_v4 = vpack.c.bf16 %v6395_v14, %v6390_v12  ;;  %v5463_v11 = vld [vmem:[%s7240_s3 + $0x58] sm:$0xff] }
 0x127   : > { %v6399_v17 = vld [vmem:[#allocation2 + $0x52] sm:$0xff]  ;;  %v6406_v20 = vpack.c.bf16 %v6397_v15, %v1325_v10  ;;  %v661_v0 = vadd.f32 %v653_v46, %v595_v43  ;;  %v5465_v10 = vld [vmem:[%s7240_s3 + $0x68] sm:$0xff]  ;;  %1522 = vmatpush.bf16.msrb.mxu1 %v5463_v11 }
 0x128   : > { %v6410_v51 = vpack.c.bf16 %v6399_v17, %v6392_v40  ;;  %4595 = vmatmul.msk.bf16.gmra.mxu0 %vm1098_vm0, %v6403_v4  ;;  %1600 = vmatpush.bf16.msrb.mxu2 %v5465_v10 }
 0x129   : > { %4607 = vmatmul.msk.bf16.gmra.mxu1 %vm1098_vm0, %v6406_v20  ;;  %v706_v26 = vpop.permute.xlu1 %705  ;;  %v1037_v8 = vpop.permute.xlu2 %1036 }
 0x12a   : > { %4619 = vmatmul.msk.bf16.gmra.mxu2 %vm1098_vm0, %v6410_v51  ;;  %v701_v28 = vpop.permute.xlu0 %700  ;;  %v720_v13 = vmul.f32 %v6223_v42, %v706_v26 }
 0x12b   : > { %v719_v34 = vmul.f32 %v6223_v42, %v701_v28 }
 0x12c   : > { %v728_v6 = vadd.f32 %v720_v13, %v661_v0  ;;  %1601 = vmatpush.bf16.msrb.mxu2 %v5464_v33  ;;  %v5469_v13 = vld [vmem:[%s7240_s3 + $0x88] sm:$0xff] }
 0x12d   : > { %v727_v45 = vadd.f32 %v719_v34, %v660_v19  ;;  %v1051_v34 = vmul.f32 %v6248_v60, %v1037_v8  ;;  %1754 = vmatpush.bf16.msra.mxu0 %v5469_v13 }
 0x12f   : > { %v793_v3 = vadd.f32 %v785_v48, %v727_v45  ;;  %v5467_v45 = vld [vmem:[%s7240_s3 + $0x78] sm:$0xff] }
 0x130   : > { %1677 = vmatpush.bf16.msrb.mxu3 %v5467_v45 }
 0x131   : > { %v833_v31 = vpop.permute.xlu1 %832  ;;  %v644_v38 = vpop.permute.xlu2 %643 }
 0x132   : > { %v772_v21 = vpop.permute.xlu0 %771  ;;  %v851_v61 = vmul.f32 %v6229_v47, %v833_v31  ;;  %v5462_v31 = vld [vmem:[%s7240_s3 + $0x50] sm:$0xff] }
 0x133   : > { %v786_v41 = vmul.f32 %v6226_v44, %v772_v21  ;;  %1523 = vmatpush.bf16.msrb.mxu1 %v5462_v31 }
 0x134   : > { %v859_v7 = vadd.f32 %v851_v61, %v793_v3 }
 0x135   : > { %v794_v53 = vadd.f32 %v786_v41, %v728_v6 }
 0x137   : > { %v860_v26 = vadd.f32 %v852_v62, %v794_v53 }
 0x139   : > { %v905_v1 = vpop.permute.xlu1 %904 }
 0x13a   : > { %v900_v58 = vpop.permute.xlu0 %899  ;;  %v919_v9 = vmul.f32 %v6239_v54, %v905_v1 }
 0x13b   : > { %v918_v39 = vmul.f32 %v6239_v54, %v900_v58 }
 0x13c   : > { %v927_v25 = vadd.f32 %v919_v9, %v860_v26 }
 0x13d   : > { %v926_v59 = vadd.f32 %v918_v39, %v859_v7  ;;  %v654_v39 = vmul.f32 %v6216_v36, %v644_v38  ;;  %v843_v7 = vpop.permute.xlu2 %842 }
 0x13f   : > { %v992_v29 = vadd.f32 %v984_v5, %v926_v59 }
 0x141   : > { %v1032_v28 = vpop.permute.xlu1 %1031 }
 0x142   : > { %v1050_v63 = vmul.f32 %v6248_v60, %v1032_v28  ;;  %v971_v16 = vpop.permute.xlu0 %970 }
 0x143   : > { %v985_v30 = vmul.f32 %v6243_v57, %v971_v16 }
 0x144   : > { %v1058_v18 = vadd.f32 %v1050_v63, %v992_v29 }
 0x145   : > { %v993_v21 = vadd.f32 %v985_v30, %v927_v25  ;;  %v1042_v31 = vpop.permute.xlu2 %1041 }
 0x146   : > { %v1070_v35 = vadd.f32 %v6257_v2, %v1058_v18 }
 0x147   : > { %v1059_v19 = vadd.f32 %v1051_v34, %v993_v21  ;;  %v5466_v21 = vld [vmem:[%s7240_s3 + $0x70] sm:$0xff] }
 0x148   : > { %vm1078_vm6 = vcmp.ge.f32.partialorder %v1070_v35, 0.0  ;;  %v1086_v43 = vmul.f32 0.01, %v1070_v35  ;;  %1678 = vmatpush.bf16.msrb.mxu3 %v5466_v21  ;;  %v5473_v21 = vld [vmem:[#allocation8 + $0x18] sm:$0xff] }
 0x149   : > { %v1071_v46 = vadd.f32 %v6257_v2, %v1059_v19  ;;  %v578_v61 = vpop.permute.xlu1 %577  ;;  %1975 = vmatpush.bf16.msra.mxu2 %v5473_v21 }
 0x14a   : > { %v1094_v48 = vsel %vm1078_vm6, %v1070_v35, %v1086_v43  ;;  %v512_v0 = vpop.permute.xlu0 %511  ;;  %v588_v1 = vmul.f32 %v6218_v37, %v578_v61  ;;  %v1052_v35 = vmul.f32 %v6248_v60, %v1042_v31  ;;  %v5468_v60 = vld [vmem:[%s7240_s3 + $0x80] sm:$0xff]  ;;  %v6534_v61 = vpop.f32.mrf.mxu1 }
 0x14b   : > { %1104 = vst.msk [vmem:[#allocation2 + $0x61] sm:$0xff] %vm1098_vm0, %v1094_v48  ;;  %vm1079_vm7 = vcmp.ge.f32.partialorder %v1071_v46, 0.0  ;;  %v1087_v41 = vmul.f32 0.01, %v1071_v46  ;;  %v522_v3 = vmul.f32 %v6204_v32, %v512_v0  ;;  %1755 = vmatpush.bf16.msra.mxu0 %v5468_v60  ;;  %v5485_v60 = vld [vmem:[#allocation8 + $0x78] sm:$0xff] }
 0x14d   : > { %v1095_v58 = vsel %vm1079_vm7, %v1071_v46, %v1087_v41  ;;  %v596_v6 = vadd.f32 %v588_v1, %v522_v3 }
 0x14e   : > { %1105 = vst.msk [vmem:[#allocation2 + $0x71] sm:$0xff] %vm1098_vm0, %v1095_v58  ;;  %v6550_v58 = vld [vmem:[#allocation2 + $0x92] sm:$0xff] }
 0x14f   : > { %v662_v62 = vadd.f32 %v654_v39, %v596_v6 }
 0x151   : > { %v777_v8 = vpop.permute.xlu1 %776 }
 0x152   : > { %v711_v53 = vpop.permute.xlu0 %710  ;;  %v1327_v59 = vld [vmem:[#allocation2 + $0x60] sm:$0xff]  ;;  %v787_v32 = vmul.f32 %v6226_v44, %v777_v8  ;;  %v6544_v1 = vpop.f32.mrf.mxu1  ;;  %v5477_v8 = vld [vmem:[#allocation8 + $0x38] sm:$0xff] }
 0x153   : > { %v721_v9 = vmul.f32 %v6223_v42, %v711_v53  ;;  %v1332_v5 = vpack.c.bf16 %v1327_v59, %v6397_v15  ;;  %v1129_v10 = vld [vmem:[#allocation2 + $0x61] sm:$0xff]  ;;  %v853_v42 = vmul.f32 %v6229_v47, %v843_v7  ;;  %1910 = vmatpush.bf16.msra.mxu1 %v5477_v8  ;;  %v5482_v8 = vld [vmem:[#allocation8 + $0x60] sm:$0xff] }
 0x154   : > { %v1251_v37 = vld [vmem:[#allocation2 + $0x62] sm:$0xff] }
 0x155   : > { %v729_v11 = vadd.f32 %v721_v9, %v662_v62  ;;  %4631 = vmatmul.msk.bf16.gmra.mxu3 %vm1098_vm0, %v1332_v5  ;;  %v1130_v26 = vld [vmem:[#allocation2 + $0x71] sm:$0xff] }
 0x156   : > { %v1114_v28 = vld [vmem:[#allocation2 + $0x70] sm:$0xff]  ;;  %v1134_v36 = vpack.c.bf16 %v1130_v26, %v1129_v10 }
 0x157   : > { %v1252_v29 = vld [vmem:[#allocation2 + $0x72] sm:$0xff]  ;;  %v1118_v63 = vpack.c.bf16 %v1114_v28, %v1327_v59  ;;  %v795_v25 = vadd.f32 %v787_v32, %v729_v11  ;;  %v5476_v32 = vld [vmem:[#allocation8 + $0x30] sm:$0xff] }
 0x158   : > { %v6468_v16 = vpack.c.bf16 %v1252_v29, %v1251_v37  ;;  %4596 = vmatmul.msk.bf16.gmra.mxu0 %vm1098_vm0, %v1134_v36  ;;  %1911 = vmatpush.bf16.msra.mxu1 %v5476_v32 }
 0x159   : > { %4608 = vmatmul.msk.bf16.gmra.mxu1 %vm1098_vm0, %v1118_v63  ;;  %v976_v44 = vpop.permute.xlu1 %975  ;;  %v861_v30 = vadd.f32 %v853_v42, %v795_v25  ;;  %v5475_v42 = vld [vmem:[#allocation8 + $0x28] sm:$0xff] }
 0x15a   : > { %4620 = vmatmul.msk.bf16.gmra.mxu2 %vm1098_vm0, %v6468_v16  ;;  %v910_v15 = vpop.permute.xlu0 %909  ;;  %v986_v33 = vmul.f32 %v6243_v57, %v976_v44  ;;  %v1484_v57 = vpack.c.bf16 %v6336_v27, %v6279_v24  ;;  %v1408_v24 = vpack.c.bf16 %v6390_v12, %v6339_v50  ;;  %v1409_v27 = vpack.c.bf16 %v1129_v10, %v6395_v14 }
 0x15b   : > { %v920_v18 = vmul.f32 %v6239_v54, %v910_v15  ;;  %v1407_v54 = vpack.c.bf16 %v6334_v49, %v6275_v22  ;;  %v1485_v49 = vpack.c.bf16 %v6392_v40, %v6343_v52 }
 0x15c   : > { %1912 = vmatpush.bf16.msra.mxu1 %v5475_v42 }
 0x15d   : > { %v928_v34 = vadd.f32 %v920_v18, %v861_v30 }
 0x15f   : > { %v994_v38 = vadd.f32 %v986_v33, %v928_v34 }
 0x161   : > { %v1060_v47 = vadd.f32 %v1052_v35, %v994_v38  ;;  %v5481_v35 = vld [vmem:[#allocation8 + $0x58] sm:$0xff] }
 0x162   : > { %2060 = vmatpush.bf16.msra.mxu3 %v5481_v35  ;;  %v5489_v35 = vld [vmem:[#allocation8 + $0x98] sm:$0xff] }
 0x163   : > { %v1072_v19 = vadd.f32 %v6257_v2, %v1060_v47  ;;  %v5472_v47 = vld [vmem:[#allocation8 + $0x10] sm:$0xff] }
 0x164   : > { %1976 = vmatpush.bf16.msra.mxu2 %v5472_v47 }
 0x165   : > { %vm1080_vm8 = vcmp.ge.f32.partialorder %v1072_v19, 0.0  ;;  %v1088_v43 = vmul.f32 0.01, %v1072_v19 }
 0x167   : > { %v1096_v45 = vsel %vm1080_vm8, %v1072_v19, %v1088_v43  ;;  %v5480_v19 = vld [vmem:[#allocation8 + $0x50] sm:$0xff] }
 0x168   : > { %1106 = vst.msk [vmem:[#allocation2 + $0x81] sm:$0xff] %vm1098_vm0, %v1096_v45  ;;  %4641 = vmatmul.msk.bf16.vlgmr.msrb.gmra.mxu0 %vm1098_vm0, %v1407_v54  ;;  %v5474_v54 = vld [vmem:[#allocation8 + $0x20] sm:$0xff]  ;;  %2061 = vmatpush.bf16.msra.mxu3 %v5480_v19  ;;  %v5479_v45 = vld [vmem:[#allocation8 + $0x48] sm:$0xff] }
 0x169   : > { %4653 = vmatmul.msk.bf16.vlgmr.msrb.gmra.mxu1 %vm1098_vm0, %v1484_v57  ;;  %v5471_v57 = vld [vmem:[#allocation8 + $0x8] sm:$0xff]  ;;  %2153 = vmatpush.bf16.msrb.mxu0 %v5485_v60 }
 0x16a   : > { %4665 = vmatmul.msk.bf16.vlgmr.msrb.gmra.mxu2 %vm1098_vm0, %v6350_v56  ;;  %v1486_v56 = vpack.c.bf16 %v1251_v37, %v6399_v17  ;;  %v6522_v17 = vld [vmem:[#allocation2 + $0x91] sm:$0xff]  ;;  %1913 = vmatpush.bf16.msra.mxu1 %v5474_v54 }
 0x16b   : > { %1977 = vmatpush.bf16.msra.mxu2 %v5471_v57 }
 0x16c   : > { %2062 = vmatpush.bf16.msra.mxu3 %v5479_v45  ;;  %v6614_v45 = vld [vmem:[#allocation7] ss:$0 sm:$0xff] }
 0x16e   : > { %2246 = vmatpush.bf16.msrb.mxu1 %v5489_v35  ;;  %v1850_v35 = vld [vmem:[#allocation2 + $0x1] sm:$0xff] }
 0x16f   : > { %v1329_v2 = vld [vmem:[#allocation2 + $0x80] sm:$0xff] }
 0x170   : > { %v1333_v22 = vpack.c.bf16 %v1329_v2, %v1114_v28  ;;  %v1406_v50 = vld [vmem:[#allocation2 + $0x81] sm:$0xff] }
 0x171   : > { %v1483_v52 = vld [vmem:[#allocation2 + $0x82] sm:$0xff]  ;;  %v1410_v12 = vpack.c.bf16 %v1406_v50, %v1130_v26 }
 0x172   : > { %4632 = vmatmul.msk.bf16.gmra.mxu3 %vm1098_vm0, %v1333_v22  ;;  %v1487_v40 = vpack.c.bf16 %v1483_v52, %v1252_v29  ;;  %v1719_v39 = vpack.c.bf16 %v6550_v58, %v1483_v52 }
 0x176   : > { %v6555_v7 = vpop.f32.mrf.mxu1 }
 0x178   : > { %4642 = vmatmul.msk.bf16.gmra.mxu0 %vm1098_vm0, %v1408_v24  ;;  %v6540_v0 = vpop.f32.mrf.mxu3 }
 0x179   : > { %4654 = vmatmul.msk.bf16.gmra.mxu1 %vm1098_vm0, %v1485_v49  ;;  %v5470_v49 = vld [vmem:[#allocation8] sm:$0xff] }
 0x17a   : > { %4666 = vmatmul.msk.bf16.gmra.mxu2 %vm1098_vm0, %v6406_v20  ;;  %v1565_v20 = vpack.c.bf16 0.0, %v1329_v2 }
 0x17b   : > { %1978 = vmatpush.bf16.msra.mxu2 %v5470_v49 }
 0x17e   : > { %v6564_v9 = vpop.f32.mrf.mxu1 }
 0x182   : > { %4677 = vmatmul.msk.bf16.vlgmr.msrb.gmra.mxu3 %vm1098_vm0, %v6347_v55  ;;  %v6515_v55 = vpop.f32.mrf.mxu0 }
 0x183   : > { %v1226_v52 = vadd.f32 %v6534_v61, %v6515_v55 }
 0x188   : > { %4643 = vmatmul.msk.bf16.gmra.mxu0 %vm1098_vm0, %v1409_v27  ;;  %v5478_v27 = vld [vmem:[#allocation8 + $0x40] sm:$0xff] }
 0x189   : > { %4655 = vmatmul.msk.bf16.gmra.mxu1 %vm1098_vm0, %v1486_v56  ;;  %v5484_v56 = vld [vmem:[#allocation8 + $0x70] sm:$0xff]  ;;  %2063 = vmatpush.bf16.msra.mxu3 %v5478_v27 }
 0x18a   : > { %4667 = vmatmul.msk.bf16.gmra.mxu2 %vm1098_vm0, %v1118_v63  ;;  %v6520_v14 = vpop.f32.mrf.mxu0  ;;  %2154 = vmatpush.bf16.msrb.mxu0 %v5484_v56 }
 0x18b   : > { %v1228_v47 = vadd.f32 %v6544_v1, %v6520_v14 }
 0x192   : > { %4678 = vmatmul.msk.bf16.gmra.mxu3 %vm1098_vm0, %v6403_v4  ;;  %v1642_v4 = vpack.c.bf16 %v6522_v17, %v1406_v50  ;;  %v6525_v46 = vpop.f32.mrf.mxu0 }
 0x198   : > { %4644 = vmatmul.msk.bf16.gmra.mxu0 %vm1098_vm0, %v1410_v12  ;;  %v5483_v12 = vld [vmem:[#allocation8 + $0x68] sm:$0xff] }
 0x199   : > { %4656 = vmatmul.msk.bf16.gmra.mxu1 %vm1098_vm0, %v1487_v40  ;;  %2155 = vmatpush.bf16.msrb.mxu0 %v5483_v12 }
 0x19a   : > { %4668 = vmatmul.msk.bf16.gmra.mxu2 %vm1098_vm0, %v1565_v20  ;;  %v6530_v13 = vpop.f32.mrf.mxu0 }
 0x19d   : > { %2156 = vmatpush.bf16.msrb.mxu0 %v5482_v8 }
 0x1a2   : > { %4679 = vmatmul.msk.bf16.gmra.mxu3 %vm1098_vm0, %v1134_v36 }
 0x1a5   : > { %v6532_v48 = vpop.f32.mrf.mxu0 }
 0x1a6   : > { %v6570_v11 = vpop.f32.mrf.mxu1 }
 0x1a8   : > { %4689 = vmatmul.msk.bf16.vlgmr.msra.gmra.mxu0 %vm1098_vm0, %v6354_v23  ;;  %v6536_v23 = vpop.f32.mrf.mxu2 }
 0x1a9   : > { %v1314_v40 = vadd.f32 %v6536_v23, %v1226_v52 }
 0x1ab   : > { %v1391_v20 = vadd.f32 %v6540_v0, %v1314_v40 }
 0x1ad   : > { %v6542_v41 = vpop.f32.mrf.mxu0 }
 0x1ae   : > { %v6576_v36 = vpop.f32.mrf.mxu1 }
 0x1b0   : > { %v6546_v3 = vpop.f32.mrf.mxu2 }
 0x1b1   : > { %v1315_v55 = vadd.f32 %v6546_v3, %v1228_v47  ;;  %v2000_v47 = vld [vmem:[#allocation2 + $0x2] sm:$0xff] }
 0x1b2   : > { %4680 = vmatmul.msk.bf16.gmra.mxu3 %vm1098_vm0, %v1642_v4 }
 0x1b8   : > { %4690 = vmatmul.msk.bf16.gmra.mxu0 %vm1098_vm0, %v6410_v51  ;;  %v6548_v51 = vpop.f32.mrf.mxu3  ;;  %v6558_v53 = vpop.f32.mrf.mxu2 }
 0x1b9   : > { %v1392_v23 = vadd.f32 %v6548_v51, %v1315_v55 }
 0x1c0   : > { %v6560_v59 = vpop.f32.mrf.mxu3  ;;  %v6566_v5 = vpop.f32.mrf.mxu2 }
 0x1c8   : > { %4691 = vmatmul.msk.bf16.gmra.mxu0 %vm1098_vm0, %v6468_v16  ;;  %v6568_v10 = vpop.f32.mrf.mxu3  ;;  %v6572_v26 = vpop.f32.mrf.mxu2 }
 0x1d0   : > { %v6578_v63 = vpop.f32.mrf.mxu2 }
 0x1d5   : > { %v6552_v6 = vpop.f32.mrf.mxu0 }
 0x1d6   : > { %v6584_v44 = vpop.f32.mrf.mxu1 }
 0x1d8   : > { %4692 = vmatmul.msk.bf16.gmra.mxu0 %vm1098_vm0, %v1719_v39  ;;  %v6574_v28 = vpop.f32.mrf.mxu3 }
 0x1dd   : > { %v6562_v62 = vpop.f32.mrf.mxu0  ;;  %v6586_v15 = vpop.f32.mrf.mxu2 }
 0x1de   : > { %v6594_v33 = vpop.f32.mrf.mxu1 }
 0x1e0   : > { %v6582_v25 = vpop.f32.mrf.mxu3 }
 0x1e5   : > { %v1448_v37 = vpop.f32.mrf.mxu0  ;;  %v6596_v34 = vpop.f32.mrf.mxu2 }
 0x1e6   : > { %v1525_v2 = vpop.f32.mrf.mxu1  ;;  %v1468_v32 = vadd.f32 %v1448_v37, %v1391_v20  ;;  %v1231_v37 = vadd.f32 %v6555_v7, %v6525_v46  ;;  %v5488_v7 = vld [vmem:[#allocation8 + $0x90] sm:$0xff] }
 0x1e7   : > { %2247 = vmatpush.bf16.msrb.mxu1 %v5488_v7 }
 0x1e8   : > { %v1545_v61 = vadd.f32 %v1525_v2, %v1468_v32  ;;  %v1316_v14 = vadd.f32 %v6558_v53, %v1231_v37  ;;  %v1233_v53 = vadd.f32 %v6564_v9, %v6530_v13 }
 0x1ea   : > { %v1393_v51 = vadd.f32 %v6560_v59, %v1316_v14  ;;  %v1317_v59 = vadd.f32 %v6566_v5, %v1233_v53 }
 0x1ed   : > { %v1450_v29 = vpop.f32.mrf.mxu0  ;;  %v1603_v22 = vpop.f32.mrf.mxu2 }
 0x1ee   : > { %v1527_v4 = vpop.f32.mrf.mxu1  ;;  %v1623_v0 = vadd.f32 %v1603_v22, %v1545_v61  ;;  %v1469_v19 = vadd.f32 %v1450_v29, %v1392_v23 }
 0x1f0   : > { %v1546_v56 = vadd.f32 %v1527_v4, %v1469_v19 }
 0x1f5   : > { %v6580_v16 = vpop.f32.mrf.mxu0  ;;  %v6590_v18 = vpop.f32.mrf.mxu3 }
 0x1f6   : > { %v1605_v39 = vpop.f32.mrf.mxu2  ;;  %v1530_v54 = vpop.f32.mrf.mxu1  ;;  %v1470_v22 = vadd.f32 %v6580_v16, %v1393_v51  ;;  %v1394_v16 = vadd.f32 %v6568_v10, %v1317_v59  ;;  %v6635_v10 = vld [vmem:[#allocation2] sm:$0xff] }
 0x1f7   : > { %v1624_v2 = vadd.f32 %v1605_v39, %v1546_v56 }
 0x1f8   : > { %v1547_v4 = vadd.f32 %v1530_v54, %v1470_v22 }
 0x1fd   : > { %v6588_v30 = vpop.f32.mrf.mxu0  ;;  %v6598_v38 = vpop.f32.mrf.mxu3 }
 0x1fe   : > { %v1608_v60 = vpop.f32.mrf.mxu2  ;;  %v1532_v12 = vpop.f32.mrf.mxu1  ;;  %v1471_v55 = vadd.f32 %v6588_v30, %v1394_v16  ;;  %v1236_v30 = vadd.f32 %v6570_v11, %v6532_v48 }
 0x1ff   : > { %v1625_v32 = vadd.f32 %v1608_v60, %v1547_v4 }
 0x200   : > { %v1318_v60 = vadd.f32 %v6572_v26, %v1236_v30  ;;  %v5486_v30 = vld [vmem:[#allocation8 + $0x80] sm:$0xff] }
 0x202   : > { %v1395_v56 = vadd.f32 %v6574_v28, %v1318_v60 }
 0x205   : > { %v6592_v31 = vpop.f32.mrf.mxu0  ;;  %v1680_v24 = vpop.f32.mrf.mxu3 }
 0x206   : > { %v1700_v57 = vadd.f32 %v1680_v24, %v1623_v0  ;;  %v1610_v20 = vpop.f32.mrf.mxu2  ;;  %v1472_v11 = vadd.f32 %v6592_v31, %v1395_v56 }
 0x20d   : > { %v6600_v43 = vpop.f32.mrf.mxu0  ;;  %v1682_v42 = vpop.f32.mrf.mxu3 }
 0x20e   : > { %v1701_v24 = vadd.f32 %v1682_v42, %v1624_v2 }
 0x215   : > { %v6602_v50 = vpop.f32.mrf.mxu0  ;;  %v1685_v1 = vpop.f32.mrf.mxu3 }
 0x216   : > { %v1702_v13 = vadd.f32 %v1685_v1, %v1625_v32  ;;  %v1613_v1 = vpop.f32.mrf.mxu2 }
 0x21d   : > { %v6608_v21 = vpop.f32.mrf.mxu0  ;;  %v1687_v8 = vpop.f32.mrf.mxu3 }
 0x21e   : > { %v1615_v4 = vpop.f32.mrf.mxu2 }
 0x225   : > { %v1757_v49 = vpop.f32.mrf.mxu0  ;;  %v1690_v48 = vpop.f32.mrf.mxu3 }
 0x226   : > { %v1777_v27 = vadd.f32 %v1757_v49, %v1700_v57  ;;  %v1548_v49 = vadd.f32 %v1532_v12, %v1471_v55 }
 0x228   : > { %v1789_v3 = vadd.f32 %v6614_v45, %v1777_v27  ;;  %v1535_v27 = vpop.f32.mrf.mxu1 }
 0x229   : > { %v1549_v53 = vadd.f32 %v1535_v27, %v1472_v11 }
 0x22a   : > { %vm1797_vm9 = vcmp.ge.f32.partialorder %v1789_v3, 0.0  ;;  %v1805_v29 = vmul.f32 0.01, %v1789_v3 }
 0x22c   : > { %v1813_v52 = vsel %vm1797_vm9, %v1789_v3, %v1805_v29  ;;  %v1626_v3 = vadd.f32 %v1610_v20, %v1548_v49 }
 0x22d   : > { %1822 = vst.msk [vmem:[#allocation2 + $0x11] sm:$0xff] %vm1821_vm10, %v1813_v52  ;;  %v1759_v46 = vpop.f32.mrf.mxu0  ;;  %v5487_v52 = vld [vmem:[#allocation8 + $0x88] sm:$0xff] }
 0x22e   : > { %v1778_v40 = vadd.f32 %v1759_v46, %v1701_v24  ;;  %v1703_v2 = vadd.f32 %v1687_v8, %v1626_v3  ;;  %v1238_v46 = vadd.f32 %v6576_v36, %v6542_v41  ;;  %2248 = vmatpush.bf16.msrb.mxu1 %v5487_v52  ;;  %v1618_v3 = vpop.f32.mrf.mxu2 }
 0x230   : > { %v1790_v39 = vadd.f32 %v6614_v45, %v1778_v40  ;;  %v1319_v28 = vadd.f32 %v6578_v63, %v1238_v46  ;;  %v1627_v40 = vadd.f32 %v1613_v1, %v1549_v53  ;;  %v1537_v20 = vpop.f32.mrf.mxu1  ;;  %v5490_v46 = vld [vmem:[#allocation8 + $0xa0] sm:$0xff] }
 0x232   : > { %vm1798_vm11 = vcmp.ge.f32.partialorder %v1790_v39, 0.0  ;;  %v1806_v42 = vmul.f32 0.01, %v1790_v39  ;;  %v1396_v12 = vadd.f32 %v6582_v25, %v1319_v28  ;;  %v1704_v36 = vadd.f32 %v1690_v48, %v1627_v40  ;;  %2249 = vmatpush.bf16.msrb.mxu1 %v5486_v30  ;;  %v5498_v30 = vld [vmem:[#allocation8 + $0xe0] sm:$0xff] }
 0x234   : > { %v1814_v9 = vsel %vm1798_vm11, %v1790_v39, %v1806_v42  ;;  %v6629_v61 = vld [vmem:[#allocation2 + $0x11] sm:$0xff]  ;;  %v1473_v41 = vadd.f32 %v6600_v43, %v1396_v12 }
 0x235   : > { %v1831_v23 = vld [vmem:[#allocation2 + $0x10] sm:$0xff]  ;;  %1823 = vst.msk [vmem:[#allocation2 + $0x21] sm:$0xff] %vm1821_vm10, %v1814_v9  ;;  %v1762_v5 = vpop.f32.mrf.mxu0  ;;  %v1858_v19 = vpack.c.bf16 %v6629_v61, %v1850_v35  ;;  %v1692_v35 = vpop.f32.mrf.mxu3 }
 0x236   : > { %v6631_v0 = vld [vmem:[#allocation2 + $0x12] sm:$0xff]  ;;  %v1838_v54 = vpack.c.bf16 %v1831_v23, %v6635_v10  ;;  %v1779_v37 = vadd.f32 %v1762_v5, %v1702_v13  ;;  %v1241_v13 = vadd.f32 %v6584_v44, %v6552_v6  ;;  %v5492_v6 = vld [vmem:[#allocation8 + $0xb0] sm:$0xff] }
 0x237   : > { %v2008_v57 = vpack.c.bf16 %v6631_v0, %v2000_v47  ;;  %4709 = vmatmul.msk.bf16.vlgmr.msra.gmra.mxu1 %vm1821_vm10, %v1858_v19  ;;  %v5497_v5 = vld [vmem:[#allocation8 + $0xd8] sm:$0xff]  ;;  %v5496_v44 = vld [vmem:[#allocation8 + $0xd0] sm:$0xff] }
 0x238   : > { %4729 = vmatmul.msk.bf16.vlgmr.msra.gmra.mxu2 %vm1821_vm10, %v1838_v54  ;;  %v1791_v14 = vadd.f32 %v6614_v45, %v1779_v37  ;;  %v1320_v19 = vadd.f32 %v6586_v15, %v1241_v13  ;;  %v1550_v54 = vadd.f32 %v1537_v20, %v1473_v41  ;;  %2432 = vmatpush.bf16.msrb.mxu3 %v5497_v5  ;;  %v1540_v15 = vpop.f32.mrf.mxu1  ;;  %v5499_v13 = vld [vmem:[#allocation8 + $0xe8] sm:$0xff]  ;;  %v5505_v5 = vld [vmem:[#allocation8 + $0x118] sm:$0xff] }
 0x239   : > { %4749 = vmatmul.msk.bf16.vlgmr.msra.gmra.mxu3 %vm1821_vm10, %v2008_v57  ;;  %2618 = vmatpush.bf16.msra.mxu1 %v5505_v5 }
 0x23a   : > { %vm1799_vm12 = vcmp.ge.f32.partialorder %v1791_v14, 0.0  ;;  %v1807_v51 = vmul.f32 0.01, %v1791_v14  ;;  %v1397_v37 = vadd.f32 %v6590_v18, %v1320_v19  ;;  %v1628_v60 = vadd.f32 %v1615_v4, %v1550_v54 }
 0x23b   : > { %v1243_v18 = vadd.f32 %v6594_v33, %v6562_v62  ;;  %v5500_v33 = vld [vmem:[#allocation8 + $0xf0] sm:$0xff] }
 0x23c   : > { %v1815_v29 = vsel %vm1799_vm12, %v1791_v14, %v1807_v51  ;;  %v2094_v22 = vld [vmem:[#allocation2 + $0x20] sm:$0xff]  ;;  %v1474_v27 = vadd.f32 %v6602_v50, %v1397_v37  ;;  %v1705_v14 = vadd.f32 %v1692_v35, %v1628_v60  ;;  %2433 = vmatpush.bf16.msrb.mxu3 %v5496_v44 }
 0x23d   : > { %1824 = vst.msk [vmem:[#allocation2 + $0x31] sm:$0xff] %vm1821_vm10, %v1815_v29  ;;  %v1764_v26 = vpop.f32.mrf.mxu0  ;;  %v2101_v24 = vpack.c.bf16 %v2094_v22, %v1831_v23  ;;  %v6655_v39 = vld [vmem:[#allocation2 + $0x21] sm:$0xff]  ;;  %v5493_v23 = vld [vmem:[#allocation8 + $0xb8] sm:$0xff] }
 0x23e   : > { %v1780_v7 = vadd.f32 %v1764_v26, %v1703_v2  ;;  %v6657_v8 = vld [vmem:[#allocation2 + $0x22] sm:$0xff]  ;;  %2339 = vmatpush.bf16.msrb.mxu2 %v5493_v23  ;;  %v1695_v2 = vpop.f32.mrf.mxu3  ;;  %v1321_v26 = vadd.f32 %v6596_v34, %v1243_v18 }
 0x23f   : > { %4769 = vmatmul.msk.bf16.vlgmr.msrb.gmra.mxu0 %vm1821_vm10, %v2101_v24  ;;  %v5491_v29 = vld [vmem:[#allocation8 + $0xa8] sm:$0xff]  ;;  %v1551_v24 = vadd.f32 %v1540_v15, %v1474_v27 }
 0x240   : > { %v1792_v31 = vadd.f32 %v6614_v45, %v1780_v7  ;;  %v5495_v50 = vld [vmem:[#allocation8 + $0xc8] sm:$0xff]  ;;  %v5494_v7 = vld [vmem:[#allocation8 + $0xc0] sm:$0xff]  ;;  %v1398_v28 = vadd.f32 %v6598_v38, %v1321_v26  ;;  %v1542_v35 = vpop.f32.mrf.mxu1  ;;  %v2194_v26 = vpack.c.bf16 %v6655_v39, %v6629_v61 }
 0x241   : > { %2434 = vmatpush.bf16.msrb.mxu3 %v5495_v50  ;;  %v1629_v53 = vadd.f32 %v1618_v3, %v1551_v24  ;;  %v2287_v24 = vpack.c.bf16 %v6657_v8, %v6631_v0  ;;  %v5502_v0 = vld [vmem:[#allocation8 + $0x100] sm:$0xff] }
 0x242   : > { %vm1800_vm13 = vcmp.ge.f32.partialorder %v1792_v31, 0.0  ;;  %v1808_v59 = vmul.f32 0.01, %v1792_v31  ;;  %2340 = vmatpush.bf16.msrb.mxu2 %v5492_v6  ;;  %v1475_v34 = vadd.f32 %v6608_v21, %v1398_v28 }
 0x243   : > { %v1706_v40 = vadd.f32 %v1695_v2, %v1629_v53 }
 0x244   : > { %v1816_v16 = vsel %vm1800_vm13, %v1792_v31, %v1808_v59  ;;  %v6660_v32 = vld [vmem:[#allocation2 + $0x31] sm:$0xff] }
 0x245   : > { %v1833_v63 = vld [vmem:[#allocation2 + $0x30] sm:$0xff]  ;;  %1825 = vst.msk [vmem:[#allocation2 + $0x41] sm:$0xff] %vm1821_vm10, %v1816_v16  ;;  %v1767_v25 = vpop.f32.mrf.mxu0  ;;  %v6667_v47 = vpack.c.bf16 %v6660_v32, %v6655_v39  ;;  %2435 = vmatpush.bf16.msrb.mxu3 %v5494_v7 }
 0x246   : > { %v6662_v42 = vld [vmem:[#allocation2 + $0x32] sm:$0xff]  ;;  %v6669_v55 = vpack.c.bf16 %v1833_v63, %v2094_v22  ;;  %v1781_v9 = vadd.f32 %v1767_v25, %v1704_v36  ;;  %2341 = vmatpush.bf16.msrb.mxu2 %v5491_v29  ;;  %v1620_v25 = vpop.f32.mrf.mxu2  ;;  %v1697_v19 = vpop.f32.mrf.mxu3 }
 0x247   : > { %v6673_v43 = vpack.c.bf16 %v6662_v42, %v6657_v8  ;;  %4710 = vmatmul.msk.bf16.gmra.mxu1 %vm1821_vm10, %v6667_v47  ;;  %v5501_v22 = vld [vmem:[#allocation8 + $0xf8] sm:$0xff] }
 0x248   : > { %4730 = vmatmul.msk.bf16.gmra.mxu2 %vm1821_vm10, %v6669_v55  ;;  %v1793_v57 = vadd.f32 %v6614_v45, %v1781_v9  ;;  %2525 = vmatpush.bf16.msra.mxu0 %v5501_v22  ;;  %v1552_v9 = vadd.f32 %v1542_v35, %v1475_v34  ;;  %v5537_v35 = vld [vmem:[#allocation11 + $0xf4] sm:$0xf0] }
 0x249   : > { %4750 = vmatmul.msk.bf16.gmra.mxu3 %vm1821_vm10, %v6673_v43 }
 0x24a   : > { %vm1801_vm14 = vcmp.ge.f32.partialorder %v1793_v57, 0.0  ;;  %v1809_v49 = vmul.f32 0.01, %v1793_v57  ;;  %2342 = vmatpush.bf16.msrb.mxu2 %v5490_v46  ;;  %v1630_v54 = vadd.f32 %v1620_v25, %v1552_v9  ;;  %v5536_v25 = vld [vmem:[#allocation11 + $0xf4] sm:$0xf] }
 0x24c   : > { %v1817_v1 = vsel %vm1801_vm14, %v1793_v57, %v1809_v49  ;;  %v2096_v56 = vld [vmem:[#allocation2 + $0x40] sm:$0xff]  ;;  %2526 = vmatpush.bf16.msra.mxu0 %v5500_v33  ;;  %v1707_v6 = vadd.f32 %v1697_v19, %v1630_v54 }
 0x24d   : > { %1826 = vst.msk [vmem:[#allocation2 + $0x51] sm:$0xff] %vm1821_vm10, %v1817_v1  ;;  %v1769_v51 = vpop.f32.mrf.mxu0  ;;  %v2102_v48 = vpack.c.bf16 %v2096_v56, %v1833_v63  ;;  %v6694_v31 = vld [vmem:[#allocation2 + $0x41] sm:$0xff] }
 0x24e   : > { %v1782_v11 = vadd.f32 %v1769_v51, %v1705_v14  ;;  %v6696_v12 = vld [vmem:[#allocation2 + $0x42] sm:$0xff]  ;;  %v2195_v46 = vpack.c.bf16 %v6694_v31, %v6660_v32 }
 0x24f   : > { %4770 = vmatmul.msk.bf16.gmra.mxu0 %vm1821_vm10, %v2102_v48  ;;  %v2288_v61 = vpack.c.bf16 %v6696_v12, %v6662_v42 }
 0x250   : > { %v1794_v52 = vadd.f32 %v6614_v45, %v1782_v11  ;;  %2527 = vmatpush.bf16.msra.mxu0 %v5499_v13 }
 0x252   : > { %vm1802_vm15 = vcmp.ge.f32.partialorder %v1794_v52, 0.0  ;;  %v1810_v62 = vmul.f32 0.01, %v1794_v52 }
 0x254   : > { %v1818_v20 = vsel %vm1802_vm15, %v1794_v52, %v1810_v62  ;;  %v6699_v59 = vld [vmem:[#allocation2 + $0x51] sm:$0xff]  ;;  %2528 = vmatpush.bf16.msra.mxu0 %v5498_v30  ;;  %v5503_v52 = vld [vmem:[#allocation8 + $0x108] sm:$0xff] }
 0x255   : > { %v1835_v4 = vld [vmem:[#allocation2 + $0x50] sm:$0xff]  ;;  %1827 = vst.msk [vmem:[#allocation2 + $0x61] sm:$0xff] %vm1821_vm10, %v1818_v20  ;;  %v1772_v38 = vpop.f32.mrf.mxu0  ;;  %v6706_v36 = vpack.c.bf16 %v6699_v59, %v6694_v31  ;;  %v5534_v30 = vld [vmem:[#allocation11 + $0xe4] sm:$0xf] }
 0x256   : > { %v6701_v41 = vld [vmem:[#allocation2 + $0x52] sm:$0xff]  ;;  %v6708_v16 = vpack.c.bf16 %v1835_v4, %v2096_v56  ;;  %v1783_v21 = vadd.f32 %v1772_v38, %v1706_v40 }
 0x257   : > { %v6712_v63 = vpack.c.bf16 %v6701_v41, %v6696_v12  ;;  %4711 = vmatmul.msk.bf16.gmra.mxu1 %vm1821_vm10, %v6706_v36 }
 0x258   : > { %4731 = vmatmul.msk.bf16.gmra.mxu2 %vm1821_vm10, %v6708_v16  ;;  %v1795_v23 = vadd.f32 %v6614_v45, %v1783_v21  ;;  %v4931_v21 = vld [vmem:[#allocation11 + $0xf0] sm:$0xf] }
 0x259   : > { %4751 = vmatmul.msk.bf16.gmra.mxu3 %vm1821_vm10, %v6712_v63  ;;  %v4932_v9 = vor.u32 %v5537_v35, %v4931_v21  ;;  %v4901_v35 = vld [vmem:[#allocation11 + $0xb8] sm:$0xf0] }
 0x25a   : > { %vm1803_vm0 = vcmp.ge.f32.partialorder %v1795_v23, 0.0  ;;  %v1811_v57 = vmul.f32 0.01, %v1795_v23 }
 0x25b   : > { %2831 = vmatpush.bf16.msra.mxu2 %v4932_v9  ;;  %v4987_v9 = vld [vmem:[#allocation11 + $0x60] sm:$0xf] }
 0x25c   : > { %v1819_v44 = vsel %vm1803_vm0, %v1795_v23, %v1811_v57  ;;  %v2098_v37 = vld [vmem:[#allocation2 + $0x60] sm:$0xff]  ;;  %v4933_v23 = vld [vmem:[#allocation11 + $0xf8] sm:$0xf0]  ;;  %v4923_v57 = vld [vmem:[#allocation11 + $0xe0] sm:$0xf] }
 0x25d   : > { %1828 = vst.msk [vmem:[#allocation2 + $0x71] sm:$0xff] %vm1821_vm10, %v1819_v44  ;;  %v1774_v60 = vpop.f32.mrf.mxu0  ;;  %v2103_v49 = vpack.c.bf16 %v2098_v37, %v1835_v4  ;;  %v1856_v1 = vld [vmem:[#allocation2 + $0x61] sm:$0xff]  ;;  %v4936_v5 = vor.u32 %v5536_v25, %v4933_v23 }
 0x25e   : > { %v1784_v27 = vadd.f32 %v1774_v60, %v1707_v6  ;;  %v2006_v56 = vld [vmem:[#allocation2 + $0x62] sm:$0xff]  ;;  %v2196_v39 = vpack.c.bf16 %v1856_v1, %v6699_v59  ;;  %v5519_v23 = vld [vmem:[#allocation11 + $0x64] sm:$0xf0] }
 0x25f   : > { %4771 = vmatmul.msk.bf16.gmra.mxu0 %vm1821_vm10, %v2103_v49  ;;  %v2289_v8 = vpack.c.bf16 %v2006_v56, %v6701_v41  ;;  %2860 = vmatpush.bf16.msra.mxu3 %v4936_v5  ;;  %v4925_v44 = vld [vmem:[#allocation11 + $0xe8] sm:$0xf0]  ;;  %v5518_v5 = vld [vmem:[#allocation11 + $0x64] sm:$0xf] }
 0x260   : > { %v1796_v15 = vadd.f32 %v6614_v45, %v1784_v27  ;;  %v5504_v45 = vld [vmem:[#allocation8 + $0x110] sm:$0xff]  ;;  %v4928_v60 = vor.u32 %v5534_v30, %v4925_v44 }
 0x261   : > { %2619 = vmatpush.bf16.msra.mxu1 %v5504_v45  ;;  %v5531_v45 = vld [vmem:[#allocation11 + $0xc4] sm:$0xf0] }
 0x262   : > { %vm1804_vm1 = vcmp.ge.f32.partialorder %v1796_v15, 0.0  ;;  %v1812_v14 = vmul.f32 0.01, %v1796_v15 }
 0x263   : > { %2861 = vmatpush.bf16.msra.mxu3 %v4928_v60  ;;  %v4979_v60 = vld [vmem:[#allocation11 + $0x50] sm:$0xf] }
 0x264   : > { %v1820_v3 = vsel %vm1804_vm1, %v1796_v15, %v1812_v14  ;;  %v1857_v51 = vld [vmem:[#allocation2 + $0x71] sm:$0xff]  ;;  %v4915_v15 = vld [vmem:[#allocation11 + $0xd0] sm:$0xf] }
 0x265   : > { %v1837_v48 = vld [vmem:[#allocation2 + $0x70] sm:$0xff]  ;;  %1829 = vst.msk [vmem:[#allocation2 + $0x81] sm:$0xff] %vm1821_vm10, %v1820_v3  ;;  %v1861_v11 = vpack.c.bf16 %v1857_v51, %v1856_v1  ;;  %2620 = vmatpush.bf16.msra.mxu1 %v5503_v52  ;;  %v5532_v1 = vld [vmem:[#allocation11 + $0xd4] sm:$0xf] }
 0x266   : > { %v2007_v18 = vld [vmem:[#allocation2 + $0x72] sm:$0xff]  ;;  %v1841_v2 = vpack.c.bf16 %v1837_v48, %v2098_v37  ;;  %v5533_v14 = vld [vmem:[#allocation11 + $0xd4] sm:$0xf0] }
 0x267   : > { %v2011_v29 = vpack.c.bf16 %v2007_v18, %v2006_v56  ;;  %4712 = vmatmul.msk.bf16.gmra.mxu1 %vm1821_vm10, %v1861_v11  ;;  %v4916_v3 = vor.u32 %v5533_v14, %v4915_v15  ;;  %v5517_v15 = vld [vmem:[#allocation11 + $0x54] sm:$0xf0]  ;;  %v5516_v14 = vld [vmem:[#allocation11 + $0x54] sm:$0xf] }
 0x268   : > { %4732 = vmatmul.msk.bf16.gmra.mxu2 %vm1821_vm10, %v1841_v2 }
 0x269   : > { %4752 = vmatmul.msk.bf16.gmra.mxu3 %vm1821_vm10, %v2011_v29  ;;  %2621 = vmatpush.bf16.msra.mxu1 %v5502_v0  ;;  %v4995_v0 = vld [vmem:[#allocation11 + $0x70] sm:$0xf] }
 0x26c   : > { %v2100_v50 = vld [vmem:[#allocation2 + $0x80] sm:$0xff] }
 0x26d   : > { %v2104_v22 = vpack.c.bf16 %v2100_v50, %v1837_v48  ;;  %v2193_v32 = vld [vmem:[#allocation2 + $0x81] sm:$0xff]  ;;  %v2383_v7 = vpack.c.bf16 %v6635_v10, %v2100_v50  ;;  %v5530_v50 = vld [vmem:[#allocation11 + $0xc4] sm:$0xf] }
 0x26e   : > { %v2286_v42 = vld [vmem:[#allocation2 + $0x82] sm:$0xff]  ;;  %v2476_v28 = vpack.c.bf16 %v6522_v17, %v2193_v32 }
 0x26f   : > { %4772 = vmatmul.msk.bf16.gmra.mxu0 %vm1821_vm10, %v2104_v22 }
 0x277   : > { %4789 = vmatmul.msk.bf16.vlgmr.msrb.gmra.mxu1 %vm1821_vm10, %v2194_v26  ;;  %v4909_v26 = vld [vmem:[#allocation11 + $0xc8] sm:$0xf0] }
 0x278   : > { %4809 = vmatmul.msk.bf16.vlgmr.msrb.gmra.mxu2 %vm1821_vm10, %v2287_v24  ;;  %v4912_v24 = vor.u32 %v5530_v50, %v4909_v26 }
 0x279   : > { %4829 = vmatmul.msk.bf16.vlgmr.msrb.gmra.mxu3 %vm1821_vm10, %v6669_v55  ;;  %v2290_v55 = vpack.c.bf16 %v2286_v42, %v2007_v18 }
 0x27f   : > { %4849 = vmatmul.msk.bf16.vlgmr.msra.gmra.mxu0 %vm1821_vm10, %v6667_v47  ;;  %v2197_v47 = vpack.c.bf16 %v2193_v32, %v1857_v51  ;;  %v4917_v51 = vld [vmem:[#allocation11 + $0xd8] sm:$0xf0] }
 0x280   : > { %v4920_v48 = vor.u32 %v5532_v1, %v4917_v51  ;;  %v4980_v1 = vor.u32 %v5517_v15, %v4979_v60  ;;  %v4965_v60 = vld [vmem:[#allocation11 + $0x38] sm:$0xf0] }
 0x282   : > { %2862 = vmatpush.bf16.msra.mxu3 %v4920_v48  ;;  %v4891_v48 = vld [vmem:[#allocation11 + $0xa0] sm:$0xf] }
 0x286   : > { %2863 = vmatpush.bf16.msra.mxu3 %v4912_v24  ;;  %v4893_v24 = vld [vmem:[#allocation11 + $0xa8] sm:$0xf0] }
 0x287   : > { %4790 = vmatmul.msk.bf16.gmra.mxu1 %vm1821_vm10, %v2195_v46 }
 0x288   : > { %4810 = vmatmul.msk.bf16.gmra.mxu2 %vm1821_vm10, %v2288_v61 }
 0x289   : > { %4830 = vmatmul.msk.bf16.gmra.mxu3 %vm1821_vm10, %v6708_v16  ;;  %v2569_v16 = vpack.c.bf16 %v6550_v58, %v2286_v42  ;;  %v5535_v58 = vld [vmem:[#allocation11 + $0xe4] sm:$0xf0] }
 0x28a   : > { %v4924_v6 = vor.u32 %v5535_v58, %v4923_v57  ;;  %v4988_v57 = vor.u32 %v5519_v23, %v4987_v9  ;;  %v4989_v58 = vld [vmem:[#allocation11 + $0x68] sm:$0xf0]  ;;  %v4885_v23 = vld [vmem:[#allocation11 + $0x98] sm:$0xf0] }
 0x28b   : > { %v4992_v30 = vor.u32 %v5518_v5, %v4989_v58  ;;  %v4963_v5 = vld [vmem:[#allocation11 + $0x30] sm:$0xf]  ;;  %v5513_v58 = vld [vmem:[#allocation11 + $0x34] sm:$0xf0] }
 0x28c   : > { %2832 = vmatpush.bf16.msra.mxu2 %v4924_v6  ;;  %v4964_v15 = vor.u32 %v5513_v58, %v4963_v5 }
 0x28f   : > { %4850 = vmatmul.msk.bf16.gmra.mxu0 %vm1821_vm10, %v6706_v36 }
 0x290   : > { %2833 = vmatpush.bf16.msra.mxu2 %v4916_v3  ;;  %v4981_v3 = vld [vmem:[#allocation11 + $0x58] sm:$0xf0] }
 0x291   : > { %v4984_v50 = vor.u32 %v5516_v14, %v4981_v3  ;;  %v4955_v3 = vld [vmem:[#allocation11 + $0x20] sm:$0xf] }
 0x297   : > { %4791 = vmatmul.msk.bf16.gmra.mxu1 %vm1821_vm10, %v2196_v39  ;;  %v5521_v39 = vld [vmem:[#allocation11 + $0x74] sm:$0xf0] }
 0x298   : > { %4811 = vmatmul.msk.bf16.gmra.mxu2 %vm1821_vm10, %v2289_v8  ;;  %v5520_v8 = vld [vmem:[#allocation11 + $0x74] sm:$0xf]  ;;  %v4996_v42 = vor.u32 %v5521_v39, %v4995_v0  ;;  %v4971_v39 = vld [vmem:[#allocation11 + $0x40] sm:$0xf] }
 0x299   : > { %4831 = vmatmul.msk.bf16.gmra.mxu3 %vm1821_vm10, %v1841_v2 }
 0x29a   : > { %2969 = vmatpush.bf16.msrb.mxu0 %v4996_v42  ;;  %v5514_v42 = vld [vmem:[#allocation11 + $0x44] sm:$0xf] }
 0x29e   : > { %2970 = vmatpush.bf16.msrb.mxu0 %v4988_v57 }
 0x29f   : > { %4851 = vmatmul.msk.bf16.gmra.mxu0 %vm1821_vm10, %v1861_v11 }
 0x2a2   : > { %2971 = vmatpush.bf16.msrb.mxu0 %v4980_v1 }
 0x2a7   : > { %4792 = vmatmul.msk.bf16.gmra.mxu1 %vm1821_vm10, %v2197_v47  ;;  %v4997_v47 = vld [vmem:[#allocation11 + $0x78] sm:$0xf0] }
 0x2a8   : > { %4812 = vmatmul.msk.bf16.gmra.mxu2 %vm1821_vm10, %v2290_v55  ;;  %v4899_v55 = vld [vmem:[#allocation11 + $0xb0] sm:$0xf] }
 0x2a9   : > { %4832 = vmatmul.msk.bf16.gmra.mxu3 %vm1821_vm10, %v2383_v7  ;;  %v5529_v7 = vld [vmem:[#allocation11 + $0xb4] sm:$0xf0] }
 0x2aa   : > { %v4900_v21 = vor.u32 %v5529_v7, %v4899_v55  ;;  %v4973_v55 = vld [vmem:[#allocation11 + $0x48] sm:$0xf0] }
 0x2ab   : > { %v4976_v7 = vor.u32 %v5514_v42, %v4973_v55  ;;  %v5522_v42 = vld [vmem:[#allocation11 + $0x84] sm:$0xf] }
 0x2af   : > { %4852 = vmatmul.msk.bf16.gmra.mxu0 %vm1821_vm10, %v2476_v28  ;;  %v5528_v28 = vld [vmem:[#allocation11 + $0xb4] sm:$0xf] }
 0x2b0   : > { %v4904_v25 = vor.u32 %v5528_v28, %v4901_v35  ;;  %v5524_v35 = vld [vmem:[#allocation11 + $0x94] sm:$0xf] }
 0x2b1   : > { %v4888_v57 = vor.u32 %v5524_v35, %v4885_v23  ;;  %v5508_v35 = vld [vmem:[#allocation11 + $0x14] sm:$0xf]  ;;  %v4949_v23 = vld [vmem:[#allocation11 + $0x18] sm:$0xf0] }
 0x2b2   : > { %2864 = vmatpush.bf16.msra.mxu3 %v4904_v25 }
 0x2b4   : > { %v6761_v53 = vpop.f32.mrf.mxu1 }
 0x2b7   : > { %4869 = vmatmul.msk.bf16.vlgmr.msra.gmra.mxu1 %vm1821_vm10, %v6673_v43 }
 0x2bb   : > { %v6771_v31 = vpop.f32.mrf.mxu2 }
 0x2bc   : > { %v6765_v62 = vpop.f32.mrf.mxu1  ;;  %v6775_v34 = vpop.f32.mrf.mxu3  ;;  %v1981_v5 = vadd.f32 %v6771_v31, %v6761_v53 }
 0x2bd   : > { %v6779_v40 = vpop.f32.mrf.mxu0 }
 0x2c3   : > { %v6777_v17 = vpop.f32.mrf.mxu2 }
 0x2c4   : > { %v6767_v33 = vpop.f32.mrf.mxu1  ;;  %v6784_v43 = vpop.f32.mrf.mxu3  ;;  %v1983_v31 = vadd.f32 %v6777_v17, %v6765_v62 }
 0x2c5   : > { %v6790_v41 = vpop.f32.mrf.mxu0 }
 0x2c7   : > { %4870 = vmatmul.msk.bf16.gmra.mxu1 %vm1821_vm10, %v6712_v63 }
 0x2cb   : > { %v6788_v4 = vpop.f32.mrf.mxu2 }
 0x2cc   : > { %v6773_v12 = vpop.f32.mrf.mxu1  ;;  %v6792_v38 = vpop.f32.mrf.mxu3  ;;  %v1986_v62 = vadd.f32 %v6788_v4, %v6767_v33 }
 0x2cd   : > { %v6800_v13 = vpop.f32.mrf.mxu0 }
 0x2d3   : > { %v6797_v63 = vpop.f32.mrf.mxu2 }
 0x2d4   : > { %v6781_v20 = vpop.f32.mrf.mxu1  ;;  %v6804_v54 = vpop.f32.mrf.mxu3  ;;  %v1988_v33 = vadd.f32 %v6797_v63, %v6773_v12 }
 0x2d5   : > { %v6808_v49 = vpop.f32.mrf.mxu0 }
 0x2d7   : > { %4871 = vmatmul.msk.bf16.gmra.mxu1 %vm1821_vm10, %v2011_v29  ;;  %v4907_v29 = vld [vmem:[#allocation11 + $0xc0] sm:$0xf] }
 0x2d8   : > { %v4908_v22 = vor.u32 %v5531_v45, %v4907_v29  ;;  %v5527_v29 = vld [vmem:[#allocation11 + $0xa4] sm:$0xf0]  ;;  %v5526_v45 = vld [vmem:[#allocation11 + $0xa4] sm:$0xf] }
 0x2d9   : > { %v4892_v26 = vor.u32 %v5527_v29, %v4891_v48  ;;  %v4896_v0 = vor.u32 %v5526_v45, %v4893_v24  ;;  %v5511_v48 = vld [vmem:[#allocation11 + $0x24] sm:$0xf0]  ;;  %v5510_v29 = vld [vmem:[#allocation11 + $0x24] sm:$0xf]  ;;  %v4875_v24 = vld [vmem:[#allocation11 + $0x80] sm:$0xf] }
 0x2da   : > { %2834 = vmatpush.bf16.msra.mxu2 %v4908_v22 }
 0x2db   : > { %v6806_v37 = vpop.f32.mrf.mxu2  ;;  %2865 = vmatpush.bf16.msra.mxu3 %v4896_v0  ;;  %v5523_v0 = vld [vmem:[#allocation11 + $0x84] sm:$0xf0] }
 0x2dc   : > { %v6786_v59 = vpop.f32.mrf.mxu1  ;;  %v6812_v56 = vpop.f32.mrf.mxu3 }
 0x2dd   : > { %v6816_v11 = vpop.f32.mrf.mxu0 }
 0x2de   : > { %2835 = vmatpush.bf16.msra.mxu2 %v4900_v21  ;;  %v5525_v21 = vld [vmem:[#allocation11 + $0x94] sm:$0xf0] }
 0x2df   : > { %2866 = vmatpush.bf16.msra.mxu3 %v4888_v57  ;;  %v4952_v57 = vor.u32 %v5508_v35, %v4949_v23 }
 0x2e2   : > { %2836 = vmatpush.bf16.msra.mxu2 %v4892_v26  ;;  %v4957_v26 = vld [vmem:[#allocation11 + $0x28] sm:$0xf0] }
 0x2e3   : > { %v6814_v18 = vpop.f32.mrf.mxu2 }
 0x2e4   : > { %v6794_v36 = vpop.f32.mrf.mxu1  ;;  %v6820_v52 = vpop.f32.mrf.mxu3 }
 0x2e5   : > { %v6826_v32 = vpop.f32.mrf.mxu0 }
 0x2e7   : > { %4872 = vmatmul.msk.bf16.gmra.mxu1 %vm1821_vm10, %v2569_v16  ;;  %v5000_v16 = vor.u32 %v5520_v8, %v4997_v47  ;;  %v5515_v8 = vld [vmem:[#allocation11 + $0x44] sm:$0xf0] }
 0x2e8   : > { %v4972_v47 = vor.u32 %v5515_v8, %v4971_v39  ;;  %v4960_v39 = vor.u32 %v5510_v29, %v4957_v26  ;;  %v4876_v8 = vor.u32 %v5523_v0, %v4875_v24 }
 0x2e9   : > { %2998 = vmatpush.bf16.msrb.mxu1 %v5000_v16  ;;  %v4883_v16 = vld [vmem:[#allocation11 + $0x90] sm:$0xf] }
 0x2ea   : > { %2972 = vmatpush.bf16.msrb.mxu0 %v4972_v47  ;;  %v4884_v9 = vor.u32 %v5525_v21, %v4883_v16  ;;  %v4877_v47 = vld [vmem:[#allocation11 + $0x88] sm:$0xf0]  ;;  %v4947_v16 = vld [vmem:[#allocation11 + $0x10] sm:$0xf]  ;;  %v5509_v21 = vld [vmem:[#allocation11 + $0x14] sm:$0xf0] }
 0x2eb   : > { %v6824_v61 = vpop.f32.mrf.mxu2 }
 0x2ec   : > { %v6802_v19 = vpop.f32.mrf.mxu1  ;;  %v6828_v6 = vpop.f32.mrf.mxu3  ;;  %2837 = vmatpush.bf16.msra.mxu2 %v4884_v9  ;;  %v4948_v9 = vor.u32 %v5509_v21, %v4947_v16  ;;  %v5552_v16 = vld [vmem:[#allocation11 + $0x174] sm:$0xf] }
 0x2ed   : > { %2999 = vmatpush.bf16.msrb.mxu1 %v4992_v30  ;;  %v6834_v22 = vpop.f32.mrf.mxu0  ;;  %v5512_v30 = vld [vmem:[#allocation11 + $0x34] sm:$0xf] }
 0x2ee   : > { %v4968_v14 = vor.u32 %v5512_v30, %v4965_v60  ;;  %2973 = vmatpush.bf16.msrb.mxu0 %v4964_v15  ;;  %v4939_v30 = vld [vmem:[#allocation11] sm:$0xf]  ;;  %v5507_v60 = vld [vmem:[#allocation11 + $0x4] sm:$0xf0]  ;;  %v5506_v15 = vld [vmem:[#allocation11 + $0x4] sm:$0xf] }
 0x2f0   : > { %2838 = vmatpush.bf16.msra.mxu2 %v4876_v8  ;;  %v2086_v8 = vadd.f32 %v6784_v43, %v1983_v31 }
 0x2f1   : > { %3000 = vmatpush.bf16.msrb.mxu1 %v4984_v50  ;;  %v4956_v50 = vor.u32 %v5511_v48, %v4955_v3  ;;  %v4941_v3 = vld [vmem:[#allocation11 + $0x8] sm:$0xf0]  ;;  %v2085_v48 = vadd.f32 %v6775_v34, %v1981_v5  ;;  %v5059_v34 = vld [vmem:[#allocation11 + $0x170] sm:$0xf] }
 0x2f3   : > { %v6832_v51 = vpop.f32.mrf.mxu2  ;;  %2974 = vmatpush.bf16.msrb.mxu0 %v4956_v50  ;;  %v4944_v50 = vor.u32 %v5506_v15, %v4941_v3  ;;  %v2178_v53 = vadd.f32 %v6779_v40, %v2085_v48  ;;  %v2179_v40 = vadd.f32 %v6790_v41, %v2086_v8  ;;  %v5551_v3 = vld [vmem:[#allocation11 + $0x164] sm:$0xf0]  ;;  %v5550_v48 = vld [vmem:[#allocation11 + $0x164] sm:$0xf] }
 0x2f4   : > { %v6810_v27 = vpop.f32.mrf.mxu1  ;;  %v6838_v25 = vpop.f32.mrf.mxu3  ;;  %v2723_v8 = vld [vmem:[#allocation2 + $0x1] sm:$0xff] }
 0x2f5   : > { %3001 = vmatpush.bf16.msrb.mxu1 %v4976_v7  ;;  %v6840_v45 = vpop.f32.mrf.mxu0  ;;  %v4880_v7 = vor.u32 %v5522_v42, %v4877_v47  ;;  %v2271_v0 = vadd.f32 %v6810_v27, %v2178_v53  ;;  %v2087_v27 = vadd.f32 %v6792_v38, %v1986_v62  ;;  %v5053_v53 = vld [vmem:[#allocation11 + $0x168] sm:$0xf0] }
 0x2f6   : > { %v5056_v4 = vor.u32 %v5550_v48, %v5053_v53 }
 0x2f7   : > { %2867 = vmatpush.bf16.msra.mxu3 %v4880_v7  ;;  %2975 = vmatpush.bf16.msrb.mxu0 %v4948_v9  ;;  %v5553_v7 = vld [vmem:[#allocation11 + $0x174] sm:$0xf0]  ;;  %v5061_v9 = vld [vmem:[#allocation11 + $0x178] sm:$0xf0] }
 0x2f8   : > { %v5060_v35 = vor.u32 %v5553_v7, %v5059_v34  ;;  %v5064_v5 = vor.u32 %v5552_v16, %v5061_v9  ;;  %v5549_v16 = vld [vmem:[#allocation11 + $0x154] sm:$0xf0] }
 0x2f9   : > { %3002 = vmatpush.bf16.msrb.mxu1 %v4968_v14  ;;  %v4940_v14 = vor.u32 %v5507_v60, %v4939_v30  ;;  %v6861_v30 = vld [vmem:[#allocation10] ss:$0 sm:$0xff] }
 0x2fa   : > { %3135 = vmatpush.bf16.msrb.mxu2 %v5060_v35 }
 0x2fb   : > { %v2344_v1 = vpop.f32.mrf.mxu2  ;;  %2976 = vmatpush.bf16.msrb.mxu0 %v4940_v14  ;;  %3164 = vmatpush.bf16.msrb.mxu3 %v5064_v5  ;;  %v5051_v14 = vld [vmem:[#allocation11 + $0x160] sm:$0xf]  ;;  %v5548_v5 = vld [vmem:[#allocation11 + $0x154] sm:$0xf] }
 0x2fc   : > { %v6818_v2 = vpop.f32.mrf.mxu1  ;;  %v2437_v58 = vpop.f32.mrf.mxu3  ;;  %v2364_v42 = vadd.f32 %v2344_v1, %v2271_v0 }
 0x2fd   : > { %3003 = vmatpush.bf16.msrb.mxu1 %v4960_v39  ;;  %v2530_v26 = vpop.f32.mrf.mxu0  ;;  %v2272_v43 = vadd.f32 %v6818_v2, %v2179_v40  ;;  %v2180_v2 = vadd.f32 %v6800_v13, %v2087_v27  ;;  %v5045_v40 = vld [vmem:[#allocation11 + $0x158] sm:$0xf0] }
 0x2fe   : > { %v2457_v17 = vadd.f32 %v2437_v58, %v2364_v42  ;;  %v2088_v42 = vadd.f32 %v6804_v54, %v1988_v33  ;;  %v1991_v54 = vadd.f32 %v6806_v37, %v6781_v20  ;;  %v5546_v33 = vld [vmem:[#allocation11 + $0x144] sm:$0xf] }
 0x2ff   : > { %3165 = vmatpush.bf16.msrb.mxu3 %v5056_v4  ;;  %v5037_v4 = vld [vmem:[#allocation11 + $0x148] sm:$0xf0] }
 0x300   : > { %v2550_v1 = vadd.f32 %v2530_v26, %v2457_v17  ;;  %v2181_v62 = vadd.f32 %v6808_v49, %v2088_v42  ;;  %v5048_v17 = vor.u32 %v5548_v5, %v5045_v40  ;;  %v2089_v49 = vadd.f32 %v6812_v56, %v1991_v54  ;;  %v5545_v54 = vld [vmem:[#allocation11 + $0x134] sm:$0xf0] }
 0x301   : > { %3004 = vmatpush.bf16.msrb.mxu1 %v4952_v57  ;;  %v1993_v56 = vadd.f32 %v6814_v18, %v6786_v59  ;;  %v5115_v18 = vld [vmem:[#allocation11 + $0x1e0] sm:$0xf] }
 0x303   : > { %v2346_v29 = vpop.f32.mrf.mxu2  ;;  %3166 = vmatpush.bf16.msrb.mxu3 %v5048_v17  ;;  %v5027_v17 = vld [vmem:[#allocation11 + $0x130] sm:$0xf] }
 0x304   : > { %v6822_v46 = vpop.f32.mrf.mxu1  ;;  %v2439_v39 = vpop.f32.mrf.mxu3  ;;  %v2365_v57 = vadd.f32 %v2346_v29, %v2272_v43 }
 0x305   : > { %3005 = vmatpush.bf16.msrb.mxu1 %v4944_v50  ;;  %v2532_v23 = vpop.f32.mrf.mxu0  ;;  %v5052_v50 = vor.u32 %v5551_v3, %v5051_v14  ;;  %v2273_v31 = vadd.f32 %v6822_v46, %v2180_v2  ;;  %v5123_v2 = vld [vmem:[#allocation11 + $0x1f0] sm:$0xf] }
 0x306   : > { %v2458_v58 = vadd.f32 %v2439_v39, %v2365_v57  ;;  %v5043_v39 = vld [vmem:[#allocation11 + $0x150] sm:$0xf] }
 0x307   : > { %3136 = vmatpush.bf16.msrb.mxu2 %v5052_v50  ;;  %v5044_v9 = vor.u32 %v5549_v16, %v5043_v39  ;;  %v5566_v39 = vld [vmem:[#allocation11 + $0x1e4] sm:$0xf] }
 0x308   : > { %v2551_v34 = vadd.f32 %v2532_v23, %v2458_v58 }
 0x30b   : > { %v2349_v21 = vpop.f32.mrf.mxu2  ;;  %3137 = vmatpush.bf16.msrb.mxu2 %v5044_v9 }
 0x30c   : > { %v6830_v44 = vpop.f32.mrf.mxu1  ;;  %v2442_v60 = vpop.f32.mrf.mxu3  ;;  %v2366_v7 = vadd.f32 %v2349_v21, %v2273_v31  ;;  %v5125_v31 = vld [vmem:[#allocation11 + $0x1f8] sm:$0xf0] }
 0x30d   : > { %v2535_v26 = vpop.f32.mrf.mxu0  ;;  %v2274_v43 = vadd.f32 %v6830_v44, %v2181_v62 }
 0x30e   : > { %v2459_v21 = vadd.f32 %v2442_v60, %v2366_v7  ;;  %v5035_v60 = vld [vmem:[#allocation11 + $0x140] sm:$0xf] }
 0x310   : > { %v2552_v14 = vadd.f32 %v2535_v26, %v2459_v21  ;;  %v5568_v26 = vld [vmem:[#allocation11 + $0x1f4] sm:$0xf] }
 0x311   : > { %v5128_v42 = vor.u32 %v5568_v26, %v5125_v31 }
 0x313   : > { %v2351_v38 = vpop.f32.mrf.mxu2  ;;  %3346 = vmatpush.bf16.msra.mxu1 %v5128_v42 }
 0x314   : > { %v6836_v28 = vpop.f32.mrf.mxu1  ;;  %v2444_v46 = vpop.f32.mrf.mxu3  ;;  %v2367_v57 = vadd.f32 %v2351_v38, %v2274_v43  ;;  %v5040_v38 = vor.u32 %v5546_v33, %v5037_v4  ;;  %v5544_v43 = vld [vmem:[#allocation11 + $0x134] sm:$0xf] }
 0x316   : > { %v2460_v58 = vadd.f32 %v2444_v46, %v2367_v57  ;;  %3167 = vmatpush.bf16.msrb.mxu3 %v5040_v38 }
 0x31b   : > { %v2354_v27 = vpop.f32.mrf.mxu2 }
 0x31c   : > { %v6842_v55 = vpop.f32.mrf.mxu1 }
 0x324   : > { %v6847_v24 = vpop.f32.mrf.mxu1 }
 0x32c   : > { %v6854_v47 = vpop.f32.mrf.mxu1 }
 0x334   : > { %v2623_v15 = vpop.f32.mrf.mxu1 }
 0x335   : > { %v2643_v41 = vadd.f32 %v2623_v15, %v2550_v1  ;;  %v2537_v15 = vpop.f32.mrf.mxu0 }
 0x337   : > { %v2655_v29 = vadd.f32 %v6861_v30, %v2643_v41  ;;  %v5547_v41 = vld [vmem:[#allocation11 + $0x144] sm:$0xf0] }
 0x338   : > { %v5036_v53 = vor.u32 %v5547_v41, %v5035_v60 }
 0x339   : > { %vm2663_vm2 = vcmp.ge.f32.partialorder %v2655_v29, 0.0  ;;  %v2671_v0 = vmul.f32 0.01, %v2655_v29 }
 0x33a   : > { %3138 = vmatpush.bf16.msrb.mxu2 %v5036_v53 }
 0x33b   : > { %v2679_v12 = vsel %vm2663_vm2, %v2655_v29, %v2671_v0  ;;  %v5569_v29 = vld [vmem:[#allocation11 + $0x1f4] sm:$0xf0] }
 0x33c   : > { %2687 = vst [vmem:[#allocation2 + $0x11] sm:$0xff] %v2679_v12  ;;  %v2625_v63 = vpop.f32.mrf.mxu1  ;;  %v2731_v13 = vpack.c.bf16 %v2679_v12, %v2723_v8  ;;  %v5124_v8 = vor.u32 %v5569_v29, %v5123_v2  ;;  %v5543_v2 = vld [vmem:[#allocation11 + $0x124] sm:$0xf0] }
 0x33d   : > { %v2644_v35 = vadd.f32 %v2625_v63, %v2551_v34  ;;  %v2447_v34 = vpop.f32.mrf.mxu3  ;;  %v2553_v63 = vadd.f32 %v2537_v15, %v2460_v58  ;;  %v2540_v62 = vpop.f32.mrf.mxu0  ;;  %v5021_v58 = vld [vmem:[#allocation11 + $0x128] sm:$0xf0] }
 0x33e   : > { %2839 = vmatmul.bf16.vlgmr.msra.gmra.mxu2 %v2731_v13  ;;  %2868 = vmatmul.bf16.vlgmr.msra.gmra.mxu3 %v2731_v13  ;;  %v5567_v13 = vld [vmem:[#allocation11 + $0x1e4] sm:$0xf0] }
 0x33f   : > { %v2656_v23 = vadd.f32 %v6861_v30, %v2644_v35  ;;  %3317 = vmatpush.bf16.msra.mxu0 %v5124_v8  ;;  %v2356_v35 = vpop.f32.mrf.mxu2  ;;  %v5116_v5 = vor.u32 %v5567_v13, %v5115_v18  ;;  %v1998_v18 = vadd.f32 %v6832_v51, %v6802_v19 }
 0x341   : > { %vm2664_vm3 = vcmp.ge.f32.partialorder %v2656_v23, 0.0  ;;  %v2672_v1 = vmul.f32 0.01, %v2656_v23 }
 0x343   : > { %v2680_v3 = vsel %vm2664_vm3, %v2656_v23, %v2672_v1  ;;  %v6875_v48 = vld [vmem:[#allocation2 + $0x10] sm:$0xff]  ;;  %v5028_v23 = vor.u32 %v5545_v54, %v5027_v17  ;;  %3318 = vmatpush.bf16.msra.mxu0 %v5116_v5  ;;  %v5560_v54 = vld [vmem:[#allocation11 + $0x1b4] sm:$0xf] }
 0x344   : > { %2688 = vst [vmem:[#allocation2 + $0x21] sm:$0xff] %v2680_v3  ;;  %v2628_v20 = vpop.f32.mrf.mxu1  ;;  %v2703_v37 = vpack.c.bf16 %v6875_v48, %v6635_v10  ;;  %v6879_v44 = vpack.c.bf16 %v2680_v3, %v2679_v12  ;;  %v2182_v10 = vadd.f32 %v6816_v11, %v2089_v49  ;;  %v2090_v12 = vadd.f32 %v6820_v52, %v1993_v56  ;;  %v5117_v11 = vld [vmem:[#allocation11 + $0x1e8] sm:$0xf0]  ;;  %v5029_v1 = vld [vmem:[#allocation11 + $0x138] sm:$0xf0] }
 0x345   : > { %v2645_v50 = vadd.f32 %v2628_v20, %v2552_v14  ;;  %v5120_v40 = vor.u32 %v5566_v39, %v5117_v11  ;;  %v5107_v52 = vld [vmem:[#allocation11 + $0x1d0] sm:$0xf]  ;;  %v5032_v15 = vor.u32 %v5544_v43, %v5029_v1  ;;  %v5565_v49 = vld [vmem:[#allocation11 + $0x1d4] sm:$0xf0]  ;;  %v5564_v14 = vld [vmem:[#allocation11 + $0x1d4] sm:$0xf]  ;;  %3139 = vmatpush.bf16.msrb.mxu2 %v5028_v23  ;;  %v2449_v4 = vpop.f32.mrf.mxu3 }
 0x346   : > { %2977 = vmatmul.bf16.vlgmr.msrb.gmra.mxu0 %v2703_v37  ;;  %3006 = vmatmul.bf16.vlgmr.msrb.gmra.mxu1 %v2703_v37  ;;  %v2275_v7 = vadd.f32 %v6836_v28, %v2182_v10  ;;  %v2183_v57 = vadd.f32 %v6826_v32, %v2090_v12  ;;  %v5108_v60 = vor.u32 %v5565_v49, %v5107_v52  ;;  %v5542_v56 = vld [vmem:[#allocation11 + $0x124] sm:$0xf]  ;;  %v5099_v10 = vld [vmem:[#allocation11 + $0x1c0] sm:$0xf]  ;;  %v5011_v39 = vld [vmem:[#allocation11 + $0x110] sm:$0xf] }
 0x347   : > { %v2657_v0 = vadd.f32 %v6861_v30, %v2645_v50  ;;  %3347 = vmatpush.bf16.msra.mxu1 %v5120_v40  ;;  %3168 = vmatpush.bf16.msrb.mxu3 %v5032_v15  ;;  %v5024_v31 = vor.u32 %v5542_v56, %v5021_v58  ;;  %v2359_v12 = vpop.f32.mrf.mxu2  ;;  %v5541_v11 = vld [vmem:[#allocation11 + $0x114] sm:$0xf0]  ;;  %v2542_v40 = vpop.f32.mrf.mxu0  ;;  %v5083_v23 = vld [vmem:[#allocation11 + $0x1a0] sm:$0xf]  ;;  %v5559_v1 = vld [vmem:[#allocation11 + $0x1a4] sm:$0xf0] }
 0x348   : > { %v2368_v16 = vadd.f32 %v2354_v27, %v2275_v7  ;;  %v1996_v27 = vadd.f32 %v6824_v61, %v6794_v36  ;;  %v2276_v50 = vadd.f32 %v6842_v55, %v2183_v57  ;;  %v5019_v36 = vld [vmem:[#allocation11 + $0x120] sm:$0xf]  ;;  %3319 = vmatpush.bf16.msra.mxu0 %v5108_v60  ;;  %v5101_v7 = vld [vmem:[#allocation11 + $0x1c8] sm:$0xf0]  ;;  %v5558_v52 = vld [vmem:[#allocation11 + $0x1a4] sm:$0xf] }
 0x349   : > { %vm2665_vm4 = vcmp.ge.f32.partialorder %v2657_v0, 0.0  ;;  %v2673_v59 = vmul.f32 0.01, %v2657_v0  ;;  %v5020_v55 = vor.u32 %v5543_v2, %v5019_v36  ;;  %v5085_v57 = vld [vmem:[#allocation11 + $0x1a8] sm:$0xf0] }
 0x34a   : > { %v2461_v20 = vadd.f32 %v2447_v34, %v2368_v16  ;;  %v2091_v61 = vadd.f32 %v6828_v6, %v1996_v27  ;;  %v2369_v33 = vadd.f32 %v2356_v35, %v2276_v50  ;;  %v5562_v34 = vld [vmem:[#allocation11 + $0x1c4] sm:$0xf]  ;;  %v5540_v16 = vld [vmem:[#allocation11 + $0x114] sm:$0xf]  ;;  %v2092_v27 = vadd.f32 %v6838_v25, %v1998_v18  ;;  %v5003_v49 = vld [vmem:[#allocation11 + $0x100] sm:$0xf] }
 0x34b   : > { %v2681_v9 = vsel %vm2665_vm4, %v2657_v0, %v2673_v59  ;;  %v6892_v53 = vld [vmem:[#allocation2 + $0x20] sm:$0xff]  ;;  %3140 = vmatpush.bf16.msrb.mxu2 %v5020_v55  ;;  %3169 = vmatpush.bf16.msrb.mxu3 %v5024_v31  ;;  %v5104_v13 = vor.u32 %v5562_v34, %v5101_v7  ;;  %v5556_v56 = vld [vmem:[#allocation11 + $0x194] sm:$0xf]  ;;  %v5077_v58 = vld [vmem:[#allocation11 + $0x198] sm:$0xf0] }
 0x34c   : > { %2689 = vst [vmem:[#allocation2 + $0x31] sm:$0xff] %v2681_v9  ;;  %v2630_v46 = vpop.f32.mrf.mxu1  ;;  %v2732_v28 = vpack.c.bf16 %v2681_v9, %v2680_v3  ;;  %v5109_v3 = vld [vmem:[#allocation11 + $0x1d8] sm:$0xf0]  ;;  %v2554_v38 = vadd.f32 %v2540_v62, %v2461_v20  ;;  %v5563_v0 = vld [vmem:[#allocation11 + $0x1c4] sm:$0xf0]  ;;  %v2184_v35 = vadd.f32 %v6834_v22, %v2091_v61  ;;  %v2462_v5 = vadd.f32 %v2449_v4, %v2369_v33 }
 0x34d   : > { %v2646_v21 = vadd.f32 %v2630_v46, %v2553_v63  ;;  %v5112_v41 = vor.u32 %v5564_v14, %v5109_v3  ;;  %v5100_v42 = vor.u32 %v5563_v0, %v5099_v10  ;;  %v5012_v62 = vor.u32 %v5541_v11, %v5011_v39  ;;  %v5091_v46 = vld [vmem:[#allocation11 + $0x1b0] sm:$0xf]  ;;  %v5539_v60 = vld [vmem:[#allocation11 + $0x104] sm:$0xf0]  ;;  %v5005_v50 = vld [vmem:[#allocation11 + $0x108] sm:$0xf0]  ;;  %v2452_v25 = vpop.f32.mrf.mxu3 }
 0x34e   : > { %2844 = vmatmul.bf16.gmra.mxu2 %v2732_v28  ;;  %2873 = vmatmul.bf16.gmra.mxu3 %v2732_v28  ;;  %v5561_v28 = vld [vmem:[#allocation11 + $0x1b4] sm:$0xf0]  ;;  %v2277_v43 = vadd.f32 %v6847_v24, %v2184_v35  ;;  %v2555_v14 = vadd.f32 %v2542_v40, %v2462_v5  ;;  %v5084_v20 = vor.u32 %v5559_v1, %v5083_v23  ;;  %v5075_v61 = vld [vmem:[#allocation11 + $0x190] sm:$0xf]  ;;  %v5555_v7 = vld [vmem:[#allocation11 + $0x184] sm:$0xf0] }
 0x34f   : > { %v2658_v37 = vadd.f32 %v6861_v30, %v2646_v21  ;;  %3348 = vmatpush.bf16.msra.mxu1 %v5112_v41  ;;  %3320 = vmatpush.bf16.msra.mxu0 %v5100_v42  ;;  %v5092_v17 = vor.u32 %v5561_v28, %v5091_v46  ;;  %v5093_v21 = vld [vmem:[#allocation11 + $0x1b8] sm:$0xf0]  ;;  %v5538_v41 = vld [vmem:[#allocation11 + $0x104] sm:$0xf]  ;;  %v5004_v24 = vor.u32 %v5539_v60, %v5003_v49  ;;  %v5557_v33 = vld [vmem:[#allocation11 + $0x194] sm:$0xf0]  ;;  %v2361_v10 = vpop.f32.mrf.mxu2  ;;  %v2545_v34 = vpop.f32.mrf.mxu0 }
 0x350   : > { %v5096_v22 = vor.u32 %v5560_v54, %v5093_v21  ;;  %3141 = vmatpush.bf16.msrb.mxu2 %v5012_v62  ;;  %v2370_v3 = vadd.f32 %v2359_v12, %v2277_v43  ;;  %v5008_v36 = vor.u32 %v5538_v41, %v5005_v50  ;;  %v2185_v55 = vadd.f32 %v6840_v45, %v2092_v27  ;;  %v5067_v42 = vld [vmem:[#allocation11 + $0x180] sm:$0xf]  ;;  %v5554_v18 = vld [vmem:[#allocation11 + $0x184] sm:$0xf]  ;;  %v5069_v12 = vld [vmem:[#allocation11 + $0x188] sm:$0xf0] }
 0x351   : > { %vm2666_vm5 = vcmp.ge.f32.partialorder %v2658_v37, 0.0  ;;  %v2674_v32 = vmul.f32 0.01, %v2658_v37  ;;  %v5068_v35 = vor.u32 %v5555_v7, %v5067_v42  ;;  %v5072_v5 = vor.u32 %v5554_v18, %v5069_v12  ;;  %v5187_v28 = vld [vmem:[#allocation11 + $0x270] sm:$0xf] }
 0x352   : > { %v2463_v31 = vadd.f32 %v2452_v25, %v2370_v3  ;;  %v5189_v23 = vld [vmem:[#allocation11 + $0x278] sm:$0xf0]  ;;  %v5179_v43 = vld [vmem:[#allocation11 + $0x260] sm:$0xf]  ;;  %v3217_v7 = vpack.c.bf16 %v6892_v53, %v6875_v48  ;;  %v5251_v18 = vld [vmem:[#allocation11 + $0x2f0] sm:$0xf] }
 0x353   : > { %v6895_v29 = vsel %vm2666_vm5, %v2658_v37, %v2674_v32  ;;  %v6897_v26 = vld [vmem:[#allocation2 + $0x30] sm:$0xff]  ;;  %3349 = vmatpush.bf16.msra.mxu1 %v5104_v13  ;;  %v5088_v37 = vor.u32 %v5558_v52, %v5085_v57  ;;  %3321 = vmatpush.bf16.msra.mxu0 %v5092_v17  ;;  %v5582_v52 = vld [vmem:[#allocation11 + $0x264] sm:$0xf]  ;;  %v5181_v57 = vld [vmem:[#allocation11 + $0x268] sm:$0xf0] }
 0x354   : > { %2690 = vst [vmem:[#allocation2 + $0x41] sm:$0xff] %v6895_v29  ;;  %v2633_v8 = vpop.f32.mrf.mxu1  ;;  %v2704_v6 = vpack.c.bf16 %v6897_v26, %v6892_v53  ;;  %v6903_v59 = vpack.c.bf16 %v6895_v29, %v2681_v9  ;;  %v5013_v9 = vld [vmem:[#allocation11 + $0x118] sm:$0xf0]  ;;  %3142 = vmatpush.bf16.msrb.mxu2 %v5004_v24  ;;  %v2556_v45 = vadd.f32 %v2545_v34, %v2463_v31  ;;  %v5601_v12 = vld [vmem:[#allocation11 + $0x2f4] sm:$0xf0] }
 0x355   : > { %v2647_v63 = vadd.f32 %v2633_v8, %v2554_v38  ;;  %v5016_v51 = vor.u32 %v5540_v16, %v5013_v9  ;;  %v5076_v8 = vor.u32 %v5557_v33, %v5075_v61  ;;  %v2454_v46 = vpop.f32.mrf.mxu3  ;;  %v5598_v48 = vld [vmem:[#allocation11 + $0x2e4] sm:$0xf]  ;;  %v5245_v53 = vld [vmem:[#allocation11 + $0x2e8] sm:$0xf0] }
 0x356   : > { %2982 = vmatmul.bf16.gmra.mxu0 %v2704_v6  ;;  %3011 = vmatmul.bf16.gmra.mxu1 %v2704_v6  ;;  %v5080_v6 = vor.u32 %v5556_v56, %v5077_v58  ;;  %v5580_v56 = vld [vmem:[#allocation11 + $0x254] sm:$0xf]  ;;  %v5173_v58 = vld [vmem:[#allocation11 + $0x258] sm:$0xf0] }
 0x357   : > { %v2659_v19 = vadd.f32 %v6861_v30, %v2647_v63  ;;  %3170 = vmatpush.bf16.msrb.mxu3 %v5016_v51  ;;  %3350 = vmatpush.bf16.msra.mxu1 %v5096_v22  ;;  %v5584_v51 = vld [vmem:[#allocation11 + $0x274] sm:$0xf]  ;;  %v5583_v22 = vld [vmem:[#allocation11 + $0x264] sm:$0xf0]  ;;  %v2547_v49 = vpop.f32.mrf.mxu0  ;;  %v5176_v31 = vor.u32 %v5580_v56, %v5173_v58  ;;  %v5573_v56 = vld [vmem:[#allocation11 + $0x214] sm:$0xf0] }
 0x358   : > { %3322 = vmatpush.bf16.msra.mxu0 %v5084_v20  ;;  %v5192_v1 = vor.u32 %v5584_v51, %v5189_v23  ;;  %v5184_v20 = vor.u32 %v5582_v52, %v5181_v57  ;;  %v5599_v51 = vld [vmem:[#allocation11 + $0x2e4] sm:$0xf0]  ;;  %v5574_v23 = vld [vmem:[#allocation11 + $0x224] sm:$0xf]  ;;  %v5597_v52 = vld [vmem:[#allocation11 + $0x2d4] sm:$0xf0] }
 0x359   : > { %vm2667_vm6 = vcmp.ge.f32.partialorder %v2659_v19, 0.0  ;;  %v2675_v15 = vmul.f32 0.01, %v2659_v19  ;;  %v6940_v57 = vld [vmem:[#allocation2 + $0x22] sm:$0xff] }
 0x35b   : > { %v2683_v32 = vsel %vm2667_vm6, %v2659_v19, %v2675_v15  ;;  %3171 = vmatpush.bf16.msrb.mxu3 %v5008_v36  ;;  %3351 = vmatpush.bf16.msra.mxu1 %v5088_v37  ;;  %v6915_v11 = vld [vmem:[#allocation2 + $0x40] sm:$0xff]  ;;  %v5585_v19 = vld [vmem:[#allocation11 + $0x274] sm:$0xf0]  ;;  %v5180_v15 = vor.u32 %v5583_v22, %v5179_v43 }
 0x35c   : > { %2691 = vst [vmem:[#allocation2 + $0x51] sm:$0xff] %v2683_v32  ;;  %v2635_v4 = vpop.f32.mrf.mxu1  ;;  %v2733_v2 = vpack.c.bf16 %v2683_v32, %v6895_v29  ;;  %v2278_v29 = vadd.f32 %v6854_v47, %v2185_v55  ;;  %3323 = vmatpush.bf16.msra.mxu0 %v5076_v8  ;;  %v5188_v21 = vor.u32 %v5585_v19, %v5187_v28  ;;  %v5579_v55 = vld [vmem:[#allocation11 + $0x244] sm:$0xf0]  ;;  %v3027_v8 = vld [vmem:[#allocation2 + $0x2] sm:$0xff] }
 0x35d   : > { %v2648_v38 = vadd.f32 %v2635_v4, %v2555_v14  ;;  %v5171_v4 = vld [vmem:[#allocation11 + $0x250] sm:$0xf]  ;;  %v5149_v22 = vld [vmem:[#allocation11 + $0x228] sm:$0xf0] }
 0x35e   : > { %2849 = vmatmul.bf16.gmra.mxu2 %v2733_v2  ;;  %2878 = vmatmul.bf16.gmra.mxu3 %v2733_v2  ;;  %v2371_v13 = vadd.f32 %v2361_v10, %v2278_v29  ;;  %v5581_v2 = vld [vmem:[#allocation11 + $0x254] sm:$0xf0]  ;;  %v5578_v10 = vld [vmem:[#allocation11 + $0x244] sm:$0xf] }
 0x35f   : > { %v2660_v0 = vadd.f32 %v6861_v30, %v2648_v38  ;;  %3352 = vmatpush.bf16.msra.mxu1 %v5080_v6  ;;  %3499 = vmatpush.bf16.msra.mxu2 %v5188_v21  ;;  %v5163_v38 = vld [vmem:[#allocation11 + $0x240] sm:$0xf]  ;;  %v5575_v21 = vld [vmem:[#allocation11 + $0x224] sm:$0xf0] }
 0x360   : > { %v2464_v17 = vadd.f32 %v2454_v46, %v2371_v13  ;;  %3324 = vmatpush.bf16.msra.mxu0 %v5068_v35  ;;  %3528 = vmatpush.bf16.msra.mxu3 %v5192_v1  ;;  %v6933_v6 = vld [vmem:[#allocation2 + $0x12] sm:$0xff]  ;;  %v5164_v42 = vor.u32 %v5579_v55, %v5163_v38  ;;  %v5577_v13 = vld [vmem:[#allocation11 + $0x234] sm:$0xf0]  ;;  %v5252_v35 = vor.u32 %v5601_v12, %v5251_v18  ;;  %v5235_v1 = vld [vmem:[#allocation11 + $0x2d0] sm:$0xf] }
 0x361   : > { %vm2668_vm7 = vcmp.ge.f32.partialorder %v2660_v0, 0.0  ;;  %v2676_v63 = vmul.f32 0.01, %v2660_v0  ;;  %v3035_v34 = vpack.c.bf16 %v6933_v6, %v3027_v8  ;;  %v5243_v46 = vld [vmem:[#allocation11 + $0x2e0] sm:$0xf] }
 0x362   : > { %v2557_v14 = vadd.f32 %v2547_v49, %v2464_v17  ;;  %v5244_v17 = vor.u32 %v5599_v51, %v5243_v46  ;;  %v5141_v38 = vld [vmem:[#allocation11 + $0x218] sm:$0xf0]  ;;  %v5219_v55 = vld [vmem:[#allocation11 + $0x2b0] sm:$0xf]  ;;  %v5213_v18 = vld [vmem:[#allocation11 + $0x2a8] sm:$0xf0] }
 0x363   : > { %v2684_v39 = vsel %vm2668_vm7, %v2660_v0, %v2676_v63  ;;  %v6917_v16 = vld [vmem:[#allocation2 + $0x50] sm:$0xff]  ;;  %3353 = vmatpush.bf16.msra.mxu1 %v5072_v5  ;;  %3500 = vmatpush.bf16.msra.mxu2 %v5180_v15  ;;  %v5165_v0 = vld [vmem:[#allocation11 + $0x248] sm:$0xf0]  ;;  %v5600_v63 = vld [vmem:[#allocation11 + $0x2f4] sm:$0xf]  ;;  %v5152_v15 = vor.u32 %v5574_v23, %v5149_v22 }
 0x364   : > { %2692 = vst [vmem:[#allocation2 + $0x61] sm:$0xff] %v2684_v39  ;;  %v2638_v40 = vpop.f32.mrf.mxu1  ;;  %v2705_v47 = vpack.c.bf16 %v6917_v16, %v6915_v11  ;;  %v6921_v62 = vpack.c.bf16 %v2684_v39, %v2683_v32  ;;  %3529 = vmatpush.bf16.msra.mxu3 %v5184_v20  ;;  %v5168_v29 = vor.u32 %v5578_v10, %v5165_v0  ;;  %v6938_v5 = vld [vmem:[#allocation2 + $0x32] sm:$0xff]  ;;  %v5588_v51 = vld [vmem:[#allocation11 + $0x294] sm:$0xf]  ;;  %v5586_v23 = vld [vmem:[#allocation11 + $0x284] sm:$0xf] }
 0x365   : > { %v2649_v9 = vadd.f32 %v2638_v40, %v2556_v45  ;;  %v5155_v45 = vld [vmem:[#allocation11 + $0x230] sm:$0xf]  ;;  %3681 = vmatpush.bf16.msrb.mxu0 %v5252_v35  ;;  %v6944_v49 = vpack.c.bf16 %v6938_v5, %v6940_v57  ;;  %v5237_v20 = vld [vmem:[#allocation11 + $0x2d8] sm:$0xf0]  ;;  %v5133_v35 = vld [vmem:[#allocation11 + $0x208] sm:$0xf0] }
 0x366   : > { %2987 = vmatmul.bf16.gmra.mxu0 %v2705_v47  ;;  %3016 = vmatmul.bf16.gmra.mxu1 %v2705_v47  ;;  %v5156_v40 = vor.u32 %v5577_v13, %v5155_v45  ;;  %v5157_v47 = vld [vmem:[#allocation11 + $0x238] sm:$0xf0]  ;;  %v5571_v45 = vld [vmem:[#allocation11 + $0x204] sm:$0xf0]  ;;  %v5570_v13 = vld [vmem:[#allocation11 + $0x204] sm:$0xf] }
 0x367   : > { %v2661_v54 = vadd.f32 %v6861_v30, %v2649_v9  ;;  %v5253_v9 = vld [vmem:[#allocation11 + $0x2f8] sm:$0xf0]  ;;  %v5197_v22 = vld [vmem:[#allocation11 + $0x288] sm:$0xf0] }
 0x368   : > { %3530 = vmatpush.bf16.msra.mxu3 %v5176_v31  ;;  %v5256_v19 = vor.u32 %v5600_v63, %v5253_v9  ;;  %v5593_v31 = vld [vmem:[#allocation11 + $0x2b4] sm:$0xf0]  ;;  %v6950_v10 = vld [vmem:[#allocation2 + $0x52] sm:$0xff]  ;;  %v6952_v9 = vld [vmem:[#allocation2 + $0x42] sm:$0xff] }
 0x369   : > { %vm2669_vm8 = vcmp.ge.f32.partialorder %v2661_v54, 0.0  ;;  %v2677_v27 = vmul.f32 0.01, %v2661_v54  ;;  %3682 = vmatpush.bf16.msrb.mxu0 %v5244_v17  ;;  %v5220_v8 = vor.u32 %v5593_v31, %v5219_v55  ;;  %v5131_v63 = vld [vmem:[#allocation11 + $0x200] sm:$0xf] }
 0x36a   : > { %3710 = vmatpush.bf16.msrb.mxu1 %v5256_v19  ;;  %v6956_v19 = vpack.c.bf16 %v6950_v10, %v6952_v9  ;;  %v5301_v31 = vld [vmem:[#allocation11 + $0x358] sm:$0xf0] }
 0x36b   : > { %v2685_v3 = vsel %vm2669_vm8, %v2661_v54, %v2677_v27  ;;  %v6925_v36 = vld [vmem:[#allocation2 + $0x60] sm:$0xff]  ;;  %v5147_v54 = vld [vmem:[#allocation11 + $0x220] sm:$0xf]  ;;  %v5248_v27 = vor.u32 %v5598_v48, %v5245_v53  ;;  %v5205_v48 = vld [vmem:[#allocation11 + $0x298] sm:$0xf0] }
 0x36c   : > { %2693 = vst [vmem:[#allocation2 + $0x71] sm:$0xff] %v2685_v3  ;;  %v2640_v37 = vpop.f32.mrf.mxu1  ;;  %v2734_v60 = vpack.c.bf16 %v2685_v3, %v2684_v39  ;;  %3531 = vmatpush.bf16.msra.mxu3 %v5168_v29  ;;  %v5576_v39 = vld [vmem:[#allocation11 + $0x234] sm:$0xf]  ;;  %v5148_v43 = vor.u32 %v5575_v21, %v5147_v54  ;;  %v5221_v29 = vld [vmem:[#allocation11 + $0x2b8] sm:$0xf0]  ;;  %v5208_v17 = vor.u32 %v5588_v51, %v5205_v48 }
 0x36d   : > { %v2650_v41 = vadd.f32 %v2640_v37, %v2557_v14  ;;  %v5160_v28 = vor.u32 %v5576_v39, %v5157_v47  ;;  %v5236_v14 = vor.u32 %v5597_v52, %v5235_v1  ;;  %v5227_v37 = vld [vmem:[#allocation11 + $0x2c0] sm:$0xf]  ;;  %v5132_v39 = vor.u32 %v5571_v45, %v5131_v63  ;;  %v5589_v47 = vld [vmem:[#allocation11 + $0x294] sm:$0xf0]  ;;  %v5587_v21 = vld [vmem:[#allocation11 + $0x284] sm:$0xf0] }
 0x36e   : > { %2854 = vmatmul.bf16.gmra.mxu2 %v2734_v60  ;;  %2883 = vmatmul.bf16.gmra.mxu3 %v2734_v60  ;;  %v5595_v60 = vld [vmem:[#allocation11 + $0x2c4] sm:$0xf0]  ;;  %v5195_v54 = vld [vmem:[#allocation11 + $0x280] sm:$0xf]  ;;  %v5200_v1 = vor.u32 %v5586_v23, %v5197_v22  ;;  %v3219_v52 = vpack.c.bf16 %v6925_v36, %v6917_v16  ;;  %v3581_v63 = vpack.c.bf16 %v6940_v57, %v6933_v6  ;;  %v5285_v48 = vld [vmem:[#allocation11 + $0x338] sm:$0xf0] }
 0x36f   : > { %v2662_v50 = vadd.f32 %v6861_v30, %v2650_v41  ;;  %v5172_v30 = vor.u32 %v5581_v2, %v5171_v4  ;;  %3711 = vmatpush.bf16.msrb.mxu1 %v5248_v27  ;;  %3683 = vmatpush.bf16.msrb.mxu0 %v5236_v14  ;;  %v3218_v4 = vpack.c.bf16 %v6915_v11, %v6897_v26  ;;  %v5139_v2 = vld [vmem:[#allocation11 + $0x210] sm:$0xf]  ;;  %v5591_v11 = vld [vmem:[#allocation11 + $0x2a4] sm:$0xf0]  ;;  %v5616_v14 = vld [vmem:[#allocation11 + $0x374] sm:$0xf] }
 0x370   : > { %3532 = vmatpush.bf16.msra.mxu3 %v5160_v28  ;;  %v5140_v58 = vor.u32 %v5573_v56, %v5139_v2  ;;  %v5136_v28 = vor.u32 %v5570_v13, %v5133_v35  ;;  %v5315_v27 = vld [vmem:[#allocation11 + $0x370] sm:$0xf]  ;;  %v5633_v35 = vld [vmem:[#allocation11 + $0x3f4] sm:$0xf0]  ;;  %v5631_v23 = vld [vmem:[#allocation11 + $0x3e4] sm:$0xf0] }
 0x371   : > { %vm2670_vm9 = vcmp.ge.f32.partialorder %v2662_v50, 0.0  ;;  %v2678_v32 = vmul.f32 0.01, %v2662_v50  ;;  %3501 = vmatpush.bf16.msra.mxu2 %v5172_v30  ;;  %v5572_v30 = vld [vmem:[#allocation11 + $0x214] sm:$0xf] }
 0x372   : > { %v5144_v0 = vor.u32 %v5572_v30, %v5141_v38  ;;  %v5299_v30 = vld [vmem:[#allocation11 + $0x350] sm:$0xf]  ;;  %v5612_v38 = vld [vmem:[#allocation11 + $0x354] sm:$0xf] }
 0x373   : > { %v2686_v24 = vsel %vm2670_vm9, %v2662_v50, %v2678_v32  ;;  %v6927_v61 = vld [vmem:[#allocation2 + $0x70] sm:$0xff]  ;;  %v5228_v50 = vor.u32 %v5595_v60, %v5227_v37  ;;  %v5594_v32 = vld [vmem:[#allocation11 + $0x2c4] sm:$0xf] }
 0x374   : > { %2694 = vst [vmem:[#allocation2 + $0x81] sm:$0xff] %v2686_v24  ;;  %v2706_v33 = vpack.c.bf16 %v6927_v61, %v6925_v36  ;;  %v6931_v25 = vpack.c.bf16 %v2686_v24, %v2685_v3  ;;  %v5596_v3 = vld [vmem:[#allocation11 + $0x2d4] sm:$0xf]  ;;  %3533 = vmatpush.bf16.msra.mxu3 %v5152_v15  ;;  %v5229_v24 = vld [vmem:[#allocation11 + $0x2c8] sm:$0xf0]  ;;  %v6962_v60 = vld [vmem:[#allocation2 + $0x72] sm:$0xff] }
 0x375   : > { %3502 = vmatpush.bf16.msra.mxu2 %v5164_v42  ;;  %v5240_v41 = vor.u32 %v5596_v3, %v5237_v20  ;;  %3684 = vmatpush.bf16.msrb.mxu0 %v5228_v50  ;;  %v5592_v42 = vld [vmem:[#allocation11 + $0x2b4] sm:$0xf]  ;;  %v5617_v15 = vld [vmem:[#allocation11 + $0x374] sm:$0xf0]  ;;  %v5317_v20 = vld [vmem:[#allocation11 + $0x378] sm:$0xf0] }
 0x376   : > { %2992 = vmatmul.bf16.gmra.mxu0 %v2706_v33  ;;  %3021 = vmatmul.bf16.gmra.mxu1 %v2706_v33  ;;  %v5232_v33 = vor.u32 %v5594_v32, %v5229_v24  ;;  %v5224_v26 = vor.u32 %v5592_v42, %v5221_v29  ;;  %v5316_v3 = vor.u32 %v5617_v15, %v5315_v27  ;;  %v5307_v50 = vld [vmem:[#allocation11 + $0x360] sm:$0xf]  ;;  %v5615_v32 = vld [vmem:[#allocation11 + $0x364] sm:$0xf0]  ;;  %v5614_v24 = vld [vmem:[#allocation11 + $0x364] sm:$0xf] }
 0x377   : > { %3712 = vmatpush.bf16.msrb.mxu1 %v5240_v41  ;;  %v5320_v37 = vor.u32 %v5616_v14, %v5317_v20  ;;  %v6964_v41 = vld [vmem:[#allocation2 + $0x62] sm:$0xff]  ;;  %v5308_v36 = vor.u32 %v5615_v32, %v5307_v50  ;;  %v5611_v42 = vld [vmem:[#allocation11 + $0x344] sm:$0xf0]  ;;  %v5610_v29 = vld [vmem:[#allocation11 + $0x344] sm:$0xf] }
 0x378   : > { %3534 = vmatpush.bf16.msra.mxu3 %v5144_v0  ;;  %v6968_v16 = vpack.c.bf16 %v6962_v60, %v6964_v41  ;;  %v5304_v0 = vor.u32 %v5612_v38, %v5301_v31  ;;  %v5275_v14 = vld [vmem:[#allocation11 + $0x320] sm:$0xf]  ;;  %v5606_v20 = vld [vmem:[#allocation11 + $0x324] sm:$0xf] }
 0x379   : > { %3503 = vmatpush.bf16.msra.mxu2 %v5156_v40  ;;  %3685 = vmatpush.bf16.msrb.mxu0 %v5220_v8  ;;  %v5203_v40 = vld [vmem:[#allocation11 + $0x290] sm:$0xf]  ;;  %v5291_v8 = vld [vmem:[#allocation11 + $0x340] sm:$0xf] }
 0x37a   : > { %v5204_v53 = vor.u32 %v5589_v47, %v5203_v40  ;;  %v5632_v40 = vld [vmem:[#allocation11 + $0x3f4] sm:$0xf]  ;;  %v5283_v47 = vld [vmem:[#allocation11 + $0x330] sm:$0xf] }
 0x37b   : > { %3713 = vmatpush.bf16.msrb.mxu1 %v5232_v33  ;;  %v5309_v33 = vld [vmem:[#allocation11 + $0x368] sm:$0xf0] }
 0x37c   : > { %3535 = vmatpush.bf16.msra.mxu3 %v5136_v28  ;;  %v6972_v2 = vld [vmem:[#allocation2 + $0x80] sm:$0xff] }
 0x37d   : > { %3504 = vmatpush.bf16.msra.mxu2 %v5148_v43  ;;  %v5196_v43 = vor.u32 %v5587_v21, %v5195_v54  ;;  %v3220_v56 = vpack.c.bf16 %v6972_v2, %v6927_v61  ;;  %v5371_v21 = vld [vmem:[#allocation11 + $0x3e0] sm:$0xf] }
 0x37e   : > { %3143 = vmatmul.bf16.vlgmr.msrb.gmra.mxu2 %v3035_v34  ;;  %3172 = vmatmul.bf16.vlgmr.msrb.gmra.mxu3 %v3035_v34  ;;  %v5211_v34 = vld [vmem:[#allocation11 + $0x2a0] sm:$0xf]  ;;  %v5372_v22 = vor.u32 %v5631_v23, %v5371_v21  ;;  %v5341_v21 = vld [vmem:[#allocation11 + $0x3a8] sm:$0xf0] }
 0x37f   : > { %v5212_v12 = vor.u32 %v5591_v11, %v5211_v34  ;;  %3714 = vmatpush.bf16.msrb.mxu1 %v5224_v26  ;;  %v5292_v34 = vor.u32 %v5611_v42, %v5291_v8  ;;  %v5293_v26 = vld [vmem:[#allocation11 + $0x348] sm:$0xf0]  ;;  %v5627_v8 = vld [vmem:[#allocation11 + $0x3c4] sm:$0xf0]  ;;  %v5626_v42 = vld [vmem:[#allocation11 + $0x3c4] sm:$0xf] }
 0x380   : > { %3892 = vmatpush.bf16.msrb.mxu3 %v5320_v37  ;;  %v5296_v11 = vor.u32 %v5610_v29, %v5293_v26  ;;  %v5259_v23 = vld [vmem:[#allocation11 + $0x300] sm:$0xf] }
 0x381   : > { %3505 = vmatpush.bf16.msra.mxu2 %v5140_v58  ;;  %3686 = vmatpush.bf16.msrb.mxu0 %v5212_v12  ;;  %v5613_v58 = vld [vmem:[#allocation11 + $0x354] sm:$0xf0] }
 0x382   : > { %v5300_v55 = vor.u32 %v5613_v58, %v5299_v30  ;;  %v5628_v30 = vld [vmem:[#allocation11 + $0x3d4] sm:$0xf]  ;;  %v5365_v58 = vld [vmem:[#allocation11 + $0x3d8] sm:$0xf0] }
 0x383   : > { %v5368_v38 = vor.u32 %v5628_v30, %v5365_v58 }
 0x385   : > { %3506 = vmatpush.bf16.msra.mxu2 %v5132_v39  ;;  %3687 = vmatpush.bf16.msrb.mxu0 %v5204_v53  ;;  %v5379_v39 = vld [vmem:[#allocation11 + $0x3f0] sm:$0xf]  ;;  %v5381_v53 = vld [vmem:[#allocation11 + $0x3f8] sm:$0xf0] }
 0x386   : > { %3325 = vmatmul.bf16.vlgmr.msra.gmra.mxu0 %v3217_v7  ;;  %3354 = vmatmul.bf16.vlgmr.msra.gmra.mxu1 %v3217_v7  ;;  %v5590_v7 = vld [vmem:[#allocation11 + $0x2a4] sm:$0xf]  ;;  %v5380_v28 = vor.u32 %v5633_v35, %v5379_v39  ;;  %v5384_v54 = vor.u32 %v5632_v40, %v5381_v53  ;;  %v5604_v39 = vld [vmem:[#allocation11 + $0x314] sm:$0xf]  ;;  %v5269_v40 = vld [vmem:[#allocation11 + $0x318] sm:$0xf0] }
 0x387   : > { %v5216_v46 = vor.u32 %v5590_v7, %v5213_v18 }
 0x389   : > { %3715 = vmatpush.bf16.msrb.mxu1 %v5216_v46  ;;  %3688 = vmatpush.bf16.msrb.mxu0 %v5196_v43  ;;  %v5608_v46 = vld [vmem:[#allocation11 + $0x334] sm:$0xf]  ;;  %v5630_v43 = vld [vmem:[#allocation11 + $0x3e4] sm:$0xf] }
 0x38a   : > { %3863 = vmatpush.bf16.msrb.mxu2 %v5316_v3  ;;  %v5607_v3 = vld [vmem:[#allocation11 + $0x324] sm:$0xf0] }
 0x38b   : > { %v5276_v32 = vor.u32 %v5607_v3, %v5275_v14  ;;  %v5261_v14 = vld [vmem:[#allocation11 + $0x308] sm:$0xf0]  ;;  %v5331_v3 = vld [vmem:[#allocation11 + $0x390] sm:$0xf] }
 0x38d   : > { %3716 = vmatpush.bf16.msrb.mxu1 %v5208_v17  ;;  %v5288_v17 = vor.u32 %v5608_v46, %v5285_v48  ;;  %4045 = vmatpush.bf16.msra.mxu0 %v5380_v28  ;;  %v5272_v46 = vor.u32 %v5604_v39, %v5269_v40  ;;  %v5349_v48 = vld [vmem:[#allocation11 + $0x3b8] sm:$0xf0] }
 0x38e   : > { %3148 = vmatmul.bf16.gmra.mxu2 %v6944_v49  ;;  %3177 = vmatmul.bf16.gmra.mxu3 %v6944_v49 }
 0x38f   : > { %3864 = vmatpush.bf16.msrb.mxu2 %v5308_v36  ;;  %v5363_v36 = vld [vmem:[#allocation11 + $0x3d0] sm:$0xf] }
 0x391   : > { %3717 = vmatpush.bf16.msrb.mxu1 %v5200_v1  ;;  %v5373_v1 = vld [vmem:[#allocation11 + $0x3e8] sm:$0xf0]  ;;  %4046 = vmatpush.bf16.msra.mxu0 %v5372_v22 }
 0x392   : > { %v5376_v15 = vor.u32 %v5630_v43, %v5373_v1  ;;  %v5603_v43 = vld [vmem:[#allocation11 + $0x304] sm:$0xf0] }
 0x393   : > { %3865 = vmatpush.bf16.msrb.mxu2 %v5300_v55 }
 0x395   : > { %4074 = vmatpush.bf16.msra.mxu1 %v5384_v54  ;;  %v5623_v54 = vld [vmem:[#allocation11 + $0x3a4] sm:$0xf0] }
 0x396   : > { %3330 = vmatmul.bf16.gmra.mxu0 %v3218_v4  ;;  %3359 = vmatmul.bf16.gmra.mxu1 %v3218_v4  ;;  %v5312_v4 = vor.u32 %v5614_v24, %v5309_v33  ;;  %v5277_v24 = vld [vmem:[#allocation11 + $0x328] sm:$0xf0]  ;;  %v5629_v33 = vld [vmem:[#allocation11 + $0x3d4] sm:$0xf0] }
 0x397   : > { %3866 = vmatpush.bf16.msrb.mxu2 %v5292_v34  ;;  %v5357_v34 = vld [vmem:[#allocation11 + $0x3c8] sm:$0xf0] }
 0x398   : > { %3893 = vmatpush.bf16.msrb.mxu3 %v5312_v4  ;;  %v5280_v4 = vor.u32 %v5606_v20, %v5277_v24 }
 0x399   : > { %4075 = vmatpush.bf16.msra.mxu1 %v5376_v15  ;;  %v5602_v15 = vld [vmem:[#allocation11 + $0x304] sm:$0xf] }
 0x39a   : > { %v5264_v24 = vor.u32 %v5602_v15, %v5261_v14  ;;  %v5429_v14 = vld [vmem:[#allocation11 + $0x458] sm:$0xf0] }
 0x39c   : > { %3894 = vmatpush.bf16.msrb.mxu3 %v5304_v0  ;;  %v5355_v0 = vld [vmem:[#allocation11 + $0x3c0] sm:$0xf] }
 0x39d   : > { %v5356_v29 = vor.u32 %v5627_v8, %v5355_v0  ;;  %4076 = vmatpush.bf16.msra.mxu1 %v5368_v38  ;;  %v5618_v0 = vld [vmem:[#allocation11 + $0x384] sm:$0xf] }
 0x39e   : > { %3153 = vmatmul.bf16.gmra.mxu2 %v6956_v19  ;;  %3182 = vmatmul.bf16.gmra.mxu3 %v6956_v19 }
 0x3a0   : > { %3895 = vmatpush.bf16.msrb.mxu3 %v5296_v11 }
 0x3a4   : > { %3896 = vmatpush.bf16.msrb.mxu3 %v5288_v17  ;;  %v5339_v17 = vld [vmem:[#allocation11 + $0x3a0] sm:$0xf] }
 0x3a6   : > { %3335 = vmatmul.bf16.gmra.mxu0 %v3219_v52  ;;  %3364 = vmatmul.bf16.gmra.mxu1 %v3219_v52 }
 0x3a8   : > { %3897 = vmatpush.bf16.msrb.mxu3 %v5280_v4  ;;  %v5333_v4 = vld [vmem:[#allocation11 + $0x398] sm:$0xf0] }
 0x3ac   : > { %3898 = vmatpush.bf16.msrb.mxu3 %v5272_v46 }
 0x3ae   : > { %3158 = vmatmul.bf16.gmra.mxu2 %v6968_v16  ;;  %3187 = vmatmul.bf16.gmra.mxu3 %v6968_v16 }
 0x3b0   : > { %3899 = vmatpush.bf16.msrb.mxu3 %v5264_v24 }
 0x3b6   : > { %3340 = vmatmul.bf16.gmra.mxu0 %v3220_v56  ;;  %3369 = vmatmul.bf16.gmra.mxu1 %v3220_v56  ;;  %v5364_v56 = vor.u32 %v5629_v33, %v5363_v36  ;;  %v5621_v36 = vld [vmem:[#allocation11 + $0x394] sm:$0xf0]  ;;  %v5620_v33 = vld [vmem:[#allocation11 + $0x394] sm:$0xf] }
 0x3b7   : > { %v5336_v30 = vor.u32 %v5620_v33, %v5333_v4  ;;  %v3756_v33 = vld [vmem:[#allocation2 + $0x30] sm:$0xff]  ;;  %v3755_v4 = vld [vmem:[#allocation2 + $0x20] sm:$0xff] }
 0x3b8   : > { %4047 = vmatpush.bf16.msra.mxu0 %v5364_v56  ;;  %v5332_v56 = vor.u32 %v5621_v36, %v5331_v3 }
 0x3bc   : > { %4048 = vmatpush.bf16.msra.mxu0 %v5356_v29 }
 0x3be   : > { %3507 = vmatmul.bf16.vlgmr.msra.gmra.mxu2 %v6879_v44  ;;  %3536 = vmatmul.bf16.vlgmr.msra.gmra.mxu3 %v6879_v44  ;;  %v5609_v44 = vld [vmem:[#allocation11 + $0x334] sm:$0xf0] }
 0x3bf   : > { %v5284_v51 = vor.u32 %v5609_v44, %v5283_v47  ;;  %v5347_v47 = vld [vmem:[#allocation11 + $0x3b0] sm:$0xf]  ;;  %v5625_v44 = vld [vmem:[#allocation11 + $0x3b4] sm:$0xf0] }
 0x3c0   : > { %v5348_v28 = vor.u32 %v5625_v44, %v5347_v47 }
 0x3c1   : > { %v2840_v61 = vpop.f32.mrf.mxu2  ;;  %v2869_v7 = vpop.f32.mrf.mxu3  ;;  %3867 = vmatpush.bf16.msrb.mxu2 %v5284_v51  ;;  %v5624_v51 = vld [vmem:[#allocation11 + $0x3b4] sm:$0xf] }
 0x3c2   : > { %4049 = vmatpush.bf16.msra.mxu0 %v5348_v28  ;;  %v5647_v28 = vld [vmem:[#allocation11 + $0x464] sm:$0xf0] }
 0x3c3   : > { %v2978_v18 = vpop.f32.mrf.mxu0  ;;  %v3007_v12 = vpop.f32.mrf.mxu1 }
 0x3c4   : > { %v6980_v45 = vadd.f32 %v2978_v18, %v2840_v61  ;;  %v6982_v13 = vadd.f32 %v3007_v12, %v2869_v7  ;;  %v5360_v61 = vor.u32 %v5626_v42, %v5357_v34  ;;  %v3582_v7 = vpack.c.bf16 %v6952_v9, %v6938_v5  ;;  %v5267_v12 = vld [vmem:[#allocation11 + $0x310] sm:$0xf]  ;;  %v5325_v42 = vld [vmem:[#allocation11 + $0x388] sm:$0xf0] }
 0x3c5   : > { %3868 = vmatpush.bf16.msrb.mxu2 %v5276_v32  ;;  %v5352_v5 = vor.u32 %v5624_v51, %v5349_v48  ;;  %v5646_v51 = vld [vmem:[#allocation11 + $0x464] sm:$0xf] }
 0x3c6   : > { %3689 = vmatmul.bf16.vlgmr.msrb.gmra.mxu0 %v3581_v63  ;;  %3718 = vmatmul.bf16.vlgmr.msrb.gmra.mxu1 %v3581_v63  ;;  %v5605_v63 = vld [vmem:[#allocation11 + $0x314] sm:$0xf0] }
 0x3c7   : > { %v5268_v35 = vor.u32 %v5605_v63, %v5267_v12  ;;  %4077 = vmatpush.bf16.msra.mxu1 %v5360_v61  ;;  %v5649_v12 = vld [vmem:[#allocation11 + $0x474] sm:$0xf0]  ;;  %v5648_v63 = vld [vmem:[#allocation11 + $0x474] sm:$0xf] }
 0x3c9   : > { %v2842_v6 = vpop.f32.mrf.mxu2  ;;  %v2871_v57 = vpop.f32.mrf.mxu3  ;;  %3869 = vmatpush.bf16.msrb.mxu2 %v5268_v35  ;;  %v5445_v35 = vld [vmem:[#allocation11 + $0x478] sm:$0xf0] }
 0x3ca   : > { %v5448_v40 = vor.u32 %v5648_v63, %v5445_v35  ;;  %v3937_v35 = vld [vmem:[#allocation2 + $0x21] sm:$0xff] }
 0x3cb   : > { %v2980_v52 = vpop.f32.mrf.mxu0  ;;  %v3009_v27 = vpop.f32.mrf.mxu1  ;;  %4078 = vmatpush.bf16.msra.mxu1 %v5352_v5 }
 0x3cc   : > { %v6984_v37 = vadd.f32 %v2980_v52, %v2842_v6  ;;  %v6986_v50 = vadd.f32 %v3009_v27, %v2871_v57  ;;  %v5622_v6 = vld [vmem:[#allocation11 + $0x3a4] sm:$0xf]  ;;  %v5340_v57 = vor.u32 %v5623_v54, %v5339_v17  ;;  %v5260_v27 = vor.u32 %v5603_v43, %v5259_v23  ;;  %4256 = vmatpush.bf16.msra.mxu3 %v5448_v40  ;;  %v7014_v54 = vld [vmem:[#allocation2 + $0x82] sm:$0xff] }
 0x3cd   : > { %v5344_v52 = vor.u32 %v5622_v6, %v5341_v21  ;;  %v3584_v43 = vpack.c.bf16 %v7014_v54, %v6962_v60 }
 0x3ce   : > { %3512 = vmatmul.bf16.gmra.mxu2 %v6903_v59  ;;  %3541 = vmatmul.bf16.gmra.mxu3 %v6903_v59 }
 0x3cf   : > { %4050 = vmatpush.bf16.msra.mxu0 %v5340_v57  ;;  %3870 = vmatpush.bf16.msrb.mxu2 %v5260_v27  ;;  %v5645_v27 = vld [vmem:[#allocation11 + $0x454] sm:$0xf0] }
 0x3d0   : > { %4079 = vmatpush.bf16.msra.mxu1 %v5344_v52  ;;  %v5427_v52 = vld [vmem:[#allocation11 + $0x450] sm:$0xf] }
 0x3d1   : > { %v2845_v55 = vpop.f32.mrf.mxu2  ;;  %v2874_v31 = vpop.f32.mrf.mxu3  ;;  %v5428_v15 = vor.u32 %v5645_v27, %v5427_v52  ;;  %v5639_v52 = vld [vmem:[#allocation11 + $0x424] sm:$0xf0]  ;;  %v5638_v27 = vld [vmem:[#allocation11 + $0x424] sm:$0xf] }
 0x3d3   : > { %v2983_v26 = vpop.f32.mrf.mxu0  ;;  %v3012_v11 = vpop.f32.mrf.mxu1  ;;  %4051 = vmatpush.bf16.msra.mxu0 %v5332_v56 }
 0x3d4   : > { %v6992_v59 = vadd.f32 %v2983_v26, %v2845_v55  ;;  %v6994_v18 = vadd.f32 %v3012_v11, %v2874_v31  ;;  %v5323_v55 = vld [vmem:[#allocation11 + $0x380] sm:$0xf]  ;;  %v5619_v31 = vld [vmem:[#allocation11 + $0x384] sm:$0xf0]  ;;  %4080 = vmatpush.bf16.msra.mxu1 %v5336_v30  ;;  %v5328_v26 = vor.u32 %v5618_v0, %v5325_v42  ;;  %v3583_v11 = vpack.c.bf16 %v6964_v41, %v6950_v10  ;;  %v5421_v42 = vld [vmem:[#allocation11 + $0x448] sm:$0xf0] }
 0x3d5   : > { %v5324_v8 = vor.u32 %v5619_v31, %v5323_v55  ;;  %v5435_v41 = vld [vmem:[#allocation11 + $0x460] sm:$0xf]  ;;  %v3763_v0 = vpack.c.bf16 %v3756_v33, %v3755_v4 }
 0x3d6   : > { %3694 = vmatmul.bf16.gmra.mxu0 %v3582_v7  ;;  %3723 = vmatmul.bf16.gmra.mxu1 %v3582_v7  ;;  %v5443_v7 = vld [vmem:[#allocation11 + $0x470] sm:$0xf]  ;;  %v5419_v30 = vld [vmem:[#allocation11 + $0x440] sm:$0xf] }
 0x3d7   : > { %4052 = vmatpush.bf16.msra.mxu0 %v5324_v8  ;;  %v5444_v39 = vor.u32 %v5649_v12, %v5443_v7 }
 0x3d8   : > { %4081 = vmatpush.bf16.msra.mxu1 %v5328_v26 }
 0x3d9   : > { %v2847_v9 = vpop.f32.mrf.mxu2  ;;  %v2876_v53 = vpop.f32.mrf.mxu3  ;;  %4227 = vmatpush.bf16.msra.mxu2 %v5444_v39 }
 0x3db   : > { %v2985_v22 = vpop.f32.mrf.mxu0  ;;  %v3014_v1 = vpop.f32.mrf.mxu1 }
 0x3dc   : > { %v6996_v20 = vadd.f32 %v2985_v22, %v2847_v9  ;;  %v6998_v32 = vadd.f32 %v3014_v1, %v2876_v53  ;;  %v5436_v9 = vor.u32 %v5647_v28, %v5435_v41  ;;  %v5437_v53 = vld [vmem:[#allocation11 + $0x468] sm:$0xf0]  ;;  %v5640_v41 = vld [vmem:[#allocation11 + $0x434] sm:$0xf] }
 0x3dd   : > { %v5440_v17 = vor.u32 %v5646_v51, %v5437_v53  ;;  %v5413_v51 = vld [vmem:[#allocation11 + $0x438] sm:$0xf0] }
 0x3de   : > { %3517 = vmatmul.bf16.gmra.mxu2 %v6921_v62  ;;  %3546 = vmatmul.bf16.gmra.mxu3 %v6921_v62 }
 0x3df   : > { %4228 = vmatpush.bf16.msra.mxu2 %v5436_v9  ;;  %4257 = vmatpush.bf16.msra.mxu3 %v5440_v17  ;;  %v5416_v9 = vor.u32 %v5640_v41, %v5413_v51  ;;  %v3758_v17 = vld [vmem:[#allocation2 + $0x50] sm:$0xff]  ;;  %v5635_v41 = vld [vmem:[#allocation11 + $0x404] sm:$0xf0] }
 0x3e1   : > { %v2850_v58 = vpop.f32.mrf.mxu2  ;;  %v2879_v38 = vpop.f32.mrf.mxu3 }
 0x3e3   : > { %v2988_v29 = vpop.f32.mrf.mxu0  ;;  %v3017_v34 = vpop.f32.mrf.mxu1  ;;  %4229 = vmatpush.bf16.msra.mxu2 %v5428_v15 }
 0x3e4   : > { %v7004_v61 = vadd.f32 %v2988_v29, %v2850_v58  ;;  %v7006_v62 = vadd.f32 %v3017_v34, %v2879_v38  ;;  %v5643_v58 = vld [vmem:[#allocation11 + $0x444] sm:$0xf0]  ;;  %v5642_v38 = vld [vmem:[#allocation11 + $0x444] sm:$0xf]  ;;  %v3938_v34 = vld [vmem:[#allocation2 + $0x31] sm:$0xff] }
 0x3e5   : > { %v5420_v8 = vor.u32 %v5643_v58, %v5419_v30  ;;  %v5424_v29 = vor.u32 %v5642_v38, %v5421_v42  ;;  %v3945_v40 = vpack.c.bf16 %v3938_v34, %v3937_v35  ;;  %v3939_v58 = vld [vmem:[#allocation2 + $0x41] sm:$0xff]  ;;  %v5636_v34 = vld [vmem:[#allocation11 + $0x414] sm:$0xf] }
 0x3e6   : > { %3699 = vmatmul.bf16.gmra.mxu0 %v3583_v11  ;;  %3728 = vmatmul.bf16.gmra.mxu1 %v3583_v11  ;;  %v5395_v42 = vld [vmem:[#allocation11 + $0x410] sm:$0xf] }
 0x3e7   : > { %4230 = vmatpush.bf16.msra.mxu2 %v5420_v8  ;;  %v3759_v35 = vld [vmem:[#allocation2 + $0x60] sm:$0xff] }
 0x3e9   : > { %v2852_v47 = vpop.f32.mrf.mxu2  ;;  %v2881_v44 = vpop.f32.mrf.mxu3 }
 0x3eb   : > { %v2990_v46 = vpop.f32.mrf.mxu0  ;;  %v3019_v10 = vpop.f32.mrf.mxu1 }
 0x3ec   : > { %v7008_v48 = vadd.f32 %v2990_v46, %v2852_v47  ;;  %v7010_v5 = vadd.f32 %v3019_v10, %v2881_v44  ;;  %v5411_v46 = vld [vmem:[#allocation11 + $0x430] sm:$0xf]  ;;  %v5641_v10 = vld [vmem:[#allocation11 + $0x434] sm:$0xf0] }
 0x3ed   : > { %v5412_v28 = vor.u32 %v5641_v10, %v5411_v46  ;;  %v5387_v10 = vld [vmem:[#allocation11 + $0x400] sm:$0xf] }
 0x3ee   : > { %3522 = vmatmul.bf16.gmra.mxu2 %v6931_v25  ;;  %3551 = vmatmul.bf16.gmra.mxu3 %v6931_v25  ;;  %v5644_v25 = vld [vmem:[#allocation11 + $0x454] sm:$0xf] }
 0x3ef   : > { %v5432_v3 = vor.u32 %v5644_v25, %v5429_v14  ;;  %4231 = vmatpush.bf16.msra.mxu2 %v5412_v28  ;;  %v5405_v14 = vld [vmem:[#allocation11 + $0x428] sm:$0xf0]  ;;  %v5634_v28 = vld [vmem:[#allocation11 + $0x404] sm:$0xf] }
 0x3f1   : > { %v2855_v6 = vpop.f32.mrf.mxu2  ;;  %v2884_v57 = vpop.f32.mrf.mxu3  ;;  %4258 = vmatpush.bf16.msra.mxu3 %v5432_v3 }
 0x3f3   : > { %v2993_v21 = vpop.f32.mrf.mxu0  ;;  %v3022_v23 = vpop.f32.mrf.mxu1 }
 0x3f4   : > { %v7018_v22 = vadd.f32 %v2993_v21, %v2855_v6  ;;  %v7020_v1 = vadd.f32 %v3022_v23, %v2884_v57  ;;  %v3757_v57 = vld [vmem:[#allocation2 + $0x40] sm:$0xff] }
 0x3f5   : > { %4259 = vmatpush.bf16.msra.mxu3 %v5424_v29  ;;  %v3764_v25 = vpack.c.bf16 %v3758_v17, %v3757_v57  ;;  %v5637_v29 = vld [vmem:[#allocation11 + $0x414] sm:$0xf0] }
 0x3f6   : > { %3704 = vmatmul.bf16.gmra.mxu0 %v3584_v43  ;;  %3733 = vmatmul.bf16.gmra.mxu1 %v3584_v43  ;;  %v5403_v43 = vld [vmem:[#allocation11 + $0x420] sm:$0xf] }
 0x3f7   : > { %v5404_v15 = vor.u32 %v5639_v52, %v5403_v43  ;;  %v3941_v52 = vld [vmem:[#allocation2 + $0x61] sm:$0xff] }
 0x3f9   : > { %v2857_v24 = vpop.f32.mrf.mxu2  ;;  %v2886_v36 = vpop.f32.mrf.mxu3  ;;  %4260 = vmatpush.bf16.msra.mxu3 %v5416_v9  ;;  %4232 = vmatpush.bf16.msra.mxu2 %v5404_v15  ;;  %v5388_v9 = vor.u32 %v5635_v41, %v5387_v10 }
 0x3fb   : > { %v2995_v56 = vpop.f32.mrf.mxu0  ;;  %v3024_v60 = vpop.f32.mrf.mxu1 }
 0x3fc   : > { %v7022_v55 = vadd.f32 %v2995_v56, %v2857_v24  ;;  %v7024_v31 = vadd.f32 %v3024_v60, %v2886_v36  ;;  %v5408_v36 = vor.u32 %v5638_v27, %v5405_v14 }
 0x3fe   : > { %3871 = vmatmul.bf16.vlgmr.msrb.gmra.mxu2 %v3763_v0  ;;  %3900 = vmatmul.bf16.vlgmr.msrb.gmra.mxu3 %v3763_v0 }
 0x3ff   : > { %4261 = vmatpush.bf16.msra.mxu3 %v5408_v36 }
 0x401   : > { %v3144_v26 = vpop.f32.mrf.mxu2  ;;  %v3173_v11 = vpop.f32.mrf.mxu3 }
 0x402   : > { %v3193_v7 = vadd.f32 %v3144_v26, %v6980_v45  ;;  %v3194_v12 = vadd.f32 %v3173_v11, %v6982_v13  ;;  %v5396_v26 = vor.u32 %v5637_v29, %v5395_v42  ;;  %v5397_v11 = vld [vmem:[#allocation11 + $0x418] sm:$0xf0] }
 0x403   : > { %v3326_v63 = vpop.f32.mrf.mxu0  ;;  %v3355_v39 = vpop.f32.mrf.mxu1 }
 0x404   : > { %v7028_v47 = vadd.f32 %v3326_v63, %v3193_v7  ;;  %v7030_v44 = vadd.f32 %v3355_v39, %v3194_v12  ;;  %v5400_v7 = vor.u32 %v5636_v34, %v5397_v11  ;;  %v3760_v63 = vld [vmem:[#allocation2 + $0x70] sm:$0xff]  ;;  %4233 = vmatpush.bf16.msra.mxu2 %v5396_v26 }
 0x405   : > { %v3765_v51 = vpack.c.bf16 %v3760_v63, %v3759_v35 }
 0x406   : > { %4053 = vmatmul.bf16.vlgmr.msra.gmra.mxu0 %v3945_v40  ;;  %4082 = vmatmul.bf16.vlgmr.msra.gmra.mxu1 %v3945_v40 }
 0x407   : > { %4262 = vmatpush.bf16.msra.mxu3 %v5400_v7 }
 0x408   : > { %4234 = vmatpush.bf16.msra.mxu2 %v5388_v9 }
 0x409   : > { %v3146_v53 = vpop.f32.mrf.mxu2  ;;  %v3175_v45 = vpop.f32.mrf.mxu3 }
 0x40a   : > { %v3195_v13 = vadd.f32 %v3146_v53, %v6984_v37  ;;  %v3196_v6 = vadd.f32 %v3175_v45, %v6986_v50  ;;  %v3940_v37 = vld [vmem:[#allocation2 + $0x51] sm:$0xff]  ;;  %v5389_v53 = vld [vmem:[#allocation11 + $0x408] sm:$0xf0] }
 0x40b   : > { %v3328_v21 = vpop.f32.mrf.mxu0  ;;  %v3357_v23 = vpop.f32.mrf.mxu1  ;;  %v3946_v38 = vpack.c.bf16 %v3940_v37, %v3939_v58  ;;  %v3944_v58 = vld [vmem:[#allocation2 + $0x91] sm:$0xff] }
 0x40c   : > { %v7034_v3 = vadd.f32 %v3328_v21, %v3195_v13  ;;  %v7036_v24 = vadd.f32 %v3357_v23, %v3196_v6  ;;  %v5392_v13 = vor.u32 %v5634_v28, %v5389_v53 }
 0x40e   : > { %3876 = vmatmul.bf16.gmra.mxu2 %v3764_v25  ;;  %3905 = vmatmul.bf16.gmra.mxu3 %v3764_v25 }
 0x40f   : > { %4263 = vmatpush.bf16.msra.mxu3 %v5392_v13 }
 0x411   : > { %v3149_v50 = vpop.f32.mrf.mxu2  ;;  %v3178_v33 = vpop.f32.mrf.mxu3 }
 0x412   : > { %v3197_v4 = vadd.f32 %v3149_v50, %v6992_v59  ;;  %v3198_v56 = vadd.f32 %v3178_v33, %v6994_v18 }
 0x413   : > { %v3331_v60 = vpop.f32.mrf.mxu0  ;;  %v3360_v30 = vpop.f32.mrf.mxu1 }
 0x414   : > { %v7040_v0 = vadd.f32 %v3331_v60, %v3197_v4  ;;  %v7042_v8 = vadd.f32 %v3360_v30, %v3198_v56  ;;  %v5752_v4 = vld [vmem:[#allocation2] sm:$0xff] }
 0x415   : > { %v3943_v30 = vld [vmem:[#allocation2 + $0x81] sm:$0xff] }
 0x416   : > { %4058 = vmatmul.bf16.gmra.mxu0 %v3946_v38  ;;  %4087 = vmatmul.bf16.gmra.mxu1 %v3946_v38 }
 0x419   : > { %v3151_v12 = vpop.f32.mrf.mxu2  ;;  %v3180_v59 = vpop.f32.mrf.mxu3 }
 0x41a   : > { %v3199_v18 = vadd.f32 %v3151_v12, %v6996_v20  ;;  %v3200_v39 = vadd.f32 %v3180_v59, %v6998_v32  ;;  %v3942_v20 = vld [vmem:[#allocation2 + $0x71] sm:$0xff] }
 0x41b   : > { %v3333_v40 = vpop.f32.mrf.mxu0  ;;  %v3362_v46 = vpop.f32.mrf.mxu1  ;;  %v3947_v27 = vpack.c.bf16 %v3942_v20, %v3941_v52 }
 0x41c   : > { %v7046_v45 = vadd.f32 %v3333_v40, %v3199_v18  ;;  %v7048_v17 = vadd.f32 %v3362_v46, %v3200_v39 }
 0x41e   : > { %3881 = vmatmul.bf16.gmra.mxu2 %v3765_v51  ;;  %3910 = vmatmul.bf16.gmra.mxu3 %v3765_v51 }
 0x421   : > { %v3154_v32 = vpop.f32.mrf.mxu2  ;;  %v3183_v6 = vpop.f32.mrf.mxu3 }
 0x422   : > { %v3201_v57 = vadd.f32 %v3154_v32, %v7004_v61  ;;  %v3202_v21 = vadd.f32 %v3183_v6, %v7006_v62  ;;  %v3766_v62 = vpack.c.bf16 %v5752_v4, %v6972_v2 }
 0x423   : > { %v3336_v23 = vpop.f32.mrf.mxu0  ;;  %v3365_v43 = vpop.f32.mrf.mxu1 }
 0x424   : > { %v7052_v25 = vadd.f32 %v3336_v23, %v3201_v57  ;;  %v7054_v15 = vadd.f32 %v3365_v43, %v3202_v21  ;;  %v4126_v21 = vld [vmem:[#allocation2 + $0x92] sm:$0xff] }
 0x426   : > { %4063 = vmatmul.bf16.gmra.mxu0 %v3947_v27  ;;  %4092 = vmatmul.bf16.gmra.mxu1 %v3947_v27 }
 0x429   : > { %v3156_v14 = vpop.f32.mrf.mxu2  ;;  %v3185_v36 = vpop.f32.mrf.mxu3 }
 0x42a   : > { %v3203_v37 = vadd.f32 %v3156_v14, %v7008_v48  ;;  %v3204_v50 = vadd.f32 %v3185_v36, %v7010_v5  ;;  %v3948_v5 = vpack.c.bf16 %v3944_v58, %v3943_v30 }
 0x42b   : > { %v3338_v33 = vpop.f32.mrf.mxu0  ;;  %v3367_v61 = vpop.f32.mrf.mxu1 }
 0x42c   : > { %v3385_v56 = vadd.f32 %v3338_v33, %v3203_v37  ;;  %v3386_v60 = vadd.f32 %v3367_v61, %v3204_v50 }
 0x42e   : > { %3886 = vmatmul.bf16.gmra.mxu2 %v3766_v62  ;;  %3915 = vmatmul.bf16.gmra.mxu3 %v3766_v62 }
 0x431   : > { %v3159_v38 = vpop.f32.mrf.mxu2  ;;  %v3188_v42 = vpop.f32.mrf.mxu3 }
 0x432   : > { %v3205_v29 = vadd.f32 %v3159_v38, %v7018_v22  ;;  %v3206_v34 = vadd.f32 %v3188_v42, %v7020_v1 }
 0x433   : > { %v3341_v48 = vpop.f32.mrf.mxu0  ;;  %v3370_v26 = vpop.f32.mrf.mxu1 }
 0x434   : > { %v3387_v11 = vadd.f32 %v3341_v48, %v3205_v29  ;;  %v3388_v7 = vadd.f32 %v3370_v26, %v3206_v34 }
 0x436   : > { %4068 = vmatmul.bf16.gmra.mxu0 %v3948_v5  ;;  %4097 = vmatmul.bf16.gmra.mxu1 %v3948_v5 }
 0x439   : > { %v3161_v2 = vpop.f32.mrf.mxu2  ;;  %v3190_v12 = vpop.f32.mrf.mxu3 }
 0x43a   : > { %v3207_v59 = vadd.f32 %v3161_v2, %v7022_v55  ;;  %v3208_v63 = vadd.f32 %v3190_v12, %v7024_v31 }
 0x43b   : > { %v3343_v18 = vpop.f32.mrf.mxu0  ;;  %v3372_v39 = vpop.f32.mrf.mxu1 }
 0x43c   : > { %v3389_v35 = vadd.f32 %v3343_v18, %v3207_v59  ;;  %v3390_v40 = vadd.f32 %v3372_v39, %v3208_v63 }
 0x43e   : > { %4235 = vmatmul.bf16.vlgmr.msra.gmra.mxu2 %v6944_v49  ;;  %4264 = vmatmul.bf16.vlgmr.msra.gmra.mxu3 %v6944_v49 }
 0x441   : > { %v3508_v22 = vpop.f32.mrf.mxu2  ;;  %v3537_v1 = vpop.f32.mrf.mxu3 }
 0x442   : > { %v7066_v46 = vadd.f32 %v3508_v22, %v7028_v47  ;;  %v7069_v10 = vadd.f32 %v3537_v1, %v7030_v44 }
 0x443   : > { %v3690_v13 = vpop.f32.mrf.mxu0  ;;  %v3719_v20 = vpop.f32.mrf.mxu1 }
 0x449   : > { %v3510_v41 = vpop.f32.mrf.mxu2  ;;  %v3539_v55 = vpop.f32.mrf.mxu3 }
 0x44a   : > { %v7072_v31 = vadd.f32 %v3510_v41, %v7034_v3  ;;  %v7075_v28 = vadd.f32 %v3539_v55, %v7036_v24 }
 0x44b   : > { %v7099_v6 = vpop.f32.mrf.mxu0 }
 0x44e   : > { %4240 = vmatmul.bf16.gmra.mxu2 %v6956_v19  ;;  %4269 = vmatmul.bf16.gmra.mxu3 %v6956_v19 }
 0x451   : > { %v3513_v49 = vpop.f32.mrf.mxu2  ;;  %v3542_v51 = vpop.f32.mrf.mxu3 }
 0x452   : > { %v7080_v47 = vadd.f32 %v3513_v49, %v7040_v0  ;;  %v7083_v44 = vadd.f32 %v3542_v51, %v7042_v8 }
 0x459   : > { %v3515_v9 = vpop.f32.mrf.mxu2  ;;  %v3544_v53 = vpop.f32.mrf.mxu3 }
 0x45a   : > { %v7086_v3 = vadd.f32 %v3515_v9, %v7046_v45  ;;  %v7089_v24 = vadd.f32 %v3544_v53, %v7048_v17  ;;  %v7101_v45 = vpop.f32.mrf.mxu1  ;;  %v3739_v9 = vadd.f32 %v3690_v13, %v7066_v46  ;;  %v3740_v53 = vadd.f32 %v3719_v20, %v7069_v10 }
 0x45b   : > { %v3742_v46 = vadd.f32 %v7101_v45, %v7075_v28 }
 0x45e   : > { %4245 = vmatmul.bf16.gmra.mxu2 %v6968_v16  ;;  %4274 = vmatmul.bf16.gmra.mxu3 %v6968_v16  ;;  %v4130_v16 = vpack.c.bf16 %v4126_v21, %v7014_v54 }
 0x461   : > { %v3518_v19 = vpop.f32.mrf.mxu2  ;;  %v3547_v0 = vpop.f32.mrf.mxu3 }
 0x462   : > { %v7094_v32 = vadd.f32 %v3518_v19, %v7052_v25  ;;  %v7097_v8 = vadd.f32 %v3547_v0, %v7054_v15  ;;  %v7108_v25 = vpop.f32.mrf.mxu0  ;;  %v7110_v15 = vpop.f32.mrf.mxu1 }
 0x469   : > { %v3520_v17 = vpop.f32.mrf.mxu2  ;;  %v3549_v57 = vpop.f32.mrf.mxu3 }
 0x46a   : > { %v7103_v23 = vadd.f32 %v3520_v17, %v3385_v56  ;;  %v7105_v43 = vadd.f32 %v3549_v57, %v3386_v60  ;;  %v7120_v4 = vpop.f32.mrf.mxu0  ;;  %v7122_v54 = vpop.f32.mrf.mxu1  ;;  %v4301_v17 = vld [vmem:[#allocation13] sm:$0x3] }
 0x46b   : > { %v7163_v21 = vperm.slane %v4301_v17, 0 }
 0x46e   : > { %4250 = vmatmul.bf16.gmra.mxu2 %v4130_v16  ;;  %4279 = vmatmul.bf16.gmra.mxu3 %v4130_v16 }
 0x471   : > { %v3523_v52 = vpop.f32.mrf.mxu2  ;;  %v3552_v27 = vpop.f32.mrf.mxu3 }
 0x472   : > { %v7112_v14 = vadd.f32 %v3523_v52, %v3387_v11  ;;  %v7114_v36 = vadd.f32 %v3552_v27, %v3388_v7  ;;  %v7124_v60 = vpop.f32.mrf.mxu0  ;;  %v7126_v30 = vpop.f32.mrf.mxu1  ;;  %v7165_v52 = vperm.slane %v4301_v17, 1  ;;  %v3743_v17 = vadd.f32 %v7108_v25, %v7080_v47 }
 0x479   : > { %v3525_v37 = vpop.f32.mrf.mxu2  ;;  %v3554_v50 = vpop.f32.mrf.mxu3 }
 0x47a   : > { %v7116_v33 = vadd.f32 %v3525_v37, %v3389_v35  ;;  %v7118_v61 = vadd.f32 %v3554_v50, %v3390_v40  ;;  %v7128_v42 = vpop.f32.mrf.mxu0  ;;  %v7130_v29 = vpop.f32.mrf.mxu1  ;;  %v3741_v50 = vadd.f32 %v7099_v6, %v7072_v31 }
 0x481   : > { %v3872_v62 = vpop.f32.mrf.mxu2  ;;  %v3901_v56 = vpop.f32.mrf.mxu3 }
 0x482   : > { %v7136_v11 = vpop.f32.mrf.mxu0  ;;  %v7138_v7 = vpop.f32.mrf.mxu1  ;;  %v3921_v19 = vadd.f32 %v3872_v62, %v3739_v9  ;;  %v3922_v0 = vadd.f32 %v3901_v56, %v3740_v53 }
 0x489   : > { %v3874_v58 = vpop.f32.mrf.mxu2  ;;  %v3903_v38 = vpop.f32.mrf.mxu3 }
 0x48a   : > { %v7144_v59 = vpop.f32.mrf.mxu0  ;;  %v7146_v63 = vpop.f32.mrf.mxu1  ;;  %v3923_v56 = vadd.f32 %v3874_v58, %v3741_v50 }
 0x491   : > { %v3877_v34 = vpop.f32.mrf.mxu2  ;;  %v3906_v48 = vpop.f32.mrf.mxu3 }
 0x492   : > { %v4054_v35 = vpop.f32.mrf.mxu0  ;;  %v4083_v40 = vpop.f32.mrf.mxu1 }
 0x493   : > { %v4103_v57 = vadd.f32 %v4054_v35, %v3921_v19  ;;  %v4104_v16 = vadd.f32 %v4083_v40, %v3922_v0  ;;  %v3924_v35 = vadd.f32 %v3903_v38, %v3742_v46 }
 0x499   : > { %v7132_v26 = vpop.f32.mrf.mxu2  ;;  %v7134_v5 = vpop.f32.mrf.mxu3 }
 0x49a   : > { %v4056_v41 = vpop.f32.mrf.mxu0  ;;  %v4085_v55 = vpop.f32.mrf.mxu1 }
 0x49b   : > { %v4105_v28 = vadd.f32 %v4056_v41, %v3923_v56  ;;  %v4106_v6 = vadd.f32 %v4085_v55, %v3924_v35 }
 0x4a1   : > { %v7140_v2 = vpop.f32.mrf.mxu2  ;;  %v7142_v12 = vpop.f32.mrf.mxu3 }
 0x4a2   : > { %v4059_v10 = vpop.f32.mrf.mxu0  ;;  %v4088_v13 = vpop.f32.mrf.mxu1 }
 0x4a9   : > { %v7148_v18 = vpop.f32.mrf.mxu2  ;;  %v7150_v39 = vpop.f32.mrf.mxu3 }
 0x4aa   : > { %v4061_v46 = vpop.f32.mrf.mxu0 }
 0x4b1   : > { %v7152_v22 = vpop.f32.mrf.mxu2  ;;  %v7154_v1 = vpop.f32.mrf.mxu3 }
 0x4b9   : > { %v7156_v49 = vpop.f32.mrf.mxu2  ;;  %v7158_v51 = vpop.f32.mrf.mxu3 }
 0x4c1   : > { %v4236_v27 = vpop.f32.mrf.mxu2  ;;  %v4265_v37 = vpop.f32.mrf.mxu3 }
 0x4c2   : > { %v4285_v20 = vadd.f32 %v4236_v27, %v4103_v57  ;;  %v4286_v62 = vadd.f32 %v4265_v37, %v4104_v16  ;;  %v3744_v57 = vadd.f32 %v7110_v15, %v7083_v44  ;;  %v3925_v37 = vadd.f32 %v3877_v34, %v3743_v17 }
 0x4c3   : > { %v3745_v34 = vadd.f32 %v7120_v4, %v7086_v3 }
 0x4c4   : > { %v4307_v9 = vadd.f32 %v7163_v21, %v4285_v20  ;;  %v4308_v40 = vadd.f32 %v7165_v52, %v4286_v62  ;;  %v3926_v50 = vadd.f32 %v3906_v48, %v3744_v57  ;;  %v4090_v20 = vpop.f32.mrf.mxu1  ;;  %v4107_v35 = vadd.f32 %v4059_v10, %v3925_v37 }
 0x4c5   : > { %v3746_v48 = vadd.f32 %v7122_v54, %v7089_v24  ;;  %v3748_v57 = vadd.f32 %v7126_v30, %v7097_v8 }
 0x4c6   : > { %vm4323_vm10 = vcmp.ge.f32.partialorder %v4307_v9, 0.0  ;;  %v4339_v53 = vmul.f32 0.01, %v4307_v9  ;;  %vm4324_vm11 = vcmp.ge.f32.partialorder %v4308_v40, 0.0  ;;  %v4340_v19 = vmul.f32 0.01, %v4308_v40 }
 0x4c7   : > { %v4108_v44 = vadd.f32 %v4088_v13, %v3926_v50  ;;  %v4064_v13 = vpop.f32.mrf.mxu0  ;;  %v3930_v50 = vadd.f32 %v7142_v12, %v3748_v57  ;;  %v3749_v12 = vadd.f32 %v7128_v42, %v7103_v23 }
 0x4c8   : > { %v4355_v0 = vsel %vm4323_vm10, %v4307_v9, %v4339_v53  ;;  %v4356_v31 = vsel %vm4324_vm11, %v4308_v40, %v4340_v19 }
 0x4c9   : > { %v4371_v45 = vpack.c.bf16 %v4356_v31, %v4355_v0  ;;  %v4238_v58 = vpop.f32.mrf.mxu2  ;;  %v4267_v38 = vpop.f32.mrf.mxu3  ;;  %v3927_v0 = vadd.f32 %v7132_v26, %v3745_v34  ;;  %v3928_v31 = vadd.f32 %v7134_v5, %v3746_v48  ;;  %v3747_v5 = vadd.f32 %v7124_v60, %v7094_v32 }
 0x4ca   : > { %v4287_v16 = vadd.f32 %v4238_v58, %v4105_v28  ;;  %v4288_v27 = vadd.f32 %v4267_v38, %v4106_v6 }
 0x4cb   : > { %4379 = vst [vmem:[%s7176_s22] sm:$0xff] %v4371_v45  ;;  %v4109_v54 = vadd.f32 %v4061_v46, %v3927_v0  ;;  %v4110_v58 = vadd.f32 %v4090_v20, %v3928_v31  ;;  %v3929_v37 = vadd.f32 %v7140_v2, %v3747_v5 }
 0x4cc   : > { %v4309_v62 = vadd.f32 %v7163_v21, %v4287_v16  ;;  %v4310_v41 = vadd.f32 %v7165_v52, %v4288_v27  ;;  %v4093_v6 = vpop.f32.mrf.mxu1 }
 0x4cd   : > { %v4111_v30 = vadd.f32 %v4064_v13, %v3929_v37 }
 0x4ce   : > { %vm4325_vm12 = vcmp.ge.f32.partialorder %v4309_v62, 0.0  ;;  %v4341_v55 = vmul.f32 0.01, %v4309_v62  ;;  %vm4326_vm13 = vcmp.ge.f32.partialorder %v4310_v41, 0.0  ;;  %v4342_v56 = vmul.f32 0.01, %v4310_v41 }
 0x4cf   : > { %v4066_v32 = vpop.f32.mrf.mxu0 }
 0x4d0   : > { %v4357_v47 = vsel %vm4325_vm12, %v4309_v62, %v4341_v55  ;;  %v4358_v25 = vsel %vm4326_vm13, %v4310_v41, %v4342_v56  ;;  %v4112_v56 = vadd.f32 %v4093_v6, %v3930_v50 }
 0x4d1   : > { %v4372_v15 = vpack.c.bf16 %v4358_v25, %v4357_v47  ;;  %v4241_v9 = vpop.f32.mrf.mxu2  ;;  %v4270_v40 = vpop.f32.mrf.mxu3 }
 0x4d2   : > { %v4289_v53 = vadd.f32 %v4241_v9, %v4107_v35  ;;  %v4290_v19 = vadd.f32 %v4270_v40, %v4108_v44  ;;  %v3750_v35 = vadd.f32 %v7130_v29, %v7105_v43  ;;  %v3931_v9 = vadd.f32 %v7148_v18, %v3749_v12 }
 0x4d3   : > { %4380 = vst [vmem:[%s7176_s22 + $0x8] sm:$0xff] %v4372_v15  ;;  %v3751_v18 = vadd.f32 %v7136_v11, %v7112_v14 }
 0x4d4   : > { %v4311_v28 = vadd.f32 %v7163_v21, %v4289_v53  ;;  %v4312_v10 = vadd.f32 %v7165_v52, %v4290_v19  ;;  %v4095_v60 = vpop.f32.mrf.mxu1  ;;  %v3932_v40 = vadd.f32 %v7150_v39, %v3750_v35  ;;  %v4113_v0 = vadd.f32 %v4066_v32, %v3931_v9 }
 0x4d5   : > { %v3752_v39 = vadd.f32 %v7138_v7, %v7114_v36 }
 0x4d6   : > { %vm4327_vm14 = vcmp.ge.f32.partialorder %v4311_v28, 0.0  ;;  %v4343_v45 = vmul.f32 0.01, %v4311_v28  ;;  %vm4328_vm15 = vcmp.ge.f32.partialorder %v4312_v10, 0.0  ;;  %v4344_v3 = vmul.f32 0.01, %v4312_v10 }
 0x4d7   : > { %v4114_v43 = vadd.f32 %v4095_v60, %v3932_v40  ;;  %v4069_v6 = vpop.f32.mrf.mxu0 }
 0x4d8   : > { %v4359_v4 = vsel %vm4327_vm14, %v4311_v28, %v4343_v45  ;;  %v4360_v24 = vsel %vm4328_vm15, %v4312_v10, %v4344_v3  ;;  %v3933_v3 = vadd.f32 %v7152_v22, %v3751_v18  ;;  %v3753_v22 = vadd.f32 %v7144_v59, %v7116_v33 }
 0x4d9   : > { %v4373_v38 = vpack.c.bf16 %v4360_v24, %v4359_v4  ;;  %v4243_v17 = vpop.f32.mrf.mxu2  ;;  %v4272_v26 = vpop.f32.mrf.mxu3  ;;  %v3934_v4 = vadd.f32 %v7154_v1, %v3752_v39  ;;  %v3754_v1 = vadd.f32 %v7146_v63, %v7118_v61 }
 0x4da   : > { %v4291_v16 = vadd.f32 %v4243_v17, %v4109_v54  ;;  %v4292_v27 = vadd.f32 %v4272_v26, %v4110_v58  ;;  %v4115_v7 = vadd.f32 %v4069_v6, %v3933_v3 }
 0x4db   : > { %4381 = vst [vmem:[%s7176_s22 + $0x10] sm:$0xff] %v4373_v38  ;;  %v3936_v37 = vadd.f32 %v7158_v51, %v3754_v1 }
 0x4dc   : > { %v4313_v62 = vadd.f32 %v7163_v21, %v4291_v16  ;;  %v4314_v46 = vadd.f32 %v7165_v52, %v4292_v27  ;;  %v4098_v45 = vpop.f32.mrf.mxu1  ;;  %v3935_v27 = vadd.f32 %v7156_v49, %v3753_v22 }
 0x4dd   : > { %v4116_v38 = vadd.f32 %v4098_v45, %v3934_v4 }
 0x4de   : > { %vm4329_vm0 = vcmp.ge.f32.partialorder %v4313_v62, 0.0  ;;  %v4345_v20 = vmul.f32 0.01, %v4313_v62  ;;  %vm4330_vm1 = vcmp.ge.f32.partialorder %v4314_v46, 0.0  ;;  %v4346_v41 = vmul.f32 0.01, %v4314_v46 }
 0x4e0   : > { %v4361_v55 = vsel %vm4329_vm0, %v4313_v62, %v4345_v20  ;;  %v4362_v8 = vsel %vm4330_vm1, %v4314_v46, %v4346_v41  ;;  %v4071_v46 = vpop.f32.mrf.mxu0 }
 0x4e1   : > { %v4374_v47 = vpack.c.bf16 %v4362_v8, %v4361_v55  ;;  %v4246_v25 = vpop.f32.mrf.mxu2  ;;  %v4275_v2 = vpop.f32.mrf.mxu3  ;;  %v4117_v63 = vadd.f32 %v4071_v46, %v3935_v27 }
 0x4e2   : > { %v4293_v44 = vadd.f32 %v4246_v25, %v4111_v30  ;;  %v4294_v15 = vadd.f32 %v4275_v2, %v4112_v56 }
 0x4e3   : > { %4382 = vst [vmem:[%s7176_s22 + $0x18] sm:$0xff] %v4374_v47 }
 0x4e4   : > { %v4315_v34 = vadd.f32 %v7163_v21, %v4293_v44  ;;  %v4316_v48 = vadd.f32 %v7165_v52, %v4294_v15  ;;  %v4100_v20 = vpop.f32.mrf.mxu1 }
 0x4e5   : > { %v4118_v32 = vadd.f32 %v4100_v20, %v3936_v37 }
 0x4e6   : > { %vm4331_vm2 = vcmp.ge.f32.partialorder %v4315_v34, 0.0  ;;  %v4347_v53 = vmul.f32 0.01, %v4315_v34  ;;  %vm4332_vm3 = vcmp.ge.f32.partialorder %v4316_v48, 0.0  ;;  %v4348_v19 = vmul.f32 0.01, %v4316_v48 }
 0x4e8   : > { %v4363_v23 = vsel %vm4331_vm2, %v4315_v34, %v4347_v53  ;;  %v4364_v42 = vsel %vm4332_vm3, %v4316_v48, %v4348_v19 }
 0x4e9   : > { %v4375_v29 = vpack.c.bf16 %v4364_v42, %v4363_v23  ;;  %v4248_v31 = vpop.f32.mrf.mxu2  ;;  %v4277_v28 = vpop.f32.mrf.mxu3 }
 0x4ea   : > { %v4295_v10 = vadd.f32 %v4248_v31, %v4113_v0  ;;  %v4296_v13 = vadd.f32 %v4277_v28, %v4114_v43 }
 0x4eb   : > { %4383 = vst [vmem:[%s7176_s22 + $0x20] sm:$0xff] %v4375_v29 }
 0x4ec   : > { %v4317_v24 = vadd.f32 %v7163_v21, %v4295_v10  ;;  %v4318_v54 = vadd.f32 %v7165_v52, %v4296_v13 }
 0x4ee   : > { %vm4333_vm4 = vcmp.ge.f32.partialorder %v4317_v24, 0.0  ;;  %v4349_v58 = vmul.f32 0.01, %v4317_v24  ;;  %vm4334_vm5 = vcmp.ge.f32.partialorder %v4318_v54, 0.0  ;;  %v4350_v14 = vmul.f32 0.01, %v4318_v54 }
 0x4f0   : > { %v4365_v11 = vsel %vm4333_vm4, %v4317_v24, %v4349_v58  ;;  %v4366_v36 = vsel %vm4334_vm5, %v4318_v54, %v4350_v14 }
 0x4f1   : > { %v4376_v17 = vpack.c.bf16 %v4366_v36, %v4365_v11  ;;  %v4251_v26 = vpop.f32.mrf.mxu2  ;;  %v4280_v5 = vpop.f32.mrf.mxu3 }
 0x4f2   : > { %v4297_v57 = vadd.f32 %v4251_v26, %v4115_v7  ;;  %v4298_v16 = vadd.f32 %v4280_v5, %v4116_v38 }
 0x4f3   : > { %4384 = vst [vmem:[%s7176_s22 + $0x28] sm:$0xff] %v4376_v17 }
 0x4f4   : > { %v4319_v50 = vadd.f32 %v7163_v21, %v4297_v57  ;;  %v4320_v62 = vadd.f32 %v7165_v52, %v4298_v16 }
 0x4f6   : > { %vm4335_vm6 = vcmp.ge.f32.partialorder %v4319_v50, 0.0  ;;  %v4351_v41 = vmul.f32 0.01, %v4319_v50  ;;  %vm4336_vm7 = vcmp.ge.f32.partialorder %v4320_v62, 0.0  ;;  %v4352_v33 = vmul.f32 0.01, %v4320_v62 }
 0x4f8   : > { %v4367_v59 = vsel %vm4335_vm6, %v4319_v50, %v4351_v41  ;;  %v4368_v61 = vsel %vm4336_vm7, %v4320_v62, %v4352_v33 }
 0x4f9   : > { %v4377_v60 = vpack.c.bf16 %v4368_v61, %v4367_v59  ;;  %v4253_v49 = vpop.f32.mrf.mxu2  ;;  %v4282_v55 = vpop.f32.mrf.mxu3 }
 0x4fa   : > { %v4299_v51 = vadd.f32 %v4253_v49, %v4117_v63  ;;  %v4300_v8 = vadd.f32 %v4282_v55, %v4118_v32 }
 0x4fb   : > { %4385 = vst [vmem:[%s7176_s22 + $0x30] sm:$0xff] %v4377_v60 }
 0x4fc   : > { %v4321_v30 = vadd.f32 %v7163_v21, %v4299_v51  ;;  %v4322_v56 = vadd.f32 %v7165_v52, %v4300_v8 }
 0x4fe   : > { %vm4337_vm8 = vcmp.ge.f32.partialorder %v4321_v30, 0.0  ;;  %v4353_v47 = vmul.f32 0.01, %v4321_v30  ;;  %vm4338_vm9 = vcmp.ge.f32.partialorder %v4322_v56, 0.0  ;;  %v4354_v25 = vmul.f32 0.01, %v4322_v56 }
 0x500   : > { %v4369_v2 = vsel %vm4337_vm8, %v4321_v30, %v4353_v47  ;;  %v4370_v12 = vsel %vm4338_vm9, %v4322_v56, %v4354_v25 }
 0x501   : > { %v4378_v35 = vpack.c.bf16 %v4370_v12, %v4369_v2 }
 0x503   : > { %4386 = vst [vmem:[%s7176_s22 + $0x38] sm:$0xff] %v4378_v35 }
 0x504 PF: > { %s23_s30 = sadd.s32 1, %s5985_s30  }
 0x505   : > { %p20_p8 = scmp.ge.s32.totalorder %s23_s30, 4  }
 0x507   :  { %22 = sbr.rel (!%p20_p8) target bundleno = 4 (0x4), region = 119 }
 0x50c   :  { %4411 = vsyncpa [#allocation4], 1 }
 0x50d   :  { %4413 = vsyncpa [#allocation4 + $0x1], 1 }
 0x50e   :  { %4414 = vsyncpa [#allocation6], 1 }
 0x50f   :  { %4415 = vsyncpa [#allocation9], 1 }
 0x510   :  { %4416 = vsyncpa [#allocation12], 1 }

// kernel: convdqn_forward.3
= control target key start
LH: loop header
LB: loop body
LE: loop exit
PB: predicated region body
PF: predicated region fallthrough
CT: control target
= control target key end

     0   :  { %10 = vsyncpa [#allocation4], 0  ;;  %s9048_s0 = inlined_call_operand.vmem [shape: bf16[2,16384], index: 0, kind: input, shape index: {}]   ;;  %s9049_s1 = inlined_call_operand.hbm [shape: bf16[16384,512], index: 1, kind: input, shape index: {}]   ;;  %s9050_s2 = inlined_call_operand.hbm [shape: f32[1,512], index: 2, kind: input, shape index: {}]   ;;  %s9051_s3 = inlined_call_operand.vmem [shape: bf16[512,8], index: 3, kind: input, shape index: {}]   ;;  %s9052_s4 = inlined_call_operand.hbm [shape: f32[1,8], index: 4, kind: input, shape index: {}]   ;;  %s9053_s5 = inlined_call_operand.hbm [shape: f32[2,8], index: 5, kind: output, shape index: {}]  }
   0x1   :  { %12 = vsyncpa [#allocation4 + $0x1], 0 }
   0x2   :  { %13 = vsyncpa [#allocation7], 0 }
   0x3   :  { %14 = vsyncpa [#allocation5], 0  ;;  %s7719_s18 = smov 0   ;;  %s7721_s19 = smov 0  }
   0x4   :  { %s7723_s20 = smov 0   ;;  %s7725_s21 = smov 0  }
   0x5 LB: > { %s7738_s22 = sadd.s32 4294967295, %s7681_s21   ;;  %s7741_s23 = sadd.s32 1, %s7681_s21   ;;  %s7681_s21 = sphi %s7725_s21, %s9061_s21   ;;  %s7677_s20 = sphi %s7723_s20, %s9060_s20   ;;  %s7673_s19 = sphi %s7721_s19, %s9059_s19   ;;  %s7669_s18 = sphi %s7719_s18, %s9058_s18  }
   0x6   : > { %s50_s24 = ssub.s32 %s7681_s21, %s7741_s23  ;;  %s53_s25 = sadd.s32 1, %s7677_s20 }
   0x7   : > { %p51_p0 = scmp.eq.s32.totalorder %s50_s24, 0  ;;  %p60_p1 = scmp.ne.s32.totalorder %s7677_s20, %s7673_s19 }
   0x8   : > { %p61_p2 = scmp.eq.s32.totalorder %s7681_s21, 0  ;;  %p66_p3 = scmp.ne.s32.totalorder %s7673_s19, %s7669_s18 }
   0x9   : > { %s7751_s26 = scalar_select %p51_p0, %s7677_s20, %s53_s25  }
   0xa   : > { %p7753_p4 = por %p61_p2, %p60_p1  ;;  %p67_p5 = scmp.eq.s32.totalorder %s7738_s22, 0 }
   0xb   : > { %p4685_p6 = scmp.ge.s32.totalorder %s7681_s21, 1  ;;  %p161_p7 = scmp.lt.s32.totalorder %s7681_s21, 9 }
   0xc   : > { %p7762_p8 = por %p67_p5, %p66_p3  ;;  %p4686_p9 = scmp.ne.s32.totalorder %s7738_s22, 0 }
   0xd   : > { %p7767_p10 = pnand %p4685_p6, %p161_p7  ;;  %s173_s7 = sshll.u32 %s9050_s2, 4  ;;  %s174_s7 = int_to_ptr.hbm [resolvable:$true] %s173_s7 }
   0xe   : > { %s7683_s8 = smov [#allocation6]   ;;  %p7453_p13 = scmp.lt.s32.totalorder %s7681_s21, 8 }
   0xf   : > { %p7440_p11 = pneg %p7767_p10  ;;  %s175_s9 = sshll.u32 %s7683_s8, 4  ;;  %s176_s9 = int_to_ptr.vmem [resolvable:$true] %s175_s9 }
  0x10   : > { %s188_s12 = sshll.u32 %s9052_s4, 4  ;;  %p7784_p0 = pnand %p7453_p13, %p7753_p4  ;;  %s189_s12 = int_to_ptr.hbm [resolvable:$true] %s188_s12 }
  0x11   : > { %p7441_p12 = pnand %p7440_p11, %p67_p5  ;;  %s7684_s14 = smov [#allocation8]  }
  0x12   : > { %s190_s15 = sshll.u32 %s7684_s14, 4  ;;  %s209_s16 = sand.u32 1, %s7677_s20   ;;  %s191_s15 = int_to_ptr.vmem [resolvable:$true] %s190_s15 }
  0x13   : > { %7443 = dma.hbm_to_vmem [thread:$0]  (!%p7441_p12), %s174_s7, 64, %s176_s9, [#allocation7]  }
  0x14   : > { %7446 = dma.hbm_to_vmem [thread:$0]  (!%p7441_p12), %s189_s12, 16, %s191_s15, [#allocation7]  }
  0x15   : > { %s4689_s17 = sshll.u32 %s209_s16, 12  ;;  %s6881_s18 = sshll.u32 %s7681_s21, 12 }
  0x16   : > { %s219_s30 = scalar_lea.hbm %s9049_s1, %s6881_s18  ;;  %s213_s27 = scalar_lea.vmem [#allocation3], %s4689_s17 }
  0x17   : > { %s220_s6 = sshll.u32 %s219_s30, 4  ;;  %s222_s8 = sshll.u32 %s213_s27, 4  ;;  %s221_s6 = int_to_ptr.hbm [resolvable:$true] %s220_s6  ;;  %s223_s8 = int_to_ptr.vmem [resolvable:$true] %s222_s8 }
  0x18   : > { %s210_s10 = scalar_lea.sflag [#allocation4], %s209_s16  ;;  %s7581_s7 = sshra.s32 %s221_s6, 4  ;;  %s7582_s7 = int_to_ptr.hbm [resolvable:$true] %s7581_s7 }
  0x19   : > { %s7583_s9 = scalar_lea.hbm %s7582_s7, 4096  ;;  %p7585_p2 = pneg %p7784_p0 }
  0x1a   : > { %p7584_p1 = scmp.ne.s32.totalorder %s7582_s7, %s7583_s9  ;;  %s7588_s12 = scalar_lea.hbm %s9049_s1, 32768 }
  0x1b   : > { %p7589_p6 = scmp.lt.s32.totalorder %s7582_s7, %s9049_s1  ;;  %p7590_p7 = scmp.lt.s32.totalorder %s7588_s12, %s7583_s9 }
  0x1c   : > { %p7586_p3 = pnand %p7585_p2, %p7584_p1 }
  0x1d   : > { %p7591_p11 = por %p7590_p7, %p7589_p6 }
  0x1e   : > { %p7587_p4 = pneg %p7586_p3 }
  0x20   : > { %p7592_p12 = pnand %p7591_p11, %p7587_p4 }
  0x22   : > { %7595 = shalt.err (!%p7592_p12)
}
  0x23   : > { %s7685_s16 = smov 256   ;;  %s7686_s17 = smov 16  }
  0x24   : > { %7450 = dma.hbm_to_vmem [thread:$0]  (!%p7784_p0), %s221_s6, 65536, %s223_s8, %s210_s10, %s7685_s16, %s7685_s16, %s7686_s17  }
  0x25   : > { %234 = sbr.rel (%p7767_p10) target bundleno = 897 (0x381), region = 40  ;;  %s236_s18 = sand.u32 (!%p7767_p10), 1, %s7673_s19  }
  0x26   : > { %s4694_s24 = sshll.u32 (!%p7767_p10), %s236_s18, 12  ;;  %s237_s25 = scalar_lea.sflag (!%p7767_p10), [#allocation4], %s236_s18 }
  0x27   : > { %s7806_s30 = scalar_lea.vmem (!%p7767_p10), [#allocation3], %s4694_s24 }
  0x2a   : > { %7656 = dma.done.wait (%p7762_p8), %s237_s25, 65536  }
  0x2b   : > { %7658 = vsyncadd (%p7762_p8), %s237_s25, 4294901760 }
  0x2c   : > { %7660 = dma.done.wait (%p67_p5), [#allocation7], 80  }
  0x2d   : > { %7662 = vsyncadd (%p67_p5), [#allocation7], 4294967216  ;;  %s4697_s29 = sshll.u32 %s7738_s22, 4  ;;  %286 = sbr.rel (%p4686_p9) target bundleno = 52 (0x34), region = 56 }
  0x2e   : > { %p278_p10 = scmp.lt.s32.totalorder %s4697_s29, 127 }
  0x30   : > { %s9063_s29 = smov (!%p278_p10, %s4697_s29), 127 }
  0x31   : > { %s7820_s27 = scalar_lea.vmem %s9048_s0, %s9063_s29 }
  0x32   : > { %v7687_v0 = vmov 0.0  }
  0x33   : > { %287 = vst [vmem:[#allocation2] sm:$0xff] %v7687_v0 }
  0x34 PF: > { %v4813_v1 = vld [vmem:[%s7806_s30 + $0xe0] sm:$0xf]  ;;  %v6912_v2 = vld [vmem:[%s7806_s30 + $0xec] sm:$0xf0]  ;;  %vm4238_vm0 = vcmask 1041408   ;;  %vm4240_vm1 = vcmask 1045508  }
  0x35   : > { %v4941_v3 = vld [vmem:[%s7806_s30 + $0x1e0] sm:$0xf]  ;;  %v4814_v4 = vor.u32 %v6912_v2, %v4813_v1  ;;  %v6944_v5 = vld [vmem:[%s7806_s30 + $0x1ec] sm:$0xf0]  ;;  %vm4242_vm2 = vcmask 1043456   ;;  %p6747_p5 = scmp.ne.s32.totalorder %s7738_s22, 7 }
  0x36   : > { %v5069_v6 = vld [vmem:[%s7806_s30 + $0x2e0] sm:$0xf]  ;;  %v6976_v7 = vld [vmem:[%s7806_s30 + $0x2ec] sm:$0xf0]  ;;  %v4942_v8 = vor.u32 %v6944_v5, %v4941_v3 }
  0x37   : > { %v5070_v9 = vor.u32 %v6976_v7, %v5069_v6  ;;  %v5197_v10 = vld [vmem:[%s7806_s30 + $0x3e0] sm:$0xf]  ;;  %v7008_v11 = vld [vmem:[%s7806_s30 + $0x3ec] sm:$0xf0]  ;;  %3399 = vmatpush.bf16.msra.mxu0 %v4814_v4 }
  0x38   : > { %v4797_v12 = vld [vmem:[%s7806_s30 + $0xc0] sm:$0xf]  ;;  %v5198_v13 = vor.u32 %v7008_v11, %v5197_v10  ;;  %v6908_v14 = vld [vmem:[%s7806_s30 + $0xcc] sm:$0xf0]  ;;  %3412 = vmatpush.bf16.msra.mxu1 %v4942_v8 }
  0x39   : > { %v4925_v15 = vld [vmem:[%s7806_s30 + $0x1c0] sm:$0xf]  ;;  %v6940_v16 = vld [vmem:[%s7806_s30 + $0x1cc] sm:$0xf0]  ;;  %3425 = vmatpush.bf16.msra.mxu2 %v5070_v9  ;;  %v4798_v17 = vor.u32 %v6908_v14, %v4797_v12 }
  0x3a   : > { %v4926_v18 = vor.u32 %v6940_v16, %v4925_v15  ;;  %v5053_v19 = vld [vmem:[%s7806_s30 + $0x2c0] sm:$0xf]  ;;  %v6972_v20 = vld [vmem:[%s7806_s30 + $0x2cc] sm:$0xf0]  ;;  %3438 = vmatpush.bf16.msra.mxu3 %v5198_v13 }
  0x3b   : > { %v5181_v21 = vld [vmem:[%s7806_s30 + $0x3c0] sm:$0xf]  ;;  %v5054_v22 = vor.u32 %v6972_v20, %v5053_v19  ;;  %v7004_v23 = vld [vmem:[%s7806_s30 + $0x3cc] sm:$0xf0]  ;;  %3400 = vmatpush.bf16.msra.mxu0 %v4798_v17 }
  0x3c   : > { %v4781_v24 = vld [vmem:[%s7806_s30 + $0xa0] sm:$0xf]  ;;  %v6904_v25 = vld [vmem:[%s7806_s30 + $0xac] sm:$0xf0]  ;;  %v5182_v26 = vor.u32 %v7004_v23, %v5181_v21  ;;  %3413 = vmatpush.bf16.msra.mxu1 %v4926_v18 }
  0x3d   : > { %v4909_v27 = vld [vmem:[%s7806_s30 + $0x1a0] sm:$0xf]  ;;  %v6936_v28 = vld [vmem:[%s7806_s30 + $0x1ac] sm:$0xf0]  ;;  %v4782_v30 = vor.u32 %v6904_v25, %v4781_v24  ;;  %3426 = vmatpush.bf16.msra.mxu2 %v5054_v22 }
  0x3e   : > { %v5037_v29 = vld [vmem:[%s7806_s30 + $0x2a0] sm:$0xf]  ;;  %v6968_v31 = vld [vmem:[%s7806_s30 + $0x2ac] sm:$0xf0]  ;;  %v4910_v34 = vor.u32 %v6936_v28, %v4909_v27  ;;  %3439 = vmatpush.bf16.msra.mxu3 %v5182_v26 }
  0x3f   : > { %v5165_v32 = vld [vmem:[%s7806_s30 + $0x3a0] sm:$0xf]  ;;  %v7000_v33 = vld [vmem:[%s7806_s30 + $0x3ac] sm:$0xf0]  ;;  %v5038_v35 = vor.u32 %v6968_v31, %v5037_v29  ;;  %3401 = vmatpush.bf16.msra.mxu0 %v4782_v30 }
  0x40   : > { %v4765_v36 = vld [vmem:[%s7806_s30 + $0x80] sm:$0xf]  ;;  %v6900_v37 = vld [vmem:[%s7806_s30 + $0x8c] sm:$0xf0]  ;;  %v5166_v39 = vor.u32 %v7000_v33, %v5165_v32  ;;  %3414 = vmatpush.bf16.msra.mxu1 %v4910_v34 }
  0x41   : > { %v4893_v38 = vld [vmem:[%s7806_s30 + $0x180] sm:$0xf]  ;;  %v6932_v40 = vld [vmem:[%s7806_s30 + $0x18c] sm:$0xf0]  ;;  %v4766_v45 = vor.u32 %v6900_v37, %v4765_v36  ;;  %3427 = vmatpush.bf16.msra.mxu2 %v5038_v35 }
  0x42   : > { %v5021_v41 = vld [vmem:[%s7806_s30 + $0x280] sm:$0xf]  ;;  %v6964_v42 = vld [vmem:[%s7806_s30 + $0x28c] sm:$0xf0]  ;;  %v4894_v46 = vor.u32 %v6932_v40, %v4893_v38  ;;  %3440 = vmatpush.bf16.msra.mxu3 %v5166_v39 }
  0x43   : > { %v5149_v43 = vld [vmem:[%s7806_s30 + $0x380] sm:$0xf]  ;;  %v6996_v44 = vld [vmem:[%s7806_s30 + $0x38c] sm:$0xf0]  ;;  %v5022_v47 = vor.u32 %v6964_v42, %v5021_v41  ;;  %3402 = vmatpush.bf16.msra.mxu0 %v4766_v45 }
  0x44   : > { %v4749_v48 = vld [vmem:[%s7806_s30 + $0x60] sm:$0xf]  ;;  %v6896_v49 = vld [vmem:[%s7806_s30 + $0x6c] sm:$0xf0]  ;;  %v5150_v51 = vor.u32 %v6996_v44, %v5149_v43  ;;  %3415 = vmatpush.bf16.msra.mxu1 %v4894_v46 }
  0x45   : > { %v4877_v50 = vld [vmem:[%s7806_s30 + $0x160] sm:$0xf]  ;;  %v6928_v52 = vld [vmem:[%s7806_s30 + $0x16c] sm:$0xf0]  ;;  %v4750_v57 = vor.u32 %v6896_v49, %v4749_v48  ;;  %3428 = vmatpush.bf16.msra.mxu2 %v5022_v47 }
  0x46   : > { %v5005_v53 = vld [vmem:[%s7806_s30 + $0x260] sm:$0xf]  ;;  %v6960_v54 = vld [vmem:[%s7806_s30 + $0x26c] sm:$0xf0]  ;;  %v4878_v58 = vor.u32 %v6928_v52, %v4877_v50  ;;  %3441 = vmatpush.bf16.msra.mxu3 %v5150_v51 }
  0x47   : > { %v5133_v55 = vld [vmem:[%s7806_s30 + $0x360] sm:$0xf]  ;;  %v6992_v56 = vld [vmem:[%s7806_s30 + $0x36c] sm:$0xf0]  ;;  %v5006_v59 = vor.u32 %v6960_v54, %v5005_v53  ;;  %3403 = vmatpush.bf16.msra.mxu0 %v4750_v57 }
  0x48   : > { %v4733_v60 = vld [vmem:[%s7806_s30 + $0x40] sm:$0xf]  ;;  %v6892_v61 = vld [vmem:[%s7806_s30 + $0x4c] sm:$0xf0]  ;;  %v5134_v63 = vor.u32 %v6992_v56, %v5133_v55  ;;  %3416 = vmatpush.bf16.msra.mxu1 %v4878_v58 }
  0x49   : > { %v4861_v62 = vld [vmem:[%s7806_s30 + $0x140] sm:$0xf]  ;;  %v6924_v0 = vld [vmem:[%s7806_s30 + $0x14c] sm:$0xf0]  ;;  %v4734_v5 = vor.u32 %v6892_v61, %v4733_v60  ;;  %3429 = vmatpush.bf16.msra.mxu2 %v5006_v59 }
  0x4a   : > { %v4989_v1 = vld [vmem:[%s7806_s30 + $0x240] sm:$0xf]  ;;  %v6956_v2 = vld [vmem:[%s7806_s30 + $0x24c] sm:$0xf0]  ;;  %v4862_v6 = vor.u32 %v6924_v0, %v4861_v62  ;;  %3442 = vmatpush.bf16.msra.mxu3 %v5134_v63 }
  0x4b   : > { %v5117_v3 = vld [vmem:[%s7806_s30 + $0x340] sm:$0xf]  ;;  %v6988_v4 = vld [vmem:[%s7806_s30 + $0x34c] sm:$0xf0]  ;;  %v4990_v7 = vor.u32 %v6956_v2, %v4989_v1  ;;  %3404 = vmatpush.bf16.msra.mxu0 %v4734_v5 }
  0x4c   : > { %v4717_v8 = vld [vmem:[%s7806_s30 + $0x20] sm:$0xf]  ;;  %v6888_v9 = vld [vmem:[%s7806_s30 + $0x2c] sm:$0xf0]  ;;  %v5118_v11 = vor.u32 %v6988_v4, %v5117_v3  ;;  %3417 = vmatpush.bf16.msra.mxu1 %v4862_v6 }
  0x4d   : > { %v4845_v10 = vld [vmem:[%s7806_s30 + $0x120] sm:$0xf]  ;;  %v6920_v12 = vld [vmem:[%s7806_s30 + $0x12c] sm:$0xf0]  ;;  %v4718_v17 = vor.u32 %v6888_v9, %v4717_v8  ;;  %3430 = vmatpush.bf16.msra.mxu2 %v4990_v7 }
  0x4e   : > { %v4973_v13 = vld [vmem:[%s7806_s30 + $0x220] sm:$0xf]  ;;  %v6952_v14 = vld [vmem:[%s7806_s30 + $0x22c] sm:$0xf0]  ;;  %v4846_v20 = vor.u32 %v6920_v12, %v4845_v10  ;;  %3443 = vmatpush.bf16.msra.mxu3 %v5118_v11 }
  0x4f   : > { %v5101_v15 = vld [vmem:[%s7806_s30 + $0x320] sm:$0xf]  ;;  %v6984_v16 = vld [vmem:[%s7806_s30 + $0x32c] sm:$0xf0]  ;;  %v4974_v21 = vor.u32 %v6952_v14, %v4973_v13  ;;  %3405 = vmatpush.bf16.msra.mxu0 %v4718_v17 }
  0x50   : > { %v4701_v18 = vld [vmem:[%s7806_s30] sm:$0xf]  ;;  %v6884_v19 = vld [vmem:[%s7806_s30 + $0xc] sm:$0xf0]  ;;  %v5102_v25 = vor.u32 %v6984_v16, %v5101_v15  ;;  %3418 = vmatpush.bf16.msra.mxu1 %v4846_v20 }
  0x51   : > { %v4829_v22 = vld [vmem:[%s7806_s30 + $0x100] sm:$0xf]  ;;  %v6916_v23 = vld [vmem:[%s7806_s30 + $0x10c] sm:$0xf0]  ;;  %v4702_v32 = vor.u32 %v6884_v19, %v4701_v18  ;;  %3431 = vmatpush.bf16.msra.mxu2 %v4974_v21 }
  0x52   : > { %v4957_v24 = vld [vmem:[%s7806_s30 + $0x200] sm:$0xf]  ;;  %v6948_v26 = vld [vmem:[%s7806_s30 + $0x20c] sm:$0xf0]  ;;  %v4830_v36 = vor.u32 %v6916_v23, %v4829_v22  ;;  %3444 = vmatpush.bf16.msra.mxu3 %v5102_v25 }
  0x53   : > { %v5085_v27 = vld [vmem:[%s7806_s30 + $0x300] sm:$0xf]  ;;  %v6980_v28 = vld [vmem:[%s7806_s30 + $0x30c] sm:$0xf0]  ;;  %v4958_v37 = vor.u32 %v6948_v26, %v4957_v24  ;;  %3406 = vmatpush.bf16.msra.mxu0 %v4702_v32 }
  0x54   : > { %v5325_v29 = vld [vmem:[%s7806_s30 + $0x4e0] sm:$0xf]  ;;  %v7040_v30 = vld [vmem:[%s7806_s30 + $0x4ec] sm:$0xf0]  ;;  %v5086_v40 = vor.u32 %v6980_v28, %v5085_v27  ;;  %3419 = vmatpush.bf16.msra.mxu1 %v4830_v36 }
  0x55   : > { %v5453_v31 = vld [vmem:[%s7806_s30 + $0x5e0] sm:$0xf]  ;;  %v7072_v33 = vld [vmem:[%s7806_s30 + $0x5ec] sm:$0xf0]  ;;  %v5326_v41 = vor.u32 %v7040_v30, %v5325_v29  ;;  %3432 = vmatpush.bf16.msra.mxu2 %v4958_v37 }
  0x56   : > { %v5581_v34 = vld [vmem:[%s7806_s30 + $0x6e0] sm:$0xf]  ;;  %v7104_v35 = vld [vmem:[%s7806_s30 + $0x6ec] sm:$0xf0]  ;;  %v5454_v42 = vor.u32 %v7072_v33, %v5453_v31  ;;  %3445 = vmatpush.bf16.msra.mxu3 %v5086_v40 }
  0x57   : > { %v5709_v38 = vld [vmem:[%s7806_s30 + $0x7e0] sm:$0xf]  ;;  %v7136_v39 = vld [vmem:[%s7806_s30 + $0x7ec] sm:$0xf0]  ;;  %v5582_v43 = vor.u32 %v7104_v35, %v5581_v34  ;;  %3451 = vmatpush.bf16.msrb.mxu0 %v5326_v41 }
  0x58   : > { %v5309_v44 = vld [vmem:[%s7806_s30 + $0x4c0] sm:$0xf]  ;;  %v7036_v45 = vld [vmem:[%s7806_s30 + $0x4cc] sm:$0xf0]  ;;  %v5710_v47 = vor.u32 %v7136_v39, %v5709_v38  ;;  %3464 = vmatpush.bf16.msrb.mxu1 %v5454_v42 }
  0x59   : > { %v5437_v46 = vld [vmem:[%s7806_s30 + $0x5c0] sm:$0xf]  ;;  %v7068_v48 = vld [vmem:[%s7806_s30 + $0x5cc] sm:$0xf0]  ;;  %v5310_v53 = vor.u32 %v7036_v45, %v5309_v44  ;;  %3477 = vmatpush.bf16.msrb.mxu2 %v5582_v43 }
  0x5a   : > { %v5565_v49 = vld [vmem:[%s7806_s30 + $0x6c0] sm:$0xf]  ;;  %v7100_v50 = vld [vmem:[%s7806_s30 + $0x6cc] sm:$0xf0]  ;;  %v5438_v56 = vor.u32 %v7068_v48, %v5437_v46  ;;  %3490 = vmatpush.bf16.msrb.mxu3 %v5710_v47 }
  0x5b   : > { %v5693_v51 = vld [vmem:[%s7806_s30 + $0x7c0] sm:$0xf]  ;;  %v7132_v52 = vld [vmem:[%s7806_s30 + $0x7cc] sm:$0xf0]  ;;  %v5566_v57 = vor.u32 %v7100_v50, %v5565_v49  ;;  %3452 = vmatpush.bf16.msrb.mxu0 %v5310_v53 }
  0x5c   : > { %v5293_v54 = vld [vmem:[%s7806_s30 + $0x4a0] sm:$0xf]  ;;  %v7032_v55 = vld [vmem:[%s7806_s30 + $0x4ac] sm:$0xf0]  ;;  %v5694_v61 = vor.u32 %v7132_v52, %v5693_v51  ;;  %3465 = vmatpush.bf16.msrb.mxu1 %v5438_v56 }
  0x5d   : > { %v5421_v58 = vld [vmem:[%s7806_s30 + $0x5a0] sm:$0xf]  ;;  %v7064_v59 = vld [vmem:[%s7806_s30 + $0x5ac] sm:$0xf0]  ;;  %v5294_v2 = vor.u32 %v7032_v55, %v5293_v54  ;;  %3478 = vmatpush.bf16.msrb.mxu2 %v5566_v57 }
  0x5e   : > { %v289_v60 = vld [vmem:[%s7820_s27] sm:$0xff]  ;;  %v5549_v62 = vld [vmem:[%s7806_s30 + $0x6a0] sm:$0xf]  ;;  %v5422_v3 = vor.u32 %v7064_v59, %v5421_v58  ;;  %3491 = vmatpush.bf16.msrb.mxu3 %v5694_v61 }
  0x5f   : > { %v7096_v63 = vld [vmem:[%s7806_s30 + $0x6ac] sm:$0xf0]  ;;  %804 = vst [vmem:[#allocation1] ss:$9 sm:$0xff] %v289_v60  ;;  %v5677_v0 = vld [vmem:[%s7806_s30 + $0x7a0] sm:$0xf]  ;;  %3453 = vmatpush.bf16.msrb.mxu0 %v5294_v2 }
  0x60   : > { %v7128_v1 = vld [vmem:[%s7806_s30 + $0x7ac] sm:$0xf0]  ;;  %v5550_v4 = vor.u32 %v7096_v63, %v5549_v62  ;;  %v5277_v5 = vld [vmem:[%s7806_s30 + $0x480] sm:$0xf]  ;;  %3466 = vmatpush.bf16.msrb.mxu1 %v5422_v3  ;;  %v290_v62 = vld [vmem:[%s7820_s27 + $0x8] sm:$0xff] }
  0x61   : > { %v7028_v6 = vld [vmem:[%s7806_s30 + $0x48c] sm:$0xf0]  ;;  %v5405_v7 = vld [vmem:[%s7806_s30 + $0x580] sm:$0xf]  ;;  %v5678_v8 = vor.u32 %v7128_v1, %v5677_v0 }
  0x62   : > { %v7060_v9 = vld [vmem:[%s7806_s30 + $0x58c] sm:$0xf0]  ;;  %v5533_v10 = vld [vmem:[%s7806_s30 + $0x680] sm:$0xf]  ;;  %v5278_v15 = vor.u32 %v7028_v6, %v5277_v5  ;;  %3479 = vmatpush.bf16.msrb.mxu2 %v5550_v4 }
  0x63   : > { %v7092_v11 = vld [vmem:[%s7806_s30 + $0x68c] sm:$0xf0]  ;;  %v5661_v12 = vld [vmem:[%s7806_s30 + $0x780] sm:$0xf]  ;;  %v5406_v19 = vor.u32 %v7060_v9, %v5405_v7  ;;  %3492 = vmatpush.bf16.msrb.mxu3 %v5678_v8 }
  0x64   : > { %v7124_v13 = vld [vmem:[%s7806_s30 + $0x78c] sm:$0xf0]  ;;  %v5261_v14 = vld [vmem:[%s7806_s30 + $0x460] sm:$0xf]  ;;  %v5534_v20 = vor.u32 %v7092_v11, %v5533_v10  ;;  %3454 = vmatpush.bf16.msrb.mxu0 %v5278_v15 }
  0x65   : > { %v7024_v16 = vld [vmem:[%s7806_s30 + $0x46c] sm:$0xf0]  ;;  %v5389_v17 = vld [vmem:[%s7806_s30 + $0x560] sm:$0xf]  ;;  %v5662_v24 = vor.u32 %v7124_v13, %v5661_v12  ;;  %3467 = vmatpush.bf16.msrb.mxu1 %v5406_v19 }
  0x66   : > { %v7056_v18 = vld [vmem:[%s7806_s30 + $0x56c] sm:$0xf0]  ;;  %v7925_v21 = vld [vmem:[#allocation1 + $0x12] sm:$0xff]  ;;  %v7934_v27 = vld [vmem:[#allocation1 + $0x9] sm:$0xff]  ;;  %v5262_v30 = vor.u32 %v7024_v16, %v5261_v14  ;;  %3480 = vmatpush.bf16.msrb.mxu2 %v5534_v20 }
  0x67   : > { %v7927_v22 = vld [vmem:[#allocation1] sm:$0xff]  ;;  %v5517_v25 = vld [vmem:[%s7806_s30 + $0x660] sm:$0xf]  ;;  %3433 = vmatmul.bf16.vlgmr.msra.gmra.mxu2 %v7925_v21  ;;  %3420 = vmatmul.bf16.vlgmr.msra.gmra.mxu1 %v7934_v27  ;;  %v5390_v31 = vor.u32 %v7056_v18, %v5389_v17  ;;  %v7963_v61 = vld [vmem:[#allocation1 + $0x36] sm:$0xff] }
  0x68   : > { %v7929_v23 = vld [vmem:[#allocation1 + $0x1b] sm:$0xff]  ;;  %v5645_v28 = vld [vmem:[%s7806_s30 + $0x760] sm:$0xf]  ;;  %3407 = vmatmul.bf16.vlgmr.msra.gmra.mxu0 %v7927_v22  ;;  %3493 = vmatpush.bf16.msrb.mxu3 %v5662_v24  ;;  %v7966_v1 = vld [vmem:[#allocation1 + $0x24] sm:$0xff] }
  0x69   : > { %v7088_v26 = vld [vmem:[%s7806_s30 + $0x66c] sm:$0xf0]  ;;  %3446 = vmatmul.bf16.vlgmr.msra.gmra.mxu3 %v7929_v23  ;;  %v5245_v33 = vld [vmem:[%s7806_s30 + $0x440] sm:$0xf]  ;;  %3455 = vmatpush.bf16.msrb.mxu0 %v5262_v30 }
  0x6a   : > { %v7120_v29 = vld [vmem:[%s7806_s30 + $0x76c] sm:$0xf0]  ;;  %v5518_v32 = vor.u32 %v7088_v26, %v5517_v25  ;;  %v5373_v35 = vld [vmem:[%s7806_s30 + $0x540] sm:$0xf]  ;;  %3468 = vmatpush.bf16.msrb.mxu1 %v5390_v31 }
  0x6b   : > { %v7020_v34 = vld [vmem:[%s7806_s30 + $0x44c] sm:$0xf0]  ;;  %v5646_v36 = vor.u32 %v7120_v29, %v5645_v28  ;;  %v5501_v38 = vld [vmem:[%s7806_s30 + $0x640] sm:$0xf] }
  0x6c   : > { %v7052_v37 = vld [vmem:[%s7806_s30 + $0x54c] sm:$0xf0]  ;;  %v5629_v40 = vld [vmem:[%s7806_s30 + $0x740] sm:$0xf]  ;;  %v5246_v42 = vor.u32 %v7020_v34, %v5245_v33  ;;  %3481 = vmatpush.bf16.msrb.mxu2 %v5518_v32 }
  0x6d   : > { %v7084_v39 = vld [vmem:[%s7806_s30 + $0x64c] sm:$0xf0]  ;;  %v5229_v43 = vld [vmem:[%s7806_s30 + $0x420] sm:$0xf]  ;;  %v5374_v44 = vor.u32 %v7052_v37, %v5373_v35  ;;  %3494 = vmatpush.bf16.msrb.mxu3 %v5646_v36 }
  0x6e   : > { %v7116_v41 = vld [vmem:[%s7806_s30 + $0x74c] sm:$0xf0]  ;;  %v5502_v45 = vor.u32 %v7084_v39, %v5501_v38  ;;  %v5357_v47 = vld [vmem:[%s7806_s30 + $0x520] sm:$0xf]  ;;  %3456 = vmatpush.bf16.msrb.mxu0 %v5246_v42 }
  0x6f   : > { %v7016_v46 = vld [vmem:[%s7806_s30 + $0x42c] sm:$0xf0]  ;;  %v5630_v49 = vor.u32 %v7116_v41, %v5629_v40  ;;  %v5485_v50 = vld [vmem:[%s7806_s30 + $0x620] sm:$0xf]  ;;  %3469 = vmatpush.bf16.msrb.mxu1 %v5374_v44 }
  0x70   : > { %v7048_v48 = vld [vmem:[%s7806_s30 + $0x52c] sm:$0xf0]  ;;  %v5613_v52 = vld [vmem:[%s7806_s30 + $0x720] sm:$0xf]  ;;  %v5230_v56 = vor.u32 %v7016_v46, %v5229_v43  ;;  %3482 = vmatpush.bf16.msrb.mxu2 %v5502_v45 }
  0x71   : > { %v7080_v51 = vld [vmem:[%s7806_s30 + $0x62c] sm:$0xf0]  ;;  %v5213_v54 = vld [vmem:[%s7806_s30 + $0x400] sm:$0xf]  ;;  %v5358_v63 = vor.u32 %v7048_v48, %v5357_v47  ;;  %3495 = vmatpush.bf16.msrb.mxu3 %v5630_v49 }
  0x72   : > { %v7112_v53 = vld [vmem:[%s7806_s30 + $0x72c] sm:$0xf0]  ;;  %v5341_v57 = vld [vmem:[%s7806_s30 + $0x500] sm:$0xf]  ;;  %v5486_v0 = vor.u32 %v7080_v51, %v5485_v50  ;;  %3457 = vmatpush.bf16.msrb.mxu0 %v5230_v56 }
  0x73   : > { %v7012_v55 = vld [vmem:[%s7806_s30 + $0x40c] sm:$0xf0]  ;;  %v5469_v59 = vld [vmem:[%s7806_s30 + $0x600] sm:$0xf]  ;;  %v5614_v4 = vor.u32 %v7112_v53, %v5613_v52  ;;  %3470 = vmatpush.bf16.msrb.mxu1 %v5358_v63 }
  0x74   : > { %v7044_v58 = vld [vmem:[%s7806_s30 + $0x50c] sm:$0xf0]  ;;  %v7970_v3 = vld [vmem:[#allocation1 + $0x2d] sm:$0xff]  ;;  %v5214_v10 = vor.u32 %v7012_v55, %v5213_v54  ;;  %3483 = vmatpush.bf16.msrb.mxu2 %v5486_v0 }
  0x75   : > { %v7076_v60 = vld [vmem:[%s7806_s30 + $0x60c] sm:$0xf0]  ;;  %v5597_v5 = vld [vmem:[%s7806_s30 + $0x700] sm:$0xf]  ;;  %v5342_v14 = vor.u32 %v7044_v58, %v5341_v57  ;;  %3496 = vmatpush.bf16.msrb.mxu3 %v5614_v4 }
  0x76   : > { %v7968_v2 = vld [vmem:[#allocation1 + $0x3f] sm:$0xff]  ;;  %v5837_v7 = vld [vmem:[%s7806_s30 + $0x8e0] sm:$0xf]  ;;  %v5470_v15 = vor.u32 %v7076_v60, %v5469_v59  ;;  %3458 = vmatpush.bf16.msrb.mxu0 %v5214_v10 }
  0x77   : > { %v7108_v6 = vld [vmem:[%s7806_s30 + $0x70c] sm:$0xf0]  ;;  %814 = vst [vmem:[#allocation1] ss:$9 sm:$0xff] %v290_v62  ;;  %v5965_v9 = vld [vmem:[%s7806_s30 + $0x9e0] sm:$0xf]  ;;  %3471 = vmatpush.bf16.msrb.mxu1 %v5342_v14 }
  0x78   : > { %v7168_v8 = vld [vmem:[%s7806_s30 + $0x8ec] sm:$0xf0]  ;;  %v6093_v12 = vld [vmem:[%s7806_s30 + $0xae0] sm:$0xf]  ;;  %v5598_v18 = vor.u32 %v7108_v6, %v5597_v5  ;;  %3484 = vmatpush.bf16.msrb.mxu2 %v5470_v15 }
  0x79   : > { %v7200_v11 = vld [vmem:[%s7806_s30 + $0x9ec] sm:$0xf0]  ;;  %v6221_v16 = vld [vmem:[%s7806_s30 + $0xbe0] sm:$0xf]  ;;  %v5838_v19 = vor.u32 %v7168_v8, %v5837_v7  ;;  %3459 = vmatmul.bf16.vlgmr.msrb.gmra.mxu0 %v7966_v1 }
  0x7a   : > { %v7232_v13 = vld [vmem:[%s7806_s30 + $0xaec] sm:$0xf0]  ;;  %v5966_v20 = vor.u32 %v7200_v11, %v5965_v9  ;;  %v5821_v25 = vld [vmem:[%s7806_s30 + $0x8c0] sm:$0xf]  ;;  %3497 = vmatpush.bf16.msrb.mxu3 %v5598_v18  ;;  %3472 = vmatmul.bf16.vlgmr.msrb.gmra.mxu1 %v7970_v3 }
  0x7b   : > { %v7264_v17 = vld [vmem:[%s7806_s30 + $0xbec] sm:$0xf0]  ;;  %v6094_v24 = vor.u32 %v7232_v13, %v6093_v12  ;;  %v5949_v28 = vld [vmem:[%s7806_s30 + $0x9c0] sm:$0xf]  ;;  %3503 = vmatpush.bf16.msra.mxu0 %v5838_v19  ;;  %3485 = vmatmul.bf16.vlgmr.msrb.gmra.mxu2 %v7963_v61 }
  0x7c   : > { %v7164_v26 = vld [vmem:[%s7806_s30 + $0x8cc] sm:$0xf0]  ;;  %v6222_v29 = vor.u32 %v7264_v17, %v6221_v16  ;;  %v6077_v31 = vld [vmem:[%s7806_s30 + $0xac0] sm:$0xf]  ;;  %3516 = vmatpush.bf16.msra.mxu1 %v5966_v20 }
  0x7d   : > { %v7196_v30 = vld [vmem:[%s7806_s30 + $0x9cc] sm:$0xf0]  ;;  %v6205_v33 = vld [vmem:[%s7806_s30 + $0xbc0] sm:$0xf]  ;;  %v5822_v35 = vor.u32 %v7164_v26, %v5821_v25  ;;  %3529 = vmatpush.bf16.msra.mxu2 %v6094_v24  ;;  %3498 = vmatmul.bf16.vlgmr.msrb.gmra.mxu3 %v7968_v2 }
  0x7e   : > { %v7228_v32 = vld [vmem:[%s7806_s30 + $0xacc] sm:$0xf0]  ;;  %v5950_v36 = vor.u32 %v7196_v30, %v5949_v28  ;;  %v5805_v38 = vld [vmem:[%s7806_s30 + $0x8a0] sm:$0xf]  ;;  %3542 = vmatpush.bf16.msra.mxu3 %v6222_v29 }
  0x7f   : > { %v7260_v34 = vld [vmem:[%s7806_s30 + $0xbcc] sm:$0xf0]  ;;  %v6078_v37 = vor.u32 %v7228_v32, %v6077_v31  ;;  %v5933_v40 = vld [vmem:[%s7806_s30 + $0x9a0] sm:$0xf]  ;;  %3504 = vmatpush.bf16.msra.mxu0 %v5822_v35 }
  0x80   : > { %v7160_v39 = vld [vmem:[%s7806_s30 + $0x8ac] sm:$0xf0]  ;;  %v6206_v41 = vor.u32 %v7260_v34, %v6205_v33  ;;  %v6061_v43 = vld [vmem:[%s7806_s30 + $0xaa0] sm:$0xf]  ;;  %3517 = vmatpush.bf16.msra.mxu1 %v5950_v36 }
  0x81   : > { %v7192_v42 = vld [vmem:[%s7806_s30 + $0x9ac] sm:$0xf0]  ;;  %v6189_v45 = vld [vmem:[%s7806_s30 + $0xba0] sm:$0xf]  ;;  %v5806_v47 = vor.u32 %v7160_v39, %v5805_v38  ;;  %3530 = vmatpush.bf16.msra.mxu2 %v6078_v37 }
  0x82   : > { %v7224_v44 = vld [vmem:[%s7806_s30 + $0xaac] sm:$0xf0]  ;;  %v5934_v48 = vor.u32 %v7192_v42, %v5933_v40  ;;  %v5789_v50 = vld [vmem:[%s7806_s30 + $0x880] sm:$0xf]  ;;  %3543 = vmatpush.bf16.msra.mxu3 %v6206_v41 }
  0x83   : > { %v7256_v46 = vld [vmem:[%s7806_s30 + $0xbac] sm:$0xf0]  ;;  %v6062_v49 = vor.u32 %v7224_v44, %v6061_v43  ;;  %v5917_v52 = vld [vmem:[%s7806_s30 + $0x980] sm:$0xf]  ;;  %3505 = vmatpush.bf16.msra.mxu0 %v5806_v47 }
  0x84   : > { %v7156_v51 = vld [vmem:[%s7806_s30 + $0x88c] sm:$0xf0]  ;;  %v6190_v53 = vor.u32 %v7256_v46, %v6189_v45  ;;  %v6045_v55 = vld [vmem:[%s7806_s30 + $0xa80] sm:$0xf]  ;;  %3518 = vmatpush.bf16.msra.mxu1 %v5934_v48 }
  0x85   : > { %v7188_v54 = vld [vmem:[%s7806_s30 + $0x98c] sm:$0xf0]  ;;  %v6173_v57 = vld [vmem:[%s7806_s30 + $0xb80] sm:$0xf]  ;;  %v5790_v59 = vor.u32 %v7156_v51, %v5789_v50  ;;  %3531 = vmatpush.bf16.msra.mxu2 %v6062_v49 }
  0x86   : > { %v7220_v56 = vld [vmem:[%s7806_s30 + $0xa8c] sm:$0xf0]  ;;  %v5918_v60 = vor.u32 %v7188_v54, %v5917_v52  ;;  %v5773_v63 = vld [vmem:[%s7806_s30 + $0x860] sm:$0xf]  ;;  %3544 = vmatpush.bf16.msra.mxu3 %v6190_v53 }
  0x87   : > { %v7252_v58 = vld [vmem:[%s7806_s30 + $0xb8c] sm:$0xf0]  ;;  %v6046_v62 = vor.u32 %v7220_v56, %v6045_v55  ;;  %v5901_v4 = vld [vmem:[%s7806_s30 + $0x960] sm:$0xf]  ;;  %3506 = vmatpush.bf16.msra.mxu0 %v5790_v59 }
  0x88   : > { %v7152_v0 = vld [vmem:[%s7806_s30 + $0x86c] sm:$0xf0]  ;;  %v6174_v5 = vor.u32 %v7252_v58, %v6173_v57  ;;  %v6029_v7 = vld [vmem:[%s7806_s30 + $0xa60] sm:$0xf]  ;;  %3519 = vmatpush.bf16.msra.mxu1 %v5918_v60 }
  0x89   : > { %v7184_v6 = vld [vmem:[%s7806_s30 + $0x96c] sm:$0xf0]  ;;  %v6157_v9 = vld [vmem:[%s7806_s30 + $0xb60] sm:$0xf]  ;;  %v5774_v11 = vor.u32 %v7152_v0, %v5773_v63  ;;  %3532 = vmatpush.bf16.msra.mxu2 %v6046_v62 }
  0x8a   : > { %v7216_v8 = vld [vmem:[%s7806_s30 + $0xa6c] sm:$0xf0]  ;;  %v5902_v12 = vor.u32 %v7184_v6, %v5901_v4  ;;  %v5757_v14 = vld [vmem:[%s7806_s30 + $0x840] sm:$0xf]  ;;  %3545 = vmatpush.bf16.msra.mxu3 %v6174_v5 }
  0x8b   : > { %v7248_v10 = vld [vmem:[%s7806_s30 + $0xb6c] sm:$0xf0]  ;;  %v6030_v13 = vor.u32 %v7216_v8, %v6029_v7  ;;  %v5885_v16 = vld [vmem:[%s7806_s30 + $0x940] sm:$0xf]  ;;  %3507 = vmatpush.bf16.msra.mxu0 %v5774_v11 }
  0x8c   : > { %v7148_v15 = vld [vmem:[%s7806_s30 + $0x84c] sm:$0xf0]  ;;  %v6158_v17 = vor.u32 %v7248_v10, %v6157_v9  ;;  %v6013_v19 = vld [vmem:[%s7806_s30 + $0xa40] sm:$0xf]  ;;  %3520 = vmatpush.bf16.msra.mxu1 %v5902_v12 }
  0x8d   : > { %v7180_v18 = vld [vmem:[%s7806_s30 + $0x94c] sm:$0xf0]  ;;  %v6141_v24 = vld [vmem:[%s7806_s30 + $0xb40] sm:$0xf]  ;;  %v5758_v26 = vor.u32 %v7148_v15, %v5757_v14  ;;  %3533 = vmatpush.bf16.msra.mxu2 %v6030_v13 }
  0x8e   : > { %v7212_v20 = vld [vmem:[%s7806_s30 + $0xa4c] sm:$0xf0]  ;;  %v5886_v28 = vor.u32 %v7180_v18, %v5885_v16  ;;  %v5741_v30 = vld [vmem:[%s7806_s30 + $0x820] sm:$0xf]  ;;  %3546 = vmatpush.bf16.msra.mxu3 %v6158_v17 }
  0x8f   : > { %v7244_v25 = vld [vmem:[%s7806_s30 + $0xb4c] sm:$0xf0]  ;;  %v6014_v29 = vor.u32 %v7212_v20, %v6013_v19  ;;  %v5869_v32 = vld [vmem:[%s7806_s30 + $0x920] sm:$0xf]  ;;  %3508 = vmatpush.bf16.msra.mxu0 %v5758_v26 }
  0x90   : > { %v7144_v31 = vld [vmem:[%s7806_s30 + $0x82c] sm:$0xf0]  ;;  %v6142_v33 = vor.u32 %v7244_v25, %v6141_v24  ;;  %v5997_v35 = vld [vmem:[%s7806_s30 + $0xa20] sm:$0xf]  ;;  %3521 = vmatpush.bf16.msra.mxu1 %v5886_v28 }
  0x91   : > { %v7176_v34 = vld [vmem:[%s7806_s30 + $0x92c] sm:$0xf0]  ;;  %v6125_v37 = vld [vmem:[%s7806_s30 + $0xb20] sm:$0xf]  ;;  %v5742_v39 = vor.u32 %v7144_v31, %v5741_v30  ;;  %3534 = vmatpush.bf16.msra.mxu2 %v6014_v29 }
  0x92   : > { %v7208_v36 = vld [vmem:[%s7806_s30 + $0xa2c] sm:$0xf0]  ;;  %v5725_v40 = vld [vmem:[%s7806_s30 + $0x800] sm:$0xf]  ;;  %v5870_v42 = vor.u32 %v7176_v34, %v5869_v32  ;;  %3547 = vmatpush.bf16.msra.mxu3 %v6142_v33 }
  0x93   : > { %v7240_v38 = vld [vmem:[%s7806_s30 + $0xb2c] sm:$0xf0]  ;;  %v5998_v43 = vor.u32 %v7208_v36, %v5997_v35  ;;  %v5853_v44 = vld [vmem:[%s7806_s30 + $0x900] sm:$0xf]  ;;  %3509 = vmatpush.bf16.msra.mxu0 %v5742_v39 }
  0x94   : > { %v7140_v41 = vld [vmem:[%s7806_s30 + $0x80c] sm:$0xf0]  ;;  %v5981_v46 = vld [vmem:[%s7806_s30 + $0xa00] sm:$0xf]  ;;  %v6126_v47 = vor.u32 %v7240_v38, %v6125_v37  ;;  %3522 = vmatpush.bf16.msra.mxu1 %v5870_v42 }
  0x95   : > { %v7172_v45 = vld [vmem:[%s7806_s30 + $0x90c] sm:$0xf0]  ;;  %v6109_v49 = vld [vmem:[%s7806_s30 + $0xb00] sm:$0xf]  ;;  %v5726_v54 = vor.u32 %v7140_v41, %v5725_v40  ;;  %3535 = vmatpush.bf16.msra.mxu2 %v5998_v43 }
  0x96   : > { %v7204_v48 = vld [vmem:[%s7806_s30 + $0xa0c] sm:$0xf0]  ;;  %v6349_v51 = vld [vmem:[%s7806_s30 + $0xce0] sm:$0xf]  ;;  %v5854_v58 = vor.u32 %v7172_v45, %v5853_v44  ;;  %3548 = vmatpush.bf16.msra.mxu3 %v6126_v47 }
  0x97   : > { %v7236_v50 = vld [vmem:[%s7806_s30 + $0xb0c] sm:$0xf0]  ;;  %v6477_v53 = vld [vmem:[%s7806_s30 + $0xde0] sm:$0xf]  ;;  %v5982_v59 = vor.u32 %v7204_v48, %v5981_v46  ;;  %3510 = vmatpush.bf16.msra.mxu0 %v5726_v54 }
  0x98   : > { %v7296_v52 = vld [vmem:[%s7806_s30 + $0xcec] sm:$0xf0]  ;;  %v6605_v56 = vld [vmem:[%s7806_s30 + $0xee0] sm:$0xf]  ;;  %v6110_v63 = vor.u32 %v7236_v50, %v6109_v49  ;;  %3523 = vmatpush.bf16.msra.mxu1 %v5854_v58 }
  0x99   : > { %v7328_v55 = vld [vmem:[%s7806_s30 + $0xdec] sm:$0xf0]  ;;  %v6733_v60 = vld [vmem:[%s7806_s30 + $0xfe0] sm:$0xf]  ;;  %v6350_v0 = vor.u32 %v7296_v52, %v6349_v51  ;;  %3536 = vmatpush.bf16.msra.mxu2 %v5982_v59 }
  0x9a   : > { %v7360_v57 = vld [vmem:[%s7806_s30 + $0xeec] sm:$0xf0]  ;;  %v6478_v4 = vor.u32 %v7328_v55, %v6477_v53  ;;  %v6333_v6 = vld [vmem:[%s7806_s30 + $0xcc0] sm:$0xf]  ;;  %3549 = vmatpush.bf16.msra.mxu3 %v6110_v63 }
  0x9b   : > { %v7392_v62 = vld [vmem:[%s7806_s30 + $0xfec] sm:$0xf0]  ;;  %v6606_v5 = vor.u32 %v7360_v57, %v6605_v56  ;;  %v6461_v8 = vld [vmem:[%s7806_s30 + $0xdc0] sm:$0xf]  ;;  %3555 = vmatpush.bf16.msrb.mxu0 %v6350_v0 }
  0x9c   : > { %v7292_v7 = vld [vmem:[%s7806_s30 + $0xccc] sm:$0xf0]  ;;  %v6734_v9 = vor.u32 %v7392_v62, %v6733_v60  ;;  %v6589_v11 = vld [vmem:[%s7806_s30 + $0xec0] sm:$0xf]  ;;  %3568 = vmatpush.bf16.msrb.mxu1 %v6478_v4 }
  0x9d   : > { %v7324_v10 = vld [vmem:[%s7806_s30 + $0xdcc] sm:$0xf0]  ;;  %v6717_v14 = vld [vmem:[%s7806_s30 + $0xfc0] sm:$0xf]  ;;  %v6334_v19 = vor.u32 %v7292_v7, %v6333_v6  ;;  %3581 = vmatpush.bf16.msrb.mxu2 %v6606_v5 }
  0x9e   : > { %v7356_v12 = vld [vmem:[%s7806_s30 + $0xecc] sm:$0xf0]  ;;  %v817_v16 = vld [vmem:[#allocation1 + $0x12] sm:$0xff]  ;;  %v816_v17 = vld [vmem:[#allocation1 + $0x9] sm:$0xff]  ;;  %v6462_v20 = vor.u32 %v7324_v10, %v6461_v8  ;;  %3594 = vmatpush.bf16.msrb.mxu3 %v6734_v9 }
  0x9f   : > { %v815_v13 = vld [vmem:[#allocation1] sm:$0xff]  ;;  %v6590_v24 = vor.u32 %v7356_v12, %v6589_v11  ;;  %v6317_v25 = vld [vmem:[%s7806_s30 + $0xca0] sm:$0xf]  ;;  %3537 = vmatmul.bf16.vlgmr.msra.gmra.mxu2 %v817_v16  ;;  %3524 = vmatmul.bf16.vlgmr.msra.gmra.mxu1 %v816_v17 }
  0xa0   : > { %v7388_v15 = vld [vmem:[%s7806_s30 + $0xfcc] sm:$0xf0]  ;;  %v6445_v28 = vld [vmem:[%s7806_s30 + $0xda0] sm:$0xf]  ;;  %3511 = vmatmul.bf16.vlgmr.msra.gmra.mxu0 %v815_v13  ;;  %3569 = vmatpush.bf16.msrb.mxu1 %v6462_v20 }
  0xa1   : > { %v818_v18 = vld [vmem:[#allocation1 + $0x1b] sm:$0xff]  ;;  %v6718_v29 = vor.u32 %v7388_v15, %v6717_v14  ;;  %v6573_v31 = vld [vmem:[%s7806_s30 + $0xea0] sm:$0xf]  ;;  %3556 = vmatpush.bf16.msrb.mxu0 %v6334_v19  ;;  %3582 = vmatpush.bf16.msrb.mxu2 %v6590_v24 }
  0xa2   : > { %v7288_v26 = vld [vmem:[%s7806_s30 + $0xcac] sm:$0xf0]  ;;  %v6701_v33 = vld [vmem:[%s7806_s30 + $0xfa0] sm:$0xf]  ;;  %3550 = vmatmul.bf16.vlgmr.msra.gmra.mxu3 %v818_v18 }
  0xa3   : > { %v7320_v30 = vld [vmem:[%s7806_s30 + $0xdac] sm:$0xf0]  ;;  %v6318_v35 = vor.u32 %v7288_v26, %v6317_v25  ;;  %v6301_v38 = vld [vmem:[%s7806_s30 + $0xc80] sm:$0xf]  ;;  %3595 = vmatpush.bf16.msrb.mxu3 %v6718_v29 }
  0xa4   : > { %v7352_v32 = vld [vmem:[%s7806_s30 + $0xeac] sm:$0xf0]  ;;  %v6446_v36 = vor.u32 %v7320_v30, %v6445_v28  ;;  %v6429_v40 = vld [vmem:[%s7806_s30 + $0xd80] sm:$0xf] }
  0xa5   : > { %v7384_v34 = vld [vmem:[%s7806_s30 + $0xfac] sm:$0xf0]  ;;  %v6574_v37 = vor.u32 %v7352_v32, %v6573_v31  ;;  %v6557_v43 = vld [vmem:[%s7806_s30 + $0xe80] sm:$0xf]  ;;  %3557 = vmatpush.bf16.msrb.mxu0 %v6318_v35 }
  0xa6   : > { %v7284_v39 = vld [vmem:[%s7806_s30 + $0xc8c] sm:$0xf0]  ;;  %v6702_v41 = vor.u32 %v7384_v34, %v6701_v33  ;;  %v6685_v45 = vld [vmem:[%s7806_s30 + $0xf80] sm:$0xf]  ;;  %3570 = vmatpush.bf16.msrb.mxu1 %v6446_v36 }
  0xa7   : > { %v7316_v42 = vld [vmem:[%s7806_s30 + $0xd8c] sm:$0xf0]  ;;  %v6302_v47 = vor.u32 %v7284_v39, %v6301_v38  ;;  %3583 = vmatpush.bf16.msrb.mxu2 %v6574_v37  ;;  %v6285_v50 = vld [vmem:[%s7806_s30 + $0xc60] sm:$0xf]  ;;  %v6910_v39 = vld [vmem:[%s7806_s30 + $0xe4] sm:$0xf] }
  0xa8   : > { %v7348_v44 = vld [vmem:[%s7806_s30 + $0xe8c] sm:$0xf0]  ;;  %v6430_v48 = vor.u32 %v7316_v42, %v6429_v40  ;;  %v6413_v52 = vld [vmem:[%s7806_s30 + $0xd60] sm:$0xf]  ;;  %3596 = vmatpush.bf16.msrb.mxu3 %v6702_v41  ;;  %v4815_v40 = vld [vmem:[%s7806_s30 + $0xf0] sm:$0xf0] }
  0xa9   : > { %v7380_v46 = vld [vmem:[%s7806_s30 + $0xf8c] sm:$0xf0]  ;;  %v6558_v49 = vor.u32 %v7348_v44, %v6557_v43  ;;  %v6541_v55 = vld [vmem:[%s7806_s30 + $0xe60] sm:$0xf]  ;;  %3558 = vmatpush.bf16.msrb.mxu0 %v6302_v47  ;;  %v6942_v41 = vld [vmem:[%s7806_s30 + $0x1e4] sm:$0xf] }
  0xaa   : > { %v7280_v51 = vld [vmem:[%s7806_s30 + $0xc6c] sm:$0xf0]  ;;  %v6686_v53 = vor.u32 %v7380_v46, %v6685_v45  ;;  %v6669_v57 = vld [vmem:[%s7806_s30 + $0xf60] sm:$0xf]  ;;  %3571 = vmatpush.bf16.msrb.mxu1 %v6430_v48  ;;  %v4943_v43 = vld [vmem:[%s7806_s30 + $0x1f0] sm:$0xf0] }
  0xab   : > { %v7312_v54 = vld [vmem:[%s7806_s30 + $0xd6c] sm:$0xf0]  ;;  %v6286_v59 = vor.u32 %v7280_v51, %v6285_v50  ;;  %3584 = vmatpush.bf16.msrb.mxu2 %v6558_v49  ;;  %v6269_v63 = vld [vmem:[%s7806_s30 + $0xc40] sm:$0xf]  ;;  %v6974_v44 = vld [vmem:[%s7806_s30 + $0x2e4] sm:$0xf]  ;;  %v4818_v51 = vor.u32 %v6910_v39, %v4815_v40 }
  0xac   : > { %v7344_v56 = vld [vmem:[%s7806_s30 + $0xe6c] sm:$0xf0]  ;;  %v6414_v60 = vor.u32 %v7312_v54, %v6413_v52  ;;  %v6397_v4 = vld [vmem:[%s7806_s30 + $0xd40] sm:$0xf]  ;;  %3597 = vmatpush.bf16.msrb.mxu3 %v6686_v53  ;;  %v5071_v45 = vld [vmem:[%s7806_s30 + $0x2f0] sm:$0xf0]  ;;  %v4946_v52 = vor.u32 %v6942_v41, %v4943_v43 }
  0xad   : > { %v7376_v58 = vld [vmem:[%s7806_s30 + $0xf6c] sm:$0xf0]  ;;  %v6542_v62 = vor.u32 %v7344_v56, %v6541_v55  ;;  %v6525_v7 = vld [vmem:[%s7806_s30 + $0xe40] sm:$0xf]  ;;  %3559 = vmatpush.bf16.msrb.mxu0 %v6286_v59  ;;  %v7006_v48 = vld [vmem:[%s7806_s30 + $0x3e4] sm:$0xf]  ;;  %v5074_v53 = vor.u32 %v6974_v44, %v5071_v45 }
  0xae   : > { %v7276_v0 = vld [vmem:[%s7806_s30 + $0xc4c] sm:$0xf0]  ;;  %v6670_v5 = vor.u32 %v7376_v58, %v6669_v57  ;;  %v6653_v9 = vld [vmem:[%s7806_s30 + $0xf40] sm:$0xf]  ;;  %3572 = vmatpush.bf16.msrb.mxu1 %v6414_v60  ;;  %v5199_v49 = vld [vmem:[%s7806_s30 + $0x3f0] sm:$0xf0] }
  0xaf   : > { %v7308_v6 = vld [vmem:[%s7806_s30 + $0xd4c] sm:$0xf0]  ;;  %v6270_v11 = vor.u32 %v7276_v0, %v6269_v63  ;;  %3585 = vmatpush.bf16.msrb.mxu2 %v6542_v62  ;;  %v6253_v14 = vld [vmem:[%s7806_s30 + $0xc20] sm:$0xf]  ;;  %v6906_v54 = vld [vmem:[%s7806_s30 + $0xc4] sm:$0xf]  ;;  %v5202_v57 = vor.u32 %v7006_v48, %v5199_v49 }
  0xb0   : > { %v7340_v8 = vld [vmem:[%s7806_s30 + $0xe4c] sm:$0xf0]  ;;  %v6398_v12 = vor.u32 %v7308_v6, %v6397_v4  ;;  %v6381_v16 = vld [vmem:[%s7806_s30 + $0xd20] sm:$0xf]  ;;  %3598 = vmatpush.bf16.msrb.mxu3 %v6670_v5  ;;  %v4799_v55 = vld [vmem:[%s7806_s30 + $0xd0] sm:$0xf0] }
  0xb1   : > { %v7372_v10 = vld [vmem:[%s7806_s30 + $0xf4c] sm:$0xf0]  ;;  %v6526_v13 = vor.u32 %v7340_v8, %v6525_v7  ;;  %v6509_v19 = vld [vmem:[%s7806_s30 + $0xe20] sm:$0xf]  ;;  %3560 = vmatpush.bf16.msrb.mxu0 %v6270_v11  ;;  %v6938_v56 = vld [vmem:[%s7806_s30 + $0x1c4] sm:$0xf]  ;;  %v4802_v7 = vor.u32 %v6906_v54, %v4799_v55 }
  0xb2   : > { %v7272_v15 = vld [vmem:[%s7806_s30 + $0xc2c] sm:$0xf0]  ;;  %v6654_v17 = vor.u32 %v7372_v10, %v6653_v9  ;;  %v6637_v24 = vld [vmem:[%s7806_s30 + $0xf20] sm:$0xf]  ;;  %3573 = vmatpush.bf16.msrb.mxu1 %v6398_v12  ;;  %v4927_v58 = vld [vmem:[%s7806_s30 + $0x1d0] sm:$0xf0] }
  0xb3   : > { %v7304_v18 = vld [vmem:[%s7806_s30 + $0xd2c] sm:$0xf0]  ;;  %v6254_v26 = vor.u32 %v7272_v15, %v6253_v14  ;;  %v6237_v28 = vld [vmem:[%s7806_s30 + $0xc00] sm:$0xf]  ;;  %3586 = vmatpush.bf16.msrb.mxu2 %v6526_v13  ;;  %v6970_v59 = vld [vmem:[%s7806_s30 + $0x2c4] sm:$0xf]  ;;  %v4930_v8 = vor.u32 %v6938_v56, %v4927_v58 }
  0xb4   : > { %v7336_v20 = vld [vmem:[%s7806_s30 + $0xe2c] sm:$0xf0]  ;;  %v6382_v30 = vor.u32 %v7304_v18, %v6381_v16  ;;  %v6365_v32 = vld [vmem:[%s7806_s30 + $0xd00] sm:$0xf]  ;;  %3599 = vmatpush.bf16.msrb.mxu3 %v6654_v17  ;;  %v5055_v60 = vld [vmem:[%s7806_s30 + $0x2d0] sm:$0xf0] }
  0xb5   : > { %v7368_v25 = vld [vmem:[%s7806_s30 + $0xf2c] sm:$0xf0]  ;;  %v6510_v31 = vor.u32 %v7336_v20, %v6509_v19  ;;  %v6493_v34 = vld [vmem:[%s7806_s30 + $0xe00] sm:$0xf]  ;;  %3561 = vmatpush.bf16.msrb.mxu0 %v6254_v26  ;;  %v819_v62 = vld [vmem:[#allocation1 + $0x24] sm:$0xff]  ;;  %v5058_v9 = vor.u32 %v6970_v59, %v5055_v60 }
  0xb6   : > { %v7268_v29 = vld [vmem:[%s7806_s30 + $0xc0c] sm:$0xf0]  ;;  %v6638_v35 = vor.u32 %v7368_v25, %v6637_v24  ;;  %v6621_v37 = vld [vmem:[%s7806_s30 + $0xf00] sm:$0xf]  ;;  %3574 = vmatpush.bf16.msrb.mxu1 %v6382_v30  ;;  %v7002_v63 = vld [vmem:[%s7806_s30 + $0x3c4] sm:$0xf] }
  0xb7   : > { %v7300_v33 = vld [vmem:[%s7806_s30 + $0xd0c] sm:$0xf0]  ;;  %v6238_v42 = vor.u32 %v7268_v29, %v6237_v28  ;;  %3587 = vmatpush.bf16.msrb.mxu2 %v6510_v31  ;;  %v5183_v0 = vld [vmem:[%s7806_s30 + $0x3d0] sm:$0xf0]  ;;  %v821_v4 = vld [vmem:[#allocation1 + $0x36] sm:$0xff] }
  0xb8   : > { %v7332_v36 = vld [vmem:[%s7806_s30 + $0xe0c] sm:$0xf0]  ;;  %v6366_v46 = vor.u32 %v7300_v33, %v6365_v32  ;;  %3600 = vmatpush.bf16.msrb.mxu3 %v6638_v35  ;;  %v820_v5 = vld [vmem:[#allocation1 + $0x2d] sm:$0xff]  ;;  %v4783_v11 = vld [vmem:[%s7806_s30 + $0xb0] sm:$0xf0]  ;;  %v5186_v13 = vor.u32 %v7002_v63, %v5183_v0 }
  0xb9   : > { %v7364_v38 = vld [vmem:[%s7806_s30 + $0xf0c] sm:$0xf0]  ;;  %v6494_v47 = vor.u32 %v7332_v36, %v6493_v34  ;;  %3562 = vmatpush.bf16.msrb.mxu0 %v6238_v42  ;;  %v6902_v10 = vld [vmem:[%s7806_s30 + $0xa4] sm:$0xf]  ;;  %v4911_v14 = vld [vmem:[%s7806_s30 + $0x1b0] sm:$0xf0] }
  0xba   : > { %v6622_v50 = vor.u32 %v7364_v38, %v6621_v37  ;;  %3575 = vmatpush.bf16.msrb.mxu1 %v6366_v46  ;;  %v822_v6 = vld [vmem:[#allocation1 + $0x3f] sm:$0xff]  ;;  %v6934_v12 = vld [vmem:[%s7806_s30 + $0x1a4] sm:$0xf]  ;;  %v4786_v19 = vor.u32 %v6902_v10, %v4783_v11 }
  0xbb   : > { %3588 = vmatpush.bf16.msrb.mxu2 %v6494_v47  ;;  %v6966_v15 = vld [vmem:[%s7806_s30 + $0x2a4] sm:$0xf]  ;;  %v5039_v16 = vld [vmem:[%s7806_s30 + $0x2b0] sm:$0xf0]  ;;  %v4914_v20 = vor.u32 %v6934_v12, %v4911_v14 }
  0xbc   : > { %3601 = vmatpush.bf16.msrb.mxu3 %v6622_v50  ;;  %3563 = vmatmul.bf16.vlgmr.msrb.gmra.mxu0 %v819_v62  ;;  %v6998_v17 = vld [vmem:[%s7806_s30 + $0x3a4] sm:$0xf]  ;;  %v5167_v18 = vld [vmem:[%s7806_s30 + $0x3b0] sm:$0xf0]  ;;  %v5042_v24 = vor.u32 %v6966_v15, %v5039_v16 }
  0xbd   : > { %3607 = vmatpush.bf16.msra.mxu0 %v4818_v51  ;;  %3576 = vmatmul.bf16.vlgmr.msrb.gmra.mxu1 %v820_v5  ;;  %v6898_v25 = vld [vmem:[%s7806_s30 + $0x84] sm:$0xf]  ;;  %v4767_v26 = vld [vmem:[%s7806_s30 + $0x90] sm:$0xf0]  ;;  %v5170_v29 = vor.u32 %v6998_v17, %v5167_v18 }
  0xbe   : > { %3620 = vmatpush.bf16.msra.mxu1 %v4946_v52  ;;  %3589 = vmatmul.bf16.vlgmr.msrb.gmra.mxu2 %v821_v4  ;;  %v6930_v28 = vld [vmem:[%s7806_s30 + $0x184] sm:$0xf]  ;;  %v4895_v30 = vld [vmem:[%s7806_s30 + $0x190] sm:$0xf0]  ;;  %v4770_v35 = vor.u32 %v6898_v25, %v4767_v26 }
  0xbf   : > { %3633 = vmatpush.bf16.msra.mxu2 %v5074_v53  ;;  %3602 = vmatmul.bf16.vlgmr.msrb.gmra.mxu3 %v822_v6  ;;  %v6962_v31 = vld [vmem:[%s7806_s30 + $0x284] sm:$0xf]  ;;  %v5023_v32 = vld [vmem:[%s7806_s30 + $0x290] sm:$0xf0]  ;;  %v4898_v36 = vor.u32 %v6930_v28, %v4895_v30 }
  0xc0   : > { %3646 = vmatpush.bf16.msra.mxu3 %v5202_v57  ;;  %v6994_v33 = vld [vmem:[%s7806_s30 + $0x384] sm:$0xf]  ;;  %v5151_v34 = vld [vmem:[%s7806_s30 + $0x390] sm:$0xf0]  ;;  %v5026_v37 = vor.u32 %v6962_v31, %v5023_v32 }
  0xc1   : > { %3608 = vmatpush.bf16.msra.mxu0 %v4802_v7  ;;  %v6894_v38 = vld [vmem:[%s7806_s30 + $0x64] sm:$0xf]  ;;  %v4751_v39 = vld [vmem:[%s7806_s30 + $0x70] sm:$0xf0]  ;;  %v5154_v41 = vor.u32 %v6994_v33, %v5151_v34 }
  0xc2   : > { %3621 = vmatpush.bf16.msra.mxu1 %v4930_v8  ;;  %v6926_v40 = vld [vmem:[%s7806_s30 + $0x164] sm:$0xf]  ;;  %v4879_v42 = vld [vmem:[%s7806_s30 + $0x170] sm:$0xf0]  ;;  %v4754_v47 = vor.u32 %v6894_v38, %v4751_v39 }
  0xc3   : > { %3634 = vmatpush.bf16.msra.mxu2 %v5058_v9  ;;  %v6958_v43 = vld [vmem:[%s7806_s30 + $0x264] sm:$0xf]  ;;  %v5007_v44 = vld [vmem:[%s7806_s30 + $0x270] sm:$0xf0]  ;;  %v4882_v48 = vor.u32 %v6926_v40, %v4879_v42 }
  0xc4   : > { %3647 = vmatpush.bf16.msra.mxu3 %v5186_v13  ;;  %v6990_v45 = vld [vmem:[%s7806_s30 + $0x364] sm:$0xf]  ;;  %v5135_v46 = vld [vmem:[%s7806_s30 + $0x370] sm:$0xf0]  ;;  %v5010_v49 = vor.u32 %v6958_v43, %v5007_v44 }
  0xc5   : > { %3609 = vmatpush.bf16.msra.mxu0 %v4786_v19  ;;  %v6890_v50 = vld [vmem:[%s7806_s30 + $0x44] sm:$0xf]  ;;  %v4735_v51 = vld [vmem:[%s7806_s30 + $0x50] sm:$0xf0]  ;;  %v5138_v53 = vor.u32 %v6990_v45, %v5135_v46 }
  0xc6   : > { %3622 = vmatpush.bf16.msra.mxu1 %v4914_v20  ;;  %v6922_v52 = vld [vmem:[%s7806_s30 + $0x144] sm:$0xf]  ;;  %v4863_v54 = vld [vmem:[%s7806_s30 + $0x150] sm:$0xf0]  ;;  %v4738_v59 = vor.u32 %v6890_v50, %v4735_v51 }
  0xc7   : > { %3635 = vmatpush.bf16.msra.mxu2 %v5042_v24  ;;  %v6954_v55 = vld [vmem:[%s7806_s30 + $0x244] sm:$0xf]  ;;  %v4991_v56 = vld [vmem:[%s7806_s30 + $0x250] sm:$0xf0]  ;;  %v4866_v60 = vor.u32 %v6922_v52, %v4863_v54 }
  0xc8   : > { %3648 = vmatpush.bf16.msra.mxu3 %v5170_v29  ;;  %v6986_v57 = vld [vmem:[%s7806_s30 + $0x344] sm:$0xf]  ;;  %v5119_v58 = vld [vmem:[%s7806_s30 + $0x350] sm:$0xf0]  ;;  %v4994_v62 = vor.u32 %v6954_v55, %v4991_v56 }
  0xc9   : > { %3610 = vmatpush.bf16.msra.mxu0 %v4770_v35  ;;  %v6886_v63 = vld [vmem:[%s7806_s30 + $0x24] sm:$0xf]  ;;  %v4719_v0 = vld [vmem:[%s7806_s30 + $0x30] sm:$0xf0]  ;;  %v5122_v5 = vor.u32 %v6986_v57, %v5119_v58 }
  0xca   : > { %3623 = vmatpush.bf16.msra.mxu1 %v4898_v36  ;;  %v6918_v4 = vld [vmem:[%s7806_s30 + $0x124] sm:$0xf]  ;;  %v4847_v6 = vld [vmem:[%s7806_s30 + $0x130] sm:$0xf0]  ;;  %v4722_v11 = vor.u32 %v6886_v63, %v4719_v0 }
  0xcb   : > { %3636 = vmatpush.bf16.msra.mxu2 %v5026_v37  ;;  %v6950_v7 = vld [vmem:[%s7806_s30 + $0x224] sm:$0xf]  ;;  %v4975_v8 = vld [vmem:[%s7806_s30 + $0x230] sm:$0xf0]  ;;  %v4850_v14 = vor.u32 %v6918_v4, %v4847_v6 }
  0xcc   : > { %3649 = vmatpush.bf16.msra.mxu3 %v5154_v41  ;;  %v6982_v9 = vld [vmem:[%s7806_s30 + $0x324] sm:$0xf]  ;;  %v5103_v10 = vld [vmem:[%s7806_s30 + $0x330] sm:$0xf0]  ;;  %v4978_v15 = vor.u32 %v6950_v7, %v4975_v8 }
  0xcd   : > { %3611 = vmatpush.bf16.msra.mxu0 %v4754_v47  ;;  %v6882_v12 = vld [vmem:[%s7806_s30 + $0x4] sm:$0xf]  ;;  %v4703_v13 = vld [vmem:[%s7806_s30 + $0x10] sm:$0xf0]  ;;  %v5106_v19 = vor.u32 %v6982_v9, %v5103_v10 }
  0xce   : > { %3624 = vmatpush.bf16.msra.mxu1 %v4882_v48  ;;  %v6914_v16 = vld [vmem:[%s7806_s30 + $0x104] sm:$0xf]  ;;  %v4831_v17 = vld [vmem:[%s7806_s30 + $0x110] sm:$0xf0]  ;;  %v4706_v30 = vor.u32 %v6882_v12, %v4703_v13 }
  0xcf   : > { %3637 = vmatpush.bf16.msra.mxu2 %v5010_v49  ;;  %v6946_v18 = vld [vmem:[%s7806_s30 + $0x204] sm:$0xf]  ;;  %v4959_v20 = vld [vmem:[%s7806_s30 + $0x210] sm:$0xf0]  ;;  %v4834_v34 = vor.u32 %v6914_v16, %v4831_v17 }
  0xd0   : > { %3650 = vmatpush.bf16.msra.mxu3 %v5138_v53  ;;  %v6978_v24 = vld [vmem:[%s7806_s30 + $0x304] sm:$0xf]  ;;  %v5087_v25 = vld [vmem:[%s7806_s30 + $0x310] sm:$0xf0]  ;;  %v4962_v35 = vor.u32 %v6946_v18, %v4959_v20 }
  0xd1   : > { %3612 = vmatpush.bf16.msra.mxu0 %v4738_v59  ;;  %v7038_v26 = vld [vmem:[%s7806_s30 + $0x4e4] sm:$0xf]  ;;  %v5327_v28 = vld [vmem:[%s7806_s30 + $0x4f0] sm:$0xf0]  ;;  %v5090_v38 = vor.u32 %v6978_v24, %v5087_v25 }
  0xd2   : > { %3625 = vmatpush.bf16.msra.mxu1 %v4866_v60  ;;  %v7070_v29 = vld [vmem:[%s7806_s30 + $0x5e4] sm:$0xf]  ;;  %v5455_v31 = vld [vmem:[%s7806_s30 + $0x5f0] sm:$0xf0]  ;;  %v5330_v39 = vor.u32 %v7038_v26, %v5327_v28 }
  0xd3   : > { %3638 = vmatpush.bf16.msra.mxu2 %v4994_v62  ;;  %v7102_v32 = vld [vmem:[%s7806_s30 + $0x6e4] sm:$0xf]  ;;  %v5583_v33 = vld [vmem:[%s7806_s30 + $0x6f0] sm:$0xf0]  ;;  %v5458_v40 = vor.u32 %v7070_v29, %v5455_v31 }
  0xd4   : > { %3651 = vmatpush.bf16.msra.mxu3 %v5122_v5  ;;  %v7134_v36 = vld [vmem:[%s7806_s30 + $0x7e4] sm:$0xf]  ;;  %v5711_v37 = vld [vmem:[%s7806_s30 + $0x7f0] sm:$0xf0]  ;;  %v5586_v41 = vor.u32 %v7102_v32, %v5583_v33 }
  0xd5   : > { %3613 = vmatpush.bf16.msra.mxu0 %v4722_v11  ;;  %v7034_v42 = vld [vmem:[%s7806_s30 + $0x4c4] sm:$0xf]  ;;  %v5311_v43 = vld [vmem:[%s7806_s30 + $0x4d0] sm:$0xf0]  ;;  %v5714_v45 = vor.u32 %v7134_v36, %v5711_v37 }
  0xd6   : > { %3626 = vmatpush.bf16.msra.mxu1 %v4850_v14  ;;  %v7066_v44 = vld [vmem:[%s7806_s30 + $0x5c4] sm:$0xf]  ;;  %v5439_v46 = vld [vmem:[%s7806_s30 + $0x5d0] sm:$0xf0]  ;;  %v5314_v51 = vor.u32 %v7034_v42, %v5311_v43 }
  0xd7   : > { %3639 = vmatpush.bf16.msra.mxu2 %v4978_v15  ;;  %v7098_v47 = vld [vmem:[%s7806_s30 + $0x6c4] sm:$0xf]  ;;  %v5567_v48 = vld [vmem:[%s7806_s30 + $0x6d0] sm:$0xf0]  ;;  %v5442_v52 = vor.u32 %v7066_v44, %v5439_v46 }
  0xd8   : > { %3652 = vmatpush.bf16.msra.mxu3 %v5106_v19  ;;  %v7130_v49 = vld [vmem:[%s7806_s30 + $0x7c4] sm:$0xf]  ;;  %v5695_v50 = vld [vmem:[%s7806_s30 + $0x7d0] sm:$0xf0]  ;;  %v5570_v53 = vor.u32 %v7098_v47, %v5567_v48 }
  0xd9   : > { %3614 = vmatpush.bf16.msra.mxu0 %v4706_v30  ;;  %v7030_v54 = vld [vmem:[%s7806_s30 + $0x4a4] sm:$0xf]  ;;  %v5295_v55 = vld [vmem:[%s7806_s30 + $0x4b0] sm:$0xf0]  ;;  %v5698_v57 = vor.u32 %v7130_v49, %v5695_v50 }
  0xda   : > { %3627 = vmatpush.bf16.msra.mxu1 %v4834_v34  ;;  %v7062_v56 = vld [vmem:[%s7806_s30 + $0x5a4] sm:$0xf]  ;;  %v5423_v58 = vld [vmem:[%s7806_s30 + $0x5b0] sm:$0xf0]  ;;  %v5298_v0 = vor.u32 %v7030_v54, %v5295_v55 }
  0xdb   : > { %3640 = vmatpush.bf16.msra.mxu2 %v4962_v35  ;;  %v7094_v59 = vld [vmem:[%s7806_s30 + $0x6a4] sm:$0xf]  ;;  %v5551_v60 = vld [vmem:[%s7806_s30 + $0x6b0] sm:$0xf0]  ;;  %v5426_v4 = vor.u32 %v7062_v56, %v5423_v58 }
  0xdc   : > { %3653 = vmatpush.bf16.msra.mxu3 %v5090_v38  ;;  %v7126_v62 = vld [vmem:[%s7806_s30 + $0x7a4] sm:$0xf]  ;;  %v5679_v63 = vld [vmem:[%s7806_s30 + $0x7b0] sm:$0xf0]  ;;  %3615 = vmatmul.bf16.vlgmr.msra.gmra.mxu0 %v7927_v22  ;;  %v5554_v5 = vor.u32 %v7094_v59, %v5551_v60 }
  0xdd   : > { %3659 = vmatpush.bf16.msrb.mxu0 %v5330_v39  ;;  %3628 = vmatmul.bf16.vlgmr.msra.gmra.mxu1 %v7934_v27  ;;  %v7026_v6 = vld [vmem:[%s7806_s30 + $0x484] sm:$0xf]  ;;  %v5279_v7 = vld [vmem:[%s7806_s30 + $0x490] sm:$0xf0]  ;;  %v5682_v9 = vor.u32 %v7126_v62, %v5679_v63 }
  0xde   : > { %3672 = vmatpush.bf16.msrb.mxu1 %v5458_v40  ;;  %3641 = vmatmul.bf16.vlgmr.msra.gmra.mxu2 %v7925_v21  ;;  %v7058_v8 = vld [vmem:[%s7806_s30 + $0x584] sm:$0xf]  ;;  %v5407_v10 = vld [vmem:[%s7806_s30 + $0x590] sm:$0xf0]  ;;  %v5282_v15 = vor.u32 %v7026_v6, %v5279_v7 }
  0xdf   : > { %3685 = vmatpush.bf16.msrb.mxu2 %v5586_v41  ;;  %3654 = vmatmul.bf16.vlgmr.msra.gmra.mxu3 %v7929_v23  ;;  %v7090_v11 = vld [vmem:[%s7806_s30 + $0x684] sm:$0xf]  ;;  %v5535_v12 = vld [vmem:[%s7806_s30 + $0x690] sm:$0xf0]  ;;  %v5410_v16 = vor.u32 %v7058_v8, %v5407_v10 }
  0xe0   : > { %3698 = vmatpush.bf16.msrb.mxu3 %v5714_v45  ;;  %v7122_v13 = vld [vmem:[%s7806_s30 + $0x784] sm:$0xf]  ;;  %v5663_v14 = vld [vmem:[%s7806_s30 + $0x790] sm:$0xf0]  ;;  %v5538_v17 = vor.u32 %v7090_v11, %v5535_v12 }
  0xe1   : > { %3660 = vmatpush.bf16.msrb.mxu0 %v5314_v51  ;;  %v7022_v18 = vld [vmem:[%s7806_s30 + $0x464] sm:$0xf]  ;;  %v5263_v19 = vld [vmem:[%s7806_s30 + $0x470] sm:$0xf0]  ;;  %v5666_v24 = vor.u32 %v7122_v13, %v5663_v14 }
  0xe2   : > { %3673 = vmatpush.bf16.msrb.mxu1 %v5442_v52  ;;  %v7054_v20 = vld [vmem:[%s7806_s30 + $0x564] sm:$0xf]  ;;  %v5391_v25 = vld [vmem:[%s7806_s30 + $0x570] sm:$0xf0]  ;;  %v5266_v31 = vor.u32 %v7022_v18, %v5263_v19 }
  0xe3   : > { %3686 = vmatpush.bf16.msrb.mxu2 %v5570_v53  ;;  %v7086_v26 = vld [vmem:[%s7806_s30 + $0x664] sm:$0xf]  ;;  %v5519_v28 = vld [vmem:[%s7806_s30 + $0x670] sm:$0xf0]  ;;  %v5394_v32 = vor.u32 %v7054_v20, %v5391_v25 }
  0xe4   : > { %3699 = vmatpush.bf16.msrb.mxu3 %v5698_v57  ;;  %v7118_v29 = vld [vmem:[%s7806_s30 + $0x764] sm:$0xf]  ;;  %v5647_v30 = vld [vmem:[%s7806_s30 + $0x770] sm:$0xf0]  ;;  %v5522_v33 = vor.u32 %v7086_v26, %v5519_v28  ;;  %v3421_v50 = vpop.f32.mrf.mxu1 }
  0xe5   : > { %3661 = vmatpush.bf16.msrb.mxu0 %v5298_v0  ;;  %v7018_v34 = vld [vmem:[%s7806_s30 + $0x444] sm:$0xf]  ;;  %v5247_v35 = vld [vmem:[%s7806_s30 + $0x450] sm:$0xf0]  ;;  %v5650_v37 = vor.u32 %v7118_v29, %v5647_v30  ;;  %v3408_v44 = vpop.f32.mrf.mxu0 }
  0xe6   : > { %3674 = vmatpush.bf16.msrb.mxu1 %v5426_v4  ;;  %v7050_v36 = vld [vmem:[%s7806_s30 + $0x544] sm:$0xf]  ;;  %v5375_v38 = vld [vmem:[%s7806_s30 + $0x550] sm:$0xf0]  ;;  %v5250_v43 = vor.u32 %v7018_v34, %v5247_v35  ;;  %v3422_v55 = vadd.f32 %v3421_v50, %v3408_v44 }
  0xe7   : > { %3687 = vmatpush.bf16.msrb.mxu2 %v5554_v5  ;;  %v7082_v39 = vld [vmem:[%s7806_s30 + $0x644] sm:$0xf]  ;;  %v5503_v40 = vld [vmem:[%s7806_s30 + $0x650] sm:$0xf0]  ;;  %v5378_v45 = vor.u32 %v7050_v36, %v5375_v38 }
  0xe8   : > { %3700 = vmatpush.bf16.msrb.mxu3 %v5682_v9  ;;  %v7114_v41 = vld [vmem:[%s7806_s30 + $0x744] sm:$0xf]  ;;  %v5631_v42 = vld [vmem:[%s7806_s30 + $0x750] sm:$0xf0]  ;;  %v5506_v46 = vor.u32 %v7082_v39, %v5503_v40 }
  0xe9   : > { %3662 = vmatpush.bf16.msrb.mxu0 %v5282_v15  ;;  %v7014_v47 = vld [vmem:[%s7806_s30 + $0x424] sm:$0xf]  ;;  %v5231_v48 = vld [vmem:[%s7806_s30 + $0x430] sm:$0xf0]  ;;  %v5634_v51 = vor.u32 %v7114_v41, %v5631_v42 }
  0xea   : > { %3675 = vmatpush.bf16.msrb.mxu1 %v5410_v16  ;;  %v7046_v49 = vld [vmem:[%s7806_s30 + $0x524] sm:$0xf]  ;;  %v5359_v52 = vld [vmem:[%s7806_s30 + $0x530] sm:$0xf0]  ;;  %v5234_v58 = vor.u32 %v7014_v47, %v5231_v48  ;;  %v3434_v6 = vpop.f32.mrf.mxu2 }
  0xeb   : > { %3688 = vmatpush.bf16.msrb.mxu2 %v5538_v17  ;;  %v7078_v53 = vld [vmem:[%s7806_s30 + $0x624] sm:$0xf]  ;;  %v5487_v54 = vld [vmem:[%s7806_s30 + $0x630] sm:$0xf0]  ;;  %v5362_v62 = vor.u32 %v7046_v49, %v5359_v52  ;;  %v3435_v11 = vadd.f32 %v3434_v6, %v3422_v55 }
  0xec   : > { %3701 = vmatpush.bf16.msrb.mxu3 %v5666_v24  ;;  %v7110_v56 = vld [vmem:[%s7806_s30 + $0x724] sm:$0xf]  ;;  %v5615_v57 = vld [vmem:[%s7806_s30 + $0x730] sm:$0xf0]  ;;  %v5490_v63 = vor.u32 %v7078_v53, %v5487_v54  ;;  %v3447_v12 = vpop.f32.mrf.mxu3  ;;  %v3423_v30 = vpop.f32.mrf.mxu1 }
  0xed   : > { %3663 = vmatpush.bf16.msrb.mxu0 %v5266_v31  ;;  %v7010_v59 = vld [vmem:[%s7806_s30 + $0x404] sm:$0xf]  ;;  %v5215_v60 = vld [vmem:[%s7806_s30 + $0x410] sm:$0xf0]  ;;  %v5618_v7 = vor.u32 %v7110_v56, %v5615_v57  ;;  %v8244_v20 = vadd.f32 %v3447_v12, %v3435_v11  ;;  %v3410_v24 = vpop.f32.mrf.mxu0 }
  0xee   : > { %3676 = vmatpush.bf16.msrb.mxu1 %v5394_v32  ;;  %v7042_v0 = vld [vmem:[%s7806_s30 + $0x504] sm:$0xf]  ;;  %v5343_v4 = vld [vmem:[%s7806_s30 + $0x510] sm:$0xf0]  ;;  %v5218_v16 = vor.u32 %v7010_v59, %v5215_v60 }
  0xef   : > { %3689 = vmatpush.bf16.msrb.mxu2 %v5522_v33  ;;  %v7074_v5 = vld [vmem:[%s7806_s30 + $0x604] sm:$0xf]  ;;  %v5471_v8 = vld [vmem:[%s7806_s30 + $0x610] sm:$0xf0]  ;;  %v5346_v25 = vor.u32 %v7042_v0, %v5343_v4 }
  0xf0   : > { %3702 = vmatpush.bf16.msrb.mxu3 %v5650_v37  ;;  %v7106_v9 = vld [vmem:[%s7806_s30 + $0x704] sm:$0xf]  ;;  %v5599_v10 = vld [vmem:[%s7806_s30 + $0x710] sm:$0xf0]  ;;  %v5474_v26 = vor.u32 %v7074_v5, %v5471_v8 }
  0xf1   : > { %3664 = vmatpush.bf16.msrb.mxu0 %v5250_v43  ;;  %v7166_v13 = vld [vmem:[%s7806_s30 + $0x8e4] sm:$0xf]  ;;  %v5839_v14 = vld [vmem:[%s7806_s30 + $0x8f0] sm:$0xf0]  ;;  %v5602_v31 = vor.u32 %v7106_v9, %v5599_v10 }
  0xf2   : > { %3677 = vmatpush.bf16.msrb.mxu1 %v5378_v45  ;;  %v7198_v15 = vld [vmem:[%s7806_s30 + $0x9e4] sm:$0xf]  ;;  %v5967_v17 = vld [vmem:[%s7806_s30 + $0x9f0] sm:$0xf0]  ;;  %v5842_v32 = vor.u32 %v7166_v13, %v5839_v14  ;;  %v3436_v44 = vpop.f32.mrf.mxu2 }
  0xf3   : > { %3690 = vmatpush.bf16.msrb.mxu2 %v5506_v46  ;;  %v7230_v18 = vld [vmem:[%s7806_s30 + $0xae4] sm:$0xf]  ;;  %v6095_v19 = vld [vmem:[%s7806_s30 + $0xaf0] sm:$0xf0]  ;;  %v5970_v33 = vor.u32 %v7198_v15, %v5967_v17 }
  0xf4   : > { %3703 = vmatpush.bf16.msrb.mxu3 %v5634_v51  ;;  %v7262_v28 = vld [vmem:[%s7806_s30 + $0xbe4] sm:$0xf]  ;;  %v6223_v29 = vld [vmem:[%s7806_s30 + $0xbf0] sm:$0xf0]  ;;  %v6098_v34 = vor.u32 %v7230_v18, %v6095_v19  ;;  %v3449_v46 = vpop.f32.mrf.mxu3 }
  0xf5   : > { %3665 = vmatpush.bf16.msrb.mxu0 %v5234_v58  ;;  %v7162_v35 = vld [vmem:[%s7806_s30 + $0x8c4] sm:$0xf]  ;;  %v5823_v36 = vld [vmem:[%s7806_s30 + $0x8d0] sm:$0xf0]  ;;  %v6226_v38 = vor.u32 %v7262_v28, %v6223_v29 }
  0xf6   : > { %3678 = vmatpush.bf16.msrb.mxu1 %v5362_v62  ;;  %v7194_v37 = vld [vmem:[%s7806_s30 + $0x9c4] sm:$0xf]  ;;  %v5951_v39 = vld [vmem:[%s7806_s30 + $0x9d0] sm:$0xf0]  ;;  %v5826_v45 = vor.u32 %v7162_v35, %v5823_v36  ;;  %v3460_v11 = vpop.f32.mrf.mxu0 }
  0xf7   : > { %3691 = vmatpush.bf16.msrb.mxu2 %v5490_v63  ;;  %v7226_v40 = vld [vmem:[%s7806_s30 + $0xac4] sm:$0xf]  ;;  %v6079_v41 = vld [vmem:[%s7806_s30 + $0xad0] sm:$0xf0]  ;;  %v5954_v47 = vor.u32 %v7194_v37, %v5951_v39  ;;  %v3461_v17 = vadd.f32 %v3460_v11, %v8244_v20  ;;  %v3473_v18 = vpop.f32.mrf.mxu1 }
  0xf8   : > { %3704 = vmatpush.bf16.msrb.mxu3 %v5618_v7  ;;  %v7258_v42 = vld [vmem:[%s7806_s30 + $0xbc4] sm:$0xf]  ;;  %v6207_v43 = vld [vmem:[%s7806_s30 + $0xbd0] sm:$0xf0]  ;;  %v6082_v48 = vor.u32 %v7226_v40, %v6079_v41 }
  0xf9   : > { %3666 = vmatpush.bf16.msrb.mxu0 %v5218_v16  ;;  %v7158_v49 = vld [vmem:[%s7806_s30 + $0x8a4] sm:$0xf]  ;;  %v5807_v50 = vld [vmem:[%s7806_s30 + $0x8b0] sm:$0xf0]  ;;  %v6210_v52 = vor.u32 %v7258_v42, %v6207_v43  ;;  %v3474_v30 = vadd.f32 %v3473_v18, %v3461_v17 }
  0xfa   : > { %3679 = vmatpush.bf16.msrb.mxu1 %v5346_v25  ;;  %v7190_v51 = vld [vmem:[%s7806_s30 + $0x9a4] sm:$0xf]  ;;  %v5935_v53 = vld [vmem:[%s7806_s30 + $0x9b0] sm:$0xf0]  ;;  %v5810_v58 = vor.u32 %v7158_v49, %v5807_v50 }
  0xfb   : > { %3692 = vmatpush.bf16.msrb.mxu2 %v5474_v26  ;;  %v7222_v54 = vld [vmem:[%s7806_s30 + $0xaa4] sm:$0xf]  ;;  %v6063_v55 = vld [vmem:[%s7806_s30 + $0xab0] sm:$0xf0]  ;;  %v5938_v59 = vor.u32 %v7190_v51, %v5935_v53 }
  0xfc   : > { %3705 = vmatpush.bf16.msrb.mxu3 %v5602_v31  ;;  %3667 = vmatmul.bf16.vlgmr.msrb.gmra.mxu0 %v7966_v1  ;;  %v7254_v56 = vld [vmem:[%s7806_s30 + $0xba4] sm:$0xf]  ;;  %v6191_v57 = vld [vmem:[%s7806_s30 + $0xbb0] sm:$0xf0]  ;;  %v6066_v60 = vor.u32 %v7222_v54, %v6063_v55 }
  0xfd   : > { %3711 = vmatpush.bf16.msra.mxu0 %v5842_v32  ;;  %3680 = vmatmul.bf16.vlgmr.msrb.gmra.mxu1 %v7970_v3  ;;  %v7154_v62 = vld [vmem:[%s7806_s30 + $0x884] sm:$0xf]  ;;  %v5791_v63 = vld [vmem:[%s7806_s30 + $0x890] sm:$0xf0]  ;;  %v6194_v4 = vor.u32 %v7254_v56, %v6191_v57 }
  0xfe   : > { %3724 = vmatpush.bf16.msra.mxu1 %v5970_v33  ;;  %3693 = vmatmul.bf16.vlgmr.msrb.gmra.mxu2 %v7963_v61  ;;  %v7186_v0 = vld [vmem:[%s7806_s30 + $0x984] sm:$0xf]  ;;  %v5919_v5 = vld [vmem:[%s7806_s30 + $0x990] sm:$0xf0]  ;;  %v5794_v10 = vor.u32 %v7154_v62, %v5791_v63  ;;  %v3486_v36 = vpop.f32.mrf.mxu2 }
  0xff   : > { %3737 = vmatpush.bf16.msra.mxu2 %v6098_v34  ;;  %3706 = vmatmul.bf16.vlgmr.msrb.gmra.mxu3 %v7968_v2  ;;  %v7218_v6 = vld [vmem:[%s7806_s30 + $0xa84] sm:$0xf]  ;;  %v6047_v7 = vld [vmem:[%s7806_s30 + $0xa90] sm:$0xf0]  ;;  %v5922_v12 = vor.u32 %v7186_v0, %v5919_v5  ;;  %v3487_v41 = vadd.f32 %v3486_v36, %v3474_v30  ;;  %v3475_v53 = vpop.f32.mrf.mxu1 }
 0x100   : > { %3750 = vmatpush.bf16.msra.mxu3 %v6226_v38  ;;  %v7250_v8 = vld [vmem:[%s7806_s30 + $0xb84] sm:$0xf]  ;;  %v6175_v9 = vld [vmem:[%s7806_s30 + $0xb90] sm:$0xf0]  ;;  %v6050_v13 = vor.u32 %v7218_v6, %v6047_v7  ;;  %v3499_v42 = vpop.f32.mrf.mxu3 }
 0x101   : > { %3712 = vmatpush.bf16.msra.mxu0 %v5826_v45  ;;  %v7150_v14 = vld [vmem:[%s7806_s30 + $0x864] sm:$0xf]  ;;  %v5775_v15 = vld [vmem:[%s7806_s30 + $0x870] sm:$0xf0]  ;;  %v6178_v19 = vor.u32 %v7250_v8, %v6175_v9  ;;  %v8293_v46 = vadd.f32 %v3499_v42, %v3487_v41 }
 0x102   : > { %3725 = vmatpush.bf16.msra.mxu1 %v5954_v47  ;;  %v7182_v16 = vld [vmem:[%s7806_s30 + $0x964] sm:$0xf]  ;;  %v5903_v24 = vld [vmem:[%s7806_s30 + $0x970] sm:$0xf0]  ;;  %v5778_v31 = vor.u32 %v7150_v14, %v5775_v15  ;;  %v3462_v47 = vpop.f32.mrf.mxu0 }
 0x103   : > { %3738 = vmatpush.bf16.msra.mxu2 %v6082_v48  ;;  %v7214_v25 = vld [vmem:[%s7806_s30 + $0xa64] sm:$0xf]  ;;  %v6031_v26 = vld [vmem:[%s7806_s30 + $0xa70] sm:$0xf0]  ;;  %v5906_v20 = vor.u32 %v7182_v16, %v5903_v24 }
 0x104   : > { %3751 = vmatpush.bf16.msra.mxu3 %v6210_v52  ;;  %v7246_v28 = vld [vmem:[%s7806_s30 + $0xb64] sm:$0xf]  ;;  %v6159_v29 = vld [vmem:[%s7806_s30 + $0xb70] sm:$0xf0]  ;;  %v6034_v32 = vor.u32 %v7214_v25, %v6031_v26 }
 0x105   : > { %3713 = vmatpush.bf16.msra.mxu0 %v5810_v58  ;;  %v7146_v33 = vld [vmem:[%s7806_s30 + $0x844] sm:$0xf]  ;;  %v5759_v34 = vld [vmem:[%s7806_s30 + $0x850] sm:$0xf0]  ;;  %v6162_v37 = vor.u32 %v7246_v28, %v6159_v29 }
 0x106   : > { %3726 = vmatpush.bf16.msra.mxu1 %v5938_v59  ;;  %v7178_v35 = vld [vmem:[%s7806_s30 + $0x944] sm:$0xf]  ;;  %v5887_v38 = vld [vmem:[%s7806_s30 + $0x950] sm:$0xf0]  ;;  %v5762_v45 = vor.u32 %v7146_v33, %v5759_v34  ;;  %v3488_v8 = vpop.f32.mrf.mxu2 }
 0x107   : > { %3739 = vmatpush.bf16.msra.mxu2 %v6066_v60  ;;  %v7210_v39 = vld [vmem:[%s7806_s30 + $0xa44] sm:$0xf]  ;;  %v6015_v40 = vld [vmem:[%s7806_s30 + $0xa50] sm:$0xf0]  ;;  %v5890_v48 = vor.u32 %v7178_v35, %v5887_v38 }
 0x108   : > { %3752 = vmatpush.bf16.msra.mxu3 %v6194_v4  ;;  %v7242_v43 = vld [vmem:[%s7806_s30 + $0xb44] sm:$0xf]  ;;  %v6143_v44 = vld [vmem:[%s7806_s30 + $0xb50] sm:$0xf0]  ;;  %v6018_v49 = vor.u32 %v7210_v39, %v6015_v40 }
 0x109   : > { %3714 = vmatpush.bf16.msra.mxu0 %v5794_v10  ;;  %v7142_v50 = vld [vmem:[%s7806_s30 + $0x824] sm:$0xf]  ;;  %v5743_v51 = vld [vmem:[%s7806_s30 + $0x830] sm:$0xf0]  ;;  %v6146_v54 = vor.u32 %v7242_v43, %v6143_v44 }
 0x10a   : > { %3727 = vmatpush.bf16.msra.mxu1 %v5922_v12  ;;  %v7174_v52 = vld [vmem:[%s7806_s30 + $0x924] sm:$0xf]  ;;  %v5871_v55 = vld [vmem:[%s7806_s30 + $0x930] sm:$0xf0]  ;;  %v5746_v60 = vor.u32 %v7142_v50, %v5743_v51 }
 0x10b   : > { %3740 = vmatpush.bf16.msra.mxu2 %v6050_v13  ;;  %v7206_v56 = vld [vmem:[%s7806_s30 + $0xa24] sm:$0xf]  ;;  %v5999_v57 = vld [vmem:[%s7806_s30 + $0xa30] sm:$0xf0]  ;;  %v5874_v0 = vor.u32 %v7174_v52, %v5871_v55  ;;  %v3501_v13 = vpop.f32.mrf.mxu3  ;;  %v7498_v55 = vld [vmem:[#allocation1 + $0x9] sm:$0xff] }
 0x10c   : > { %3753 = vmatpush.bf16.msra.mxu3 %v6178_v19  ;;  %v7238_v58 = vld [vmem:[%s7806_s30 + $0xb24] sm:$0xf]  ;;  %v6127_v59 = vld [vmem:[%s7806_s30 + $0xb30] sm:$0xf0]  ;;  %v6002_v4 = vor.u32 %v7206_v56, %v5999_v57 }
 0x10d   : > { %3715 = vmatpush.bf16.msra.mxu0 %v5778_v31  ;;  %v7138_v62 = vld [vmem:[%s7806_s30 + $0x804] sm:$0xf]  ;;  %v5727_v63 = vld [vmem:[%s7806_s30 + $0x810] sm:$0xf0]  ;;  %v6130_v9 = vor.u32 %v7238_v58, %v6127_v59  ;;  %v7499_v58 = vld [vmem:[#allocation1 + $0x1b] sm:$0xff] }
 0x10e   : > { %3728 = vmatpush.bf16.msra.mxu1 %v5906_v20  ;;  %v7170_v5 = vld [vmem:[%s7806_s30 + $0x904] sm:$0xf]  ;;  %v5855_v6 = vld [vmem:[%s7806_s30 + $0x910] sm:$0xf0]  ;;  %v5730_v17 = vor.u32 %v7138_v62, %v5727_v63 }
 0x10f   : > { %3741 = vmatpush.bf16.msra.mxu2 %v6034_v32  ;;  %v7202_v7 = vld [vmem:[%s7806_s30 + $0xa04] sm:$0xf]  ;;  %v5983_v10 = vld [vmem:[%s7806_s30 + $0xa10] sm:$0xf0]  ;;  %v5858_v25 = vor.u32 %v7170_v5, %v5855_v6 }
 0x110   : > { %3754 = vmatpush.bf16.msra.mxu3 %v6162_v37  ;;  %v7234_v11 = vld [vmem:[%s7806_s30 + $0xb04] sm:$0xf]  ;;  %v6111_v12 = vld [vmem:[%s7806_s30 + $0xb10] sm:$0xf0]  ;;  %v5986_v26 = vor.u32 %v7202_v7, %v5983_v10 }
 0x111   : > { %3716 = vmatpush.bf16.msra.mxu0 %v5762_v45  ;;  %v7294_v14 = vld [vmem:[%s7806_s30 + $0xce4] sm:$0xf]  ;;  %v6351_v15 = vld [vmem:[%s7806_s30 + $0xcf0] sm:$0xf0]  ;;  %v6114_v30 = vor.u32 %v7234_v11, %v6111_v12 }
 0x112   : > { %3729 = vmatpush.bf16.msra.mxu1 %v5890_v48  ;;  %v7326_v16 = vld [vmem:[%s7806_s30 + $0xde4] sm:$0xf]  ;;  %v6479_v18 = vld [vmem:[%s7806_s30 + $0xdf0] sm:$0xf0]  ;;  %v6354_v31 = vor.u32 %v7294_v14, %v6351_v15 }
 0x113   : > { %3742 = vmatpush.bf16.msra.mxu2 %v6018_v49  ;;  %v7358_v19 = vld [vmem:[%s7806_s30 + $0xee4] sm:$0xf]  ;;  %v6607_v24 = vld [vmem:[%s7806_s30 + $0xef0] sm:$0xf0]  ;;  %v6482_v20 = vor.u32 %v7326_v16, %v6479_v18 }
 0x114   : > { %3755 = vmatpush.bf16.msra.mxu3 %v6146_v54  ;;  %v7390_v28 = vld [vmem:[%s7806_s30 + $0xfe4] sm:$0xf]  ;;  %v6735_v29 = vld [vmem:[%s7806_s30 + $0xff0] sm:$0xf0]  ;;  %v6610_v32 = vor.u32 %v7358_v19, %v6607_v24 }
 0x115   : > { %3717 = vmatpush.bf16.msra.mxu0 %v5746_v60  ;;  %v7290_v33 = vld [vmem:[%s7806_s30 + $0xcc4] sm:$0xf]  ;;  %v6335_v34 = vld [vmem:[%s7806_s30 + $0xcd0] sm:$0xf0]  ;;  %v6738_v36 = vor.u32 %v7390_v28, %v6735_v29 }
 0x116   : > { %3730 = vmatpush.bf16.msra.mxu1 %v5874_v0  ;;  %v7322_v35 = vld [vmem:[%s7806_s30 + $0xdc4] sm:$0xf]  ;;  %v6463_v37 = vld [vmem:[%s7806_s30 + $0xdd0] sm:$0xf0]  ;;  %v6338_v42 = vor.u32 %v7290_v33, %v6335_v34 }
 0x117   : > { %3743 = vmatpush.bf16.msra.mxu2 %v6002_v4  ;;  %v7354_v38 = vld [vmem:[%s7806_s30 + $0xec4] sm:$0xf]  ;;  %v6591_v39 = vld [vmem:[%s7806_s30 + $0xed0] sm:$0xf0]  ;;  %v6466_v43 = vor.u32 %v7322_v35, %v6463_v37 }
 0x118   : > { %3756 = vmatpush.bf16.msra.mxu3 %v6130_v9  ;;  %v7386_v40 = vld [vmem:[%s7806_s30 + $0xfc4] sm:$0xf]  ;;  %v6719_v41 = vld [vmem:[%s7806_s30 + $0xfd0] sm:$0xf0]  ;;  %v6594_v44 = vor.u32 %v7354_v38, %v6591_v39 }
 0x119   : > { %3718 = vmatpush.bf16.msra.mxu0 %v5730_v17  ;;  %v7286_v45 = vld [vmem:[%s7806_s30 + $0xca4] sm:$0xf]  ;;  %v6319_v47 = vld [vmem:[%s7806_s30 + $0xcb0] sm:$0xf0]  ;;  %v6722_v50 = vor.u32 %v7386_v40, %v6719_v41 }
 0x11a   : > { %3731 = vmatpush.bf16.msra.mxu1 %v5858_v25  ;;  %v7318_v48 = vld [vmem:[%s7806_s30 + $0xda4] sm:$0xf]  ;;  %v7496_v49 = vld [vmem:[#allocation1] sm:$0xff]  ;;  %v6322_v59 = vor.u32 %v7286_v45, %v6319_v47 }
 0x11b   : > { %3744 = vmatpush.bf16.msra.mxu2 %v5986_v26  ;;  %v6447_v51 = vld [vmem:[%s7806_s30 + $0xdb0] sm:$0xf0]  ;;  %v7350_v52 = vld [vmem:[%s7806_s30 + $0xea4] sm:$0xf] }
 0x11c   : > { %3757 = vmatpush.bf16.msra.mxu3 %v6114_v30  ;;  %3719 = vmatmul.bf16.vlgmr.msra.gmra.mxu0 %v7496_v49  ;;  %v6575_v53 = vld [vmem:[%s7806_s30 + $0xeb0] sm:$0xf0]  ;;  %v7497_v54 = vld [vmem:[#allocation1 + $0x12] sm:$0xff]  ;;  %v6450_v60 = vor.u32 %v7318_v48, %v6447_v51  ;;  %v3525_v14 = vpop.f32.mrf.mxu1 }
 0x11d   : > { %3763 = vmatpush.bf16.msrb.mxu0 %v6354_v31  ;;  %3732 = vmatmul.bf16.vlgmr.msra.gmra.mxu1 %v7498_v55  ;;  %v7382_v56 = vld [vmem:[%s7806_s30 + $0xfa4] sm:$0xf]  ;;  %v6703_v57 = vld [vmem:[%s7806_s30 + $0xfb0] sm:$0xf0]  ;;  %v6578_v62 = vor.u32 %v7350_v52, %v6575_v53  ;;  %v3512_v9 = vpop.f32.mrf.mxu0 }
 0x11e   : > { %3776 = vmatpush.bf16.msrb.mxu1 %v6482_v20  ;;  %3745 = vmatmul.bf16.vlgmr.msra.gmra.mxu2 %v7497_v54  ;;  %v7282_v63 = vld [vmem:[%s7806_s30 + $0xc84] sm:$0xf]  ;;  %v6303_v0 = vld [vmem:[%s7806_s30 + $0xc90] sm:$0xf0]  ;;  %v6706_v5 = vor.u32 %v7382_v56, %v6703_v57  ;;  %v3513_v12 = vadd.f32 %v3512_v9, %v8293_v46 }
 0x11f   : > { %3789 = vmatpush.bf16.msrb.mxu2 %v6610_v32  ;;  %3758 = vmatmul.bf16.vlgmr.msra.gmra.mxu3 %v7499_v58  ;;  %v7314_v4 = vld [vmem:[%s7806_s30 + $0xd84] sm:$0xf]  ;;  %v6431_v6 = vld [vmem:[%s7806_s30 + $0xd90] sm:$0xf0]  ;;  %v6306_v13 = vor.u32 %v7282_v63, %v6303_v0 }
 0x120   : > { %3802 = vmatpush.bf16.msrb.mxu3 %v6738_v36  ;;  %v7346_v7 = vld [vmem:[%s7806_s30 + $0xe84] sm:$0xf]  ;;  %v6559_v8 = vld [vmem:[%s7806_s30 + $0xe90] sm:$0xf0]  ;;  %v6434_v15 = vor.u32 %v7314_v4, %v6431_v6  ;;  %v3526_v25 = vadd.f32 %v3525_v14, %v3513_v12  ;;  %v4821_v14 = vld [vmem:[%s7806_s30 + $0xe8] sm:$0xf] }
 0x121   : > { %3764 = vmatpush.bf16.msrb.mxu0 %v6338_v42  ;;  %v7378_v10 = vld [vmem:[%s7806_s30 + $0xf84] sm:$0xf]  ;;  %v6687_v11 = vld [vmem:[%s7806_s30 + $0xf90] sm:$0xf0]  ;;  %v6562_v16 = vor.u32 %v7346_v7, %v6559_v8 }
 0x122   : > { %3777 = vmatpush.bf16.msrb.mxu1 %v6466_v43  ;;  %v7278_v17 = vld [vmem:[%s7806_s30 + $0xc64] sm:$0xf]  ;;  %v6287_v18 = vld [vmem:[%s7806_s30 + $0xc70] sm:$0xf0]  ;;  %v6690_v24 = vor.u32 %v7378_v10, %v6687_v11  ;;  %v3538_v37 = vpop.f32.mrf.mxu2 }
 0x123   : > { %3790 = vmatpush.bf16.msrb.mxu2 %v6594_v44  ;;  %v7310_v19 = vld [vmem:[%s7806_s30 + $0xd64] sm:$0xf]  ;;  %v6415_v26 = vld [vmem:[%s7806_s30 + $0xd70] sm:$0xf0]  ;;  %v6290_v31 = vor.u32 %v7278_v17, %v6287_v18  ;;  %v3539_v41 = vadd.f32 %v3538_v37, %v3526_v25  ;;  %v6977_v25 = vld [vmem:[%s7806_s30 + $0x2f4] sm:$0xf0] }
 0x124   : > { %3803 = vmatpush.bf16.msrb.mxu3 %v6722_v50  ;;  %v7342_v28 = vld [vmem:[%s7806_s30 + $0xe64] sm:$0xf]  ;;  %v6543_v46 = vld [vmem:[%s7806_s30 + $0xe70] sm:$0xf0]  ;;  %v6418_v20 = vor.u32 %v7310_v19, %v6415_v26  ;;  %v3527_v48 = vpop.f32.mrf.mxu1  ;;  %v6945_v19 = vld [vmem:[%s7806_s30 + $0x1f4] sm:$0xf0] }
 0x125   : > { %3765 = vmatpush.bf16.msrb.mxu0 %v6322_v59  ;;  %v7374_v29 = vld [vmem:[%s7806_s30 + $0xf64] sm:$0xf]  ;;  %v6671_v30 = vld [vmem:[%s7806_s30 + $0xf70] sm:$0xf0]  ;;  %v6546_v32 = vor.u32 %v7342_v28, %v6543_v46  ;;  %v3551_v42 = vpop.f32.mrf.mxu3  ;;  %v3514_v45 = vpop.f32.mrf.mxu0  ;;  %v5205_v46 = vld [vmem:[%s7806_s30 + $0x3e8] sm:$0xf] }
 0x126   : > { %3778 = vmatpush.bf16.msrb.mxu1 %v6450_v60  ;;  %v7274_v33 = vld [vmem:[%s7806_s30 + $0xc44] sm:$0xf]  ;;  %v6271_v34 = vld [vmem:[%s7806_s30 + $0xc50] sm:$0xf0]  ;;  %v6674_v36 = vor.u32 %v7374_v29, %v6671_v30  ;;  %v8360_v49 = vadd.f32 %v3551_v42, %v3539_v41  ;;  %v7009_v29 = vld [vmem:[%s7806_s30 + $0x3f4] sm:$0xf0] }
 0x127   : > { %3791 = vmatpush.bf16.msrb.mxu2 %v6578_v62  ;;  %v7306_v35 = vld [vmem:[%s7806_s30 + $0xd44] sm:$0xf]  ;;  %v6399_v38 = vld [vmem:[%s7806_s30 + $0xd50] sm:$0xf0]  ;;  %v6274_v47 = vor.u32 %v7274_v33, %v6271_v34  ;;  %v4805_v33 = vld [vmem:[%s7806_s30 + $0xc8] sm:$0xf] }
 0x128   : > { %3804 = vmatpush.bf16.msrb.mxu3 %v6706_v5  ;;  %v7338_v39 = vld [vmem:[%s7806_s30 + $0xe44] sm:$0xf]  ;;  %v6527_v40 = vld [vmem:[%s7806_s30 + $0xe50] sm:$0xf0]  ;;  %v6402_v50 = vor.u32 %v7306_v35, %v6399_v38  ;;  %v6909_v34 = vld [vmem:[%s7806_s30 + $0xd4] sm:$0xf0] }
 0x129   : > { %3766 = vmatpush.bf16.msrb.mxu0 %v6306_v13  ;;  %v7370_v43 = vld [vmem:[%s7806_s30 + $0xf44] sm:$0xf]  ;;  %v6655_v44 = vld [vmem:[%s7806_s30 + $0xf50] sm:$0xf0]  ;;  %v6530_v51 = vor.u32 %v7338_v39, %v6527_v40  ;;  %v4933_v35 = vld [vmem:[%s7806_s30 + $0x1c8] sm:$0xf]  ;;  %v4806_v42 = vor.u32 %v6909_v34, %v4805_v33 }
 0x12a   : > { %3779 = vmatpush.bf16.msrb.mxu1 %v6434_v15  ;;  %v7270_v52 = vld [vmem:[%s7806_s30 + $0xc24] sm:$0xf]  ;;  %v6255_v53 = vld [vmem:[%s7806_s30 + $0xc30] sm:$0xf0]  ;;  %v6658_v55 = vor.u32 %v7370_v43, %v6655_v44  ;;  %v3540_v13 = vpop.f32.mrf.mxu2  ;;  %v6913_v15 = vld [vmem:[%s7806_s30 + $0xf4] sm:$0xf0] }
 0x12b   : > { %3792 = vmatpush.bf16.msrb.mxu2 %v6562_v16  ;;  %v7302_v54 = vld [vmem:[%s7806_s30 + $0xd24] sm:$0xf]  ;;  %v6383_v56 = vld [vmem:[%s7806_s30 + $0xd30] sm:$0xf0]  ;;  %v6258_v62 = vor.u32 %v7270_v52, %v6255_v53  ;;  %v4949_v16 = vld [vmem:[%s7806_s30 + $0x1e8] sm:$0xf] }
 0x12c   : > { %3805 = vmatpush.bf16.msrb.mxu3 %v6690_v24  ;;  %v7334_v57 = vld [vmem:[%s7806_s30 + $0xe24] sm:$0xf]  ;;  %v6511_v58 = vld [vmem:[%s7806_s30 + $0xe30] sm:$0xf0]  ;;  %v6386_v4 = vor.u32 %v7302_v54, %v6383_v56  ;;  %v5077_v24 = vld [vmem:[%s7806_s30 + $0x2e8] sm:$0xf] }
 0x12d   : > { %3767 = vmatpush.bf16.msrb.mxu0 %v6290_v31  ;;  %v7366_v59 = vld [vmem:[%s7806_s30 + $0xf24] sm:$0xf]  ;;  %v6639_v60 = vld [vmem:[%s7806_s30 + $0xf30] sm:$0xf0]  ;;  %v6514_v5 = vor.u32 %v7334_v57, %v6511_v58  ;;  %v3553_v17 = vpop.f32.mrf.mxu3  ;;  %v4822_v31 = vor.u32 %v6913_v15, %v4821_v14  ;;  %v6941_v37 = vld [vmem:[%s7806_s30 + $0x1d4] sm:$0xf0] }
 0x12e   : > { %3780 = vmatpush.bf16.msrb.mxu1 %v6418_v20  ;;  %v7266_v63 = vld [vmem:[%s7806_s30 + $0xc04] sm:$0xf]  ;;  %v6239_v0 = vld [vmem:[%s7806_s30 + $0xc10] sm:$0xf0]  ;;  %v6642_v9 = vor.u32 %v7366_v59, %v6639_v60  ;;  %v4950_v20 = vor.u32 %v6945_v19, %v4949_v16  ;;  %v5061_v38 = vld [vmem:[%s7806_s30 + $0x2c8] sm:$0xf]  ;;  %v4934_v43 = vor.u32 %v6941_v37, %v4933_v35 }
 0x12f   : > { %3793 = vmatpush.bf16.msrb.mxu2 %v6546_v32  ;;  %v7298_v6 = vld [vmem:[%s7806_s30 + $0xd04] sm:$0xf]  ;;  %v6367_v7 = vld [vmem:[%s7806_s30 + $0xd10] sm:$0xf0]  ;;  %v6242_v18 = vor.u32 %v7266_v63, %v6239_v0  ;;  %v5078_v32 = vor.u32 %v6977_v25, %v5077_v24  ;;  %v6973_v39 = vld [vmem:[%s7806_s30 + $0x2d4] sm:$0xf0] }
 0x130   : > { %3806 = vmatpush.bf16.msrb.mxu3 %v6674_v36  ;;  %v7330_v8 = vld [vmem:[%s7806_s30 + $0xe04] sm:$0xf]  ;;  %v6495_v10 = vld [vmem:[%s7806_s30 + $0xe10] sm:$0xf0]  ;;  %v6370_v26 = vor.u32 %v7298_v6, %v6367_v7  ;;  %v5206_v36 = vor.u32 %v7009_v29, %v5205_v46  ;;  %v5189_v40 = vld [vmem:[%s7806_s30 + $0x3c8] sm:$0xf]  ;;  %v5062_v44 = vor.u32 %v6973_v39, %v5061_v38 }
 0x131   : > { %3768 = vmatpush.bf16.msrb.mxu0 %v6274_v47  ;;  %v7362_v11 = vld [vmem:[%s7806_s30 + $0xf04] sm:$0xf]  ;;  %v6623_v12 = vld [vmem:[%s7806_s30 + $0xf10] sm:$0xf0]  ;;  %v6498_v28 = vor.u32 %v7330_v8, %v6495_v10  ;;  %v7005_v41 = vld [vmem:[%s7806_s30 + $0x3d4] sm:$0xf0] }
 0x132   : > { %3781 = vmatpush.bf16.msrb.mxu1 %v6402_v50  ;;  %v6626_v30 = vor.u32 %v7362_v11, %v6623_v12  ;;  %v4789_v45 = vld [vmem:[%s7806_s30 + $0xa8] sm:$0xf]  ;;  %v6905_v47 = vld [vmem:[%s7806_s30 + $0xb4] sm:$0xf0]  ;;  %v7502_v56 = vld [vmem:[#allocation1 + $0x2d] sm:$0xff] }
 0x133   : > { %3794 = vmatpush.bf16.msrb.mxu2 %v6530_v51  ;;  %v4917_v48 = vld [vmem:[%s7806_s30 + $0x1a8] sm:$0xf]  ;;  %v7500_v50 = vld [vmem:[#allocation1 + $0x24] sm:$0xff]  ;;  %v5190_v51 = vor.u32 %v7005_v41, %v5189_v40  ;;  %v4790_v60 = vor.u32 %v6905_v47, %v4789_v45 }
 0x134   : > { %3807 = vmatpush.bf16.msrb.mxu3 %v6658_v55  ;;  %v6937_v52 = vld [vmem:[%s7806_s30 + $0x1b4] sm:$0xf0]  ;;  %v5045_v53 = vld [vmem:[%s7806_s30 + $0x2a8] sm:$0xf]  ;;  %v7503_v59 = vld [vmem:[#allocation1 + $0x3f] sm:$0xff] }
 0x135   : > { %3769 = vmatpush.bf16.msrb.mxu0 %v6258_v62  ;;  %v6969_v54 = vld [vmem:[%s7806_s30 + $0x2b4] sm:$0xf0]  ;;  %v7501_v55 = vld [vmem:[#allocation1 + $0x36] sm:$0xff]  ;;  %v4918_v62 = vor.u32 %v6937_v52, %v4917_v48 }
 0x136   : > { %3782 = vmatpush.bf16.msrb.mxu1 %v6386_v4  ;;  %v5173_v57 = vld [vmem:[%s7806_s30 + $0x3a8] sm:$0xf]  ;;  %v7001_v58 = vld [vmem:[%s7806_s30 + $0x3b4] sm:$0xf0]  ;;  %v5046_v63 = vor.u32 %v6969_v54, %v5045_v53 }
 0x137   : > { %3795 = vmatpush.bf16.msrb.mxu2 %v6514_v5  ;;  %v4773_v0 = vld [vmem:[%s7806_s30 + $0x88] sm:$0xf]  ;;  %v6901_v4 = vld [vmem:[%s7806_s30 + $0x94] sm:$0xf0]  ;;  %v5174_v6 = vor.u32 %v7001_v58, %v5173_v57 }
 0x138   : > { %3808 = vmatpush.bf16.msrb.mxu3 %v6642_v9  ;;  %v4901_v5 = vld [vmem:[%s7806_s30 + $0x188] sm:$0xf]  ;;  %v6933_v7 = vld [vmem:[%s7806_s30 + $0x194] sm:$0xf0]  ;;  %v4774_v14 = vor.u32 %v6901_v4, %v4773_v0 }
 0x139   : > { %3770 = vmatpush.bf16.msrb.mxu0 %v6242_v18  ;;  %v5029_v8 = vld [vmem:[%s7806_s30 + $0x288] sm:$0xf]  ;;  %v6965_v9 = vld [vmem:[%s7806_s30 + $0x294] sm:$0xf0]  ;;  %v3564_v10 = vpop.f32.mrf.mxu0  ;;  %v4902_v16 = vor.u32 %v6933_v7, %v4901_v5 }
 0x13a   : > { %3783 = vmatpush.bf16.msrb.mxu1 %v6370_v26  ;;  %v5157_v11 = vld [vmem:[%s7806_s30 + $0x388] sm:$0xf]  ;;  %v6997_v12 = vld [vmem:[%s7806_s30 + $0x394] sm:$0xf0]  ;;  %v3565_v13 = vadd.f32 %v3564_v10, %v8360_v49  ;;  %v3577_v15 = vpop.f32.mrf.mxu1  ;;  %v5030_v17 = vor.u32 %v6965_v9, %v5029_v8 }
 0x13b   : > { %3796 = vmatpush.bf16.msrb.mxu2 %v6498_v28  ;;  %v4757_v18 = vld [vmem:[%s7806_s30 + $0x68] sm:$0xf]  ;;  %v6897_v19 = vld [vmem:[%s7806_s30 + $0x74] sm:$0xf0]  ;;  %v5158_v25 = vor.u32 %v6997_v12, %v5157_v11 }
 0x13c   : > { %3809 = vmatpush.bf16.msrb.mxu3 %v6626_v30  ;;  %3771 = vmatmul.bf16.vlgmr.msrb.gmra.mxu0 %v7500_v50  ;;  %v4885_v24 = vld [vmem:[%s7806_s30 + $0x168] sm:$0xf]  ;;  %v3578_v26 = vadd.f32 %v3577_v15, %v3565_v13  ;;  %v6929_v28 = vld [vmem:[%s7806_s30 + $0x174] sm:$0xf0] }
 0x13d   : > { %3815 = vmatpush.bf16.msra.mxu0 %v4822_v31  ;;  %3784 = vmatmul.bf16.vlgmr.msrb.gmra.mxu1 %v7502_v56  ;;  %v5013_v46 = vld [vmem:[%s7806_s30 + $0x268] sm:$0xf]  ;;  %v6961_v49 = vld [vmem:[%s7806_s30 + $0x274] sm:$0xf0]  ;;  %v4758_v31 = vor.u32 %v6897_v19, %v4757_v18 }
 0x13e   : > { %3828 = vmatpush.bf16.msra.mxu1 %v4950_v20  ;;  %3797 = vmatmul.bf16.vlgmr.msrb.gmra.mxu2 %v7501_v55  ;;  %v5141_v29 = vld [vmem:[%s7806_s30 + $0x368] sm:$0xf]  ;;  %v6993_v30 = vld [vmem:[%s7806_s30 + $0x374] sm:$0xf0]  ;;  %v4886_v20 = vor.u32 %v6929_v28, %v4885_v24 }
 0x13f   : > { %3841 = vmatpush.bf16.msra.mxu2 %v5078_v32  ;;  %3810 = vmatmul.bf16.vlgmr.msrb.gmra.mxu3 %v7503_v59  ;;  %v5014_v32 = vor.u32 %v6961_v49, %v5013_v46  ;;  %v4741_v33 = vld [vmem:[%s7806_s30 + $0x48] sm:$0xf]  ;;  %v6893_v34 = vld [vmem:[%s7806_s30 + $0x54] sm:$0xf0] }
 0x140   : > { %3854 = vmatpush.bf16.msra.mxu3 %v5206_v36  ;;  %v4869_v35 = vld [vmem:[%s7806_s30 + $0x148] sm:$0xf]  ;;  %v5142_v36 = vor.u32 %v6993_v30, %v5141_v29  ;;  %v6925_v38 = vld [vmem:[%s7806_s30 + $0x154] sm:$0xf0]  ;;  %v4742_v47 = vor.u32 %v6893_v34, %v4741_v33 }
 0x141   : > { %3816 = vmatpush.bf16.msra.mxu0 %v4806_v42  ;;  %v3590_v37 = vpop.f32.mrf.mxu2  ;;  %v4997_v39 = vld [vmem:[%s7806_s30 + $0x248] sm:$0xf]  ;;  %v6957_v40 = vld [vmem:[%s7806_s30 + $0x254] sm:$0xf0]  ;;  %v3566_v45 = vpop.f32.mrf.mxu0 }
 0x142   : > { %3829 = vmatpush.bf16.msra.mxu1 %v4934_v43  ;;  %v3591_v41 = vadd.f32 %v3590_v37, %v3578_v26  ;;  %v3603_v42 = vpop.f32.mrf.mxu3  ;;  %v5125_v43 = vld [vmem:[%s7806_s30 + $0x348] sm:$0xf]  ;;  %v3579_v48 = vpop.f32.mrf.mxu1  ;;  %v4998_v52 = vor.u32 %v6957_v40, %v4997_v39  ;;  %v6889_v54 = vld [vmem:[%s7806_s30 + $0x34] sm:$0xf0] }
 0x143   : > { %3842 = vmatpush.bf16.msra.mxu2 %v5062_v44  ;;  %v6989_v44 = vld [vmem:[%s7806_s30 + $0x354] sm:$0xf0]  ;;  %v4725_v53 = vld [vmem:[%s7806_s30 + $0x28] sm:$0xf] }
 0x144   : > { %3855 = vmatpush.bf16.msra.mxu3 %v5190_v51  ;;  %v8427_v50 = vadd.f32 %v3603_v42, %v3591_v41  ;;  %v4870_v51 = vor.u32 %v6925_v38, %v4869_v35  ;;  %v4853_v55 = vld [vmem:[%s7806_s30 + $0x128] sm:$0xf]  ;;  %v5126_v56 = vor.u32 %v6989_v44, %v5125_v43  ;;  %v6921_v57 = vld [vmem:[%s7806_s30 + $0x134] sm:$0xf0] }
 0x145   : > { %3817 = vmatpush.bf16.msra.mxu0 %v4790_v60  ;;  %v4981_v58 = vld [vmem:[%s7806_s30 + $0x228] sm:$0xf]  ;;  %v6953_v59 = vld [vmem:[%s7806_s30 + $0x234] sm:$0xf0]  ;;  %v4854_v5 = vor.u32 %v6921_v57, %v4853_v55 }
 0x146   : > { %3830 = vmatpush.bf16.msra.mxu1 %v4918_v62  ;;  %v5109_v60 = vld [vmem:[%s7806_s30 + $0x328] sm:$0xf]  ;;  %v6985_v62 = vld [vmem:[%s7806_s30 + $0x334] sm:$0xf0] }
 0x147   : > { %3843 = vmatpush.bf16.msra.mxu2 %v5046_v63  ;;  %v4726_v63 = vor.u32 %v6889_v54, %v4725_v53  ;;  %v4709_v0 = vld [vmem:[%s7806_s30 + $0x8] sm:$0xf]  ;;  %v6885_v4 = vld [vmem:[%s7806_s30 + $0x14] sm:$0xf0]  ;;  %v5110_v10 = vor.u32 %v6985_v62, %v5109_v60 }
 0x148   : > { %3856 = vmatpush.bf16.msra.mxu3 %v5174_v6  ;;  %v4982_v6 = vor.u32 %v6953_v59, %v4981_v58  ;;  %v4837_v7 = vld [vmem:[%s7806_s30 + $0x108] sm:$0xf]  ;;  %v6917_v8 = vld [vmem:[%s7806_s30 + $0x114] sm:$0xf0]  ;;  %v4710_v19 = vor.u32 %v6885_v4, %v4709_v0 }
 0x149   : > { %3818 = vmatpush.bf16.msra.mxu0 %v4774_v14  ;;  %v4965_v9 = vld [vmem:[%s7806_s30 + $0x208] sm:$0xf]  ;;  %v6949_v11 = vld [vmem:[%s7806_s30 + $0x214] sm:$0xf0]  ;;  %v3592_v14 = vpop.f32.mrf.mxu2  ;;  %v4838_v28 = vor.u32 %v6917_v8, %v4837_v7 }
 0x14a   : > { %3831 = vmatpush.bf16.msra.mxu1 %v4902_v16  ;;  %v5093_v12 = vld [vmem:[%s7806_s30 + $0x308] sm:$0xf]  ;;  %v6981_v13 = vld [vmem:[%s7806_s30 + $0x314] sm:$0xf0]  ;;  %v3605_v18 = vpop.f32.mrf.mxu3  ;;  %v4966_v46 = vor.u32 %v6949_v11, %v4965_v9 }
 0x14b   : > { %3844 = vmatpush.bf16.msra.mxu2 %v5030_v17  ;;  %v5333_v15 = vld [vmem:[%s7806_s30 + $0x4e8] sm:$0xf]  ;;  %v7041_v16 = vld [vmem:[%s7806_s30 + $0x4f4] sm:$0xf0]  ;;  %v5094_v30 = vor.u32 %v6981_v13, %v5093_v12 }
 0x14c   : > { %3857 = vmatpush.bf16.msra.mxu3 %v5158_v25  ;;  %v5461_v17 = vld [vmem:[%s7806_s30 + $0x5e8] sm:$0xf]  ;;  %v7073_v24 = vld [vmem:[%s7806_s30 + $0x5f4] sm:$0xf0] }
 0x14d   : > { %3819 = vmatpush.bf16.msra.mxu0 %v4758_v31  ;;  %v5589_v25 = vld [vmem:[%s7806_s30 + $0x6e8] sm:$0xf]  ;;  %v7105_v26 = vld [vmem:[%s7806_s30 + $0x6f4] sm:$0xf0]  ;;  %v5334_v31 = vor.u32 %v7041_v16, %v5333_v15 }
 0x14e   : > { %3832 = vmatpush.bf16.msra.mxu1 %v4886_v20  ;;  %v5717_v49 = vld [vmem:[%s7806_s30 + $0x7e8] sm:$0xf]  ;;  %v7137_v29 = vld [vmem:[%s7806_s30 + $0x7f4] sm:$0xf0]  ;;  %v5462_v20 = vor.u32 %v7073_v24, %v5461_v17 }
 0x14f   : > { %3845 = vmatpush.bf16.msra.mxu2 %v5014_v32  ;;  %v5590_v32 = vor.u32 %v7105_v26, %v5589_v25  ;;  %v5317_v33 = vld [vmem:[%s7806_s30 + $0x4c8] sm:$0xf]  ;;  %v7037_v34 = vld [vmem:[%s7806_s30 + $0x4d4] sm:$0xf0] }
 0x150   : > { %3858 = vmatpush.bf16.msra.mxu3 %v5142_v36  ;;  %v5445_v35 = vld [vmem:[%s7806_s30 + $0x5c8] sm:$0xf]  ;;  %v5718_v36 = vor.u32 %v7137_v29, %v5717_v49  ;;  %v7069_v37 = vld [vmem:[%s7806_s30 + $0x5d4] sm:$0xf0]  ;;  %v5318_v42 = vor.u32 %v7037_v34, %v5317_v33 }
 0x151   : > { %3820 = vmatpush.bf16.msra.mxu0 %v4742_v47  ;;  %v5573_v38 = vld [vmem:[%s7806_s30 + $0x6c8] sm:$0xf]  ;;  %v7101_v39 = vld [vmem:[%s7806_s30 + $0x6d4] sm:$0xf0]  ;;  %v5446_v43 = vor.u32 %v7069_v37, %v5445_v35 }
 0x152   : > { %3833 = vmatpush.bf16.msra.mxu1 %v4870_v51  ;;  %v5701_v40 = vld [vmem:[%s7806_s30 + $0x7c8] sm:$0xf]  ;;  %v7133_v41 = vld [vmem:[%s7806_s30 + $0x7d4] sm:$0xf0]  ;;  %v5574_v44 = vor.u32 %v7101_v39, %v5573_v38 }
 0x153   : > { %3846 = vmatpush.bf16.msra.mxu2 %v4998_v52  ;;  %v5301_v45 = vld [vmem:[%s7806_s30 + $0x4a8] sm:$0xf]  ;;  %v7033_v47 = vld [vmem:[%s7806_s30 + $0x4b4] sm:$0xf0]  ;;  %v5702_v51 = vor.u32 %v7133_v41, %v5701_v40 }
 0x154   : > { %3859 = vmatpush.bf16.msra.mxu3 %v5126_v56  ;;  %v5429_v48 = vld [vmem:[%s7806_s30 + $0x5a8] sm:$0xf]  ;;  %v7065_v52 = vld [vmem:[%s7806_s30 + $0x5b4] sm:$0xf0]  ;;  %v5302_v57 = vor.u32 %v7033_v47, %v5301_v45 }
 0x155   : > { %3821 = vmatpush.bf16.msra.mxu0 %v4726_v63  ;;  %v5557_v53 = vld [vmem:[%s7806_s30 + $0x6a8] sm:$0xf]  ;;  %v7097_v54 = vld [vmem:[%s7806_s30 + $0x6b4] sm:$0xf0]  ;;  %v5430_v58 = vor.u32 %v7065_v52, %v5429_v48 }
 0x156   : > { %3834 = vmatpush.bf16.msra.mxu1 %v4854_v5  ;;  %v5685_v55 = vld [vmem:[%s7806_s30 + $0x7a8] sm:$0xf]  ;;  %v7129_v56 = vld [vmem:[%s7806_s30 + $0x7b4] sm:$0xf0]  ;;  %v5558_v59 = vor.u32 %v7097_v54, %v5557_v53 }
 0x157   : > { %3847 = vmatpush.bf16.msra.mxu2 %v4982_v6  ;;  %v5285_v60 = vld [vmem:[%s7806_s30 + $0x488] sm:$0xf]  ;;  %v7029_v62 = vld [vmem:[%s7806_s30 + $0x494] sm:$0xf0]  ;;  %v5686_v0 = vor.u32 %v7129_v56, %v5685_v55 }
 0x158   : > { %3860 = vmatpush.bf16.msra.mxu3 %v5110_v10  ;;  %v5413_v63 = vld [vmem:[%s7806_s30 + $0x588] sm:$0xf]  ;;  %v7061_v4 = vld [vmem:[%s7806_s30 + $0x594] sm:$0xf0]  ;;  %v5286_v9 = vor.u32 %v7029_v62, %v5285_v60 }
 0x159   : > { %3822 = vmatpush.bf16.msra.mxu0 %v4710_v19  ;;  %v5541_v5 = vld [vmem:[%s7806_s30 + $0x688] sm:$0xf]  ;;  %v7093_v6 = vld [vmem:[%s7806_s30 + $0x694] sm:$0xf0]  ;;  %v3616_v10 = vpop.f32.mrf.mxu0  ;;  %v5414_v11 = vor.u32 %v7061_v4, %v5413_v63 }
 0x15a   : > { %3835 = vmatpush.bf16.msra.mxu1 %v4838_v28  ;;  %v5669_v7 = vld [vmem:[%s7806_s30 + $0x788] sm:$0xf]  ;;  %v7125_v8 = vld [vmem:[%s7806_s30 + $0x794] sm:$0xf0]  ;;  %v5542_v12 = vor.u32 %v7093_v6, %v5541_v5  ;;  %v3629_v16 = vpop.f32.mrf.mxu1 }
 0x15b   : > { %3848 = vmatpush.bf16.msra.mxu2 %v4966_v46  ;;  %v5269_v13 = vld [vmem:[%s7806_s30 + $0x468] sm:$0xf]  ;;  %v7025_v14 = vld [vmem:[%s7806_s30 + $0x474] sm:$0xf0]  ;;  %v5670_v17 = vor.u32 %v7125_v8, %v5669_v7  ;;  %v3630_v25 = vadd.f32 %v3629_v16, %v3616_v10 }
 0x15c   : > { %3861 = vmatpush.bf16.msra.mxu3 %v5094_v30  ;;  %3823 = vmatmul.bf16.vlgmr.msra.gmra.mxu0 %v7927_v22  ;;  %v5397_v15 = vld [vmem:[%s7806_s30 + $0x568] sm:$0xf]  ;;  %v7057_v18 = vld [vmem:[%s7806_s30 + $0x574] sm:$0xf0]  ;;  %v5270_v46 = vor.u32 %v7025_v14, %v5269_v13 }
 0x15d   : > { %3867 = vmatpush.bf16.msrb.mxu0 %v5334_v31  ;;  %3836 = vmatmul.bf16.vlgmr.msra.gmra.mxu1 %v7934_v27  ;;  %v5525_v19 = vld [vmem:[%s7806_s30 + $0x668] sm:$0xf]  ;;  %v7089_v24 = vld [vmem:[%s7806_s30 + $0x674] sm:$0xf0]  ;;  %v5398_v49 = vor.u32 %v7057_v18, %v5397_v15 }
 0x15e   : > { %3880 = vmatpush.bf16.msrb.mxu1 %v5462_v20  ;;  %3849 = vmatmul.bf16.vlgmr.msra.gmra.mxu2 %v7925_v21  ;;  %v5653_v26 = vld [vmem:[%s7806_s30 + $0x768] sm:$0xf]  ;;  %v7121_v28 = vld [vmem:[%s7806_s30 + $0x774] sm:$0xf0]  ;;  %v5526_v29 = vor.u32 %v7089_v24, %v5525_v19 }
 0x15f   : > { %3893 = vmatpush.bf16.msrb.mxu2 %v5590_v32  ;;  %3862 = vmatmul.bf16.vlgmr.msra.gmra.mxu3 %v7929_v23  ;;  %v5253_v30 = vld [vmem:[%s7806_s30 + $0x448] sm:$0xf]  ;;  %v7021_v31 = vld [vmem:[%s7806_s30 + $0x454] sm:$0xf0]  ;;  %v5654_v33 = vor.u32 %v7121_v28, %v5653_v26 }
 0x160   : > { %3906 = vmatpush.bf16.msrb.mxu3 %v5718_v36  ;;  %v5381_v20 = vld [vmem:[%s7806_s30 + $0x548] sm:$0xf]  ;;  %v7053_v34 = vld [vmem:[%s7806_s30 + $0x554] sm:$0xf0]  ;;  %v5254_v41 = vor.u32 %v7021_v31, %v5253_v30 }
 0x161   : > { %3868 = vmatpush.bf16.msrb.mxu0 %v5318_v42  ;;  %v3642_v32 = vpop.f32.mrf.mxu2  ;;  %v5509_v35 = vld [vmem:[%s7806_s30 + $0x648] sm:$0xf]  ;;  %v7085_v36 = vld [vmem:[%s7806_s30 + $0x654] sm:$0xf0] }
 0x162   : > { %3881 = vmatpush.bf16.msrb.mxu1 %v5446_v43  ;;  %v3643_v37 = vadd.f32 %v3642_v32, %v3630_v25  ;;  %v3655_v38 = vpop.f32.mrf.mxu3  ;;  %v5637_v39 = vld [vmem:[%s7806_s30 + $0x748] sm:$0xf]  ;;  %v7117_v40 = vld [vmem:[%s7806_s30 + $0x754] sm:$0xf0]  ;;  %v3618_v43 = vpop.f32.mrf.mxu0  ;;  %v5510_v45 = vor.u32 %v7085_v36, %v5509_v35 }
 0x163   : > { %3894 = vmatpush.bf16.msrb.mxu2 %v5574_v44  ;;  %v5382_v44 = vor.u32 %v7053_v34, %v5381_v20  ;;  %v5237_v47 = vld [vmem:[%s7806_s30 + $0x428] sm:$0xf]  ;;  %v7017_v48 = vld [vmem:[%s7806_s30 + $0x434] sm:$0xf0]  ;;  %v3631_v52 = vpop.f32.mrf.mxu1  ;;  %v5638_v53 = vor.u32 %v7117_v40, %v5637_v39 }
 0x164   : > { %3907 = vmatpush.bf16.msrb.mxu3 %v5702_v51  ;;  %v8497_v42 = vadd.f32 %v3655_v38, %v3643_v37  ;;  %v5365_v51 = vld [vmem:[%s7806_s30 + $0x528] sm:$0xf]  ;;  %v7049_v54 = vld [vmem:[%s7806_s30 + $0x534] sm:$0xf0] }
 0x165   : > { %3869 = vmatpush.bf16.msrb.mxu0 %v5302_v57  ;;  %v5493_v55 = vld [vmem:[%s7806_s30 + $0x628] sm:$0xf]  ;;  %v7081_v56 = vld [vmem:[%s7806_s30 + $0x634] sm:$0xf0]  ;;  %v5366_v63 = vor.u32 %v7049_v54, %v5365_v51 }
 0x166   : > { %3882 = vmatpush.bf16.msrb.mxu1 %v5430_v58  ;;  %v5621_v57 = vld [vmem:[%s7806_s30 + $0x728] sm:$0xf]  ;;  %v7113_v58 = vld [vmem:[%s7806_s30 + $0x734] sm:$0xf0] }
 0x167   : > { %3895 = vmatpush.bf16.msrb.mxu2 %v5558_v59  ;;  %v5238_v59 = vor.u32 %v7017_v48, %v5237_v47  ;;  %v5221_v60 = vld [vmem:[%s7806_s30 + $0x408] sm:$0xf]  ;;  %v7013_v62 = vld [vmem:[%s7806_s30 + $0x414] sm:$0xf0]  ;;  %v5622_v8 = vor.u32 %v7113_v58, %v5621_v57 }
 0x168   : > { %3908 = vmatpush.bf16.msrb.mxu3 %v5686_v0  ;;  %v5494_v0 = vor.u32 %v7081_v56, %v5493_v55  ;;  %v5349_v4 = vld [vmem:[%s7806_s30 + $0x508] sm:$0xf]  ;;  %v7045_v5 = vld [vmem:[%s7806_s30 + $0x514] sm:$0xf0]  ;;  %v5222_v16 = vor.u32 %v7013_v62, %v5221_v60 }
 0x169   : > { %3870 = vmatpush.bf16.msrb.mxu0 %v5286_v9  ;;  %v5477_v6 = vld [vmem:[%s7806_s30 + $0x608] sm:$0xf]  ;;  %v3644_v7 = vpop.f32.mrf.mxu2  ;;  %v7077_v9 = vld [vmem:[%s7806_s30 + $0x614] sm:$0xf0]  ;;  %v5350_v24 = vor.u32 %v7045_v5, %v5349_v4 }
 0x16a   : > { %3883 = vmatpush.bf16.msrb.mxu1 %v5414_v11  ;;  %v5605_v10 = vld [vmem:[%s7806_s30 + $0x708] sm:$0xf]  ;;  %v7109_v11 = vld [vmem:[%s7806_s30 + $0x714] sm:$0xf0]  ;;  %v5478_v25 = vor.u32 %v7077_v9, %v5477_v6 }
 0x16b   : > { %3896 = vmatpush.bf16.msrb.mxu2 %v5542_v12  ;;  %v3657_v12 = vpop.f32.mrf.mxu3  ;;  %v5845_v13 = vld [vmem:[%s7806_s30 + $0x8e8] sm:$0xf]  ;;  %v7169_v14 = vld [vmem:[%s7806_s30 + $0x8f4] sm:$0xf0] }
 0x16c   : > { %3909 = vmatpush.bf16.msrb.mxu3 %v5670_v17  ;;  %v5973_v15 = vld [vmem:[%s7806_s30 + $0x9e8] sm:$0xf]  ;;  %v7201_v17 = vld [vmem:[%s7806_s30 + $0x9f4] sm:$0xf0] }
 0x16d   : > { %3871 = vmatpush.bf16.msrb.mxu0 %v5270_v46  ;;  %v6101_v18 = vld [vmem:[%s7806_s30 + $0xae8] sm:$0xf]  ;;  %v7233_v19 = vld [vmem:[%s7806_s30 + $0xaf4] sm:$0xf0]  ;;  %v5606_v46 = vor.u32 %v7109_v11, %v5605_v10 }
 0x16e   : > { %3884 = vmatpush.bf16.msrb.mxu1 %v5398_v49  ;;  %v6229_v26 = vld [vmem:[%s7806_s30 + $0xbe8] sm:$0xf]  ;;  %v7265_v28 = vld [vmem:[%s7806_s30 + $0xbf4] sm:$0xf0]  ;;  %v5846_v49 = vor.u32 %v7169_v14, %v5845_v13  ;;  %v6102_v30 = vor.u32 %v7233_v19, %v6101_v18 }
 0x16f   : > { %3897 = vmatpush.bf16.msrb.mxu2 %v5526_v29  ;;  %v5974_v29 = vor.u32 %v7201_v17, %v5973_v15  ;;  %v5829_v31 = vld [vmem:[%s7806_s30 + $0x8c8] sm:$0xf]  ;;  %v7165_v20 = vld [vmem:[%s7806_s30 + $0x8d4] sm:$0xf0] }
 0x170   : > { %3910 = vmatpush.bf16.msrb.mxu3 %v5654_v33  ;;  %v5957_v32 = vld [vmem:[%s7806_s30 + $0x9c8] sm:$0xf]  ;;  %v6230_v33 = vor.u32 %v7265_v28, %v6229_v26  ;;  %v7197_v34 = vld [vmem:[%s7806_s30 + $0x9d4] sm:$0xf0]  ;;  %v5830_v39 = vor.u32 %v7165_v20, %v5829_v31 }
 0x171   : > { %3872 = vmatpush.bf16.msrb.mxu0 %v5254_v41  ;;  %v6085_v35 = vld [vmem:[%s7806_s30 + $0xac8] sm:$0xf]  ;;  %v7229_v36 = vld [vmem:[%s7806_s30 + $0xad4] sm:$0xf0]  ;;  %v5958_v40 = vor.u32 %v7197_v34, %v5957_v32 }
 0x172   : > { %3885 = vmatpush.bf16.msrb.mxu1 %v5382_v44  ;;  %v6213_v37 = vld [vmem:[%s7806_s30 + $0xbc8] sm:$0xf]  ;;  %v7261_v38 = vld [vmem:[%s7806_s30 + $0xbd4] sm:$0xf0]  ;;  %v6086_v41 = vor.u32 %v7229_v36, %v6085_v35 }
 0x173   : > { %3898 = vmatpush.bf16.msrb.mxu2 %v5510_v45  ;;  %v5813_v43 = vld [vmem:[%s7806_s30 + $0x8a8] sm:$0xf]  ;;  %v7161_v44 = vld [vmem:[%s7806_s30 + $0x8b4] sm:$0xf0]  ;;  %v6214_v47 = vor.u32 %v7261_v38, %v6213_v37 }
 0x174   : > { %3911 = vmatpush.bf16.msrb.mxu3 %v5638_v53  ;;  %v5941_v45 = vld [vmem:[%s7806_s30 + $0x9a8] sm:$0xf]  ;;  %v7193_v48 = vld [vmem:[%s7806_s30 + $0x9b4] sm:$0xf0]  ;;  %v5814_v55 = vor.u32 %v7161_v44, %v5813_v43 }
 0x175   : > { %3873 = vmatpush.bf16.msrb.mxu0 %v5238_v59  ;;  %v6069_v51 = vld [vmem:[%s7806_s30 + $0xaa8] sm:$0xf]  ;;  %v7225_v52 = vld [vmem:[%s7806_s30 + $0xab4] sm:$0xf0]  ;;  %v5942_v56 = vor.u32 %v7193_v48, %v5941_v45 }
 0x176   : > { %3886 = vmatpush.bf16.msrb.mxu1 %v5366_v63  ;;  %v6197_v53 = vld [vmem:[%s7806_s30 + $0xba8] sm:$0xf]  ;;  %v7257_v54 = vld [vmem:[%s7806_s30 + $0xbb4] sm:$0xf0]  ;;  %v6070_v57 = vor.u32 %v7225_v52, %v6069_v51 }
 0x177   : > { %3899 = vmatpush.bf16.msrb.mxu2 %v5494_v0  ;;  %v5797_v58 = vld [vmem:[%s7806_s30 + $0x888] sm:$0xf]  ;;  %v7157_v59 = vld [vmem:[%s7806_s30 + $0x894] sm:$0xf0]  ;;  %v6198_v62 = vor.u32 %v7257_v54, %v6197_v53 }
 0x178   : > { %3912 = vmatpush.bf16.msrb.mxu3 %v5622_v8  ;;  %v5925_v60 = vld [vmem:[%s7806_s30 + $0x988] sm:$0xf]  ;;  %v7189_v63 = vld [vmem:[%s7806_s30 + $0x994] sm:$0xf0]  ;;  %v5798_v7 = vor.u32 %v7157_v59, %v5797_v58 }
 0x179   : > { %3874 = vmatpush.bf16.msrb.mxu0 %v5222_v16  ;;  %v6053_v0 = vld [vmem:[%s7806_s30 + $0xa88] sm:$0xf]  ;;  %v7221_v4 = vld [vmem:[%s7806_s30 + $0xa94] sm:$0xf0]  ;;  %v3668_v8 = vpop.f32.mrf.mxu0  ;;  %v5926_v9 = vor.u32 %v7189_v63, %v5925_v60 }
 0x17a   : > { %3887 = vmatpush.bf16.msrb.mxu1 %v5350_v24  ;;  %v6181_v5 = vld [vmem:[%s7806_s30 + $0xb88] sm:$0xf]  ;;  %v7253_v6 = vld [vmem:[%s7806_s30 + $0xb94] sm:$0xf0]  ;;  %v6054_v10 = vor.u32 %v7221_v4, %v6053_v0  ;;  %v3669_v14 = vadd.f32 %v3668_v8, %v8497_v42  ;;  %v3681_v15 = vpop.f32.mrf.mxu1 }
 0x17b   : > { %3900 = vmatpush.bf16.msrb.mxu2 %v5478_v25  ;;  %v5781_v11 = vld [vmem:[%s7806_s30 + $0x868] sm:$0xf]  ;;  %v7153_v12 = vld [vmem:[%s7806_s30 + $0x874] sm:$0xf0]  ;;  %v6182_v16 = vor.u32 %v7253_v6, %v6181_v5 }
 0x17c   : > { %3913 = vmatpush.bf16.msrb.mxu3 %v5606_v46  ;;  %3875 = vmatmul.bf16.vlgmr.msrb.gmra.mxu0 %v7966_v1  ;;  %v5909_v13 = vld [vmem:[%s7806_s30 + $0x968] sm:$0xf]  ;;  %v7185_v17 = vld [vmem:[%s7806_s30 + $0x974] sm:$0xf0]  ;;  %v3682_v26 = vadd.f32 %v3681_v15, %v3669_v14  ;;  %v5782_v28 = vor.u32 %v7153_v12, %v5781_v11 }
 0x17d   : > { %3919 = vmatpush.bf16.msra.mxu0 %v5846_v49  ;;  %3888 = vmatmul.bf16.vlgmr.msrb.gmra.mxu1 %v7970_v3  ;;  %v6037_v18 = vld [vmem:[%s7806_s30 + $0xa68] sm:$0xf]  ;;  %v7217_v19 = vld [vmem:[%s7806_s30 + $0xa74] sm:$0xf0]  ;;  %v5910_v42 = vor.u32 %v7185_v17, %v5909_v13 }
 0x17e   : > { %3932 = vmatpush.bf16.msra.mxu1 %v5974_v29  ;;  %3901 = vmatmul.bf16.vlgmr.msrb.gmra.mxu2 %v7963_v61  ;;  %v6165_v24 = vld [vmem:[%s7806_s30 + $0xb68] sm:$0xf]  ;;  %v7249_v25 = vld [vmem:[%s7806_s30 + $0xb74] sm:$0xf0]  ;;  %v6038_v46 = vor.u32 %v7217_v19, %v6037_v18 }
 0x17f   : > { %3945 = vmatpush.bf16.msra.mxu2 %v6102_v30  ;;  %3914 = vmatmul.bf16.vlgmr.msrb.gmra.mxu3 %v7968_v2  ;;  %v5765_v49 = vld [vmem:[%s7806_s30 + $0x848] sm:$0xf]  ;;  %v7149_v29 = vld [vmem:[%s7806_s30 + $0x854] sm:$0xf0]  ;;  %v6166_v20 = vor.u32 %v7249_v25, %v6165_v24 }
 0x180   : > { %3958 = vmatpush.bf16.msra.mxu3 %v6230_v33  ;;  %v5893_v30 = vld [vmem:[%s7806_s30 + $0x948] sm:$0xf]  ;;  %v7181_v32 = vld [vmem:[%s7806_s30 + $0x954] sm:$0xf0] }
 0x181   : > { %3920 = vmatpush.bf16.msra.mxu0 %v5830_v39  ;;  %v3694_v31 = vpop.f32.mrf.mxu2  ;;  %v6021_v33 = vld [vmem:[%s7806_s30 + $0xa48] sm:$0xf]  ;;  %v7213_v34 = vld [vmem:[%s7806_s30 + $0xa54] sm:$0xf0]  ;;  %v5766_v39 = vor.u32 %v7149_v29, %v5765_v49  ;;  %v5894_v43 = vor.u32 %v7181_v32, %v5893_v30 }
 0x182   : > { %3933 = vmatpush.bf16.msra.mxu1 %v5958_v40  ;;  %v3695_v35 = vadd.f32 %v3694_v31, %v3682_v26  ;;  %v3707_v36 = vpop.f32.mrf.mxu3  ;;  %v6149_v37 = vld [vmem:[%s7806_s30 + $0xb48] sm:$0xf]  ;;  %v7245_v38 = vld [vmem:[%s7806_s30 + $0xb54] sm:$0xf0]  ;;  %v6022_v44 = vor.u32 %v7213_v34, %v6021_v33  ;;  %v3683_v51 = vpop.f32.mrf.mxu1 }
 0x183   : > { %3946 = vmatpush.bf16.msra.mxu2 %v6086_v41  ;;  %v3670_v41 = vpop.f32.mrf.mxu0  ;;  %v5749_v45 = vld [vmem:[%s7806_s30 + $0x828] sm:$0xf]  ;;  %v6150_v52 = vor.u32 %v7245_v38, %v6149_v37  ;;  %v7177_v53 = vld [vmem:[%s7806_s30 + $0x934] sm:$0xf0] }
 0x184   : > { %3959 = vmatpush.bf16.msra.mxu3 %v6214_v47  ;;  %v8568_v40 = vadd.f32 %v3707_v36, %v3695_v35  ;;  %v7145_v47 = vld [vmem:[%s7806_s30 + $0x834] sm:$0xf0]  ;;  %v5877_v48 = vld [vmem:[%s7806_s30 + $0x928] sm:$0xf] }
 0x185   : > { %3921 = vmatpush.bf16.msra.mxu0 %v5814_v55  ;;  %v6005_v54 = vld [vmem:[%s7806_s30 + $0xa28] sm:$0xf]  ;;  %v7209_v55 = vld [vmem:[%s7806_s30 + $0xa34] sm:$0xf0]  ;;  %v5750_v58 = vor.u32 %v7145_v47, %v5749_v45  ;;  %v7504_v45 = vld [vmem:[#allocation1] sm:$0xff] }
 0x186   : > { %3934 = vmatpush.bf16.msra.mxu1 %v5942_v56  ;;  %v6133_v56 = vld [vmem:[%s7806_s30 + $0xb28] sm:$0xf]  ;;  %v7141_v60 = vld [vmem:[%s7806_s30 + $0x814] sm:$0xf0]  ;;  %v6006_v63 = vor.u32 %v7209_v55, %v6005_v54 }
 0x187   : > { %3947 = vmatpush.bf16.msra.mxu2 %v6070_v57  ;;  %v7241_v57 = vld [vmem:[%s7806_s30 + $0xb34] sm:$0xf0]  ;;  %v5733_v59 = vld [vmem:[%s7806_s30 + $0x808] sm:$0xf] }
 0x188   : > { %3960 = vmatpush.bf16.msra.mxu3 %v6198_v62  ;;  %v5878_v62 = vor.u32 %v7177_v53, %v5877_v48  ;;  %v5861_v0 = vld [vmem:[%s7806_s30 + $0x908] sm:$0xf]  ;;  %v7173_v4 = vld [vmem:[%s7806_s30 + $0x914] sm:$0xf0]  ;;  %v5734_v15 = vor.u32 %v7141_v60, %v5733_v59 }
 0x189   : > { %3922 = vmatpush.bf16.msra.mxu0 %v5798_v7  ;;  %v5989_v5 = vld [vmem:[%s7806_s30 + $0xa08] sm:$0xf]  ;;  %v3696_v6 = vpop.f32.mrf.mxu2  ;;  %v6134_v7 = vor.u32 %v7241_v57, %v6133_v56  ;;  %v7205_v8 = vld [vmem:[%s7806_s30 + $0xa14] sm:$0xf0]  ;;  %v5862_v19 = vor.u32 %v7173_v4, %v5861_v0 }
 0x18a   : > { %3935 = vmatpush.bf16.msra.mxu1 %v5926_v9  ;;  %v6117_v9 = vld [vmem:[%s7806_s30 + $0xb08] sm:$0xf]  ;;  %v3709_v11 = vpop.f32.mrf.mxu3  ;;  %v7297_v13 = vld [vmem:[%s7806_s30 + $0xcf4] sm:$0xf0]  ;;  %v5990_v24 = vor.u32 %v7205_v8, %v5989_v5 }
 0x18b   : > { %3948 = vmatpush.bf16.msra.mxu2 %v6054_v10  ;;  %v7237_v10 = vld [vmem:[%s7806_s30 + $0xb14] sm:$0xf0]  ;;  %v6357_v12 = vld [vmem:[%s7806_s30 + $0xce8] sm:$0xf] }
 0x18c   : > { %3961 = vmatpush.bf16.msra.mxu3 %v6182_v16  ;;  %v6485_v14 = vld [vmem:[%s7806_s30 + $0xde8] sm:$0xf]  ;;  %v7329_v16 = vld [vmem:[%s7806_s30 + $0xdf4] sm:$0xf0] }
 0x18d   : > { %3923 = vmatpush.bf16.msra.mxu0 %v5782_v28  ;;  %v6613_v17 = vld [vmem:[%s7806_s30 + $0xee8] sm:$0xf]  ;;  %v7361_v18 = vld [vmem:[%s7806_s30 + $0xef4] sm:$0xf0]  ;;  %v6118_v28 = vor.u32 %v7237_v10, %v6117_v9 }
 0x18e   : > { %3936 = vmatpush.bf16.msra.mxu1 %v5910_v42  ;;  %v6741_v25 = vld [vmem:[%s7806_s30 + $0xfe8] sm:$0xf]  ;;  %v7393_v26 = vld [vmem:[%s7806_s30 + $0xff4] sm:$0xf0]  ;;  %v6358_v42 = vor.u32 %v7297_v13, %v6357_v12  ;;  %v6614_v49 = vor.u32 %v7361_v18, %v6613_v17 }
 0x18f   : > { %3949 = vmatpush.bf16.msra.mxu2 %v6038_v46  ;;  %v6486_v46 = vor.u32 %v7329_v16, %v6485_v14  ;;  %v6341_v29 = vld [vmem:[%s7806_s30 + $0xcc8] sm:$0xf]  ;;  %v7293_v30 = vld [vmem:[%s7806_s30 + $0xcd4] sm:$0xf0] }
 0x190   : > { %3962 = vmatpush.bf16.msra.mxu3 %v6166_v20  ;;  %v6469_v31 = vld [vmem:[%s7806_s30 + $0xdc8] sm:$0xf]  ;;  %v6742_v20 = vor.u32 %v7393_v26, %v6741_v25  ;;  %v7325_v32 = vld [vmem:[%s7806_s30 + $0xdd4] sm:$0xf0]  ;;  %v6342_v37 = vor.u32 %v7293_v30, %v6341_v29 }
 0x191   : > { %3924 = vmatpush.bf16.msra.mxu0 %v5766_v39  ;;  %v6597_v33 = vld [vmem:[%s7806_s30 + $0xec8] sm:$0xf]  ;;  %v7357_v34 = vld [vmem:[%s7806_s30 + $0xed4] sm:$0xf0]  ;;  %v6470_v38 = vor.u32 %v7325_v32, %v6469_v31 }
 0x192   : > { %3937 = vmatpush.bf16.msra.mxu1 %v5894_v43  ;;  %v6725_v35 = vld [vmem:[%s7806_s30 + $0xfc8] sm:$0xf]  ;;  %v7389_v36 = vld [vmem:[%s7806_s30 + $0xfd4] sm:$0xf0]  ;;  %v6598_v39 = vor.u32 %v7357_v34, %v6597_v33 }
 0x193   : > { %3950 = vmatpush.bf16.msra.mxu2 %v6022_v44  ;;  %v6325_v41 = vld [vmem:[%s7806_s30 + $0xca8] sm:$0xf]  ;;  %v7289_v43 = vld [vmem:[%s7806_s30 + $0xcb4] sm:$0xf0]  ;;  %v6726_v47 = vor.u32 %v7389_v36, %v6725_v35 }
 0x194   : > { %3963 = vmatpush.bf16.msra.mxu3 %v6150_v52  ;;  %v6453_v44 = vld [vmem:[%s7806_s30 + $0xda8] sm:$0xf]  ;;  %v7321_v48 = vld [vmem:[%s7806_s30 + $0xdb4] sm:$0xf0] }
 0x195   : > { %3925 = vmatpush.bf16.msra.mxu0 %v5750_v58  ;;  %v6581_v51 = vld [vmem:[%s7806_s30 + $0xea8] sm:$0xf]  ;;  %v7353_v52 = vld [vmem:[%s7806_s30 + $0xeb4] sm:$0xf0]  ;;  %v6326_v58 = vor.u32 %v7289_v43, %v6325_v41  ;;  %v6454_v59 = vor.u32 %v7321_v48, %v6453_v44 }
 0x196   : > { %3938 = vmatpush.bf16.msra.mxu1 %v5878_v62  ;;  %v7505_v53 = vld [vmem:[#allocation1 + $0x12] sm:$0xff]  ;;  %v7506_v54 = vld [vmem:[#allocation1 + $0x9] sm:$0xff]  ;;  %v7507_v57 = vld [vmem:[#allocation1 + $0x1b] sm:$0xff]  ;;  %v6582_v60 = vor.u32 %v7353_v52, %v6581_v51 }
 0x197   : > { %3951 = vmatpush.bf16.msra.mxu2 %v6006_v63  ;;  %v6709_v55 = vld [vmem:[%s7806_s30 + $0xfa8] sm:$0xf]  ;;  %v7385_v56 = vld [vmem:[%s7806_s30 + $0xfb4] sm:$0xf0] }
 0x198   : > { %3964 = vmatpush.bf16.msra.mxu3 %v6134_v7  ;;  %v6309_v62 = vld [vmem:[%s7806_s30 + $0xc88] sm:$0xf]  ;;  %v7285_v63 = vld [vmem:[%s7806_s30 + $0xc94] sm:$0xf0]  ;;  %v6710_v4 = vor.u32 %v7385_v56, %v6709_v55 }
 0x199   : > { %3926 = vmatpush.bf16.msra.mxu0 %v5734_v15  ;;  %v6437_v0 = vld [vmem:[%s7806_s30 + $0xd88] sm:$0xf]  ;;  %v7317_v5 = vld [vmem:[%s7806_s30 + $0xd94] sm:$0xf0]  ;;  %v3720_v8 = vpop.f32.mrf.mxu0  ;;  %v6310_v12 = vor.u32 %v7285_v63, %v6309_v62 }
 0x19a   : > { %3939 = vmatpush.bf16.msra.mxu1 %v5862_v19  ;;  %v6565_v6 = vld [vmem:[%s7806_s30 + $0xe88] sm:$0xf]  ;;  %v7349_v7 = vld [vmem:[%s7806_s30 + $0xe94] sm:$0xf0]  ;;  %v3721_v11 = vadd.f32 %v3720_v8, %v8568_v40  ;;  %v3733_v13 = vpop.f32.mrf.mxu1  ;;  %v6438_v14 = vor.u32 %v7317_v5, %v6437_v0 }
 0x19b   : > { %3952 = vmatpush.bf16.msra.mxu2 %v5990_v24  ;;  %v6693_v9 = vld [vmem:[%s7806_s30 + $0xf88] sm:$0xf]  ;;  %v7381_v10 = vld [vmem:[%s7806_s30 + $0xf94] sm:$0xf0]  ;;  %v6566_v15 = vor.u32 %v7349_v7, %v6565_v6 }
 0x19c   : > { %3965 = vmatpush.bf16.msra.mxu3 %v6118_v28  ;;  %3927 = vmatmul.bf16.vlgmr.msra.gmra.mxu0 %v7504_v45  ;;  %v6293_v16 = vld [vmem:[%s7806_s30 + $0xc68] sm:$0xf]  ;;  %v7281_v17 = vld [vmem:[%s7806_s30 + $0xc74] sm:$0xf0]  ;;  %v6694_v19 = vor.u32 %v7381_v10, %v6693_v9  ;;  %v3734_v24 = vadd.f32 %v3733_v13, %v3721_v11 }
 0x19d   : > { %3971 = vmatpush.bf16.msrb.mxu0 %v6358_v42  ;;  %3940 = vmatmul.bf16.vlgmr.msra.gmra.mxu1 %v7506_v54  ;;  %v6421_v18 = vld [vmem:[%s7806_s30 + $0xd68] sm:$0xf]  ;;  %v7313_v25 = vld [vmem:[%s7806_s30 + $0xd74] sm:$0xf0] }
 0x19e   : > { %3984 = vmatpush.bf16.msrb.mxu1 %v6486_v46  ;;  %3953 = vmatmul.bf16.vlgmr.msra.gmra.mxu2 %v7505_v53  ;;  %v6549_v26 = vld [vmem:[%s7806_s30 + $0xe68] sm:$0xf]  ;;  %v7345_v40 = vld [vmem:[%s7806_s30 + $0xe74] sm:$0xf0]  ;;  %v6294_v46 = vor.u32 %v7281_v17, %v6293_v16  ;;  %v6943_v16 = vld [vmem:[%s7806_s30 + $0x1ec] sm:$0xf] }
 0x19f   : > { %3997 = vmatpush.bf16.msrb.mxu2 %v6614_v49  ;;  %3966 = vmatmul.bf16.vlgmr.msra.gmra.mxu3 %v7507_v57  ;;  %v6677_v28 = vld [vmem:[%s7806_s30 + $0xf68] sm:$0xf]  ;;  %v7377_v42 = vld [vmem:[%s7806_s30 + $0xf74] sm:$0xf0]  ;;  %v6422_v49 = vor.u32 %v7313_v25, %v6421_v18  ;;  %v6550_v29 = vor.u32 %v7345_v40, %v6549_v26  ;;  %v5079_v25 = vld [vmem:[%s7806_s30 + $0x2f8] sm:$0xf0] }
 0x1a0   : > { %4010 = vmatpush.bf16.msrb.mxu3 %v6742_v20  ;;  %v6277_v30 = vld [vmem:[%s7806_s30 + $0xc48] sm:$0xf]  ;;  %v7277_v31 = vld [vmem:[%s7806_s30 + $0xc54] sm:$0xf0]  ;;  %v6678_v32 = vor.u32 %v7377_v42, %v6677_v28  ;;  %v7007_v28 = vld [vmem:[%s7806_s30 + $0x3ec] sm:$0xf] }
 0x1a1   : > { %3972 = vmatpush.bf16.msrb.mxu0 %v6342_v37  ;;  %v6405_v20 = vld [vmem:[%s7806_s30 + $0xd48] sm:$0xf]  ;;  %v3746_v33 = vpop.f32.mrf.mxu2  ;;  %v7309_v34 = vld [vmem:[%s7806_s30 + $0xd54] sm:$0xf0]  ;;  %v3722_v43 = vpop.f32.mrf.mxu0  ;;  %v6278_v44 = vor.u32 %v7277_v31, %v6277_v30  ;;  %v5207_v42 = vld [vmem:[%s7806_s30 + $0x3f8] sm:$0xf0] }
 0x1a2   : > { %3985 = vmatpush.bf16.msrb.mxu1 %v6470_v38  ;;  %v6533_v35 = vld [vmem:[%s7806_s30 + $0xe48] sm:$0xf]  ;;  %v7341_v36 = vld [vmem:[%s7806_s30 + $0xe54] sm:$0xf0]  ;;  %v3747_v37 = vadd.f32 %v3746_v33, %v3734_v24  ;;  %v3759_v38 = vpop.f32.mrf.mxu3  ;;  %v3735_v45 = vpop.f32.mrf.mxu1  ;;  %v6406_v48 = vor.u32 %v7309_v34, %v6405_v20  ;;  %v6975_v24 = vld [vmem:[%s7806_s30 + $0x2ec] sm:$0xf]  ;;  %v5210_v33 = vor.u32 %v7007_v28, %v5207_v42 }
 0x1a3   : > { %3998 = vmatpush.bf16.msrb.mxu2 %v6598_v39  ;;  %v6661_v39 = vld [vmem:[%s7806_s30 + $0xf48] sm:$0xf]  ;;  %v7373_v41 = vld [vmem:[%s7806_s30 + $0xf54] sm:$0xf0]  ;;  %v6534_v51 = vor.u32 %v7341_v36, %v6533_v35  ;;  %v5082_v30 = vor.u32 %v6975_v24, %v5079_v25  ;;  %v6907_v31 = vld [vmem:[%s7806_s30 + $0xcc] sm:$0xf] }
 0x1a4   : > { %4011 = vmatpush.bf16.msrb.mxu3 %v6726_v47  ;;  %v8635_v47 = vadd.f32 %v3759_v38, %v3747_v37  ;;  %v6261_v52 = vld [vmem:[%s7806_s30 + $0xc28] sm:$0xf]  ;;  %v7273_v53 = vld [vmem:[%s7806_s30 + $0xc34] sm:$0xf0]  ;;  %v6662_v55 = vor.u32 %v7373_v41, %v6661_v39  ;;  %v4807_v20 = vld [vmem:[%s7806_s30 + $0xd8] sm:$0xf0] }
 0x1a5   : > { %3973 = vmatpush.bf16.msrb.mxu0 %v6326_v58  ;;  %v6389_v54 = vld [vmem:[%s7806_s30 + $0xd28] sm:$0xf]  ;;  %v7305_v56 = vld [vmem:[%s7806_s30 + $0xd34] sm:$0xf0]  ;;  %v6262_v62 = vor.u32 %v7273_v53, %v6261_v52  ;;  %v4935_v34 = vld [vmem:[%s7806_s30 + $0x1d8] sm:$0xf0]  ;;  %v4810_v39 = vor.u32 %v6907_v31, %v4807_v20 }
 0x1a6   : > { %3986 = vmatpush.bf16.msrb.mxu1 %v6454_v59  ;;  %v6517_v57 = vld [vmem:[%s7806_s30 + $0xe28] sm:$0xf]  ;;  %v7337_v58 = vld [vmem:[%s7806_s30 + $0xe34] sm:$0xf0]  ;;  %v6971_v35 = vld [vmem:[%s7806_s30 + $0x2cc] sm:$0xf] }
 0x1a7   : > { %3999 = vmatpush.bf16.msrb.mxu2 %v6582_v60  ;;  %v6645_v59 = vld [vmem:[%s7806_s30 + $0xf28] sm:$0xf]  ;;  %v7369_v60 = vld [vmem:[%s7806_s30 + $0xf34] sm:$0xf0]  ;;  %v6518_v5 = vor.u32 %v7337_v58, %v6517_v57  ;;  %v5063_v36 = vld [vmem:[%s7806_s30 + $0x2d8] sm:$0xf0] }
 0x1a8   : > { %4012 = vmatpush.bf16.msrb.mxu3 %v6710_v4  ;;  %v6245_v63 = vld [vmem:[%s7806_s30 + $0xc08] sm:$0xf]  ;;  %v7269_v0 = vld [vmem:[%s7806_s30 + $0xc14] sm:$0xf0]  ;;  %v6390_v4 = vor.u32 %v7305_v56, %v6389_v54  ;;  %v6646_v9 = vor.u32 %v7369_v60, %v6645_v59  ;;  %v7003_v37 = vld [vmem:[%s7806_s30 + $0x3cc] sm:$0xf]  ;;  %v5066_v43 = vor.u32 %v6971_v35, %v5063_v36 }
 0x1a9   : > { %3974 = vmatpush.bf16.msrb.mxu0 %v6310_v12  ;;  %v6373_v6 = vld [vmem:[%s7806_s30 + $0xd08] sm:$0xf]  ;;  %v7301_v7 = vld [vmem:[%s7806_s30 + $0xd14] sm:$0xf0]  ;;  %v3748_v13 = vpop.f32.mrf.mxu2  ;;  %v6246_v18 = vor.u32 %v7269_v0, %v6245_v63  ;;  %v5191_v38 = vld [vmem:[%s7806_s30 + $0x3d8] sm:$0xf0] }
 0x1aa   : > { %3987 = vmatpush.bf16.msrb.mxu1 %v6438_v14  ;;  %v6501_v8 = vld [vmem:[%s7806_s30 + $0xe08] sm:$0xf]  ;;  %v7333_v10 = vld [vmem:[%s7806_s30 + $0xe14] sm:$0xf0]  ;;  %v6911_v14 = vld [vmem:[%s7806_s30 + $0xec] sm:$0xf]  ;;  %v3761_v17 = vpop.f32.mrf.mxu3  ;;  %v6374_v26 = vor.u32 %v7301_v7, %v6373_v6  ;;  %v5194_v52 = vor.u32 %v7003_v37, %v5191_v38 }
 0x1ab   : > { %4000 = vmatpush.bf16.msrb.mxu2 %v6566_v15  ;;  %v6629_v11 = vld [vmem:[%s7806_s30 + $0xf08] sm:$0xf]  ;;  %v7365_v12 = vld [vmem:[%s7806_s30 + $0xf14] sm:$0xf0]  ;;  %v4823_v15 = vld [vmem:[%s7806_s30 + $0xf8] sm:$0xf0]  ;;  %v6502_v40 = vor.u32 %v7333_v10, %v6501_v8 }
 0x1ac   : > { %4013 = vmatpush.bf16.msrb.mxu3 %v6694_v19  ;;  %v4951_v19 = vld [vmem:[%s7806_s30 + $0x1f8] sm:$0xf0]  ;;  %v6967_v54 = vld [vmem:[%s7806_s30 + $0x2ac] sm:$0xf] }
 0x1ad   : > { %3975 = vmatpush.bf16.msrb.mxu0 %v6294_v46  ;;  %v6630_v46 = vor.u32 %v7365_v12, %v6629_v11  ;;  %v4791_v45 = vld [vmem:[%s7806_s30 + $0xb8] sm:$0xf0]  ;;  %v7509_v56 = vld [vmem:[#allocation1 + $0x36] sm:$0xff]  ;;  %v7511_v60 = vld [vmem:[#allocation1 + $0x3f] sm:$0xff] }
 0x1ae   : > { %3988 = vmatpush.bf16.msrb.mxu1 %v6422_v49  ;;  %v4826_v49 = vor.u32 %v6911_v14, %v4823_v15  ;;  %v4919_v53 = vld [vmem:[%s7806_s30 + $0x1b8] sm:$0xf0]  ;;  %v6999_v58 = vld [vmem:[%s7806_s30 + $0x3ac] sm:$0xf] }
 0x1af   : > { %4001 = vmatpush.bf16.msrb.mxu2 %v6550_v29  ;;  %v4954_v29 = vor.u32 %v6943_v16, %v4951_v19  ;;  %v7510_v57 = vld [vmem:[#allocation1 + $0x2d] sm:$0xff]  ;;  %v6931_v6 = vld [vmem:[%s7806_s30 + $0x18c] sm:$0xf] }
 0x1b0   : > { %4014 = vmatpush.bf16.msrb.mxu3 %v6678_v32  ;;  %v6939_v32 = vld [vmem:[%s7806_s30 + $0x1cc] sm:$0xf]  ;;  %v5175_v59 = vld [vmem:[%s7806_s30 + $0x3b8] sm:$0xf0] }
 0x1b1   : > { %3976 = vmatpush.bf16.msrb.mxu0 %v6278_v44  ;;  %v4938_v41 = vor.u32 %v6939_v32, %v4935_v34  ;;  %v6903_v44 = vld [vmem:[%s7806_s30 + $0xac] sm:$0xf]  ;;  %v5178_v7 = vor.u32 %v6999_v58, %v5175_v59  ;;  %v4903_v8 = vld [vmem:[%s7806_s30 + $0x198] sm:$0xf0] }
 0x1b2   : > { %3989 = vmatpush.bf16.msrb.mxu1 %v6406_v48  ;;  %v6935_v48 = vld [vmem:[%s7806_s30 + $0x1ac] sm:$0xf]  ;;  %v5031_v10 = vld [vmem:[%s7806_s30 + $0x298] sm:$0xf0]  ;;  %v4906_v17 = vor.u32 %v6931_v6, %v4903_v8 }
 0x1b3   : > { %4002 = vmatpush.bf16.msrb.mxu2 %v6534_v51  ;;  %v7508_v51 = vld [vmem:[#allocation1 + $0x24] sm:$0xff]  ;;  %v4922_v63 = vor.u32 %v6935_v48, %v4919_v53  ;;  %v6995_v12 = vld [vmem:[%s7806_s30 + $0x38c] sm:$0xf]  ;;  %v5159_v13 = vld [vmem:[%s7806_s30 + $0x398] sm:$0xf0] }
 0x1b4   : > { %4015 = vmatpush.bf16.msrb.mxu3 %v6662_v55  ;;  %v5047_v55 = vld [vmem:[%s7806_s30 + $0x2b8] sm:$0xf0]  ;;  %v6895_v19 = vld [vmem:[%s7806_s30 + $0x6c] sm:$0xf] }
 0x1b5   : > { %3977 = vmatpush.bf16.msrb.mxu0 %v6262_v62  ;;  %v4794_v62 = vor.u32 %v6903_v44, %v4791_v45  ;;  %v5050_v0 = vor.u32 %v6967_v54, %v5047_v55  ;;  %v4759_v24 = vld [vmem:[%s7806_s30 + $0x78] sm:$0xf0]  ;;  %v6927_v25 = vld [vmem:[%s7806_s30 + $0x16c] sm:$0xf] }
 0x1b6   : > { %3990 = vmatpush.bf16.msrb.mxu1 %v6390_v4  ;;  %v6899_v4 = vld [vmem:[%s7806_s30 + $0x8c] sm:$0xf]  ;;  %v4887_v28 = vld [vmem:[%s7806_s30 + $0x178] sm:$0xf0] }
 0x1b7   : > { %4003 = vmatpush.bf16.msrb.mxu2 %v6518_v5  ;;  %v4775_v5 = vld [vmem:[%s7806_s30 + $0x98] sm:$0xf0]  ;;  %v6959_v42 = vld [vmem:[%s7806_s30 + $0x26c] sm:$0xf] }
 0x1b8   : > { %4016 = vmatpush.bf16.msrb.mxu3 %v6646_v9  ;;  %v6963_v9 = vld [vmem:[%s7806_s30 + $0x28c] sm:$0xf]  ;;  %v4778_v15 = vor.u32 %v6899_v4, %v4775_v5  ;;  %v4743_v32 = vld [vmem:[%s7806_s30 + $0x58] sm:$0xf0] }
 0x1b9   : > { %3978 = vmatpush.bf16.msrb.mxu0 %v6246_v18  ;;  %v3772_v11 = vpop.f32.mrf.mxu0  ;;  %v5034_v18 = vor.u32 %v6963_v9, %v5031_v10  ;;  %v6891_v20 = vld [vmem:[%s7806_s30 + $0x4c] sm:$0xf]  ;;  %v4871_v36 = vld [vmem:[%s7806_s30 + $0x158] sm:$0xf0] }
 0x1ba   : > { %3991 = vmatpush.bf16.msrb.mxu1 %v6374_v26  ;;  %v3773_v14 = vadd.f32 %v3772_v11, %v8635_v47  ;;  %v3785_v16 = vpop.f32.mrf.mxu1  ;;  %v5162_v26 = vor.u32 %v6995_v12, %v5159_v13  ;;  %v5015_v47 = vld [vmem:[%s7806_s30 + $0x278] sm:$0xf0]  ;;  %v6955_v37 = vld [vmem:[%s7806_s30 + $0x24c] sm:$0xf]  ;;  %v4746_v48 = vor.u32 %v6891_v20, %v4743_v32 }
 0x1bb   : > { %4004 = vmatpush.bf16.msrb.mxu2 %v6502_v40  ;;  %v5018_v31 = vor.u32 %v6959_v42, %v5015_v47  ;;  %v4999_v38 = vld [vmem:[%s7806_s30 + $0x258] sm:$0xf0]  ;;  %v6887_v55 = vld [vmem:[%s7806_s30 + $0x2c] sm:$0xf] }
 0x1bc   : > { %4017 = vmatpush.bf16.msrb.mxu3 %v6630_v46  ;;  %3979 = vmatmul.bf16.vlgmr.msrb.gmra.mxu0 %v7508_v51  ;;  %v3786_v40 = vadd.f32 %v3785_v16, %v3773_v14  ;;  %v6991_v46 = vld [vmem:[%s7806_s30 + $0x36c] sm:$0xf]  ;;  %v5127_v44 = vld [vmem:[%s7806_s30 + $0x358] sm:$0xf0]  ;;  %v5002_v54 = vor.u32 %v6955_v37, %v4999_v38 }
 0x1bd   : > { %4023 = vmatpush.bf16.msra.mxu0 %v4826_v49  ;;  %3992 = vmatmul.bf16.vlgmr.msrb.gmra.mxu1 %v7510_v57  ;;  %v5143_v49 = vld [vmem:[%s7806_s30 + $0x378] sm:$0xf0]  ;;  %v6919_v57 = vld [vmem:[%s7806_s30 + $0x12c] sm:$0xf] }
 0x1be   : > { %4036 = vmatpush.bf16.msra.mxu1 %v4954_v29  ;;  %4005 = vmatmul.bf16.vlgmr.msrb.gmra.mxu2 %v7509_v56  ;;  %v4762_v29 = vor.u32 %v6895_v19, %v4759_v24  ;;  %v5146_v34 = vor.u32 %v6991_v46, %v5143_v49  ;;  %v4727_v56 = vld [vmem:[%s7806_s30 + $0x38] sm:$0xf0]  ;;  %v6883_v6 = vld [vmem:[%s7806_s30 + $0xc] sm:$0xf] }
 0x1bf   : > { %4049 = vmatpush.bf16.msra.mxu2 %v5082_v30  ;;  %4018 = vmatmul.bf16.vlgmr.msrb.gmra.mxu3 %v7511_v60  ;;  %v4890_v30 = vor.u32 %v6927_v25, %v4887_v28  ;;  %v4855_v59 = vld [vmem:[%s7806_s30 + $0x138] sm:$0xf0]  ;;  %v6951_v60 = vld [vmem:[%s7806_s30 + $0x22c] sm:$0xf]  ;;  %v4730_v5 = vor.u32 %v6887_v55, %v4727_v56 }
 0x1c0   : > { %4062 = vmatpush.bf16.msra.mxu3 %v5210_v33  ;;  %v6923_v33 = vld [vmem:[%s7806_s30 + $0x14c] sm:$0xf]  ;;  %v5111_v4 = vld [vmem:[%s7806_s30 + $0x338] sm:$0xf0]  ;;  %v4858_v9 = vor.u32 %v6919_v57, %v4855_v59 }
 0x1c1   : > { %4024 = vmatpush.bf16.msra.mxu0 %v4810_v39  ;;  %v3798_v35 = vpop.f32.mrf.mxu2  ;;  %v3774_v45 = vpop.f32.mrf.mxu0  ;;  %v4874_v53 = vor.u32 %v6923_v33, %v4871_v36  ;;  %v6915_v11 = vld [vmem:[%s7806_s30 + $0x10c] sm:$0xf]  ;;  %v4839_v12 = vld [vmem:[%s7806_s30 + $0x118] sm:$0xf0] }
 0x1c2   : > { %4037 = vmatpush.bf16.msra.mxu1 %v4938_v41  ;;  %v3799_v39 = vadd.f32 %v3798_v35, %v3786_v40  ;;  %v3811_v41 = vpop.f32.mrf.mxu3  ;;  %v3787_v51 = vpop.f32.mrf.mxu1  ;;  %v6947_v13 = vld [vmem:[%s7806_s30 + $0x20c] sm:$0xf]  ;;  %v5335_v19 = vld [vmem:[%s7806_s30 + $0x4f8] sm:$0xf0]  ;;  %v4842_v47 = vor.u32 %v6915_v11, %v4839_v12 }
 0x1c3   : > { %4050 = vmatpush.bf16.msra.mxu2 %v5066_v43  ;;  %v6987_v43 = vld [vmem:[%s7806_s30 + $0x34c] sm:$0xf]  ;;  %v5463_v40 = vld [vmem:[%s7806_s30 + $0x5f8] sm:$0xf0] }
 0x1c4   : > { %4063 = vmatpush.bf16.msra.mxu3 %v5194_v52  ;;  %v3812_v52 = vadd.f32 %v3811_v41, %v3799_v39  ;;  %v5130_v58 = vor.u32 %v6987_v43, %v5127_v44  ;;  %v6979_v16 = vld [vmem:[%s7806_s30 + $0x30c] sm:$0xf]  ;;  %v5591_v42 = vld [vmem:[%s7806_s30 + $0x6f8] sm:$0xf0] }
 0x1c5   : > { %4025 = vmatpush.bf16.msra.mxu0 %v4794_v62  ;;  %v4983_v62 = vld [vmem:[%s7806_s30 + $0x238] sm:$0xf0]  ;;  %v7071_v24 = vld [vmem:[%s7806_s30 + $0x5ec] sm:$0xf] }
 0x1c6   : > { %4038 = vmatpush.bf16.msra.mxu1 %v4922_v63  ;;  %v4235_v63 = vrot.slane %v3812_v52, 6  ;;  %v4986_v10 = vor.u32 %v6951_v60, %v4983_v62  ;;  %v7103_v28 = vld [vmem:[%s7806_s30 + $0x6ec] sm:$0xf]  ;;  %v5466_v20 = vor.u32 %v7071_v24, %v5463_v40  ;;  %v5447_v37 = vld [vmem:[%s7806_s30 + $0x5d8] sm:$0xf0] }
 0x1c7   : > { %4051 = vmatpush.bf16.msra.mxu2 %v5050_v0  ;;  %v6983_v0 = vld [vmem:[%s7806_s30 + $0x32c] sm:$0xf]  ;;  %v5594_v32 = vor.u32 %v7103_v28, %v5591_v42  ;;  %v5575_v39 = vld [vmem:[%s7806_s30 + $0x6d8] sm:$0xf0] }
 0x1c8   : > { %4064 = vmatpush.bf16.msra.mxu3 %v5178_v7  ;;  %v4711_v7 = vld [vmem:[%s7806_s30 + $0x18] sm:$0xf0]  ;;  %v8714_v8 = vsel %vm4238_vm0, %v8427_v50, %v4235_v63  ;;  %v5114_v14 = vor.u32 %v6983_v0, %v5111_v4  ;;  %v7135_v49 = vld [vmem:[%s7806_s30 + $0x7ec] sm:$0xf] }
 0x1c9   : > { %4026 = vmatpush.bf16.msra.mxu0 %v4778_v15  ;;  %v4967_v15 = vld [vmem:[%s7806_s30 + $0x218] sm:$0xf0]  ;;  %v3800_v50 = vpop.f32.mrf.mxu2  ;;  %v7035_v33 = vld [vmem:[%s7806_s30 + $0x4cc] sm:$0xf] }
 0x1ca   : > { %4039 = vmatpush.bf16.msra.mxu1 %v4906_v17  ;;  %v5095_v17 = vld [vmem:[%s7806_s30 + $0x318] sm:$0xf0]  ;;  %v3813_v25 = vpop.f32.mrf.mxu3  ;;  %v4970_v46 = vor.u32 %v6947_v13, %v4967_v15  ;;  %v7067_v35 = vld [vmem:[%s7806_s30 + $0x5cc] sm:$0xf] }
 0x1cb   : > { %4052 = vmatpush.bf16.msra.mxu2 %v5034_v18  ;;  %v7039_v18 = vld [vmem:[%s7806_s30 + $0x4ec] sm:$0xf]  ;;  %v5703_v43 = vld [vmem:[%s7806_s30 + $0x7d8] sm:$0xf0]  ;;  %v5450_v45 = vor.u32 %v7067_v35, %v5447_v37 }
 0x1cc   : > { %4065 = vmatpush.bf16.msra.mxu3 %v5162_v26  ;;  %v4714_v26 = vor.u32 %v6883_v6, %v4711_v7  ;;  %v7099_v38 = vld [vmem:[%s7806_s30 + $0x6cc] sm:$0xf]  ;;  %v5303_v52 = vld [vmem:[%s7806_s30 + $0x4b8] sm:$0xf0] }
 0x1cd   : > { %4027 = vmatpush.bf16.msra.mxu0 %v4762_v29  ;;  %v5719_v29 = vld [vmem:[%s7806_s30 + $0x7f8] sm:$0xf0]  ;;  %v7131_v41 = vld [vmem:[%s7806_s30 + $0x7cc] sm:$0xf] }
 0x1ce   : > { %4040 = vmatpush.bf16.msra.mxu1 %v4890_v30  ;;  %v5098_v30 = vor.u32 %v6979_v16, %v5095_v17  ;;  %v5722_v36 = vor.u32 %v7135_v49, %v5719_v29  ;;  %v7031_v51 = vld [vmem:[%s7806_s30 + $0x4ac] sm:$0xf]  ;;  %v5431_v55 = vld [vmem:[%s7806_s30 + $0x5b8] sm:$0xf0] }
 0x1cf   : > { %4053 = vmatpush.bf16.msra.mxu2 %v5018_v31  ;;  %v5338_v31 = vor.u32 %v7039_v18, %v5335_v19  ;;  %v7095_v56 = vld [vmem:[%s7806_s30 + $0x6ac] sm:$0xf]  ;;  %v5559_v57 = vld [vmem:[%s7806_s30 + $0x6b8] sm:$0xf0]  ;;  %v5306_v60 = vor.u32 %v7031_v51, %v5303_v52 }
 0x1d0   : > { %4066 = vmatpush.bf16.msra.mxu3 %v5146_v34  ;;  %v5319_v34 = vld [vmem:[%s7806_s30 + $0x4d8] sm:$0xf0]  ;;  %v5562_v63 = vor.u32 %v7095_v56, %v5559_v57  ;;  %v7059_v4 = vld [vmem:[%s7806_s30 + $0x58c] sm:$0xf] }
 0x1d1   : > { %4028 = vmatpush.bf16.msra.mxu0 %v4746_v48  ;;  %v5322_v44 = vor.u32 %v7035_v33, %v5319_v34  ;;  %v5578_v48 = vor.u32 %v7099_v38, %v5575_v39  ;;  %v5687_v59 = vld [vmem:[%s7806_s30 + $0x7b8] sm:$0xf0]  ;;  %v7123_v7 = vld [vmem:[%s7806_s30 + $0x78c] sm:$0xf] }
 0x1d2   : > { %4041 = vmatpush.bf16.msra.mxu1 %v4874_v53  ;;  %v7063_v53 = vld [vmem:[%s7806_s30 + $0x5ac] sm:$0xf]  ;;  %v5287_v0 = vld [vmem:[%s7806_s30 + $0x498] sm:$0xf0] }
 0x1d3   : > { %4054 = vmatpush.bf16.msra.mxu2 %v5002_v54  ;;  %v5706_v54 = vor.u32 %v7131_v41, %v5703_v43  ;;  %v5434_v62 = vor.u32 %v7063_v53, %v5431_v55  ;;  %v5543_v6 = vld [vmem:[%s7806_s30 + $0x698] sm:$0xf0]  ;;  %v7023_v13 = vld [vmem:[%s7806_s30 + $0x46c] sm:$0xf] }
 0x1d4   : > { %4067 = vmatpush.bf16.msra.mxu3 %v5130_v58  ;;  %v7127_v58 = vld [vmem:[%s7806_s30 + $0x7ac] sm:$0xf]  ;;  %v5399_v50 = vld [vmem:[%s7806_s30 + $0x578] sm:$0xf0] }
 0x1d5   : > { %4029 = vmatpush.bf16.msra.mxu0 %v4730_v5  ;;  %v5415_v5 = vld [vmem:[%s7806_s30 + $0x598] sm:$0xf0]  ;;  %v7055_v15 = vld [vmem:[%s7806_s30 + $0x56c] sm:$0xf] }
 0x1d6   : > { %4042 = vmatpush.bf16.msra.mxu1 %v4858_v9  ;;  %v5671_v9 = vld [vmem:[%s7806_s30 + $0x798] sm:$0xf0]  ;;  %v5418_v11 = vor.u32 %v7059_v4, %v5415_v5  ;;  %v7087_v18 = vld [vmem:[%s7806_s30 + $0x66c] sm:$0xf]  ;;  %v5402_v28 = vor.u32 %v7055_v15, %v5399_v50 }
 0x1d7   : > { %4055 = vmatpush.bf16.msra.mxu2 %v4986_v10  ;;  %v5674_v17 = vor.u32 %v7123_v7, %v5671_v9  ;;  %v5527_v19 = vld [vmem:[%s7806_s30 + $0x678] sm:$0xf0]  ;;  %v7119_v25 = vld [vmem:[%s7806_s30 + $0x76c] sm:$0xf] }
 0x1d8   : > { %4068 = vmatpush.bf16.msra.mxu3 %v5114_v14  ;;  %v5271_v14 = vld [vmem:[%s7806_s30 + $0x478] sm:$0xf0]  ;;  %v5530_v42 = vor.u32 %v7087_v18, %v5527_v19  ;;  %v7051_v49 = vld [vmem:[%s7806_s30 + $0x54c] sm:$0xf] }
 0x1d9   : > { %4030 = vmatpush.bf16.msra.mxu0 %v4714_v26  ;;  %v3824_v10 = vpop.f32.mrf.mxu0  ;;  %v5655_v26 = vld [vmem:[%s7806_s30 + $0x778] sm:$0xf0]  ;;  %v5274_v40 = vor.u32 %v7023_v13, %v5271_v14  ;;  %v7115_v35 = vld [vmem:[%s7806_s30 + $0x74c] sm:$0xf] }
 0x1da   : > { %4043 = vmatpush.bf16.msra.mxu1 %v4842_v47  ;;  %v3837_v16 = vpop.f32.mrf.mxu1  ;;  %v7019_v47 = vld [vmem:[%s7806_s30 + $0x44c] sm:$0xf]  ;;  %v5367_v53 = vld [vmem:[%s7806_s30 + $0x538] sm:$0xf0] }
 0x1db   : > { %4056 = vmatpush.bf16.msra.mxu2 %v4970_v46  ;;  %v3838_v24 = vadd.f32 %v3837_v16, %v3824_v10  ;;  %v5255_v46 = vld [vmem:[%s7806_s30 + $0x458] sm:$0xf0]  ;;  %v7111_v56 = vld [vmem:[%s7806_s30 + $0x72c] sm:$0xf] }
 0x1dc   : > { %4069 = vmatpush.bf16.msra.mxu3 %v5098_v30  ;;  %4031 = vmatmul.bf16.vlgmr.msra.gmra.mxu0 %v7927_v22  ;;  %v5690_v22 = vor.u32 %v7127_v58, %v5687_v59  ;;  %v5658_v30 = vor.u32 %v7119_v25, %v5655_v26  ;;  %v5258_v37 = vor.u32 %v7019_v47, %v5255_v46  ;;  %v5495_v55 = vld [vmem:[%s7806_s30 + $0x638] sm:$0xf0]  ;;  %v7011_v59 = vld [vmem:[%s7806_s30 + $0x40c] sm:$0xf] }
 0x1dd   : > { %4075 = vmatpush.bf16.msrb.mxu0 %v5338_v31  ;;  %4044 = vmatmul.bf16.vlgmr.msra.gmra.mxu1 %v7934_v27  ;;  %v5383_v31 = vld [vmem:[%s7806_s30 + $0x558] sm:$0xf0]  ;;  %v7075_v4 = vld [vmem:[%s7806_s30 + $0x60c] sm:$0xf] }
 0x1de   : > { %4088 = vmatpush.bf16.msrb.mxu1 %v5466_v20  ;;  %4057 = vmatmul.bf16.vlgmr.msra.gmra.mxu2 %v7925_v21  ;;  %v7027_v21 = vld [vmem:[%s7806_s30 + $0x48c] sm:$0xf]  ;;  %v5386_v41 = vor.u32 %v7051_v49, %v5383_v31  ;;  %v5623_v57 = vld [vmem:[%s7806_s30 + $0x738] sm:$0xf0] }
 0x1df   : > { %4101 = vmatpush.bf16.msrb.mxu2 %v5594_v32  ;;  %4070 = vmatmul.bf16.vlgmr.msra.gmra.mxu3 %v7929_v23  ;;  %v7091_v23 = vld [vmem:[%s7806_s30 + $0x68c] sm:$0xf]  ;;  %v5290_v27 = vor.u32 %v7027_v21, %v5287_v0  ;;  %v5511_v32 = vld [vmem:[%s7806_s30 + $0x658] sm:$0xf0]  ;;  %v5626_v5 = vor.u32 %v7111_v56, %v5623_v57 }
 0x1e0   : > { %4114 = vmatpush.bf16.msrb.mxu3 %v5722_v36  ;;  %v5546_v12 = vor.u32 %v7091_v23, %v5543_v6  ;;  %v7083_v20 = vld [vmem:[%s7806_s30 + $0x64c] sm:$0xf]  ;;  %v5639_v36 = vld [vmem:[%s7806_s30 + $0x758] sm:$0xf0] }
 0x1e1   : > { %4076 = vmatpush.bf16.msrb.mxu0 %v5322_v44  ;;  %v3850_v29 = vpop.f32.mrf.mxu2  ;;  %v3826_v39 = vpop.f32.mrf.mxu0  ;;  %v5514_v43 = vor.u32 %v7083_v20, %v5511_v32  ;;  %v7015_v44 = vld [vmem:[%s7806_s30 + $0x42c] sm:$0xf]  ;;  %v5642_v52 = vor.u32 %v7115_v35, %v5639_v36  ;;  %v5351_v0 = vld [vmem:[%s7806_s30 + $0x518] sm:$0xf0] }
 0x1e2   : > { %4089 = vmatpush.bf16.msrb.mxu1 %v5450_v45  ;;  %v3851_v33 = vadd.f32 %v3850_v29, %v3838_v24  ;;  %v3863_v34 = vpop.f32.mrf.mxu3  ;;  %v5239_v45 = vld [vmem:[%s7806_s30 + $0x438] sm:$0xf0]  ;;  %v3839_v51 = vpop.f32.mrf.mxu1  ;;  %v7043_v21 = vld [vmem:[%s7806_s30 + $0x50c] sm:$0xf] }
 0x1e3   : > { %4102 = vmatpush.bf16.msrb.mxu2 %v5578_v48  ;;  %v7047_v48 = vld [vmem:[%s7806_s30 + $0x52c] sm:$0xf]  ;;  %v5242_v58 = vor.u32 %v7015_v44, %v5239_v45  ;;  %v5479_v23 = vld [vmem:[%s7806_s30 + $0x618] sm:$0xf0]  ;;  %v5354_v16 = vor.u32 %v7043_v21, %v5351_v0 }
 0x1e4   : > { %4115 = vmatpush.bf16.msrb.mxu3 %v5706_v54  ;;  %v8774_v38 = vadd.f32 %v3863_v34, %v3851_v33  ;;  %v7079_v54 = vld [vmem:[%s7806_s30 + $0x62c] sm:$0xf]  ;;  %v5607_v7 = vld [vmem:[%s7806_s30 + $0x718] sm:$0xf0] }
 0x1e5   : > { %4077 = vmatpush.bf16.msrb.mxu0 %v5306_v60  ;;  %v5223_v60 = vld [vmem:[%s7806_s30 + $0x418] sm:$0xf0]  ;;  %v7107_v6 = vld [vmem:[%s7806_s30 + $0x70c] sm:$0xf] }
 0x1e6   : > { %4090 = vmatpush.bf16.msrb.mxu1 %v5434_v62  ;;  %v5370_v62 = vor.u32 %v7047_v48, %v5367_v53  ;;  %v5847_v10 = vld [vmem:[%s7806_s30 + $0x8f8] sm:$0xf0]  ;;  %v7231_v14 = vld [vmem:[%s7806_s30 + $0xaec] sm:$0xf]  ;;  %v5610_v19 = vor.u32 %v7107_v6, %v5607_v7 }
 0x1e7   : > { %4103 = vmatpush.bf16.msrb.mxu2 %v5562_v63  ;;  %v5498_v63 = vor.u32 %v7079_v54, %v5495_v55  ;;  %v5975_v13 = vld [vmem:[%s7806_s30 + $0x9f8] sm:$0xf0]  ;;  %v7263_v50 = vld [vmem:[%s7806_s30 + $0xbec] sm:$0xf] }
 0x1e8   : > { %4116 = vmatpush.bf16.msrb.mxu3 %v5690_v22  ;;  %v6103_v15 = vld [vmem:[%s7806_s30 + $0xaf8] sm:$0xf0]  ;;  %v7227_v49 = vld [vmem:[%s7806_s30 + $0xacc] sm:$0xf] }
 0x1e9   : > { %4078 = vmatpush.bf16.msrb.mxu0 %v5290_v27  ;;  %v3852_v22 = vpop.f32.mrf.mxu2  ;;  %v7167_v27 = vld [vmem:[%s7806_s30 + $0x8ec] sm:$0xf]  ;;  %v6231_v18 = vld [vmem:[%s7806_s30 + $0xbf8] sm:$0xf0]  ;;  %v6106_v26 = vor.u32 %v7231_v14, %v6103_v15 }
 0x1ea   : > { %4091 = vmatpush.bf16.msrb.mxu1 %v5418_v11  ;;  %v3865_v9 = vpop.f32.mrf.mxu3  ;;  %v7199_v11 = vld [vmem:[%s7806_s30 + $0x9ec] sm:$0xf]  ;;  %v5850_v24 = vor.u32 %v7167_v27, %v5847_v10  ;;  %v6234_v47 = vor.u32 %v7263_v50, %v6231_v18  ;;  %v5959_v46 = vld [vmem:[%s7806_s30 + $0x9d8] sm:$0xf0] }
 0x1eb   : > { %4104 = vmatpush.bf16.msrb.mxu2 %v5546_v12  ;;  %v5226_v12 = vor.u32 %v7011_v59, %v5223_v60  ;;  %v5978_v25 = vor.u32 %v7199_v11, %v5975_v13  ;;  %v6087_v29 = vld [vmem:[%s7806_s30 + $0xad8] sm:$0xf0]  ;;  %v7159_v34 = vld [vmem:[%s7806_s30 + $0x8ac] sm:$0xf] }
 0x1ec   : > { %4117 = vmatpush.bf16.msrb.mxu3 %v5674_v17  ;;  %v5482_v17 = vor.u32 %v7075_v4, %v5479_v23  ;;  %v6215_v31 = vld [vmem:[%s7806_s30 + $0xbd8] sm:$0xf0]  ;;  %v6090_v33 = vor.u32 %v7227_v49, %v6087_v29  ;;  %v7191_v36 = vld [vmem:[%s7806_s30 + $0x9ac] sm:$0xf] }
 0x1ed   : > { %4079 = vmatpush.bf16.msrb.mxu0 %v5274_v40  ;;  %v7163_v40 = vld [vmem:[%s7806_s30 + $0x8cc] sm:$0xf]  ;;  %v5815_v35 = vld [vmem:[%s7806_s30 + $0x8b8] sm:$0xf0] }
 0x1ee   : > { %4092 = vmatpush.bf16.msrb.mxu1 %v5402_v28  ;;  %v5831_v28 = vld [vmem:[%s7806_s30 + $0x8d8] sm:$0xf0]  ;;  %v7255_v44 = vld [vmem:[%s7806_s30 + $0xbac] sm:$0xf]  ;;  %v5818_v48 = vor.u32 %v7159_v34, %v5815_v35 }
 0x1ef   : > { %4105 = vmatpush.bf16.msrb.mxu2 %v5530_v42  ;;  %v7195_v42 = vld [vmem:[%s7806_s30 + $0x9cc] sm:$0xf]  ;;  %v5834_v20 = vor.u32 %v7163_v40, %v5831_v28  ;;  %v5943_v39 = vld [vmem:[%s7806_s30 + $0x9b8] sm:$0xf0] }
 0x1f0   : > { %4118 = vmatpush.bf16.msrb.mxu3 %v5658_v30  ;;  %v7259_v30 = vld [vmem:[%s7806_s30 + $0xbcc] sm:$0xf]  ;;  %v5962_v32 = vor.u32 %v7195_v42, %v5959_v46  ;;  %v6199_v45 = vld [vmem:[%s7806_s30 + $0xbb8] sm:$0xf0] }
 0x1f1   : > { %4080 = vmatpush.bf16.msrb.mxu0 %v5258_v37  ;;  %v6218_v37 = vor.u32 %v7259_v30, %v6215_v31  ;;  %v5799_v53 = vld [vmem:[%s7806_s30 + $0x898] sm:$0xf0]  ;;  %v7219_v55 = vld [vmem:[%s7806_s30 + $0xa8c] sm:$0xf] }
 0x1f2   : > { %4093 = vmatpush.bf16.msrb.mxu1 %v5386_v41  ;;  %v7223_v41 = vld [vmem:[%s7806_s30 + $0xaac] sm:$0xf]  ;;  %v5927_v54 = vld [vmem:[%s7806_s30 + $0x998] sm:$0xf0] }
 0x1f3   : > { %4106 = vmatpush.bf16.msrb.mxu2 %v5514_v43  ;;  %v6071_v43 = vld [vmem:[%s7806_s30 + $0xab8] sm:$0xf0]  ;;  %v7251_v57 = vld [vmem:[%s7806_s30 + $0xb8c] sm:$0xf] }
 0x1f4   : > { %4119 = vmatpush.bf16.msrb.mxu3 %v5642_v52  ;;  %v6074_v51 = vor.u32 %v7223_v41, %v6071_v43  ;;  %v7155_v52 = vld [vmem:[%s7806_s30 + $0x88c] sm:$0xf]  ;;  %v6055_v56 = vld [vmem:[%s7806_s30 + $0xa98] sm:$0xf0] }
 0x1f5   : > { %4081 = vmatpush.bf16.msrb.mxu0 %v5242_v58  ;;  %v6183_v58 = vld [vmem:[%s7806_s30 + $0xb98] sm:$0xf0]  ;;  %v7183_v0 = vld [vmem:[%s7806_s30 + $0x96c] sm:$0xf] }
 0x1f6   : > { %4094 = vmatpush.bf16.msrb.mxu1 %v5370_v62  ;;  %v6058_v62 = vor.u32 %v7219_v55, %v6055_v56  ;;  %v5783_v21 = vld [vmem:[%s7806_s30 + $0x878] sm:$0xf0]  ;;  %v7215_v6 = vld [vmem:[%s7806_s30 + $0xa6c] sm:$0xf] }
 0x1f7   : > { %4107 = vmatpush.bf16.msrb.mxu2 %v5498_v63  ;;  %v7151_v63 = vld [vmem:[%s7806_s30 + $0x86c] sm:$0xf]  ;;  %v5911_v23 = vld [vmem:[%s7806_s30 + $0x978] sm:$0xf0] }
 0x1f8   : > { %4120 = vmatpush.bf16.msrb.mxu3 %v5626_v5  ;;  %v6186_v5 = vor.u32 %v7251_v57, %v6183_v58  ;;  %v6039_v7 = vld [vmem:[%s7806_s30 + $0xa78] sm:$0xf0]  ;;  %v7247_v9 = vld [vmem:[%s7806_s30 + $0xb6c] sm:$0xf]  ;;  %v5786_v11 = vor.u32 %v7151_v63, %v5783_v21 }
 0x1f9   : > { %4082 = vmatpush.bf16.msrb.mxu0 %v5226_v12  ;;  %v3876_v59 = vpop.f32.mrf.mxu0  ;;  %v6167_v27 = vld [vmem:[%s7806_s30 + $0xb78] sm:$0xf0]  ;;  %v6042_v12 = vor.u32 %v7215_v6, %v6039_v7  ;;  %v7147_v13 = vld [vmem:[%s7806_s30 + $0x84c] sm:$0xf] }
 0x1fa   : > { %4095 = vmatpush.bf16.msrb.mxu1 %v5354_v16  ;;  %v3877_v4 = vadd.f32 %v3876_v59, %v8774_v38  ;;  %v3889_v22 = vpop.f32.mrf.mxu1  ;;  %v5914_v38 = vor.u32 %v7183_v0, %v5911_v23  ;;  %v5767_v14 = vld [vmem:[%s7806_s30 + $0x858] sm:$0xf0]  ;;  %v7179_v15 = vld [vmem:[%s7806_s30 + $0x94c] sm:$0xf] }
 0x1fb   : > { %4108 = vmatpush.bf16.msrb.mxu2 %v5482_v17  ;;  %v6170_v17 = vor.u32 %v7247_v9, %v6167_v27  ;;  %v5895_v50 = vld [vmem:[%s7806_s30 + $0x958] sm:$0xf0]  ;;  %v7211_v18 = vld [vmem:[%s7806_s30 + $0xa4c] sm:$0xf]  ;;  %v5770_v28 = vor.u32 %v7147_v13, %v5767_v14 }
 0x1fc   : > { %4121 = vmatpush.bf16.msrb.mxu3 %v5610_v19  ;;  %4083 = vmatmul.bf16.vlgmr.msrb.gmra.mxu0 %v7966_v1  ;;  %v7187_v1 = vld [vmem:[%s7806_s30 + $0x98c] sm:$0xf]  ;;  %v3890_v10 = vadd.f32 %v3889_v22, %v3877_v4  ;;  %v6023_v19 = vld [vmem:[%s7806_s30 + $0xa58] sm:$0xf0]  ;;  %v5898_v46 = vor.u32 %v7179_v15, %v5895_v50 }
 0x1fd   : > { %4127 = vmatpush.bf16.msra.mxu0 %v5850_v24  ;;  %4096 = vmatmul.bf16.vlgmr.msrb.gmra.mxu1 %v7970_v3  ;;  %v5802_v3 = vor.u32 %v7155_v52, %v5799_v53  ;;  %v5930_v60 = vor.u32 %v7187_v1, %v5927_v54  ;;  %v6151_v40 = vld [vmem:[%s7806_s30 + $0xb58] sm:$0xf0]  ;;  %v6026_v49 = vor.u32 %v7211_v18, %v6023_v19  ;;  %v7143_v29 = vld [vmem:[%s7806_s30 + $0x82c] sm:$0xf] }
 0x1fe   : > { %4140 = vmatpush.bf16.msra.mxu1 %v5978_v25  ;;  %4109 = vmatmul.bf16.vlgmr.msrb.gmra.mxu2 %v7963_v61  ;;  %v5946_v61 = vor.u32 %v7191_v36, %v5943_v39  ;;  %v5751_v30 = vld [vmem:[%s7806_s30 + $0x838] sm:$0xf0]  ;;  %v7175_v31 = vld [vmem:[%s7806_s30 + $0x92c] sm:$0xf] }
 0x1ff   : > { %4153 = vmatpush.bf16.msra.mxu2 %v6106_v26  ;;  %4122 = vmatmul.bf16.vlgmr.msrb.gmra.mxu3 %v7968_v2  ;;  %v6202_v2 = vor.u32 %v7255_v44, %v6199_v45  ;;  %v7243_v26 = vld [vmem:[%s7806_s30 + $0xb4c] sm:$0xf]  ;;  %v6007_v35 = vld [vmem:[%s7806_s30 + $0xa38] sm:$0xf0]  ;;  %v5754_v39 = vor.u32 %v7143_v29, %v5751_v30 }
 0x200   : > { %4166 = vmatpush.bf16.msra.mxu3 %v6234_v47  ;;  %v7207_v34 = vld [vmem:[%s7806_s30 + $0xa2c] sm:$0xf]  ;;  %v5735_v43 = vld [vmem:[%s7806_s30 + $0x818] sm:$0xf0] }
 0x201   : > { %4128 = vmatpush.bf16.msra.mxu0 %v5834_v20  ;;  %v3902_v16 = vpop.f32.mrf.mxu2  ;;  %v3878_v47 = vpop.f32.mrf.mxu0  ;;  %v7239_v36 = vld [vmem:[%s7806_s30 + $0xb2c] sm:$0xf]  ;;  %v6010_v45 = vor.u32 %v7207_v34, %v6007_v35  ;;  %v5991_v1 = vld [vmem:[%s7806_s30 + $0xa18] sm:$0xf0] }
 0x202   : > { %4141 = vmatpush.bf16.msra.mxu1 %v5962_v32  ;;  %v3903_v24 = vadd.f32 %v3902_v16, %v3890_v10  ;;  %v3915_v25 = vpop.f32.mrf.mxu3  ;;  %v3891_v20 = vpop.f32.mrf.mxu1  ;;  %v6154_v32 = vor.u32 %v7243_v26, %v6151_v40  ;;  %v7139_v41 = vld [vmem:[%s7806_s30 + $0x80c] sm:$0xf]  ;;  %v6119_v54 = vld [vmem:[%s7806_s30 + $0xb18] sm:$0xf0]  ;;  %v7513_v47 = vld [vmem:[#allocation1 + $0x12] sm:$0xff] }
 0x203   : > { %4154 = vmatpush.bf16.msra.mxu2 %v6090_v33  ;;  %v5879_v33 = vld [vmem:[%s7806_s30 + $0x938] sm:$0xf0]  ;;  %v7295_v56 = vld [vmem:[%s7806_s30 + $0xcec] sm:$0xf] }
 0x204   : > { %4167 = vmatpush.bf16.msra.mxu3 %v6218_v37  ;;  %v8845_v42 = vadd.f32 %v3915_v25, %v3903_v24  ;;  %v6135_v37 = vld [vmem:[%s7806_s30 + $0xb38] sm:$0xf0]  ;;  %v5882_v44 = vor.u32 %v7175_v31, %v5879_v33  ;;  %v7327_v58 = vld [vmem:[%s7806_s30 + $0xdec] sm:$0xf]  ;;  %v7512_v24 = vld [vmem:[#allocation1] sm:$0xff] }
 0x205   : > { %4129 = vmatpush.bf16.msra.mxu0 %v5818_v48  ;;  %v7171_v48 = vld [vmem:[%s7806_s30 + $0x90c] sm:$0xf]  ;;  %v6138_v53 = vor.u32 %v7239_v36, %v6135_v37  ;;  %v6359_v57 = vld [vmem:[%s7806_s30 + $0xcf8] sm:$0xf0] }
 0x206   : > { %4142 = vmatpush.bf16.msra.mxu1 %v5946_v61  ;;  %v5863_v61 = vld [vmem:[%s7806_s30 + $0x918] sm:$0xf0]  ;;  %v7391_v0 = vld [vmem:[%s7806_s30 + $0xfec] sm:$0xf] }
 0x207   : > { %4155 = vmatpush.bf16.msra.mxu2 %v6074_v51  ;;  %v7203_v51 = vld [vmem:[%s7806_s30 + $0xa0c] sm:$0xf]  ;;  %v6487_v59 = vld [vmem:[%s7806_s30 + $0xdf8] sm:$0xf0]  ;;  %v5866_v63 = vor.u32 %v7171_v48, %v5863_v61 }
 0x208   : > { %4168 = vmatpush.bf16.msra.mxu3 %v6202_v2  ;;  %v7235_v2 = vld [vmem:[%s7806_s30 + $0xb0c] sm:$0xf]  ;;  %v5994_v21 = vor.u32 %v7203_v51, %v5991_v1  ;;  %v6743_v4 = vld [vmem:[%s7806_s30 + $0xff8] sm:$0xf0]  ;;  %v6490_v23 = vor.u32 %v7327_v58, %v6487_v59 }
 0x209   : > { %4130 = vmatpush.bf16.msra.mxu0 %v5802_v3  ;;  %v3904_v52 = vpop.f32.mrf.mxu2  ;;  %v5738_v3 = vor.u32 %v7139_v41, %v5735_v43  ;;  %v6122_v22 = vor.u32 %v7235_v2, %v6119_v54  ;;  %v7291_v7 = vld [vmem:[%s7806_s30 + $0xccc] sm:$0xf]  ;;  %v6343_v9 = vld [vmem:[%s7806_s30 + $0xcd8] sm:$0xf0]  ;;  %v6746_v10 = vor.u32 %v7391_v0, %v6743_v4 }
 0x20a   : > { %4143 = vmatpush.bf16.msra.mxu1 %v5930_v60  ;;  %v3917_v55 = vpop.f32.mrf.mxu3  ;;  %v7359_v60 = vld [vmem:[%s7806_s30 + $0xeec] sm:$0xf]  ;;  %v6727_v14 = vld [vmem:[%s7806_s30 + $0xfd8] sm:$0xf0]  ;;  %v6346_v15 = vor.u32 %v7291_v7, %v6343_v9 }
 0x20b   : > { %4156 = vmatpush.bf16.msra.mxu2 %v6058_v62  ;;  %v6615_v62 = vld [vmem:[%s7806_s30 + $0xef8] sm:$0xf0]  ;;  %v7323_v27 = vld [vmem:[%s7806_s30 + $0xdcc] sm:$0xf] }
 0x20c   : > { %4169 = vmatpush.bf16.msra.mxu3 %v6186_v5  ;;  %v6362_v5 = vor.u32 %v7295_v56, %v6359_v57  ;;  %v6618_v6 = vor.u32 %v7359_v60, %v6615_v62  ;;  %v7387_v13 = vld [vmem:[%s7806_s30 + $0xfcc] sm:$0xf]  ;;  %v6327_v18 = vld [vmem:[%s7806_s30 + $0xcb8] sm:$0xf0] }
 0x20d   : > { %4131 = vmatpush.bf16.msra.mxu0 %v5786_v11  ;;  %v6471_v11 = vld [vmem:[%s7806_s30 + $0xdd8] sm:$0xf0]  ;;  %v7287_v50 = vld [vmem:[%s7806_s30 + $0xcac] sm:$0xf]  ;;  %v6730_v25 = vor.u32 %v7387_v13, %v6727_v14 }
 0x20e   : > { %4144 = vmatpush.bf16.msra.mxu1 %v5914_v38  ;;  %v7355_v38 = vld [vmem:[%s7806_s30 + $0xecc] sm:$0xf]  ;;  %v6474_v16 = vor.u32 %v7323_v27, %v6471_v11  ;;  %v6455_v26 = vld [vmem:[%s7806_s30 + $0xdb8] sm:$0xf0]  ;;  %v6330_v31 = vor.u32 %v7287_v50, %v6327_v18 }
 0x20f   : > { %4157 = vmatpush.bf16.msra.mxu2 %v6042_v12  ;;  %v6599_v12 = vld [vmem:[%s7806_s30 + $0xed8] sm:$0xf0]  ;;  %v7319_v19 = vld [vmem:[%s7806_s30 + $0xdac] sm:$0xf] }
 0x210   : > { %4170 = vmatpush.bf16.msra.mxu3 %v6170_v17  ;;  %v6602_v17 = vor.u32 %v7355_v38, %v6599_v12  ;;  %v7351_v40 = vld [vmem:[%s7806_s30 + $0xeac] sm:$0xf]  ;;  %v6711_v29 = vld [vmem:[%s7806_s30 + $0xfb8] sm:$0xf0]  ;;  %v6458_v20 = vor.u32 %v7319_v19, %v6455_v26 }
 0x211   : > { %4132 = vmatpush.bf16.msra.mxu0 %v5770_v28  ;;  %v6583_v28 = vld [vmem:[%s7806_s30 + $0xeb8] sm:$0xf0]  ;;  %v7515_v30 = vld [vmem:[#allocation1 + $0x1b] sm:$0xff] }
 0x212   : > { %4145 = vmatpush.bf16.msra.mxu1 %v5898_v46  ;;  %v7514_v46 = vld [vmem:[#allocation1 + $0x9] sm:$0xff]  ;;  %v7283_v33 = vld [vmem:[%s7806_s30 + $0xc8c] sm:$0xf] }
 0x213   : > { %4158 = vmatpush.bf16.msra.mxu2 %v6026_v49  ;;  %v7383_v49 = vld [vmem:[%s7806_s30 + $0xfac] sm:$0xf]  ;;  %v6311_v34 = vld [vmem:[%s7806_s30 + $0xc98] sm:$0xf0] }
 0x214   : > { %4171 = vmatpush.bf16.msra.mxu3 %v6154_v32  ;;  %v6586_v32 = vor.u32 %v7351_v40, %v6583_v28  ;;  %v7315_v35 = vld [vmem:[%s7806_s30 + $0xd8c] sm:$0xf]  ;;  %v6714_v36 = vor.u32 %v7383_v49, %v6711_v29  ;;  %v6439_v37 = vld [vmem:[%s7806_s30 + $0xd98] sm:$0xf0]  ;;  %v6314_v61 = vor.u32 %v7283_v33, %v6311_v34 }
 0x215   : > { %4133 = vmatpush.bf16.msra.mxu0 %v5754_v39  ;;  %v7347_v39 = vld [vmem:[%s7806_s30 + $0xe8c] sm:$0xf]  ;;  %v6567_v41 = vld [vmem:[%s7806_s30 + $0xe98] sm:$0xf0]  ;;  %v6442_v52 = vor.u32 %v7315_v35, %v6439_v37 }
 0x216   : > { %4146 = vmatpush.bf16.msra.mxu1 %v5882_v44  ;;  %v7379_v44 = vld [vmem:[%s7806_s30 + $0xf8c] sm:$0xf]  ;;  %v6295_v2 = vld [vmem:[%s7806_s30 + $0xc78] sm:$0xf0] }
 0x217   : > { %4159 = vmatpush.bf16.msra.mxu2 %v6010_v45  ;;  %v6695_v45 = vld [vmem:[%s7806_s30 + $0xf98] sm:$0xf0]  ;;  %v7279_v1 = vld [vmem:[%s7806_s30 + $0xc6c] sm:$0xf] }
 0x218   : > { %4172 = vmatpush.bf16.msra.mxu3 %v6138_v53  ;;  %v6570_v53 = vor.u32 %v7347_v39, %v6567_v41  ;;  %v7311_v54 = vld [vmem:[%s7806_s30 + $0xd6c] sm:$0xf]  ;;  %v6698_v55 = vor.u32 %v7379_v44, %v6695_v45  ;;  %v6423_v57 = vld [vmem:[%s7806_s30 + $0xd78] sm:$0xf0]  ;;  %v6298_v60 = vor.u32 %v7279_v1, %v6295_v2 }
 0x219   : > { %4134 = vmatpush.bf16.msra.mxu0 %v5738_v3  ;;  %v3928_v43 = vpop.f32.mrf.mxu0  ;;  %v7343_v58 = vld [vmem:[%s7806_s30 + $0xe6c] sm:$0xf]  ;;  %v6679_v59 = vld [vmem:[%s7806_s30 + $0xf78] sm:$0xf0]  ;;  %v6426_v62 = vor.u32 %v7311_v54, %v6423_v57 }
 0x21a   : > { %4147 = vmatpush.bf16.msra.mxu1 %v5866_v63  ;;  %v3929_v48 = vadd.f32 %v3928_v43, %v8845_v42  ;;  %v3941_v51 = vpop.f32.mrf.mxu1  ;;  %v6551_v42 = vld [vmem:[%s7806_s30 + $0xe78] sm:$0xf0]  ;;  %v7375_v3 = vld [vmem:[%s7806_s30 + $0xf6c] sm:$0xf] }
 0x21b   : > { %4160 = vmatpush.bf16.msra.mxu2 %v5994_v21  ;;  %v6554_v63 = vor.u32 %v7343_v58, %v6551_v42  ;;  %v7275_v21 = vld [vmem:[%s7806_s30 + $0xc4c] sm:$0xf]  ;;  %v6279_v0 = vld [vmem:[%s7806_s30 + $0xc58] sm:$0xf0] }
 0x21c   : > { %4173 = vmatpush.bf16.msra.mxu3 %v6122_v22  ;;  %4135 = vmatmul.bf16.vlgmr.msra.gmra.mxu0 %v7512_v24  ;;  %v3942_v56 = vadd.f32 %v3941_v51, %v3929_v48  ;;  %v7307_v4 = vld [vmem:[%s7806_s30 + $0xd4c] sm:$0xf]  ;;  %v6682_v22 = vor.u32 %v7375_v3, %v6679_v59  ;;  %v6535_v7 = vld [vmem:[%s7806_s30 + $0xe58] sm:$0xf0]  ;;  %v6282_v12 = vor.u32 %v7275_v21, %v6279_v0  ;;  %v7516_v48 = vld [vmem:[#allocation1 + $0x24] sm:$0xff] }
 0x21d   : > { %4179 = vmatpush.bf16.msrb.mxu0 %v6362_v5  ;;  %4148 = vmatmul.bf16.vlgmr.msra.gmra.mxu1 %v7514_v46  ;;  %v6663_v11 = vld [vmem:[%s7806_s30 + $0xf58] sm:$0xf0]  ;;  %v7303_v18 = vld [vmem:[%s7806_s30 + $0xd2c] sm:$0xf] }
 0x21e   : > { %4192 = vmatpush.bf16.msrb.mxu1 %v6490_v23  ;;  %4161 = vmatmul.bf16.vlgmr.msra.gmra.mxu2 %v7513_v47  ;;  %v6407_v23 = vld [vmem:[%s7806_s30 + $0xd58] sm:$0xf0]  ;;  %v7367_v40 = vld [vmem:[%s7806_s30 + $0xf2c] sm:$0xf] }
 0x21f   : > { %4205 = vmatpush.bf16.msrb.mxu2 %v6618_v6  ;;  %4174 = vmatmul.bf16.vlgmr.msra.gmra.mxu3 %v7515_v30  ;;  %v7339_v6 = vld [vmem:[%s7806_s30 + $0xe4c] sm:$0xf]  ;;  %v6263_v50 = vld [vmem:[%s7806_s30 + $0xc38] sm:$0xf0] }
 0x220   : > { %4218 = vmatpush.bf16.msrb.mxu3 %v6746_v10  ;;  %v7371_v10 = vld [vmem:[%s7806_s30 + $0xf4c] sm:$0xf]  ;;  %v6391_v24 = vld [vmem:[%s7806_s30 + $0xd38] sm:$0xf0] }
 0x221   : > { %4180 = vmatpush.bf16.msrb.mxu0 %v6346_v15  ;;  %v3954_v5 = vpop.f32.mrf.mxu2  ;;  %v3930_v38 = vpop.f32.mrf.mxu0  ;;  %v6410_v15 = vor.u32 %v7307_v4, %v6407_v23  ;;  %v6666_v19 = vor.u32 %v7371_v10, %v6663_v11  ;;  %v6519_v26 = vld [vmem:[%s7806_s30 + $0xe38] sm:$0xf0]  ;;  %v6394_v46 = vor.u32 %v7303_v18, %v6391_v24  ;;  %v7267_v29 = vld [vmem:[%s7806_s30 + $0xc0c] sm:$0xf] }
 0x222   : > { %4193 = vmatpush.bf16.msrb.mxu1 %v6474_v16  ;;  %v3955_v9 = vadd.f32 %v3954_v5, %v3942_v56  ;;  %v3967_v27 = vpop.f32.mrf.mxu3  ;;  %v3943_v13 = vpop.f32.mrf.mxu1  ;;  %v6538_v16 = vor.u32 %v7339_v6, %v6535_v7  ;;  %v6647_v28 = vld [vmem:[%s7806_s30 + $0xf38] sm:$0xf0]  ;;  %v7331_v33 = vld [vmem:[%s7806_s30 + $0xe0c] sm:$0xf] }
 0x223   : > { %4206 = vmatpush.bf16.msrb.mxu2 %v6602_v17  ;;  %v7271_v17 = vld [vmem:[%s7806_s30 + $0xc2c] sm:$0xf]  ;;  %v6247_v30 = vld [vmem:[%s7806_s30 + $0xc18] sm:$0xf0] }
 0x224   : > { %4219 = vmatpush.bf16.msrb.mxu3 %v6730_v25  ;;  %v3968_v14 = vadd.f32 %v3967_v27, %v3955_v9  ;;  %v7335_v25 = vld [vmem:[%s7806_s30 + $0xe2c] sm:$0xf]  ;;  %v6266_v47 = vor.u32 %v7271_v17, %v6263_v50  ;;  %v6503_v34 = vld [vmem:[%s7806_s30 + $0xe18] sm:$0xf0]  ;;  %v6250_v41 = vor.u32 %v7267_v29, %v6247_v30 }
 0x225   : > { %4181 = vmatpush.bf16.msrb.mxu0 %v6330_v31  ;;  %v6522_v49 = vor.u32 %v7335_v25, %v6519_v26  ;;  %v7299_v31 = vld [vmem:[%s7806_s30 + $0xd0c] sm:$0xf]  ;;  %v6631_v37 = vld [vmem:[%s7806_s30 + $0xf18] sm:$0xf0]  ;;  %v6506_v44 = vor.u32 %v7331_v33, %v6503_v34 }
 0x226   : > { %4194 = vmatpush.bf16.msrb.mxu1 %v6458_v20  ;;  %v6650_v20 = vor.u32 %v7367_v40, %v6647_v28  ;;  %v7518_v51 = vld [vmem:[#allocation1 + $0x36] sm:$0xff] }
 0x227   : > { %4207 = vmatpush.bf16.msrb.mxu2 %v6586_v32  ;;  %v6375_v32 = vld [vmem:[%s7806_s30 + $0xd18] sm:$0xf0] }
 0x228   : > { %4220 = vmatpush.bf16.msrb.mxu3 %v6714_v36  ;;  %v7363_v36 = vld [vmem:[%s7806_s30 + $0xf0c] sm:$0xf]  ;;  %v6378_v43 = vor.u32 %v7299_v31, %v6375_v32 }
 0x229   : > { %4182 = vmatpush.bf16.msrb.mxu0 %v6314_v61  ;;  %v3956_v35 = vpop.f32.mrf.mxu2  ;;  %v6634_v45 = vor.u32 %v7363_v36, %v6631_v37  ;;  %v7517_v61 = vld [vmem:[#allocation1 + $0x2d] sm:$0xff] }
 0x22a   : > { %4195 = vmatpush.bf16.msrb.mxu1 %v6442_v52  ;;  %v3969_v39 = vpop.f32.mrf.mxu3  ;;  %v7519_v52 = vld [vmem:[#allocation1 + $0x3f] sm:$0xff] }
 0x22b   : > { %4208 = vmatpush.bf16.msrb.mxu2 %v6570_v53 }
 0x22c   : > { %4221 = vmatpush.bf16.msrb.mxu3 %v6698_v55 }
 0x22d   : > { %4183 = vmatpush.bf16.msrb.mxu0 %v6298_v60 }
 0x22e   : > { %4196 = vmatpush.bf16.msrb.mxu1 %v6426_v62 }
 0x22f   : > { %4209 = vmatpush.bf16.msrb.mxu2 %v6554_v63 }
 0x230   : > { %4222 = vmatpush.bf16.msrb.mxu3 %v6682_v22 }
 0x231   : > { %4184 = vmatpush.bf16.msrb.mxu0 %v6282_v12 }
 0x232   : > { %4197 = vmatpush.bf16.msrb.mxu1 %v6410_v15 }
 0x233   : > { %4210 = vmatpush.bf16.msrb.mxu2 %v6538_v16 }
 0x234   : > { %4223 = vmatpush.bf16.msrb.mxu3 %v6666_v19 }
 0x235   : > { %4185 = vmatpush.bf16.msrb.mxu0 %v6266_v47 }
 0x236   : > { %4198 = vmatpush.bf16.msrb.mxu1 %v6394_v46 }
 0x237   : > { %4211 = vmatpush.bf16.msrb.mxu2 %v6522_v49 }
 0x238   : > { %4224 = vmatpush.bf16.msrb.mxu3 %v6650_v20 }
 0x239   : > { %4186 = vmatpush.bf16.msrb.mxu0 %v6250_v41  ;;  %v3980_v53 = vpop.f32.mrf.mxu0 }
 0x23a   : > { %4199 = vmatpush.bf16.msrb.mxu1 %v6378_v43  ;;  %v3981_v1 = vadd.f32 %v3980_v53, %v3968_v14  ;;  %v3993_v2 = vpop.f32.mrf.mxu1 }
 0x23b   : > { %4212 = vmatpush.bf16.msrb.mxu2 %v6506_v44 }
 0x23c   : > { %4225 = vmatpush.bf16.msrb.mxu3 %v6634_v45  ;;  %4187 = vmatmul.bf16.vlgmr.msrb.gmra.mxu0 %v7516_v48  ;;  %v3994_v54 = vadd.f32 %v3993_v2, %v3981_v1  ;;  %v288_v48 = vld [vmem:[#allocation2] sm:$0xff] }
 0x23d   : > { %4200 = vmatmul.bf16.vlgmr.msrb.gmra.mxu1 %v7517_v61 }
 0x23e   : > { %4213 = vmatmul.bf16.vlgmr.msrb.gmra.mxu2 %v7518_v51 }
 0x23f   : > { %4226 = vmatmul.bf16.vlgmr.msrb.gmra.mxu3 %v7519_v52 }
 0x241   : > { %v4006_v55 = vpop.f32.mrf.mxu2  ;;  %v3982_v58 = vpop.f32.mrf.mxu0 }
 0x242   : > { %v4007_v56 = vadd.f32 %v4006_v55, %v3994_v54  ;;  %v4019_v57 = vpop.f32.mrf.mxu3  ;;  %v3995_v42 = vpop.f32.mrf.mxu1 }
 0x244   : > { %v4020_v3 = vadd.f32 %v4019_v57, %v4007_v56 }
 0x246   : > { %v4236_v44 = vrot.slane %v4020_v3, 4 }
 0x249   : > { %v4008_v59 = vpop.f32.mrf.mxu2 }
 0x24a   : > { %v4021_v60 = vpop.f32.mrf.mxu3 }
 0x259   : > { %v4032_v62 = vpop.f32.mrf.mxu0 }
 0x25a   : > { %v4045_v63 = vpop.f32.mrf.mxu1 }
 0x25b   : > { %v4046_v21 = vadd.f32 %v4045_v63, %v4032_v62 }
 0x261   : > { %v4058_v0 = vpop.f32.mrf.mxu2  ;;  %v4034_v23 = vpop.f32.mrf.mxu0 }
 0x262   : > { %v4059_v4 = vadd.f32 %v4058_v0, %v4046_v21  ;;  %v4071_v22 = vpop.f32.mrf.mxu3  ;;  %v4047_v6 = vpop.f32.mrf.mxu1 }
 0x264   : > { %v4072_v5 = vadd.f32 %v4071_v22, %v4059_v4 }
 0x269   : > { %v4060_v7 = vpop.f32.mrf.mxu2 }
 0x26a   : > { %v4073_v9 = vpop.f32.mrf.mxu3 }
 0x279   : > { %v4084_v27 = vpop.f32.mrf.mxu0 }
 0x27a   : > { %v4097_v10 = vpop.f32.mrf.mxu1  ;;  %v4085_v50 = vadd.f32 %v4084_v27, %v4072_v5 }
 0x27c   : > { %v4098_v25 = vadd.f32 %v4097_v10, %v4085_v50 }
 0x281   : > { %v4110_v11 = vpop.f32.mrf.mxu2  ;;  %v4086_v12 = vpop.f32.mrf.mxu0 }
 0x282   : > { %v4123_v38 = vpop.f32.mrf.mxu3  ;;  %v4099_v13 = vpop.f32.mrf.mxu1  ;;  %v4111_v40 = vadd.f32 %v4110_v11, %v4098_v25 }
 0x284   : > { %v4124_v46 = vadd.f32 %v4123_v38, %v4111_v40 }
 0x289   : > { %v4112_v14 = vpop.f32.mrf.mxu2 }
 0x28a   : > { %v4125_v15 = vpop.f32.mrf.mxu3 }
 0x299   : > { %v4136_v16 = vpop.f32.mrf.mxu0 }
 0x29a   : > { %v4149_v17 = vpop.f32.mrf.mxu1  ;;  %v4137_v49 = vadd.f32 %v4136_v16, %v4124_v46 }
 0x29c   : > { %v4150_v29 = vadd.f32 %v4149_v17, %v4137_v49 }
 0x2a1   : > { %v4162_v18 = vpop.f32.mrf.mxu2  ;;  %v4138_v24 = vpop.f32.mrf.mxu0 }
 0x2a2   : > { %v4175_v19 = vpop.f32.mrf.mxu3  ;;  %v4151_v26 = vpop.f32.mrf.mxu1  ;;  %v4163_v30 = vadd.f32 %v4162_v18, %v4150_v29 }
 0x2a4   : > { %v4176_v31 = vadd.f32 %v4175_v19, %v4163_v30 }
 0x2a9   : > { %v4164_v28 = vpop.f32.mrf.mxu2 }
 0x2aa   : > { %v4177_v47 = vpop.f32.mrf.mxu3 }
 0x2b9   : > { %v4188_v20 = vpop.f32.mrf.mxu0 }
 0x2ba   : > { %v4201_v32 = vpop.f32.mrf.mxu1  ;;  %v4189_v33 = vadd.f32 %v4188_v20, %v4176_v31 }
 0x2bc   : > { %v4202_v34 = vadd.f32 %v4201_v32, %v4189_v33 }
 0x2c1   : > { %v4214_v35 = vpop.f32.mrf.mxu2  ;;  %v4190_v39 = vpop.f32.mrf.mxu0 }
 0x2c2   : > { %v4215_v36 = vadd.f32 %v4214_v35, %v4202_v34  ;;  %v4227_v37 = vpop.f32.mrf.mxu3  ;;  %v4203_v41 = vpop.f32.mrf.mxu1 }
 0x2c4   : > { %v4228_v43 = vadd.f32 %v4227_v37, %v4215_v36 }
 0x2c6   : > { %v4237_v45 = vrot.slane %v4228_v43, 2 }
 0x2c8   : > { %v4241_v61 = vsel %vm4240_vm1, %v4236_v44, %v4237_v45  ;;  %4250 = sbr.rel (%p6747_p5) target bundleno = 892 (0x37c), region = 60 }
 0x2c9   : > { %v4243_v51 = vsel %vm4242_vm2, %v8714_v8, %v4241_v61  ;;  %v4216_v52 = vpop.f32.mrf.mxu2 }
 0x2ca   : > { %v4245_v53 = vadd.f32 %v4243_v51, %v288_v48  ;;  %v4229_v1 = vpop.f32.mrf.mxu3 }
 0x2cc   : > { %4246 = vst [vmem:[#allocation2] sm:$0xff] %v4245_v53 }
 0x2cd   : > { %v7401_v2 = vld [vmem:[%s9051_s3 + $0x38] sm:$0xff]  ;;  %v7400_v56 = vld [vmem:[%s9051_s3 + $0x30] sm:$0xff]  ;;  %v7399_v3 = vld [vmem:[%s9051_s3 + $0x28] sm:$0xff]  ;;  %vm4595_vm4 = vcmask 58368  }
 0x2ce   : > { %v7409_v54 = vld [vmem:[%s9051_s3 + $0x78] sm:$0xff]  ;;  %4543 = vmatpush.bf16.msra.mxu0 %v7401_v2  ;;  %v7408_v57 = vld [vmem:[%s9051_s3 + $0x70] sm:$0xff]  ;;  %v7407_v59 = vld [vmem:[%s9051_s3 + $0x68] sm:$0xff] }
 0x2cf   : > { %v7417_v55 = vld [vmem:[%s9051_s3 + $0xb8] sm:$0xff]  ;;  %4556 = vmatpush.bf16.msra.mxu1 %v7409_v54  ;;  %v7416_v58 = vld [vmem:[%s9051_s3 + $0xb0] sm:$0xff]  ;;  %v7415_v60 = vld [vmem:[%s9051_s3 + $0xa8] sm:$0xff] }
 0x2d0   : > { %v7425_v8 = vld [vmem:[%s9051_s3 + $0xf8] sm:$0xff]  ;;  %4569 = vmatpush.bf16.msra.mxu2 %v7417_v55  ;;  %v7424_v42 = vld [vmem:[%s9051_s3 + $0xf0] sm:$0xff]  ;;  %v7423_v62 = vld [vmem:[%s9051_s3 + $0xe8] sm:$0xff] }
 0x2d1   : > { %4582 = vmatpush.bf16.msra.mxu3 %v7425_v8  ;;  %v7398_v63 = vld [vmem:[%s9051_s3 + $0x20] sm:$0xff]  ;;  %v4252_v22 = vld [vmem:[#allocation6] sm:$0xf]  ;;  %v7397_v9 = vld [vmem:[%s9051_s3 + $0x18] sm:$0xff] }
 0x2d2   : > { %4544 = vmatpush.bf16.msra.mxu0 %v7400_v56  ;;  %v7406_v21 = vld [vmem:[%s9051_s3 + $0x60] sm:$0xff]  ;;  %v4254_v5 = vperm.slane %v4252_v22, 0  ;;  %v4255_v23 = vperm.slane %v4252_v22, 1  ;;  %v4256_v6 = vperm.slane %v4252_v22, 2  ;;  %v4257_v7 = vperm.slane %v4252_v22, 3  ;;  %v7405_v27 = vld [vmem:[%s9051_s3 + $0x58] sm:$0xff] }
 0x2d3   : > { %4557 = vmatpush.bf16.msra.mxu1 %v7408_v57  ;;  %v7414_v0 = vld [vmem:[%s9051_s3 + $0xa0] sm:$0xff]  ;;  %v7413_v12 = vld [vmem:[%s9051_s3 + $0x98] sm:$0xff]  ;;  %v4251_v14 = vld [vmem:[#allocation2] sm:$0xff] }
 0x2d4   : > { %4570 = vmatpush.bf16.msra.mxu2 %v7416_v58  ;;  %v7422_v4 = vld [vmem:[%s9051_s3 + $0xe0] sm:$0xff]  ;;  %v4258_v10 = vrot.slane %v4255_v23, 6  ;;  %v4259_v11 = vrot.slane %v4256_v6, 4  ;;  %v4260_v38 = vrot.slane %v4257_v7, 2  ;;  %v7421_v13 = vld [vmem:[%s9051_s3 + $0xd8] sm:$0xff]  ;;  %v7396_v50 = vld [vmem:[%s9051_s3 + $0x10] sm:$0xff] }
 0x2d5   : > { %4583 = vmatpush.bf16.msra.mxu3 %v7424_v42  ;;  %v7404_v18 = vld [vmem:[%s9051_s3 + $0x50] sm:$0xff]  ;;  %v7395_v40 = vld [vmem:[%s9051_s3 + $0x8] sm:$0xff]  ;;  %v7394_v29 = vld [vmem:[%s9051_s3] sm:$0xff] }
 0x2d6   : > { %4545 = vmatpush.bf16.msra.mxu0 %v7399_v3  ;;  %v4261_v15 = vsel %vm4238_vm0, %v4254_v5, %v4258_v10  ;;  %v4262_v16 = vsel %vm4240_vm1, %v4259_v11, %v4260_v38  ;;  %v7412_v24 = vld [vmem:[%s9051_s3 + $0x90] sm:$0xff]  ;;  %v7403_v28 = vld [vmem:[%s9051_s3 + $0x48] sm:$0xff]  ;;  %v7402_v30 = vld [vmem:[%s9051_s3 + $0x40] sm:$0xff] }
 0x2d7   : > { %4558 = vmatpush.bf16.msra.mxu1 %v7407_v59  ;;  %v4263_v17 = vsel %vm4242_vm2, %v4261_v15, %v4262_v16  ;;  %v7420_v25 = vld [vmem:[%s9051_s3 + $0xd0] sm:$0xff]  ;;  %v7411_v46 = vld [vmem:[%s9051_s3 + $0x88] sm:$0xff]  ;;  %v7410_v31 = vld [vmem:[%s9051_s3 + $0x80] sm:$0xff] }
 0x2d8   : > { %4571 = vmatpush.bf16.msra.mxu2 %v7415_v60  ;;  %v4265_v19 = vadd.f32 %v4263_v17, %v4251_v14  ;;  %v7419_v49 = vld [vmem:[%s9051_s3 + $0xc8] sm:$0xff]  ;;  %v7418_v20 = vld [vmem:[%s9051_s3 + $0xc0] sm:$0xff]  ;;  %v7520_v43 = vld [vmem:[#allocation8] ss:$0 sm:$0xff] }
 0x2d9   : > { %4584 = vmatpush.bf16.msra.mxu3 %v7423_v62 }
 0x2da   : > { %4546 = vmatpush.bf16.msra.mxu0 %v7398_v63  ;;  %vm4266_vm3 = vcmp.ge.f32.partialorder %v4265_v19, 0.0  ;;  %v4267_v26 = vmul.f32 0.01, %v4265_v19 }
 0x2db   : > { %4559 = vmatpush.bf16.msra.mxu1 %v7406_v21 }
 0x2dc   : > { %4572 = vmatpush.bf16.msra.mxu2 %v7414_v0  ;;  %v4268_v47 = vsel %vm4266_vm3, %v4265_v19, %v4267_v26 }
 0x2dd   : > { %4585 = vmatpush.bf16.msra.mxu3 %v7422_v4  ;;  %4270 = vst [vmem:[#allocation1] ss:$4 sm:$0xff] %v4268_v47 }
 0x2de   : > { %4547 = vmatpush.bf16.msra.mxu0 %v7397_v9 }
 0x2df   : > { %4560 = vmatpush.bf16.msra.mxu1 %v7405_v27 }
 0x2e0   : > { %4573 = vmatpush.bf16.msra.mxu2 %v7413_v12 }
 0x2e1   : > { %4586 = vmatpush.bf16.msra.mxu3 %v7421_v13 }
 0x2e2   : > { %4548 = vmatpush.bf16.msra.mxu0 %v7396_v50 }
 0x2e3   : > { %4561 = vmatpush.bf16.msra.mxu1 %v7404_v18 }
 0x2e4   : > { %4574 = vmatpush.bf16.msra.mxu2 %v7412_v24  ;;  %v4271_v32 = vld.sshfl [vmem:[#allocation1] sm:$0xff pattern:$0x73625140]  ;;  %v4272_v33 = vld.sshfl [vmem:[#allocation1 + $0x8] sm:$0xff pattern:$0x73625140] }
 0x2e5   : > { %4587 = vmatpush.bf16.msra.mxu3 %v7420_v25  ;;  %v4279_v34 = vpack.c.bf16 %v4271_v32, %v4271_v32  ;;  %v4280_v35 = vpack.c.bf16 %v4272_v33, %v4272_v33  ;;  %v4273_v36 = vld.sshfl [vmem:[#allocation1 + $0x10] sm:$0xff pattern:$0x73625140]  ;;  %v4274_v37 = vld.sshfl [vmem:[#allocation1 + $0x18] sm:$0xff pattern:$0x73625140] }
 0x2e6   : > { %4549 = vmatpush.bf16.msra.mxu0 %v7395_v40  ;;  %v4281_v39 = vpack.c.bf16 %v4273_v36, %v4273_v36  ;;  %v4282_v41 = vpack.c.bf16 %v4274_v37, %v4274_v37 }
 0x2e7   : > { %4562 = vmatpush.bf16.msra.mxu1 %v7403_v28 }
 0x2e8   : > { %4575 = vmatpush.bf16.msra.mxu2 %v7411_v46 }
 0x2e9   : > { %4588 = vmatpush.bf16.msra.mxu3 %v7419_v49 }
 0x2ea   : > { %4550 = vmatpush.bf16.msra.mxu0 %v7394_v29 }
 0x2eb   : > { %4563 = vmatpush.bf16.msra.mxu1 %v7402_v30 }
 0x2ec   : > { %4576 = vmatpush.bf16.msra.mxu2 %v7410_v31 }
 0x2ed   : > { %4589 = vmatpush.bf16.msra.mxu3 %v7418_v20  ;;  %4551 = vmatmul.bf16.vlgmr.msra.gmra.mxu0 %v4279_v34 }
 0x2ee   : > { %4564 = vmatmul.bf16.vlgmr.msra.gmra.mxu1 %v4280_v35 }
 0x2ef   : > { %4577 = vmatmul.bf16.vlgmr.msra.gmra.mxu2 %v4281_v39 }
 0x2f0   : > { %4590 = vmatmul.bf16.vlgmr.msra.gmra.mxu3 %v4282_v41 }
 0x36a   : > { %v4552_v44 = vpop.f32.mrf.mxu0 }
 0x36b   : > { %v4565_v45 = vpop.f32.mrf.mxu1  ;;  %v4553_v48 = vadd.f32 %v7520_v43, %v4552_v44 }
 0x36d   : > { %v4566_v61 = vadd.f32 %v4565_v45, %v4553_v48 }
 0x372   : > { %v4578_v51 = vpop.f32.mrf.mxu2  ;;  %v4554_v1 = vpop.f32.mrf.mxu0 }
 0x373   : > { %v4591_v52 = vpop.f32.mrf.mxu3  ;;  %v4579_v53 = vadd.f32 %v4578_v51, %v4566_v61  ;;  %v4567_v2 = vpop.f32.mrf.mxu1 }
 0x375   : > { %v4592_v54 = vadd.f32 %v4591_v52, %v4579_v53 }
 0x377   : > { %4596 = vst.msk [vmem:[#allocation9] sm:$0x3] %vm4595_vm4, %v4592_v54 }
 0x37a   : > { %v4580_v55 = vpop.f32.mrf.mxu2 }
 0x37b   : > { %v4593_v8 = vpop.f32.mrf.mxu3 }
 0x37c PF: > { %p7456_p8 = scmp.eq.s32.totalorder %s7738_s22, 7  ;;  %s7688_s9 = smov [#allocation9]  }
 0x37d   : > { %s4603_s11 = sshll.u32 %s7688_s9, 4  ;;  %s4605_s14 = sshll.u32 %s9053_s5, 4  ;;  %s4604_s11 = int_to_ptr.vmem [resolvable:$true] %s4603_s11  ;;  %s4606_s14 = int_to_ptr.hbm [resolvable:$true] %s4605_s14 }
 0x37e   : > { %7437 = dma.vmem_to_hbm [thread:$0]  (%p7456_p8), %s4604_s11, 32, %s4606_s14, [#allocation5]  }
 0x37f   : > { %7664 = dma.done.wait (%p7456_p8), [#allocation5], 32  }
 0x380   : > { %7666 = vsyncadd (%p7456_p8), [#allocation5], 4294967264 }
 0x381 PF: > { %p17_p9 = scmp.ge.s32.totalorder %s7741_s23, 10   ;;  %s9058_s18 = smov %s7673_s19 }
 0x382   : > { %s9059_s19 = smov %s7677_s20  ;;  %s9060_s20 = smov %s7751_s26 }
 0x383   : > { %s9061_s21 = smov %s7741_s23  ;;  %19 = sbr.rel (!%p17_p9) target bundleno = 5 (0x5), region = 96 }
 0x388   :  { %4619 = vsyncpa [#allocation4], 1 }
 0x389   :  { %4621 = vsyncpa [#allocation4 + $0x1], 1 }
 0x38a   :  { %4622 = vsyncpa [#allocation7], 1 }
 0x38b   :  { %4623 = vsyncpa [#allocation5], 1 }
 0x38c   :  { %4625 = vsyncpa [#allocation5 + $0x1], 1 }

</bundles_post_ra>
